<compile_context>
chip_gen: v5e
topology: v5e:2x2
jax: 0.10.0
libtpu: 0.0.40
codegen_flags: <defaults>
</compile_context>

<pallas_src>
import functools

import jax
import jax.numpy as jnp
from jax.experimental import pallas as pl
from jax.experimental.pallas import tpu as pltpu

ACTION_PAD = 128    # lane-dense padded width of the final layer (unmasked stores)


def _round_up(x, m):
    return (x + m - 1) // m * m


def _choose_batch_tiling(batch):
    """Pick (tile_b, num_tiles) for a static batch size.

    * batch <= 128: single tile, rounded up only to the bf16 sublane multiple
      (16). The small-batch regime is weight-DMA / latency bound, so padding to
      128 rows or splitting across TensorCores (which would duplicate the
      weight fetch) is pure overhead.
    * batch > 128: tiles of at most 256 rows (fills the 256-wide MXU on
      v6e/v7x; v5e's 128-wide MXU just makes two passes per tile), with the
      grid forced to >= 2 iterations so both v7x TensorCores get work.
      Tile sizes stay multiples of 16 (bf16 sublane / (8,128) rule).
    """
    b16 = _round_up(max(batch, 1), 16)
    if b16 <= 128:
        return b16, 1
    num_tiles = max(pl.cdiv(b16, 256), 2)
    tile_b = _round_up(pl.cdiv(b16, num_tiles), 16)
    return tile_b, num_tiles


def dqn_mlp_kernel(x_ref, w1_ref, b1_ref, w2_ref, b2_ref,
                   w3_ref, b3_ref, w4_ref, b4_ref, o_ref):
    """Four fused Linear layers + ReLUs for one batch tile.

    x and weights arrive as bf16 (native-rate MXU, half the HBM traffic).
    Every matmul accumulates in f32 (preferred_element_type); bias-add + ReLU
    run on the f32 accumulator, then the activation is cast back to bf16 for
    the next matmul.
    """
    h = jnp.dot(x_ref[...], w1_ref[...],
                preferred_element_type=jnp.float32) + b1_ref[...]
    h = jnp.maximum(h, 0.0).astype(jnp.bfloat16)

    h = jnp.dot(h, w2_ref[...],
                preferred_element_type=jnp.float32) + b2_ref[...]
    h = jnp.maximum(h, 0.0).astype(jnp.bfloat16)

    h = jnp.dot(h, w3_ref[...],
                preferred_element_type=jnp.float32) + b3_ref[...]
    h = jnp.maximum(h, 0.0).astype(jnp.bfloat16)

    q = jnp.dot(h, w4_ref[...],
                preferred_element_type=jnp.float32) + b4_ref[...]
    o_ref[...] = q.astype(o_ref.dtype)


@functools.partial(jax.jit, static_argnames=("num_actions",))
def dqn_forward(state, params, num_actions):
    """state: (B, C, H, W) float32 -> q_values: (B, num_actions) float32."""
    w1, b1, w2, b2, w3, b3, w4p, b4p = params
    n_pad = w4p.shape[1]                        # == ACTION_PAD
    if num_actions > n_pad:
        raise ValueError(
            f"num_actions={num_actions} exceeds padded action width {n_pad}")

    B = state.shape[0]
    # torch.flatten(state, start_dim=1), cast to bf16 in the wrapper so the
    # kernel's x DMA (and any batch padding below) moves half the bytes.
    x = state.reshape(B, -1).astype(jnp.bfloat16)
    K = x.shape[1]

    tile_b, num_tiles = _choose_batch_tiling(B)
    B_pad = tile_b * num_tiles
    if B_pad != B:
        # Pad AFTER the bf16 cast (half the pad traffic); pad is at most 15
        # rows past the 16-row round-up.  Matmul rows are independent and the
        # padded (zero) rows are sliced off below -- that slice is the
        # invariant that makes the padding harmless.
        x = jnp.pad(x, ((0, B_pad - B), (0, 0)))

    x_map = lambda i: (i, 0)        # batch-tiled
    w_map = lambda i: (0, 0)        # constant -> weights stay VMEM-resident
    # VMEM: weights (bf16) ~3.8 MiB, double-buffered ~7.6 MiB; x/out tiles at
    # tile_b=256 add ~1.3 MiB -> ~9 MiB total, well under the 32 MiB scoped
    # limit, so single-buffering the invariant weight blocks is unnecessary.

    out = pl.pallas_call(
        dqn_mlp_kernel,
        out_shape=jax.ShapeDtypeStruct((B_pad, n_pad), jnp.float32),
        grid=(num_tiles,),
        in_specs=[
            pl.BlockSpec((tile_b, K), x_map),
            pl.BlockSpec(w1.shape, w_map), pl.BlockSpec(b1.shape, w_map),
            pl.BlockSpec(w2.shape, w_map), pl.BlockSpec(b2.shape, w_map),
            pl.BlockSpec(w3.shape, w_map), pl.BlockSpec(b3.shape, w_map),
            pl.BlockSpec(w4p.shape, w_map), pl.BlockSpec(b4p.shape, w_map),
        ],
        out_specs=pl.BlockSpec((tile_b, n_pad), x_map),
        compiler_params=pltpu.CompilerParams(
            dimension_semantics=("parallel",),
            vmem_limit_bytes=32 << 20,
        ),
    )(x, w1, b1, w2, b2, w3, b3, w4p, b4p)

    # Drop batch padding and the zero-padded action lanes.
    return out[:B, :num_actions]


def init_linear(key, fan_in, fan_out):
    """PyTorch nn.Linear default init (uniform +-1/sqrt(fan_in)).
    Weight returned pre-transposed as (fan_in, fan_out) so the kernel computes
    x @ W + b (same math as x @ W_pt.T + b)."""
    kw, kb = jax.random.split(key)
    bound = 1.0 / jnp.sqrt(jnp.float32(fan_in))
    w = jax.random.uniform(kw, (fan_in, fan_out), jnp.float32, -bound, bound)
    b = jax.random.uniform(kb, (1, fan_out), jnp.float32, -bound, bound)
    return w, b


def make_dqn_params(key, flat_dim, num_actions):
    """Weights in bf16 (HBM-bandwidth + MXU-rate win), biases in f32.
    The final layer is zero-padded to ACTION_PAD output lanes."""
    if num_actions > ACTION_PAD:
        raise ValueError(
            f"num_actions={num_actions} exceeds ACTION_PAD={ACTION_PAD}")
    k1, k2, k3, k4 = jax.random.split(key, 4)
    w1, b1 = init_linear(k1, flat_dim, 1024)
    w2, b2 = init_linear(k2, 1024, 512)
    w3, b3 = init_linear(k3, 512, 512)
    w4, b4 = init_linear(k4, 512, num_actions)

    w4p = jnp.zeros((512, ACTION_PAD), jnp.float32).at[:, :num_actions].set(w4)
    b4p = jnp.zeros((1, ACTION_PAD), jnp.float32).at[:, :num_actions].set(b4)

    return (w1.astype(jnp.bfloat16), b1,
            w2.astype(jnp.bfloat16), b2,
            w3.astype(jnp.bfloat16), b3,
            w4p.astype(jnp.bfloat16), b4p)


if __name__ == "__main__":
    # Small shapes consistent with the module: state_shape=(4,16,16), num_actions=8.
    B = 2
    state_shape = (4, 16, 16)
    num_actions = 8
    flat_dim = state_shape[0] * state_shape[1] * state_shape[2]  # 1024

    key = jax.random.PRNGKey(0)
    k_state, k_params = jax.random.split(key)
    state = jax.random.normal(k_state, (B,) + state_shape, dtype=jnp.float32)
    params = make_dqn_params(k_params, flat_dim, num_actions)

    q_values = dqn_forward(state, params, num_actions)
    q_values = jax.block_until_ready(q_values)
    assert q_values.shape == (B, num_actions)

    # Pure-JAX reference with the SAME bf16-weight / f32-accumulate math.
    # (bf16 weights/activations drift ~1e-2 relative vs the f32 PyTorch model;
    #  keep weights f32 in make_dqn_params if exact Q-value precision matters.)
    x = state.reshape(B, -1)
    w1, b1, w2, b2, w3, b3, w4p, b4p = params
    h = jnp.maximum(
        jnp.dot(x.astype(jnp.bfloat16), w1,
                preferred_element_type=jnp.float32) + b1, 0.0)
    h = jnp.maximum(
        jnp.dot(h.astype(jnp.bfloat16), w2,
                preferred_element_type=jnp.float32) + b2, 0.0)
    h = jnp.maximum(
        jnp.dot(h.astype(jnp.bfloat16), w3,
                preferred_element_type=jnp.float32) + b3, 0.0)
    ref = (jnp.dot(h.astype(jnp.bfloat16), w4p,
                   preferred_element_type=jnp.float32) + b4p)[:, :num_actions]
    assert jnp.allclose(q_values, ref, atol=1e-2, rtol=1e-2), (
        jnp.max(jnp.abs(q_values - ref)))

    print("KERNEL_OK")
</pallas_src>

<mosaic_0001>
module attributes {stable_mosaic.version = 11 : i64} {
  func.func @dqn_mlp_kernel(%arg0: i32, %arg1: memref<16x1024xbf16, #tpu.memory_space<vmem>>, %arg2: memref<1024x1024xbf16, #tpu.memory_space<vmem>>, %arg3: memref<1x1024xf32, #tpu.memory_space<vmem>>, %arg4: memref<1024x512xbf16, #tpu.memory_space<vmem>>, %arg5: memref<1x512xf32, #tpu.memory_space<vmem>>, %arg6: memref<512x512xbf16, #tpu.memory_space<vmem>>, %arg7: memref<1x512xf32, #tpu.memory_space<vmem>>, %arg8: memref<512x128xbf16, #tpu.memory_space<vmem>>, %arg9: memref<1x128xf32, #tpu.memory_space<vmem>>, %arg10: memref<16x128xf32, #tpu.memory_space<vmem>>) attributes {dimension_semantics = [#tpu.dimension_semantics<parallel>], iteration_bounds = array<i64: 1>, scalar_prefetch = 0 : i64, scratch_operands = 0 : i64, tpu.core_type = #tpu.core_type<tc>, window_params = [{transform_indices = @transform_0, window_bounds = array<i64: 16, 1024>}, {pipeline_mode = #tpu.pipeline_mode<synchronous>, transform_indices = @transform_1, window_bounds = array<i64: 1024, 1024>}, {pipeline_mode = #tpu.pipeline_mode<synchronous>, transform_indices = @transform_2, window_bounds = array<i64: 1, 1024>}, {pipeline_mode = #tpu.pipeline_mode<synchronous>, transform_indices = @transform_3, window_bounds = array<i64: 1024, 512>}, {pipeline_mode = #tpu.pipeline_mode<synchronous>, transform_indices = @transform_4, window_bounds = array<i64: 1, 512>}, {pipeline_mode = #tpu.pipeline_mode<synchronous>, transform_indices = @transform_5, window_bounds = array<i64: 512, 512>}, {pipeline_mode = #tpu.pipeline_mode<synchronous>, transform_indices = @transform_6, window_bounds = array<i64: 1, 512>}, {pipeline_mode = #tpu.pipeline_mode<synchronous>, transform_indices = @transform_7, window_bounds = array<i64: 512, 128>}, {pipeline_mode = #tpu.pipeline_mode<synchronous>, transform_indices = @transform_8, window_bounds = array<i64: 1, 128>}, {transform_indices = @transform_9, window_bounds = array<i64: 16, 128>}]} {
    %c0 = arith.constant 0 : index
    %c0_0 = arith.constant 0 : index
    %0 = vector.load %arg1[%c0, %c0_0] : memref<16x1024xbf16, #tpu.memory_space<vmem>>, vector<16x1024xbf16>
    %c0_1 = arith.constant 0 : index
    %c0_2 = arith.constant 0 : index
    %1 = vector.load %arg2[%c0_1, %c0_2] : memref<1024x1024xbf16, #tpu.memory_space<vmem>>, vector<1024x1024xbf16>
    %cst = arith.constant dense<0.000000e+00> : vector<16x1024xf32>
    %2 = tpu.matmul %0, %1, %cst {dimension_numbers = #tpu.dot_dimension_numbers<[1], [0], [0], [1], [0, 0, 1, 1], [], []>} : vector<16x1024xbf16>, vector<1024x1024xbf16>, vector<16x1024xf32> -> vector<16x1024xf32>
    %c0_3 = arith.constant 0 : index
    %c0_4 = arith.constant 0 : index
    %3 = vector.load %arg3[%c0_3, %c0_4] : memref<1x1024xf32, #tpu.memory_space<vmem>>, vector<1x1024xf32>
    %4 = vector.broadcast %3 : vector<1x1024xf32> to vector<16x1024xf32>
    %5 = arith.addf %2, %4 : vector<16x1024xf32>
    %cst_5 = arith.constant 0.000000e+00 : f32
    %6 = vector.broadcast %cst_5 : f32 to vector<16x1024xf32>
    %7 = arith.maximumf %5, %6 : vector<16x1024xf32>
    %8 = arith.truncf %7 : vector<16x1024xf32> to vector<16x1024xbf16>
    %c0_6 = arith.constant 0 : index
    %c0_7 = arith.constant 0 : index
    %9 = vector.load %arg4[%c0_6, %c0_7] : memref<1024x512xbf16, #tpu.memory_space<vmem>>, vector<1024x512xbf16>
    %cst_8 = arith.constant dense<0.000000e+00> : vector<16x512xf32>
    %10 = tpu.matmul %8, %9, %cst_8 {dimension_numbers = #tpu.dot_dimension_numbers<[1], [0], [0], [1], [0, 0, 1, 1], [], []>} : vector<16x1024xbf16>, vector<1024x512xbf16>, vector<16x512xf32> -> vector<16x512xf32>
    %c0_9 = arith.constant 0 : index
    %c0_10 = arith.constant 0 : index
    %11 = vector.load %arg5[%c0_9, %c0_10] : memref<1x512xf32, #tpu.memory_space<vmem>>, vector<1x512xf32>
    %12 = vector.broadcast %11 : vector<1x512xf32> to vector<16x512xf32>
    %13 = arith.addf %10, %12 : vector<16x512xf32>
    %cst_11 = arith.constant 0.000000e+00 : f32
    %14 = vector.broadcast %cst_11 : f32 to vector<16x512xf32>
    %15 = arith.maximumf %13, %14 : vector<16x512xf32>
    %16 = arith.truncf %15 : vector<16x512xf32> to vector<16x512xbf16>
    %c0_12 = arith.constant 0 : index
    %c0_13 = arith.constant 0 : index
    %17 = vector.load %arg6[%c0_12, %c0_13] : memref<512x512xbf16, #tpu.memory_space<vmem>>, vector<512x512xbf16>
    %cst_14 = arith.constant dense<0.000000e+00> : vector<16x512xf32>
    %18 = tpu.matmul %16, %17, %cst_14 {dimension_numbers = #tpu.dot_dimension_numbers<[1], [0], [0], [1], [0, 0, 1, 1], [], []>} : vector<16x512xbf16>, vector<512x512xbf16>, vector<16x512xf32> -> vector<16x512xf32>
    %c0_15 = arith.constant 0 : index
    %c0_16 = arith.constant 0 : index
    %19 = vector.load %arg7[%c0_15, %c0_16] : memref<1x512xf32, #tpu.memory_space<vmem>>, vector<1x512xf32>
    %20 = vector.broadcast %19 : vector<1x512xf32> to vector<16x512xf32>
    %21 = arith.addf %18, %20 : vector<16x512xf32>
    %cst_17 = arith.constant 0.000000e+00 : f32
    %22 = vector.broadcast %cst_17 : f32 to vector<16x512xf32>
    %23 = arith.maximumf %21, %22 : vector<16x512xf32>
    %24 = arith.truncf %23 : vector<16x512xf32> to vector<16x512xbf16>
    %c0_18 = arith.constant 0 : index
    %c0_19 = arith.constant 0 : index
    %25 = vector.load %arg8[%c0_18, %c0_19] : memref<512x128xbf16, #tpu.memory_space<vmem>>, vector<512x128xbf16>
    %cst_20 = arith.constant dense<0.000000e+00> : vector<16x128xf32>
    %26 = tpu.matmul %24, %25, %cst_20 {dimension_numbers = #tpu.dot_dimension_numbers<[1], [0], [0], [1], [0, 0, 1, 1], [], []>} : vector<16x512xbf16>, vector<512x128xbf16>, vector<16x128xf32> -> vector<16x128xf32>
    %c0_21 = arith.constant 0 : index
    %c0_22 = arith.constant 0 : index
    %27 = vector.load %arg9[%c0_21, %c0_22] : memref<1x128xf32, #tpu.memory_space<vmem>>, vector<1x128xf32>
    %28 = vector.broadcast %27 : vector<1x128xf32> to vector<16x128xf32>
    %29 = arith.addf %26, %28 : vector<16x128xf32>
    %c0_23 = arith.constant 0 : index
    %c0_24 = arith.constant 0 : index
    %30 = vector.load %arg10[%c0_23, %c0_24] : memref<16x128xf32, #tpu.memory_space<vmem>>, vector<16x128xf32>
    tpu.vector_store %arg10[%c0_23, %c0_24], %29 {strides = array<i32>} : memref<16x128xf32, #tpu.memory_space<vmem>>, vector<16x128xf32>,
    return
  }
  func.func @transform_0(%arg0: i32) -> (i32, i32) {
    %c0_i32 = arith.constant 0 : i32
    %c0_i32_0 = arith.constant 0 : i32
    return %arg0, %c0_i32 : i32, i32
  }
  func.func @transform_1(%arg0: i32) -> (i32, i32) {
    %c0_i32 = arith.constant 0 : i32
    %c0_i32_0 = arith.constant 0 : i32
    %c0_i32_1 = arith.constant 0 : i32
    return %c0_i32, %c0_i32_0 : i32, i32
  }
  func.func @transform_2(%arg0: i32) -> (i32, i32) {
    %c0_i32 = arith.constant 0 : i32
    %c0_i32_0 = arith.constant 0 : i32
    %c0_i32_1 = arith.constant 0 : i32
    return %c0_i32, %c0_i32_0 : i32, i32
  }
  func.func @transform_3(%arg0: i32) -> (i32, i32) {
    %c0_i32 = arith.constant 0 : i32
    %c0_i32_0 = arith.constant 0 : i32
    %c0_i32_1 = arith.constant 0 : i32
    return %c0_i32, %c0_i32_0 : i32, i32
  }
  func.func @transform_4(%arg0: i32) -> (i32, i32) {
    %c0_i32 = arith.constant 0 : i32
    %c0_i32_0 = arith.constant 0 : i32
    %c0_i32_1 = arith.constant 0 : i32
    return %c0_i32, %c0_i32_0 : i32, i32
  }
  func.func @transform_5(%arg0: i32) -> (i32, i32) {
    %c0_i32 = arith.constant 0 : i32
    %c0_i32_0 = arith.constant 0 : i32
    %c0_i32_1 = arith.constant 0 : i32
    return %c0_i32, %c0_i32_0 : i32, i32
  }
  func.func @transform_6(%arg0: i32) -> (i32, i32) {
    %c0_i32 = arith.constant 0 : i32
    %c0_i32_0 = arith.constant 0 : i32
    %c0_i32_1 = arith.constant 0 : i32
    return %c0_i32, %c0_i32_0 : i32, i32
  }
  func.func @transform_7(%arg0: i32) -> (i32, i32) {
    %c0_i32 = arith.constant 0 : i32
    %c0_i32_0 = arith.constant 0 : i32
    %c0_i32_1 = arith.constant 0 : i32
    return %c0_i32, %c0_i32_0 : i32, i32
  }
  func.func @transform_8(%arg0: i32) -> (i32, i32) {
    %c0_i32 = arith.constant 0 : i32
    %c0_i32_0 = arith.constant 0 : i32
    %c0_i32_1 = arith.constant 0 : i32
    return %c0_i32, %c0_i32_0 : i32, i32
  }
  func.func @transform_9(%arg0: i32) -> (i32, i32) {
    %c0_i32 = arith.constant 0 : i32
    %c0_i32_0 = arith.constant 0 : i32
    return %arg0, %c0_i32 : i32, i32
  }
}

</mosaic_0001>

<bundles_post_ra>
// kernel: dqn_forward.1
= control target key start
LH: loop header
LB: loop body
LE: loop exit
PB: predicated region body
PF: predicated region fallthrough
CT: control target
= control target key end

     0   :  { %14 = vsyncpa [#allocation3], 0  ;;  %s13032_s0 = inlined_call_operand.vmem [shape: bf16[16,1024], index: 0, kind: input, shape index: {}]   ;;  %s13033_s1 = inlined_call_operand.hbm [shape: bf16[1024,1024], index: 1, kind: input, shape index: {}]   ;;  %s13034_s2 = inlined_call_operand.hbm [shape: f32[1,1024], index: 2, kind: input, shape index: {}]   ;;  %s13035_s3 = inlined_call_operand.hbm [shape: bf16[1024,512], index: 3, kind: input, shape index: {}]   ;;  %s13036_s4 = inlined_call_operand.hbm [shape: f32[1,512], index: 4, kind: input, shape index: {}]   ;;  %s13037_s5 = inlined_call_operand.hbm [shape: bf16[512,512], index: 5, kind: input, shape index: {}]   ;;  %s13038_s6 = inlined_call_operand.hbm [shape: f32[1,512], index: 6, kind: input, shape index: {}]   ;;  %s13039_s7 = inlined_call_operand.hbm [shape: bf16[512,128], index: 7, kind: input, shape index: {}]   ;;  %s13040_s8 = inlined_call_operand.hbm [shape: f32[1,128], index: 8, kind: input, shape index: {}]   ;;  %s13041_s9 = inlined_call_operand.vmem [shape: f32[16,128], index: 9, kind: output, shape index: {}]  }
   0x1   :  { %15 = vsyncpa [#allocation5], 0 }
   0x2   :  { %16 = vsyncpa [#allocation8], 0 }
   0x3   :  { %17 = vsyncpa [#allocation11], 0  ;;  %s39_s11 = sshll.u32 %s13034_s2, 4  ;;  %s40_s11 = int_to_ptr.hbm [resolvable:$true] %s39_s11 }
   0x4   :  { %18 = vsyncpa [#allocation14], 0  ;;  %s12455_s12 = smov [#allocation4]   ;;  %s63_s16 = sshll.u32 %s13036_s4, 4  ;;  %s64_s16 = int_to_ptr.hbm [resolvable:$true] %s63_s16 }
   0x5   :  { %s41_s13 = sshll.u32 %s12455_s12, 4  ;;  %s12456_s17 = smov [#allocation7]   ;;  %s42_s13 = int_to_ptr.vmem [resolvable:$true] %s41_s13 }
   0x6   :  { %44 = dma.hbm_to_vmem [thread:$0]  %s40_s11, 128, %s42_s13, [#allocation5]  }
   0x7   :  { %s65_s18 = sshll.u32 %s12456_s17, 4  ;;  %s87_s21 = sshll.u32 %s13038_s6, 4  ;;  %s66_s18 = int_to_ptr.vmem [resolvable:$true] %s65_s18  ;;  %s88_s21 = int_to_ptr.hbm [resolvable:$true] %s87_s21 }
   0x8   :  { %68 = dma.hbm_to_vmem [thread:$0]  %s64_s16, 64, %s66_s18, [#allocation8]  }
   0x9   :  { %s25_s23 = sshll.u32 %s13033_s1, 4  ;;  %s12457_s24 = smov [#allocation10]   ;;  %s26_s23 = int_to_ptr.hbm [resolvable:$true] %s25_s23 }
   0xa   :  { %s89_s25 = sshll.u32 %s12457_s24, 4  ;;  %s12458_s4 = smov [#allocation2]   ;;  %s90_s25 = int_to_ptr.vmem [resolvable:$true] %s89_s25 }
   0xb   :  { %92 = dma.hbm_to_vmem [thread:$0]  %s88_s21, 64, %s90_s25, [#allocation11]  }
   0xc   :  { %s27_s26 = sshll.u32 %s12458_s4, 4  ;;  %s12459_s27 = smov 512   ;;  %s28_s26 = int_to_ptr.vmem [resolvable:$true] %s27_s26 }
   0xd   :  { %s12460_s28 = smov 32   ;;  %s49_s30 = sshll.u32 %s13035_s3, 4  ;;  %s50_s30 = int_to_ptr.hbm [resolvable:$true] %s49_s30 }
   0xe   :  { %33 = dma.hbm_to_vmem [thread:$0]  %s26_s23, 65536, %s28_s26, [#allocation3], %s12459_s27, %s12459_s27, %s12460_s28  }
   0xf   :  { %s12461_s10 = smov [#allocation6]   ;;  %s73_s13 = sshll.u32 %s13037_s5, 4  ;;  %s74_s13 = int_to_ptr.hbm [resolvable:$true] %s73_s13 }
  0x10   :  { %s51_s11 = sshll.u32 %s12461_s10, 4  ;;  %s12462_s14 = smov 256   ;;  %s52_s11 = int_to_ptr.vmem [resolvable:$true] %s51_s11 }
  0x11   :  { %s12463_s15 = smov 16   ;;  %s12464_s16 = smov [#allocation9]  }
  0x12   :  { %57 = dma.hbm_to_vmem [thread:$0]  %s50_s30, 32768, %s52_s11, [#allocation5], %s12462_s14, %s12462_s14, %s12463_s15  }
  0x13   :  { %s75_s17 = sshll.u32 %s12464_s16, 4  ;;  %s97_s20 = sshll.u32 %s13039_s7, 4  ;;  %s76_s17 = int_to_ptr.vmem [resolvable:$true] %s75_s17  ;;  %s98_s20 = int_to_ptr.hbm [resolvable:$true] %s97_s20 }
  0x14   :  { %81 = dma.hbm_to_vmem [thread:$0]  %s74_s13, 16384, %s76_s17, [#allocation8], %s12462_s14, %s12462_s14, %s12463_s15  }
  0x15   :  { %s12465_s3 = smov [#allocation12]   ;;  %s111_s5 = sshll.u32 %s13040_s8, 4  ;;  %s112_s5 = int_to_ptr.hbm [resolvable:$true] %s111_s5 }
  0x16   :  { %s99_s21 = sshll.u32 %s12465_s3, 4  ;;  %s12466_s23 = smov 64   ;;  %s100_s21 = int_to_ptr.vmem [resolvable:$true] %s99_s21 }
  0x17   :  { %s12467_s24 = smov 4   ;;  %s12468_s25 = smov [#allocation13]  }
  0x18   :  { %105 = dma.hbm_to_vmem [thread:$0]  %s98_s20, 4096, %s100_s21, [#allocation11], %s12466_s23, %s12466_s23, %s12467_s24  }
  0x19   :  { %s113_s4 = sshll.u32 %s12468_s25, 4  ;;  %s114_s4 = int_to_ptr.vmem [resolvable:$true] %s113_s4 }
  0x1a   :  { %116 = dma.hbm_to_vmem [thread:$0]  %s112_s5, 16, %s114_s4, [#allocation14]  }
  0x1b   :  { %12445 = dma.done.wait [#allocation3], 65536  }
  0x1c   :  { %12446 = vsyncadd [#allocation3], 4294901760 }
  0x1d   :  { %12447 = dma.done.wait [#allocation5], 32896  }
  0x1e   :  { %12448 = vsyncadd [#allocation5], 4294934400 }
  0x1f   :  { %12449 = dma.done.wait [#allocation8], 16448  }
  0x20   :  { %12450 = vsyncadd [#allocation8], 4294950848 }
  0x21   :  { %12451 = dma.done.wait [#allocation11], 4160  }
  0x22   :  { %12452 = vsyncadd [#allocation11], 4294963136 }
  0x23   :  { %12453 = dma.done.wait [#allocation14], 16  }
  0x24   :  { %12454 = vsyncadd [#allocation14], 4294967280  ;;  %v7812_v0 = vld [vmem:[#allocation2 + $0x1c0] sm:$0xf] }
  0x25   :  { %v11366_v1 = vld [vmem:[#allocation2 + $0x1dc] sm:$0xf0] }
  0x26   :  { %v8068_v2 = vld [vmem:[#allocation2 + $0x3c0] sm:$0xf]  ;;  %v7813_v3 = vor.u32 %v11366_v1, %v7812_v0 }
  0x27   :  { %v11430_v4 = vld [vmem:[#allocation2 + $0x3dc] sm:$0xf0] }
  0x28   :  { %v8324_v5 = vld [vmem:[#allocation2 + $0x5c0] sm:$0xf]  ;;  %v8069_v7 = vor.u32 %v11430_v4, %v8068_v2  ;;  %3287 = vmatpush.bf16.msra.mxu0 %v7813_v3 }
  0x29   :  { %v11494_v6 = vld [vmem:[#allocation2 + $0x5dc] sm:$0xf0] }
  0x2a   :  { %v8325_v8 = vor.u32 %v11494_v6, %v8324_v5  ;;  %v8580_v9 = vld [vmem:[#allocation2 + $0x7c0] sm:$0xf]  ;;  %3301 = vmatpush.bf16.msra.mxu1 %v8069_v7 }
  0x2b   :  { %v11558_v10 = vld [vmem:[#allocation2 + $0x7dc] sm:$0xf0] }
  0x2c   :  { %v7780_v11 = vld [vmem:[#allocation2 + $0x180] sm:$0xf]  ;;  %v8581_v12 = vor.u32 %v11558_v10, %v8580_v9  ;;  %3315 = vmatpush.bf16.msra.mxu2 %v8325_v8 }
  0x2d   :  { %v11358_v13 = vld [vmem:[#allocation2 + $0x19c] sm:$0xf0] }
  0x2e   :  { %v8036_v14 = vld [vmem:[#allocation2 + $0x380] sm:$0xf]  ;;  %v7781_v16 = vor.u32 %v11358_v13, %v7780_v11  ;;  %3329 = vmatpush.bf16.msra.mxu3 %v8581_v12 }
  0x2f   :  { %v11422_v15 = vld [vmem:[#allocation2 + $0x39c] sm:$0xf0] }
  0x30   :  { %v8037_v17 = vor.u32 %v11422_v15, %v8036_v14  ;;  %v8292_v18 = vld [vmem:[#allocation2 + $0x580] sm:$0xf]  ;;  %3288 = vmatpush.bf16.msra.mxu0 %v7781_v16 }
  0x31   :  { %v11486_v19 = vld [vmem:[#allocation2 + $0x59c] sm:$0xf0] }
  0x32   :  { %v8548_v20 = vld [vmem:[#allocation2 + $0x780] sm:$0xf]  ;;  %v8293_v21 = vor.u32 %v11486_v19, %v8292_v18  ;;  %3302 = vmatpush.bf16.msra.mxu1 %v8037_v17 }
  0x33   :  { %v11550_v22 = vld [vmem:[#allocation2 + $0x79c] sm:$0xf0] }
  0x34   :  { %v7748_v23 = vld [vmem:[#allocation2 + $0x140] sm:$0xf]  ;;  %v8549_v25 = vor.u32 %v11550_v22, %v8548_v20  ;;  %3316 = vmatpush.bf16.msra.mxu2 %v8293_v21 }
  0x35   :  { %v11350_v24 = vld [vmem:[#allocation2 + $0x15c] sm:$0xf0] }
  0x36   :  { %v8004_v26 = vld [vmem:[#allocation2 + $0x340] sm:$0xf]  ;;  %v7749_v29 = vor.u32 %v11350_v24, %v7748_v23  ;;  %3330 = vmatpush.bf16.msra.mxu3 %v8549_v25 }
  0x37   :  { %v11414_v27 = vld [vmem:[#allocation2 + $0x35c] sm:$0xf0] }
  0x38   :  { %v8260_v28 = vld [vmem:[#allocation2 + $0x540] sm:$0xf]  ;;  %v8005_v33 = vor.u32 %v11414_v27, %v8004_v26  ;;  %3289 = vmatpush.bf16.msra.mxu0 %v7749_v29 }
  0x39   :  { %v11478_v30 = vld [vmem:[#allocation2 + $0x55c] sm:$0xf0] }
  0x3a   :  { %v8516_v31 = vld [vmem:[#allocation2 + $0x740] sm:$0xf]  ;;  %v8261_v34 = vor.u32 %v11478_v30, %v8260_v28  ;;  %3303 = vmatpush.bf16.msra.mxu1 %v8005_v33 }
  0x3b   :  { %v11542_v32 = vld [vmem:[#allocation2 + $0x75c] sm:$0xf0] }
  0x3c   :  { %v7716_v35 = vld [vmem:[#allocation2 + $0x100] sm:$0xf]  ;;  %v8517_v38 = vor.u32 %v11542_v32, %v8516_v31  ;;  %3317 = vmatpush.bf16.msra.mxu2 %v8261_v34 }
  0x3d   :  { %v11342_v36 = vld [vmem:[#allocation2 + $0x11c] sm:$0xf0] }
  0x3e   :  { %v7972_v37 = vld [vmem:[#allocation2 + $0x300] sm:$0xf]  ;;  %v7717_v44 = vor.u32 %v11342_v36, %v7716_v35  ;;  %3331 = vmatpush.bf16.msra.mxu3 %v8517_v38 }
  0x3f   :  { %v11406_v39 = vld [vmem:[#allocation2 + $0x31c] sm:$0xf0] }
  0x40   :  { %v8228_v40 = vld [vmem:[#allocation2 + $0x500] sm:$0xf]  ;;  %v7973_v45 = vor.u32 %v11406_v39, %v7972_v37  ;;  %3290 = vmatpush.bf16.msra.mxu0 %v7717_v44 }
  0x41   :  { %v11470_v41 = vld [vmem:[#allocation2 + $0x51c] sm:$0xf0] }
  0x42   :  { %v8484_v42 = vld [vmem:[#allocation2 + $0x700] sm:$0xf]  ;;  %v8229_v46 = vor.u32 %v11470_v41, %v8228_v40  ;;  %3304 = vmatpush.bf16.msra.mxu1 %v7973_v45 }
  0x43   :  { %v11534_v43 = vld [vmem:[#allocation2 + $0x71c] sm:$0xf0] }
  0x44   :  { %v7684_v47 = vld [vmem:[#allocation2 + $0xc0] sm:$0xf]  ;;  %v8485_v50 = vor.u32 %v11534_v43, %v8484_v42  ;;  %3318 = vmatpush.bf16.msra.mxu2 %v8229_v46 }
  0x45   :  { %v11334_v48 = vld [vmem:[#allocation2 + $0xdc] sm:$0xf0] }
  0x46   :  { %v7940_v49 = vld [vmem:[#allocation2 + $0x2c0] sm:$0xf]  ;;  %v7685_v56 = vor.u32 %v11334_v48, %v7684_v47  ;;  %3332 = vmatpush.bf16.msra.mxu3 %v8485_v50 }
  0x47   :  { %v11398_v51 = vld [vmem:[#allocation2 + $0x2dc] sm:$0xf0] }
  0x48   :  { %v8196_v52 = vld [vmem:[#allocation2 + $0x4c0] sm:$0xf]  ;;  %v7941_v57 = vor.u32 %v11398_v51, %v7940_v49  ;;  %3291 = vmatpush.bf16.msra.mxu0 %v7685_v56 }
  0x49   :  { %v11462_v53 = vld [vmem:[#allocation2 + $0x4dc] sm:$0xf0] }
  0x4a   :  { %v8452_v54 = vld [vmem:[#allocation2 + $0x6c0] sm:$0xf]  ;;  %v8197_v58 = vor.u32 %v11462_v53, %v8196_v52  ;;  %3305 = vmatpush.bf16.msra.mxu1 %v7941_v57 }
  0x4b   :  { %v11526_v55 = vld [vmem:[#allocation2 + $0x6dc] sm:$0xf0] }
  0x4c   :  { %v7652_v59 = vld [vmem:[#allocation2 + $0x80] sm:$0xf]  ;;  %v8453_v62 = vor.u32 %v11526_v55, %v8452_v54  ;;  %3319 = vmatpush.bf16.msra.mxu2 %v8197_v58  ;;  %v7564_v54 = vld [vmem:[%s13032_s0 + $0x8] sm:$0xf] }
  0x4d   :  { %v11326_v60 = vld [vmem:[#allocation2 + $0x9c] sm:$0xf0] }
  0x4e   :  { %v7908_v61 = vld [vmem:[#allocation2 + $0x280] sm:$0xf]  ;;  %v7653_v4 = vor.u32 %v11326_v60, %v7652_v59  ;;  %3333 = vmatpush.bf16.msra.mxu3 %v8453_v62  ;;  %v11303_v59 = vld [vmem:[%s13032_s0 + $0x24] sm:$0xf0] }
  0x4f   :  { %v11390_v63 = vld [vmem:[#allocation2 + $0x29c] sm:$0xf0] }
  0x50   :  { %v8164_v0 = vld [vmem:[#allocation2 + $0x480] sm:$0xf]  ;;  %v7909_v5 = vor.u32 %v11390_v63, %v7908_v61  ;;  %3292 = vmatpush.bf16.msra.mxu0 %v7653_v4 }
  0x51   :  { %v11454_v1 = vld [vmem:[#allocation2 + $0x49c] sm:$0xf0] }
  0x52   :  { %v8420_v2 = vld [vmem:[#allocation2 + $0x680] sm:$0xf]  ;;  %v8165_v6 = vor.u32 %v11454_v1, %v8164_v0  ;;  %3306 = vmatpush.bf16.msra.mxu1 %v7909_v5  ;;  %v12557_v1 = vor.u32 %v11303_v59, %v7564_v54 }
  0x53   :  { %v11518_v3 = vld [vmem:[#allocation2 + $0x69c] sm:$0xf0] }
  0x54   :  { %v7620_v7 = vld [vmem:[#allocation2 + $0x40] sm:$0xf]  ;;  %v8421_v10 = vor.u32 %v11518_v3, %v8420_v2  ;;  %3320 = vmatpush.bf16.msra.mxu2 %v8165_v6  ;;  %v11298_v6 = vld [vmem:[%s13032_s0 + $0x4] sm:$0xf] }
  0x55   :  { %v11318_v8 = vld [vmem:[#allocation2 + $0x5c] sm:$0xf0] }
  0x56   :  { %v7876_v9 = vld [vmem:[#allocation2 + $0x240] sm:$0xf]  ;;  %v7621_v16 = vor.u32 %v11318_v8, %v7620_v7  ;;  %3334 = vmatpush.bf16.msra.mxu3 %v8421_v10  ;;  %v7558_v7 = vld [vmem:[%s13032_s0 + $0x20] sm:$0xf0]  ;;  %v11299_v8 = vld [vmem:[%s13032_s0 + $0xc] sm:$0xf] }
  0x57   :  { %v11382_v11 = vld [vmem:[#allocation2 + $0x25c] sm:$0xf0]  ;;  %v12570_v10 = vor.u32 %v11298_v6, %v7558_v7 }
  0x58   :  { %v8132_v12 = vld [vmem:[#allocation2 + $0x440] sm:$0xf]  ;;  %v7877_v19 = vor.u32 %v11382_v11, %v7876_v9  ;;  %3293 = vmatpush.bf16.msra.mxu0 %v7621_v16  ;;  %v7566_v11 = vld [vmem:[%s13032_s0 + $0x28] sm:$0xf0] }
  0x59   :  { %v11446_v13 = vld [vmem:[#allocation2 + $0x45c] sm:$0xf0] }
  0x5a   :  { %v8388_v14 = vld [vmem:[#allocation2 + $0x640] sm:$0xf]  ;;  %v8133_v20 = vor.u32 %v11446_v13, %v8132_v12  ;;  %3307 = vmatpush.bf16.msra.mxu1 %v7877_v19 }
  0x5b   :  { %v11510_v15 = vld [vmem:[#allocation2 + $0x65c] sm:$0xf0] }
  0x5c   :  { %v7588_v17 = vld [vmem:[#allocation2] sm:$0xf]  ;;  %v8389_v24 = vor.u32 %v11510_v15, %v8388_v14  ;;  %3321 = vmatpush.bf16.msra.mxu2 %v8133_v20 }
  0x5d   :  { %v11310_v18 = vld [vmem:[#allocation2 + $0x1c] sm:$0xf0] }
  0x5e   :  { %v7844_v21 = vld [vmem:[#allocation2 + $0x200] sm:$0xf]  ;;  %v7589_v31 = vor.u32 %v11310_v18, %v7588_v17  ;;  %3335 = vmatpush.bf16.msra.mxu3 %v8389_v24  ;;  %v12575_v17 = vor.u32 %v11299_v8, %v7566_v11 }
  0x5f   :  { %v11374_v22 = vld [vmem:[#allocation2 + $0x21c] sm:$0xf0] }
  0x60   :  { %v8100_v23 = vld [vmem:[#allocation2 + $0x400] sm:$0xf]  ;;  %v7845_v35 = vor.u32 %v11374_v22, %v7844_v21  ;;  %3294 = vmatpush.bf16.msra.mxu0 %v7589_v31 }
  0x61   :  { %v11438_v25 = vld [vmem:[#allocation2 + $0x41c] sm:$0xf0] }
  0x62   :  { %v8356_v26 = vld [vmem:[#allocation2 + $0x600] sm:$0xf]  ;;  %v8101_v36 = vor.u32 %v11438_v25, %v8100_v23  ;;  %3308 = vmatpush.bf16.msra.mxu1 %v7845_v35 }
  0x63   :  { %v11502_v27 = vld [vmem:[#allocation2 + $0x61c] sm:$0xf0] }
  0x64   :  { %v8836_v28 = vld [vmem:[#allocation2 + $0x9c0] sm:$0xf]  ;;  %v8357_v39 = vor.u32 %v11502_v27, %v8356_v26  ;;  %3322 = vmatpush.bf16.msra.mxu2 %v8101_v36 }
  0x65   :  { %v11622_v29 = vld [vmem:[#allocation2 + $0x9dc] sm:$0xf0]  ;;  %3309 = vmatmul.bf16.vlgmr.msra.gmra.mxu1 %v12570_v10 }
  0x66   :  { %v9092_v30 = vld [vmem:[#allocation2 + $0xbc0] sm:$0xf]  ;;  %v8837_v40 = vor.u32 %v11622_v29, %v8836_v28  ;;  %3336 = vmatpush.bf16.msra.mxu3 %v8357_v39 }
  0x67   :  { %v11686_v32 = vld [vmem:[#allocation2 + $0xbdc] sm:$0xf0]  ;;  %3323 = vmatmul.bf16.vlgmr.msra.gmra.mxu2 %v12557_v1 }
  0x68   :  { %v9348_v33 = vld [vmem:[#allocation2 + $0xdc0] sm:$0xf]  ;;  %v9093_v43 = vor.u32 %v11686_v32, %v9092_v30  ;;  %3343 = vmatpush.bf16.msrb.mxu0 %v8837_v40 }
  0x69   :  { %v11750_v34 = vld [vmem:[#allocation2 + $0xddc] sm:$0xf0]  ;;  %3337 = vmatmul.bf16.vlgmr.msra.gmra.mxu3 %v12575_v17 }
  0x6a   :  { %v9604_v37 = vld [vmem:[#allocation2 + $0xfc0] sm:$0xf]  ;;  %v9349_v44 = vor.u32 %v11750_v34, %v9348_v33  ;;  %3357 = vmatpush.bf16.msrb.mxu1 %v9093_v43 }
  0x6b   :  { %v11814_v38 = vld [vmem:[#allocation2 + $0xfdc] sm:$0xf0] }
  0x6c   :  { %v8804_v41 = vld [vmem:[#allocation2 + $0x980] sm:$0xf]  ;;  %v9605_v48 = vor.u32 %v11814_v38, %v9604_v37  ;;  %3371 = vmatpush.bf16.msrb.mxu2 %v9349_v44 }
  0x6d   :  { %v11614_v42 = vld [vmem:[#allocation2 + $0x99c] sm:$0xf0] }
  0x6e   :  { %v9060_v45 = vld [vmem:[#allocation2 + $0xb80] sm:$0xf]  ;;  %v8805_v55 = vor.u32 %v11614_v42, %v8804_v41  ;;  %3385 = vmatpush.bf16.msrb.mxu3 %v9605_v48 }
  0x6f   :  { %v11678_v46 = vld [vmem:[#allocation2 + $0xb9c] sm:$0xf0] }
  0x70   :  { %v9316_v47 = vld [vmem:[#allocation2 + $0xd80] sm:$0xf]  ;;  %v9061_v60 = vor.u32 %v11678_v46, %v9060_v45  ;;  %3344 = vmatpush.bf16.msrb.mxu0 %v8805_v55 }
  0x71   :  { %v11742_v49 = vld [vmem:[#allocation2 + $0xd9c] sm:$0xf0] }
  0x72   :  { %v9572_v50 = vld [vmem:[#allocation2 + $0xf80] sm:$0xf]  ;;  %v9317_v61 = vor.u32 %v11742_v49, %v9316_v47  ;;  %3358 = vmatpush.bf16.msrb.mxu1 %v9061_v60 }
  0x73   :  { %v11806_v51 = vld [vmem:[#allocation2 + $0xf9c] sm:$0xf0] }
  0x74   :  { %v7556_v52 = vld [vmem:[%s13032_s0] sm:$0xf]  ;;  %v9573_v2 = vor.u32 %v11806_v51, %v9572_v50  ;;  %3372 = vmatpush.bf16.msrb.mxu2 %v9317_v61 }
  0x75   :  { %v11302_v53 = vld [vmem:[%s13032_s0 + $0x1c] sm:$0xf0] }
  0x76   :  { %v8772_v56 = vld [vmem:[#allocation2 + $0x940] sm:$0xf]  ;;  %v12552_v58 = vor.u32 %v11302_v53, %v7556_v52  ;;  %3386 = vmatpush.bf16.msrb.mxu3 %v9573_v2 }
  0x77   :  { %v11606_v57 = vld [vmem:[#allocation2 + $0x95c] sm:$0xf0] }
  0x78   :  { %v9028_v62 = vld [vmem:[#allocation2 + $0xb40] sm:$0xf]  ;;  %3295 = vmatmul.bf16.vlgmr.msra.gmra.mxu0 %v12552_v58  ;;  %v8773_v9 = vor.u32 %v11606_v57, %v8772_v56 }
  0x79   :  { %v11670_v63 = vld [vmem:[#allocation2 + $0xb5c] sm:$0xf0] }
  0x7a   :  { %v9284_v0 = vld [vmem:[#allocation2 + $0xd40] sm:$0xf]  ;;  %v9029_v12 = vor.u32 %v11670_v63, %v9028_v62  ;;  %3345 = vmatpush.bf16.msrb.mxu0 %v8773_v9  ;;  %v11362_v9 = vld [vmem:[#allocation2 + $0x1c4] sm:$0xf] }
  0x7b   :  { %v11734_v3 = vld [vmem:[#allocation2 + $0xd5c] sm:$0xf0] }
  0x7c   :  { %v9540_v4 = vld [vmem:[#allocation2 + $0xf40] sm:$0xf]  ;;  %v9285_v13 = vor.u32 %v11734_v3, %v9284_v0  ;;  %3359 = vmatpush.bf16.msrb.mxu1 %v9029_v12  ;;  %v7814_v12 = vld [vmem:[#allocation2 + $0x1e0] sm:$0xf0] }
  0x7d   :  { %v11798_v5 = vld [vmem:[#allocation2 + $0xf5c] sm:$0xf0] }
  0x7e   :  { %v8740_v14 = vld [vmem:[#allocation2 + $0x900] sm:$0xf]  ;;  %v9541_v18 = vor.u32 %v11798_v5, %v9540_v4  ;;  %3373 = vmatpush.bf16.msrb.mxu2 %v9285_v13  ;;  %v11426_v13 = vld [vmem:[#allocation2 + $0x3c4] sm:$0xf] }
  0x7f   :  { %v11598_v15 = vld [vmem:[#allocation2 + $0x91c] sm:$0xf0] }
  0x80   :  { %v8996_v16 = vld [vmem:[#allocation2 + $0xb00] sm:$0xf]  ;;  %v8741_v24 = vor.u32 %v11598_v15, %v8740_v14  ;;  %3387 = vmatpush.bf16.msrb.mxu3 %v9541_v18  ;;  %v8070_v14 = vld [vmem:[#allocation2 + $0x3e0] sm:$0xf0] }
  0x81   :  { %v11662_v19 = vld [vmem:[#allocation2 + $0xb1c] sm:$0xf0]  ;;  %v11490_v15 = vld [vmem:[#allocation2 + $0x5c4] sm:$0xf] }
  0x82   :  { %v9252_v20 = vld [vmem:[#allocation2 + $0xd00] sm:$0xf]  ;;  %v8997_v25 = vor.u32 %v11662_v19, %v8996_v16  ;;  %3346 = vmatpush.bf16.msrb.mxu0 %v8741_v24  ;;  %v8326_v16 = vld [vmem:[#allocation2 + $0x5e0] sm:$0xf0] }
  0x83   :  { %v11726_v21 = vld [vmem:[#allocation2 + $0xd1c] sm:$0xf0]  ;;  %v11554_v18 = vld [vmem:[#allocation2 + $0x7c4] sm:$0xf] }
  0x84   :  { %v9508_v22 = vld [vmem:[#allocation2 + $0xf00] sm:$0xf]  ;;  %v9253_v26 = vor.u32 %v11726_v21, %v9252_v20  ;;  %3360 = vmatpush.bf16.msrb.mxu1 %v8997_v25  ;;  %v8582_v20 = vld [vmem:[#allocation2 + $0x7e0] sm:$0xf0]  ;;  %v7572_v21 = vld [vmem:[%s13032_s0 + $0x10] sm:$0xf] }
  0x85   :  { %v11790_v23 = vld [vmem:[#allocation2 + $0xf1c] sm:$0xf0]  ;;  %v7580_v25 = vld [vmem:[%s13032_s0 + $0x18] sm:$0xf] }
  0x86   :  { %v8708_v27 = vld [vmem:[#allocation2 + $0x8c0] sm:$0xf]  ;;  %v9509_v30 = vor.u32 %v11790_v23, %v9508_v22  ;;  %3374 = vmatpush.bf16.msrb.mxu2 %v9253_v26  ;;  %v11304_v22 = vld [vmem:[%s13032_s0 + $0x2c] sm:$0xf0]  ;;  %v11305_v26 = vld [vmem:[%s13032_s0 + $0x34] sm:$0xf0] }
  0x87   :  { %v11590_v28 = vld [vmem:[#allocation2 + $0x8dc] sm:$0xf0] }
  0x88   :  { %v8964_v29 = vld [vmem:[#allocation2 + $0xac0] sm:$0xf]  ;;  %v8709_v36 = vor.u32 %v11590_v28, %v8708_v27  ;;  %3388 = vmatpush.bf16.msrb.mxu3 %v9509_v30  ;;  %v11300_v27 = vld [vmem:[%s13032_s0 + $0x14] sm:$0xf] }
  0x89   :  { %v11654_v31 = vld [vmem:[#allocation2 + $0xadc] sm:$0xf0]  ;;  %v7574_v30 = vld [vmem:[%s13032_s0 + $0x30] sm:$0xf0] }
  0x8a   :  { %v9220_v32 = vld [vmem:[#allocation2 + $0xcc0] sm:$0xf]  ;;  %v8965_v37 = vor.u32 %v11654_v31, %v8964_v29  ;;  %3347 = vmatpush.bf16.msrb.mxu0 %v8709_v36  ;;  %v7817_v29 = vor.u32 %v11362_v9, %v7814_v12  ;;  %v11301_v31 = vld [vmem:[%s13032_s0 + $0x1c] sm:$0xf]  ;;  %v7782_v36 = vld [vmem:[#allocation2 + $0x1a0] sm:$0xf0] }
  0x8b   :  { %v11718_v33 = vld [vmem:[#allocation2 + $0xcdc] sm:$0xf0]  ;;  %v8486_v9 = vld [vmem:[#allocation2 + $0x720] sm:$0xf0] }
  0x8c   :  { %v9476_v34 = vld [vmem:[#allocation2 + $0xec0] sm:$0xf]  ;;  %v9221_v38 = vor.u32 %v11718_v33, %v9220_v32  ;;  %3361 = vmatpush.bf16.msrb.mxu1 %v8965_v37  ;;  %v7582_v32 = vld [vmem:[%s13032_s0 + $0x38] sm:$0xf0]  ;;  %v8073_v33 = vor.u32 %v11426_v13, %v8070_v14  ;;  %v11418_v37 = vld [vmem:[#allocation2 + $0x384] sm:$0xf] }
  0x8d   :  { %v11782_v35 = vld [vmem:[#allocation2 + $0xedc] sm:$0xf0]  ;;  %v11330_v14 = vld [vmem:[#allocation2 + $0xc4] sm:$0xf] }
  0x8e   :  { %v8676_v39 = vld [vmem:[#allocation2 + $0x880] sm:$0xf]  ;;  %v9477_v42 = vor.u32 %v11782_v35, %v9476_v34  ;;  %3375 = vmatpush.bf16.msrb.mxu2 %v9221_v38  ;;  %v8329_v34 = vor.u32 %v11490_v15, %v8326_v16  ;;  %v11354_v35 = vld [vmem:[#allocation2 + $0x184] sm:$0xf]  ;;  %v8585_v38 = vor.u32 %v11554_v18, %v8582_v20 }
  0x8f   :  { %v11582_v40 = vld [vmem:[#allocation2 + $0x89c] sm:$0xf0]  ;;  %v7686_v15 = vld [vmem:[#allocation2 + $0xe0] sm:$0xf0] }
  0x90   :  { %v8932_v41 = vld [vmem:[#allocation2 + $0xa80] sm:$0xf]  ;;  %v8677_v48 = vor.u32 %v11582_v40, %v8676_v39  ;;  %3389 = vmatpush.bf16.msrb.mxu3 %v9477_v42  ;;  %v12603_v39 = vor.u32 %v11304_v22, %v7572_v21  ;;  %v8038_v40 = vld [vmem:[#allocation2 + $0x3a0] sm:$0xf0] }
  0x91   :  { %v11646_v43 = vld [vmem:[#allocation2 + $0xa9c] sm:$0xf0]  ;;  %v8294_v42 = vld [vmem:[#allocation2 + $0x5a0] sm:$0xf0] }
  0x92   :  { %v9188_v44 = vld [vmem:[#allocation2 + $0xc80] sm:$0xf]  ;;  %v8933_v50 = vor.u32 %v11646_v43, %v8932_v41  ;;  %3348 = vmatpush.bf16.msrb.mxu0 %v8677_v48  ;;  %v11482_v41 = vld [vmem:[#allocation2 + $0x584] sm:$0xf]  ;;  %v12605_v43 = vor.u32 %v11305_v26, %v7580_v25  ;;  %v7785_v48 = vor.u32 %v11354_v35, %v7782_v36 }
  0x93   :  { %v11710_v45 = vld [vmem:[#allocation2 + $0xc9c] sm:$0xf0]  ;;  %v11394_v16 = vld [vmem:[#allocation2 + $0x2c4] sm:$0xf] }
  0x94   :  { %v9444_v46 = vld [vmem:[#allocation2 + $0xe80] sm:$0xf]  ;;  %v9189_v51 = vor.u32 %v11710_v45, %v9188_v44  ;;  %3362 = vmatpush.bf16.msrb.mxu1 %v8933_v50  ;;  %v12607_v44 = vor.u32 %v11300_v27, %v7574_v30  ;;  %v11546_v45 = vld [vmem:[#allocation2 + $0x784] sm:$0xf]  ;;  %v8297_v50 = vor.u32 %v11482_v41, %v8294_v42 }
  0x95   :  { %v11774_v47 = vld [vmem:[#allocation2 + $0xe9c] sm:$0xf0]  ;;  %v11458_v20 = vld [vmem:[#allocation2 + $0x4c4] sm:$0xf] }
  0x96   :  { %v8644_v49 = vld [vmem:[#allocation2 + $0x840] sm:$0xf]  ;;  %v9445_v55 = vor.u32 %v11774_v47, %v9444_v46  ;;  %3376 = vmatpush.bf16.msrb.mxu2 %v9189_v51  ;;  %v8550_v46 = vld [vmem:[#allocation2 + $0x7a0] sm:$0xf0]  ;;  %v12609_v47 = vor.u32 %v11301_v31, %v7582_v32 }
  0x97   :  { %v11574_v52 = vld [vmem:[#allocation2 + $0x85c] sm:$0xf0]  ;;  %v11346_v51 = vld [vmem:[#allocation2 + $0x144] sm:$0xf] }
  0x98   :  { %v8900_v53 = vld [vmem:[#allocation2 + $0xa40] sm:$0xf]  ;;  %v8645_v63 = vor.u32 %v11574_v52, %v8644_v49  ;;  %3390 = vmatpush.bf16.msrb.mxu3 %v9445_v55  ;;  %v8041_v49 = vor.u32 %v11418_v37, %v8038_v40  ;;  %v7750_v52 = vld [vmem:[#allocation2 + $0x160] sm:$0xf0] }
  0x99   :  { %v11638_v54 = vld [vmem:[#allocation2 + $0xa5c] sm:$0xf0]  ;;  %v8006_v55 = vld [vmem:[#allocation2 + $0x360] sm:$0xf0] }
  0x9a   :  { %v9156_v56 = vld [vmem:[#allocation2 + $0xc40] sm:$0xf]  ;;  %v8901_v5 = vor.u32 %v11638_v54, %v8900_v53  ;;  %3349 = vmatpush.bf16.msrb.mxu0 %v8645_v63  ;;  %v11410_v53 = vld [vmem:[#allocation2 + $0x344] sm:$0xf]  ;;  %v8553_v54 = vor.u32 %v11546_v45, %v8550_v46 }
  0x9b   :  { %v11702_v57 = vld [vmem:[#allocation2 + $0xc5c] sm:$0xf0]  ;;  %v8198_v21 = vld [vmem:[#allocation2 + $0x4e0] sm:$0xf0] }
  0x9c   :  { %v9412_v59 = vld [vmem:[#allocation2 + $0xe40] sm:$0xf]  ;;  %v9157_v6 = vor.u32 %v11702_v57, %v9156_v56  ;;  %3363 = vmatpush.bf16.msrb.mxu1 %v8901_v5  ;;  %v11474_v56 = vld [vmem:[#allocation2 + $0x544] sm:$0xf]  ;;  %v8201_v26 = vor.u32 %v11458_v20, %v8198_v21 }
  0x9d   :  { %v11766_v60 = vld [vmem:[#allocation2 + $0xe5c] sm:$0xf0]  ;;  %v8262_v57 = vld [vmem:[#allocation2 + $0x560] sm:$0xf0] }
  0x9e   :  { %v8612_v61 = vld [vmem:[#allocation2 + $0x800] sm:$0xf]  ;;  %v9413_v11 = vor.u32 %v11766_v60, %v9412_v59  ;;  %3377 = vmatpush.bf16.msrb.mxu2 %v9157_v6  ;;  %v11538_v59 = vld [vmem:[#allocation2 + $0x744] sm:$0xf]  ;;  %v8265_v63 = vor.u32 %v11474_v56, %v8262_v57 }
  0x9f   :  { %v11566_v62 = vld [vmem:[#allocation2 + $0x81c] sm:$0xf0]  ;;  %v8518_v60 = vld [vmem:[#allocation2 + $0x760] sm:$0xf0] }
  0xa0   :  { %v8868_v0 = vld [vmem:[#allocation2 + $0xa00] sm:$0xf]  ;;  %v8613_v19 = vor.u32 %v11566_v62, %v8612_v61  ;;  %3391 = vmatpush.bf16.msrb.mxu3 %v9413_v11  ;;  %v7753_v61 = vor.u32 %v11346_v51, %v7750_v52  ;;  %v8009_v62 = vor.u32 %v11410_v53, %v8006_v55  ;;  %v7974_v5 = vld [vmem:[#allocation2 + $0x320] sm:$0xf0] }
  0xa1   :  { %v11630_v2 = vld [vmem:[#allocation2 + $0xa1c] sm:$0xf0]  ;;  %v11466_v6 = vld [vmem:[#allocation2 + $0x504] sm:$0xf] }
  0xa2   :  { %v9124_v3 = vld [vmem:[#allocation2 + $0xc00] sm:$0xf]  ;;  %v8869_v23 = vor.u32 %v11630_v2, %v8868_v0  ;;  %3350 = vmatpush.bf16.msrb.mxu0 %v8613_v19  ;;  %v11338_v0 = vld [vmem:[#allocation2 + $0x104] sm:$0xf] }
  0xa3   :  { %v11694_v4 = vld [vmem:[#allocation2 + $0xc1c] sm:$0xf0]  ;;  %v7718_v2 = vld [vmem:[#allocation2 + $0x120] sm:$0xf0] }
  0xa4   :  { %v9380_v7 = vld [vmem:[#allocation2 + $0xe00] sm:$0xf]  ;;  %v9125_v24 = vor.u32 %v11694_v4, %v9124_v3  ;;  %3364 = vmatpush.bf16.msrb.mxu1 %v8869_v23  ;;  %v11402_v3 = vld [vmem:[#allocation2 + $0x304] sm:$0xf]  ;;  %v8521_v4 = vor.u32 %v11538_v59, %v8518_v60  ;;  %v7721_v11 = vor.u32 %v11338_v0, %v7718_v2 }
  0xa5   :  { %v11758_v8 = vld [vmem:[#allocation2 + $0xe1c] sm:$0xf0]  ;;  %3351 = vmatmul.bf16.vlgmr.msrb.gmra.mxu0 %v12603_v39  ;;  %v7977_v12 = vor.u32 %v11402_v3, %v7974_v5  ;;  %v7942_v19 = vld [vmem:[#allocation2 + $0x2e0] sm:$0xf0] }
  0xa6   :  { %v9381_v28 = vor.u32 %v11758_v8, %v9380_v7  ;;  %3378 = vmatpush.bf16.msrb.mxu2 %v9125_v24  ;;  %3399 = vmatpush.bf16.msra.mxu0 %v7817_v29  ;;  %v8230_v7 = vld [vmem:[#allocation2 + $0x520] sm:$0xf0]  ;;  %v7689_v24 = vor.u32 %v11330_v14, %v7686_v15  ;;  %v7945_v25 = vor.u32 %v11394_v16, %v7942_v19 }
  0xa7   :  { %3365 = vmatmul.bf16.vlgmr.msrb.gmra.mxu1 %v12607_v44  ;;  %v11530_v8 = vld [vmem:[#allocation2 + $0x704] sm:$0xf]  ;;  %v8233_v13 = vor.u32 %v11466_v6, %v8230_v7 }
  0xa8   :  { %3392 = vmatpush.bf16.msrb.mxu3 %v9381_v28  ;;  %3413 = vmatpush.bf16.msra.mxu1 %v8073_v33  ;;  %v8489_v18 = vor.u32 %v11530_v8, %v8486_v9  ;;  %v11522_v22 = vld [vmem:[#allocation2 + $0x6c4] sm:$0xf] }
  0xa9   :  { %3379 = vmatmul.bf16.vlgmr.msrb.gmra.mxu2 %v12605_v43  ;;  %v8454_v23 = vld [vmem:[#allocation2 + $0x6e0] sm:$0xf0] }
  0xaa   :  { %3427 = vmatpush.bf16.msra.mxu2 %v8329_v34  ;;  %3400 = vmatpush.bf16.msra.mxu0 %v7785_v48  ;;  %v11322_v27 = vld [vmem:[#allocation2 + $0x84] sm:$0xf]  ;;  %v8457_v30 = vor.u32 %v11522_v22, %v8454_v23 }
  0xab   :  { %3393 = vmatmul.bf16.vlgmr.msrb.gmra.mxu3 %v12609_v47  ;;  %v7654_v28 = vld [vmem:[#allocation2 + $0xa0] sm:$0xf0] }
  0xac   :  { %3441 = vmatpush.bf16.msra.mxu3 %v8585_v38  ;;  %3414 = vmatpush.bf16.msra.mxu1 %v8041_v49  ;;  %v11386_v29 = vld [vmem:[#allocation2 + $0x284] sm:$0xf]  ;;  %v7657_v36 = vor.u32 %v11322_v27, %v7654_v28 }
  0xad   :  { %v7910_v31 = vld [vmem:[#allocation2 + $0x2a0] sm:$0xf0] }
  0xae   :  { %3428 = vmatpush.bf16.msra.mxu2 %v8297_v50  ;;  %3401 = vmatpush.bf16.msra.mxu0 %v7753_v61  ;;  %v11450_v32 = vld [vmem:[#allocation2 + $0x484] sm:$0xf]  ;;  %v7913_v37 = vor.u32 %v11386_v29, %v7910_v31 }
  0xaf   :  { %v8166_v33 = vld [vmem:[#allocation2 + $0x4a0] sm:$0xf0] }
  0xb0   :  { %3442 = vmatpush.bf16.msra.mxu3 %v8553_v54  ;;  %3415 = vmatpush.bf16.msra.mxu1 %v8009_v62  ;;  %v11514_v34 = vld [vmem:[#allocation2 + $0x684] sm:$0xf]  ;;  %v8169_v38 = vor.u32 %v11450_v32, %v8166_v33 }
  0xb1   :  { %v8422_v35 = vld [vmem:[#allocation2 + $0x6a0] sm:$0xf0] }
  0xb2   :  { %3429 = vmatpush.bf16.msra.mxu2 %v8265_v63  ;;  %3402 = vmatpush.bf16.msra.mxu0 %v7721_v11  ;;  %v11314_v40 = vld [vmem:[#allocation2 + $0x44] sm:$0xf]  ;;  %v8425_v45 = vor.u32 %v11514_v34, %v8422_v35 }
  0xb3   :  { %v7622_v41 = vld [vmem:[#allocation2 + $0x60] sm:$0xf0] }
  0xb4   :  { %3443 = vmatpush.bf16.msra.mxu3 %v8521_v4  ;;  %3416 = vmatpush.bf16.msra.mxu1 %v7977_v12  ;;  %v11378_v42 = vld [vmem:[#allocation2 + $0x244] sm:$0xf]  ;;  %v7625_v52 = vor.u32 %v11314_v40, %v7622_v41 }
  0xb5   :  { %v7878_v46 = vld [vmem:[#allocation2 + $0x260] sm:$0xf0] }
  0xb6   :  { %3430 = vmatpush.bf16.msra.mxu2 %v8233_v13  ;;  %3403 = vmatpush.bf16.msra.mxu0 %v7689_v24  ;;  %v11442_v48 = vld [vmem:[#allocation2 + $0x444] sm:$0xf]  ;;  %v7881_v55 = vor.u32 %v11378_v42, %v7878_v46 }
  0xb7   :  { %v8134_v49 = vld [vmem:[#allocation2 + $0x460] sm:$0xf0] }
  0xb8   :  { %3444 = vmatpush.bf16.msra.mxu3 %v8489_v18  ;;  %3417 = vmatpush.bf16.msra.mxu1 %v7945_v25  ;;  %v11506_v50 = vld [vmem:[#allocation2 + $0x644] sm:$0xf]  ;;  %v8137_v56 = vor.u32 %v11442_v48, %v8134_v49 }
  0xb9   :  { %v8390_v51 = vld [vmem:[#allocation2 + $0x660] sm:$0xf0] }
  0xba   :  { %3431 = vmatpush.bf16.msra.mxu2 %v8201_v26  ;;  %3404 = vmatpush.bf16.msra.mxu0 %v7657_v36  ;;  %v11306_v53 = vld [vmem:[#allocation2 + $0x4] sm:$0xf]  ;;  %v8393_v61 = vor.u32 %v11506_v50, %v8390_v51 }
  0xbb   :  { %v7590_v54 = vld [vmem:[#allocation2 + $0x20] sm:$0xf0] }
  0xbc   :  { %3445 = vmatpush.bf16.msra.mxu3 %v8457_v30  ;;  %3418 = vmatpush.bf16.msra.mxu1 %v7913_v37  ;;  %v11370_v57 = vld [vmem:[#allocation2 + $0x204] sm:$0xf]  ;;  %v7593_v5 = vor.u32 %v11306_v53, %v7590_v54 }
  0xbd   :  { %v7846_v59 = vld [vmem:[#allocation2 + $0x220] sm:$0xf0] }
  0xbe   :  { %3432 = vmatpush.bf16.msra.mxu2 %v8169_v38  ;;  %v11434_v60 = vld [vmem:[#allocation2 + $0x404] sm:$0xf]  ;;  %3405 = vmatpush.bf16.msra.mxu0 %v7625_v52  ;;  %v7849_v9 = vor.u32 %v11370_v57, %v7846_v59 }
  0xbf   :  { %v8102_v62 = vld [vmem:[#allocation2 + $0x420] sm:$0xf0] }
  0xc0   :  { %3446 = vmatpush.bf16.msra.mxu3 %v8425_v45  ;;  %v11498_v63 = vld [vmem:[#allocation2 + $0x604] sm:$0xf]  ;;  %3419 = vmatpush.bf16.msra.mxu1 %v7881_v55  ;;  %v8105_v11 = vor.u32 %v11434_v60, %v8102_v62 }
  0xc1   :  { %v8358_v0 = vld [vmem:[#allocation2 + $0x620] sm:$0xf0] }
  0xc2   :  { %v11618_v2 = vld [vmem:[#allocation2 + $0x9c4] sm:$0xf]  ;;  %3433 = vmatpush.bf16.msra.mxu2 %v8137_v56  ;;  %v8361_v14 = vor.u32 %v11498_v63, %v8358_v0  ;;  %3406 = vmatpush.bf16.msra.mxu0 %v7593_v5 }
  0xc3   :  { %v8838_v3 = vld [vmem:[#allocation2 + $0x9e0] sm:$0xf0] }
  0xc4   :  { %v11682_v4 = vld [vmem:[#allocation2 + $0xbc4] sm:$0xf]  ;;  %3447 = vmatpush.bf16.msra.mxu3 %v8393_v61  ;;  %v8841_v15 = vor.u32 %v11618_v2, %v8838_v3  ;;  %3420 = vmatpush.bf16.msra.mxu1 %v7849_v9 }
  0xc5   :  { %v9094_v6 = vld [vmem:[#allocation2 + $0xbe0] sm:$0xf0]  ;;  %3407 = vmatmul.bf16.vlgmr.msra.gmra.mxu0 %v12552_v58 }
  0xc6   :  { %v11746_v7 = vld [vmem:[#allocation2 + $0xdc4] sm:$0xf]  ;;  %v9097_v16 = vor.u32 %v11682_v4, %v9094_v6  ;;  %3434 = vmatpush.bf16.msra.mxu2 %v8105_v11  ;;  %3455 = vmatpush.bf16.msrb.mxu0 %v8841_v15 }
  0xc7   :  { %v9350_v8 = vld [vmem:[#allocation2 + $0xde0] sm:$0xf0]  ;;  %3421 = vmatmul.bf16.vlgmr.msra.gmra.mxu1 %v12570_v10 }
  0xc8   :  { %v11810_v12 = vld [vmem:[#allocation2 + $0xfc4] sm:$0xf]  ;;  %v9353_v18 = vor.u32 %v11746_v7, %v9350_v8  ;;  %3448 = vmatpush.bf16.msra.mxu3 %v8361_v14  ;;  %3469 = vmatpush.bf16.msrb.mxu1 %v9097_v16 }
  0xc9   :  { %v9606_v13 = vld [vmem:[#allocation2 + $0xfe0] sm:$0xf0]  ;;  %3435 = vmatmul.bf16.vlgmr.msra.gmra.mxu2 %v12557_v1 }
  0xca   :  { %v11610_v19 = vld [vmem:[#allocation2 + $0x984] sm:$0xf]  ;;  %v9609_v22 = vor.u32 %v11810_v12, %v9606_v13  ;;  %3483 = vmatpush.bf16.msrb.mxu2 %v9353_v18 }
  0xcb   :  { %v8806_v20 = vld [vmem:[#allocation2 + $0x9a0] sm:$0xf0]  ;;  %3449 = vmatmul.bf16.vlgmr.msra.gmra.mxu3 %v12575_v17 }
  0xcc   :  { %v11674_v21 = vld [vmem:[#allocation2 + $0xb84] sm:$0xf]  ;;  %v8809_v28 = vor.u32 %v11610_v19, %v8806_v20  ;;  %3497 = vmatpush.bf16.msrb.mxu3 %v9609_v22 }
  0xcd   :  { %v9062_v23 = vld [vmem:[#allocation2 + $0xba0] sm:$0xf0] }
  0xce   :  { %v11738_v24 = vld [vmem:[#allocation2 + $0xd84] sm:$0xf]  ;;  %v9065_v29 = vor.u32 %v11674_v21, %v9062_v23  ;;  %3456 = vmatpush.bf16.msrb.mxu0 %v8809_v28 }
  0xcf   :  { %v9318_v25 = vld [vmem:[#allocation2 + $0xda0] sm:$0xf0] }
  0xd0   :  { %v11802_v26 = vld [vmem:[#allocation2 + $0xf84] sm:$0xf]  ;;  %v9321_v30 = vor.u32 %v11738_v24, %v9318_v25  ;;  %3470 = vmatpush.bf16.msrb.mxu1 %v9065_v29 }
  0xd1   :  { %v9574_v27 = vld [vmem:[#allocation2 + $0xfa0] sm:$0xf0] }
  0xd2   :  { %v11602_v31 = vld [vmem:[#allocation2 + $0x944] sm:$0xf]  ;;  %v9577_v34 = vor.u32 %v11802_v26, %v9574_v27  ;;  %3484 = vmatpush.bf16.msrb.mxu2 %v9321_v30 }
  0xd3   :  { %v8774_v32 = vld [vmem:[#allocation2 + $0x960] sm:$0xf0] }
  0xd4   :  { %v11666_v33 = vld [vmem:[#allocation2 + $0xb44] sm:$0xf]  ;;  %v8777_v41 = vor.u32 %v11602_v31, %v8774_v32  ;;  %3498 = vmatpush.bf16.msrb.mxu3 %v9577_v34 }
  0xd5   :  { %v9030_v35 = vld [vmem:[#allocation2 + $0xb60] sm:$0xf0] }
  0xd6   :  { %v11730_v36 = vld [vmem:[#allocation2 + $0xd44] sm:$0xf]  ;;  %v9033_v42 = vor.u32 %v11666_v33, %v9030_v35  ;;  %3457 = vmatpush.bf16.msrb.mxu0 %v8777_v41 }
  0xd7   :  { %v9286_v37 = vld [vmem:[#allocation2 + $0xd60] sm:$0xf0] }
  0xd8   :  { %v11794_v38 = vld [vmem:[#allocation2 + $0xf44] sm:$0xf]  ;;  %v9289_v45 = vor.u32 %v11730_v36, %v9286_v37  ;;  %3471 = vmatpush.bf16.msrb.mxu1 %v9033_v42 }
  0xd9   :  { %v9542_v40 = vld [vmem:[#allocation2 + $0xf60] sm:$0xf0] }
  0xda   :  { %v11594_v46 = vld [vmem:[#allocation2 + $0x904] sm:$0xf]  ;;  %v9545_v50 = vor.u32 %v11794_v38, %v9542_v40  ;;  %3485 = vmatpush.bf16.msrb.mxu2 %v9289_v45 }
  0xdb   :  { %v8742_v48 = vld [vmem:[#allocation2 + $0x920] sm:$0xf0] }
  0xdc   :  { %v11658_v49 = vld [vmem:[#allocation2 + $0xb04] sm:$0xf]  ;;  %v8745_v56 = vor.u32 %v11594_v46, %v8742_v48  ;;  %3499 = vmatpush.bf16.msrb.mxu3 %v9545_v50  ;;  %v7820_v48 = vld [vmem:[#allocation2 + $0x1c8] sm:$0xf] }
  0xdd   :  { %v8998_v51 = vld [vmem:[#allocation2 + $0xb20] sm:$0xf0]  ;;  %v8076_v50 = vld [vmem:[#allocation2 + $0x3c8] sm:$0xf] }
  0xde   :  { %v11722_v52 = vld [vmem:[#allocation2 + $0xd04] sm:$0xf]  ;;  %v9001_v57 = vor.u32 %v11658_v49, %v8998_v51  ;;  %3458 = vmatpush.bf16.msrb.mxu0 %v8745_v56  ;;  %v11367_v49 = vld [vmem:[#allocation2 + $0x1e4] sm:$0xf0] }
  0xdf   :  { %v9254_v53 = vld [vmem:[#allocation2 + $0xd20] sm:$0xf0] }
  0xe0   :  { %v11786_v54 = vld [vmem:[#allocation2 + $0xf04] sm:$0xf]  ;;  %v9257_v59 = vor.u32 %v11722_v52, %v9254_v53  ;;  %3472 = vmatpush.bf16.msrb.mxu1 %v9001_v57  ;;  %v11431_v52 = vld [vmem:[#allocation2 + $0x3e4] sm:$0xf0] }
  0xe1   :  { %v9510_v55 = vld [vmem:[#allocation2 + $0xf20] sm:$0xf0]  ;;  %v8332_v53 = vld [vmem:[#allocation2 + $0x5c8] sm:$0xf] }
  0xe2   :  { %v11586_v60 = vld [vmem:[#allocation2 + $0x8c4] sm:$0xf]  ;;  %v9513_v63 = vor.u32 %v11786_v54, %v9510_v55  ;;  %3486 = vmatpush.bf16.msrb.mxu2 %v9257_v59  ;;  %v11495_v54 = vld [vmem:[#allocation2 + $0x5e4] sm:$0xf0] }
  0xe3   :  { %v8710_v61 = vld [vmem:[#allocation2 + $0x8e0] sm:$0xf0]  ;;  %v8588_v57 = vld [vmem:[#allocation2 + $0x7c8] sm:$0xf] }
  0xe4   :  { %v11650_v62 = vld [vmem:[#allocation2 + $0xac4] sm:$0xf]  ;;  %v8713_v6 = vor.u32 %v11586_v60, %v8710_v61  ;;  %3500 = vmatpush.bf16.msrb.mxu3 %v9513_v63  ;;  %v11559_v59 = vld [vmem:[#allocation2 + $0x7e4] sm:$0xf0]  ;;  %v7821_v61 = vor.u32 %v11367_v49, %v7820_v48  ;;  %v8333_v63 = vor.u32 %v11495_v54, %v8332_v53 }
  0xe5   :  { %v8966_v0 = vld [vmem:[#allocation2 + $0xae0] sm:$0xf0]  ;;  %v8204_v48 = vld [vmem:[#allocation2 + $0x4c8] sm:$0xf] }
  0xe6   :  { %v11714_v2 = vld [vmem:[#allocation2 + $0xcc4] sm:$0xf]  ;;  %v8969_v7 = vor.u32 %v11650_v62, %v8966_v0  ;;  %3459 = vmatpush.bf16.msrb.mxu0 %v8713_v6  ;;  %v8077_v62 = vor.u32 %v11431_v52, %v8076_v50  ;;  %v7788_v0 = vld [vmem:[#allocation2 + $0x188] sm:$0xf] }
  0xe7   :  { %v9222_v3 = vld [vmem:[#allocation2 + $0xce0] sm:$0xf0]  ;;  %v8300_v6 = vld [vmem:[#allocation2 + $0x588] sm:$0xf] }
  0xe8   :  { %v11778_v4 = vld [vmem:[#allocation2 + $0xec4] sm:$0xf]  ;;  %v9225_v8 = vor.u32 %v11714_v2, %v9222_v3  ;;  %3473 = vmatpush.bf16.msrb.mxu1 %v8969_v7  ;;  %v11359_v2 = vld [vmem:[#allocation2 + $0x1a4] sm:$0xf0] }
  0xe9   :  { %v9478_v5 = vld [vmem:[#allocation2 + $0xee0] sm:$0xf0]  ;;  %v8044_v3 = vld [vmem:[#allocation2 + $0x388] sm:$0xf] }
  0xea   :  { %v11578_v9 = vld [vmem:[#allocation2 + $0x884] sm:$0xf]  ;;  %v9481_v13 = vor.u32 %v11778_v4, %v9478_v5  ;;  %3487 = vmatpush.bf16.msrb.mxu2 %v9225_v8  ;;  %v8589_v4 = vor.u32 %v11559_v59, %v8588_v57  ;;  %v11423_v5 = vld [vmem:[#allocation2 + $0x3a4] sm:$0xf0] }
  0xeb   :  { %v8678_v11 = vld [vmem:[#allocation2 + $0x8a0] sm:$0xf0]  ;;  %v11487_v7 = vld [vmem:[#allocation2 + $0x5a4] sm:$0xf0] }
  0xec   :  { %v11642_v12 = vld [vmem:[#allocation2 + $0xa84] sm:$0xf]  ;;  %v8681_v20 = vor.u32 %v11578_v9, %v8678_v11  ;;  %3501 = vmatpush.bf16.msrb.mxu3 %v9481_v13  ;;  %v8556_v8 = vld [vmem:[#allocation2 + $0x788] sm:$0xf]  ;;  %v7789_v11 = vor.u32 %v11359_v2, %v7788_v0  ;;  %v8301_v13 = vor.u32 %v11487_v7, %v8300_v6 }
  0xed   :  { %v8934_v14 = vld [vmem:[#allocation2 + $0xaa0] sm:$0xf0]  ;;  %v11551_v9 = vld [vmem:[#allocation2 + $0x7a4] sm:$0xf0] }
  0xee   :  { %v11706_v15 = vld [vmem:[#allocation2 + $0xc84] sm:$0xf]  ;;  %v8937_v21 = vor.u32 %v11642_v12, %v8934_v14  ;;  %3460 = vmatpush.bf16.msrb.mxu0 %v8681_v20  ;;  %v8045_v12 = vor.u32 %v11423_v5, %v8044_v3  ;;  %v7756_v14 = vld [vmem:[#allocation2 + $0x148] sm:$0xf] }
  0xef   :  { %v9190_v16 = vld [vmem:[#allocation2 + $0xca0] sm:$0xf0]  ;;  %v8268_v20 = vld [vmem:[#allocation2 + $0x548] sm:$0xf] }
  0xf0   :  { %v11770_v18 = vld [vmem:[#allocation2 + $0xe84] sm:$0xf]  ;;  %v9193_v22 = vor.u32 %v11706_v15, %v9190_v16  ;;  %3474 = vmatpush.bf16.msrb.mxu1 %v8937_v21  ;;  %v11351_v15 = vld [vmem:[#allocation2 + $0x164] sm:$0xf0] }
  0xf1   :  { %v9446_v19 = vld [vmem:[#allocation2 + $0xea0] sm:$0xf0]  ;;  %v8012_v16 = vld [vmem:[#allocation2 + $0x348] sm:$0xf] }
  0xf2   :  { %v11570_v23 = vld [vmem:[#allocation2 + $0x844] sm:$0xf]  ;;  %v9449_v26 = vor.u32 %v11770_v18, %v9446_v19  ;;  %3488 = vmatpush.bf16.msrb.mxu2 %v9193_v22  ;;  %v8557_v18 = vor.u32 %v11551_v9, %v8556_v8  ;;  %v11415_v19 = vld [vmem:[#allocation2 + $0x364] sm:$0xf0] }
  0xf3   :  { %v8646_v24 = vld [vmem:[#allocation2 + $0x860] sm:$0xf0]  ;;  %v11479_v21 = vld [vmem:[#allocation2 + $0x564] sm:$0xf0] }
  0xf4   :  { %v11634_v25 = vld [vmem:[#allocation2 + $0xa44] sm:$0xf]  ;;  %v8649_v32 = vor.u32 %v11570_v23, %v8646_v24  ;;  %3502 = vmatpush.bf16.msrb.mxu3 %v9449_v26  ;;  %v8524_v22 = vld [vmem:[#allocation2 + $0x748] sm:$0xf]  ;;  %v7757_v24 = vor.u32 %v11351_v15, %v7756_v14  ;;  %v8269_v26 = vor.u32 %v11479_v21, %v8268_v20 }
  0xf5   :  { %v8902_v27 = vld [vmem:[#allocation2 + $0xa60] sm:$0xf0]  ;;  %v11543_v23 = vld [vmem:[#allocation2 + $0x764] sm:$0xf0] }
  0xf6   :  { %v11698_v28 = vld [vmem:[#allocation2 + $0xc44] sm:$0xf]  ;;  %v8905_v35 = vor.u32 %v11634_v25, %v8902_v27  ;;  %3461 = vmatpush.bf16.msrb.mxu0 %v8649_v32  ;;  %v8013_v25 = vor.u32 %v11415_v19, %v8012_v16  ;;  %v7724_v27 = vld [vmem:[#allocation2 + $0x108] sm:$0xf] }
  0xf7   :  { %v9158_v29 = vld [vmem:[#allocation2 + $0xc60] sm:$0xf0]  ;;  %v8236_v32 = vld [vmem:[#allocation2 + $0x508] sm:$0xf] }
  0xf8   :  { %v11762_v30 = vld [vmem:[#allocation2 + $0xe44] sm:$0xf]  ;;  %v9161_v36 = vor.u32 %v11698_v28, %v9158_v29  ;;  %3475 = vmatpush.bf16.msrb.mxu1 %v8905_v35  ;;  %v11343_v28 = vld [vmem:[#allocation2 + $0x124] sm:$0xf0] }
  0xf9   :  { %v9414_v31 = vld [vmem:[#allocation2 + $0xe60] sm:$0xf0]  ;;  %v7980_v29 = vld [vmem:[#allocation2 + $0x308] sm:$0xf] }
  0xfa   :  { %v11562_v33 = vld [vmem:[#allocation2 + $0x804] sm:$0xf]  ;;  %v9417_v41 = vor.u32 %v11762_v30, %v9414_v31  ;;  %3489 = vmatpush.bf16.msrb.mxu2 %v9161_v36  ;;  %v8525_v30 = vor.u32 %v11543_v23, %v8524_v22  ;;  %v11407_v31 = vld [vmem:[#allocation2 + $0x324] sm:$0xf0]  ;;  %v7725_v36 = vor.u32 %v11343_v28, %v7724_v27 }
  0xfb   :  { %v8614_v34 = vld [vmem:[#allocation2 + $0x820] sm:$0xf0]  ;;  %v11535_v35 = vld [vmem:[#allocation2 + $0x724] sm:$0xf0] }
  0xfc   :  { %v11626_v37 = vld [vmem:[#allocation2 + $0xa04] sm:$0xf]  ;;  %v8617_v51 = vor.u32 %v11562_v33, %v8614_v34  ;;  %3503 = vmatpush.bf16.msrb.mxu3 %v9417_v41  ;;  %v11471_v33 = vld [vmem:[#allocation2 + $0x524] sm:$0xf0] }
  0xfd   :  { %v8870_v38 = vld [vmem:[#allocation2 + $0xa20] sm:$0xf0]  ;;  %v8492_v34 = vld [vmem:[#allocation2 + $0x708] sm:$0xf] }
  0xfe   :  { %v11690_v40 = vld [vmem:[#allocation2 + $0xc04] sm:$0xf]  ;;  %v8873_v55 = vor.u32 %v11626_v37, %v8870_v38  ;;  %3462 = vmatpush.bf16.msrb.mxu0 %v8617_v51  ;;  %v7981_v37 = vor.u32 %v11407_v31, %v7980_v29  ;;  %v8237_v38 = vor.u32 %v11471_v33, %v8236_v32  ;;  %v11335_v41 = vld [vmem:[#allocation2 + $0xe4] sm:$0xf0] }
  0xff   :  { %v9126_v42 = vld [vmem:[#allocation2 + $0xc20] sm:$0xf0]  ;;  %v11463_v49 = vld [vmem:[#allocation2 + $0x4e4] sm:$0xf0] }
 0x100   :  { %v11754_v45 = vld [vmem:[#allocation2 + $0xe04] sm:$0xf]  ;;  %v9129_v56 = vor.u32 %v11690_v40, %v9126_v42  ;;  %3476 = vmatpush.bf16.msrb.mxu1 %v8873_v55  ;;  %v7692_v40 = vld [vmem:[#allocation2 + $0xc8] sm:$0xf]  ;;  %v8205_v54 = vor.u32 %v11463_v49, %v8204_v48 }
 0x101   :  { %v9382_v46 = vld [vmem:[#allocation2 + $0xe20] sm:$0xf0]  ;;  %3463 = vmatmul.bf16.vlgmr.msrb.gmra.mxu0 %v12603_v39  ;;  %v7948_v42 = vld [vmem:[#allocation2 + $0x2c8] sm:$0xf]  ;;  %v7693_v52 = vor.u32 %v11335_v41, %v7692_v40 }
 0x102   :  { %v9385_v60 = vor.u32 %v11754_v45, %v9382_v46  ;;  %3490 = vmatpush.bf16.msrb.mxu2 %v9129_v56  ;;  %3511 = vmatpush.bf16.msra.mxu0 %v7821_v61  ;;  %v8493_v45 = vor.u32 %v11535_v35, %v8492_v34  ;;  %v11399_v46 = vld [vmem:[#allocation2 + $0x2e4] sm:$0xf0] }
 0x103   :  { %3477 = vmatmul.bf16.vlgmr.msrb.gmra.mxu1 %v12607_v44  ;;  %v8460_v50 = vld [vmem:[#allocation2 + $0x6c8] sm:$0xf]  ;;  %v7949_v53 = vor.u32 %v11399_v46, %v7948_v42 }
 0x104   :  { %3504 = vmatpush.bf16.msrb.mxu3 %v9385_v60  ;;  %3525 = vmatpush.bf16.msra.mxu1 %v8077_v62  ;;  %v11527_v51 = vld [vmem:[#allocation2 + $0x6e4] sm:$0xf0] }
 0x105   :  { %3491 = vmatmul.bf16.vlgmr.msrb.gmra.mxu2 %v12605_v43  ;;  %v7660_v55 = vld [vmem:[#allocation2 + $0x88] sm:$0xf]  ;;  %v8461_v59 = vor.u32 %v11527_v51, %v8460_v50 }
 0x106   :  { %3539 = vmatpush.bf16.msra.mxu2 %v8333_v63  ;;  %3512 = vmatpush.bf16.msra.mxu0 %v7789_v11  ;;  %v11327_v56 = vld [vmem:[#allocation2 + $0xa4] sm:$0xf0] }
 0x107   :  { %3505 = vmatmul.bf16.vlgmr.msrb.gmra.mxu3 %v12609_v47  ;;  %v7916_v57 = vld [vmem:[#allocation2 + $0x288] sm:$0xf]  ;;  %v7661_v2 = vor.u32 %v11327_v56, %v7660_v55 }
 0x108   :  { %3553 = vmatpush.bf16.msra.mxu3 %v8589_v4  ;;  %3526 = vmatpush.bf16.msra.mxu1 %v8045_v12  ;;  %v11391_v60 = vld [vmem:[#allocation2 + $0x2a4] sm:$0xf0] }
 0x109   :  { %v8172_v61 = vld [vmem:[#allocation2 + $0x488] sm:$0xf]  ;;  %v7917_v3 = vor.u32 %v11391_v60, %v7916_v57 }
 0x10a   :  { %3540 = vmatpush.bf16.msra.mxu2 %v8301_v13  ;;  %3513 = vmatpush.bf16.msra.mxu0 %v7757_v24  ;;  %v11455_v62 = vld [vmem:[#allocation2 + $0x4a4] sm:$0xf0] }
 0x10b   :  { %v8428_v63 = vld [vmem:[#allocation2 + $0x688] sm:$0xf]  ;;  %v8173_v4 = vor.u32 %v11455_v62, %v8172_v61 }
 0x10c   :  { %3554 = vmatpush.bf16.msra.mxu3 %v8557_v18  ;;  %3527 = vmatpush.bf16.msra.mxu1 %v8013_v25  ;;  %v11519_v0 = vld [vmem:[#allocation2 + $0x6a4] sm:$0xf0] }
 0x10d   :  { %v7628_v5 = vld [vmem:[#allocation2 + $0x48] sm:$0xf]  ;;  %v8429_v8 = vor.u32 %v11519_v0, %v8428_v63  ;;  %v12623_v63 = vld [vmem:[#allocation4] sm:$0xff] }
 0x10e   :  { %3541 = vmatpush.bf16.msra.mxu2 %v8269_v26  ;;  %3514 = vmatpush.bf16.msra.mxu0 %v7725_v36  ;;  %v11319_v6 = vld [vmem:[#allocation2 + $0x64] sm:$0xf0] }
 0x10f   :  { %v7884_v7 = vld [vmem:[#allocation2 + $0x248] sm:$0xf]  ;;  %v7629_v15 = vor.u32 %v11319_v6, %v7628_v5 }
 0x110   :  { %3555 = vmatpush.bf16.msra.mxu3 %v8525_v30  ;;  %3528 = vmatpush.bf16.msra.mxu1 %v7981_v37  ;;  %v11383_v9 = vld [vmem:[#allocation2 + $0x264] sm:$0xf0] }
 0x111   :  { %v8140_v11 = vld [vmem:[#allocation2 + $0x448] sm:$0xf]  ;;  %v7885_v19 = vor.u32 %v11383_v9, %v7884_v7 }
 0x112   :  { %3542 = vmatpush.bf16.msra.mxu2 %v8237_v38  ;;  %3515 = vmatpush.bf16.msra.mxu0 %v7693_v52  ;;  %v11447_v12 = vld [vmem:[#allocation2 + $0x464] sm:$0xf0] }
 0x113   :  { %v8396_v13 = vld [vmem:[#allocation2 + $0x648] sm:$0xf]  ;;  %v8141_v20 = vor.u32 %v11447_v12, %v8140_v11 }
 0x114   :  { %3556 = vmatpush.bf16.msra.mxu3 %v8493_v45  ;;  %3529 = vmatpush.bf16.msra.mxu1 %v7949_v53  ;;  %v11511_v14 = vld [vmem:[#allocation2 + $0x664] sm:$0xf0] }
 0x115   :  { %v7596_v16 = vld [vmem:[#allocation2 + $0x8] sm:$0xf]  ;;  %v8397_v24 = vor.u32 %v11511_v14, %v8396_v13 }
 0x116   :  { %3543 = vmatpush.bf16.msra.mxu2 %v8205_v54  ;;  %3516 = vmatpush.bf16.msra.mxu0 %v7661_v2  ;;  %v11311_v18 = vld [vmem:[#allocation2 + $0x24] sm:$0xf0] }
 0x117   :  { %v7852_v21 = vld [vmem:[#allocation2 + $0x208] sm:$0xf]  ;;  %v7597_v31 = vor.u32 %v11311_v18, %v7596_v16 }
 0x118   :  { %3557 = vmatpush.bf16.msra.mxu3 %v8461_v59  ;;  %3530 = vmatpush.bf16.msra.mxu1 %v7917_v3  ;;  %v11375_v22 = vld [vmem:[#allocation2 + $0x224] sm:$0xf0] }
 0x119   :  { %v8108_v23 = vld [vmem:[#allocation2 + $0x408] sm:$0xf]  ;;  %v7853_v35 = vor.u32 %v11375_v22, %v7852_v21  ;;  %v3296_v22 = vpop.f32.mrf.mxu0 }
 0x11a   :  { %3544 = vmatpush.bf16.msra.mxu2 %v8173_v4  ;;  %v11439_v25 = vld [vmem:[#allocation2 + $0x424] sm:$0xf0]  ;;  %3517 = vmatpush.bf16.msra.mxu0 %v7629_v15 }
 0x11b   :  { %v8364_v26 = vld [vmem:[#allocation2 + $0x608] sm:$0xf]  ;;  %v8109_v36 = vor.u32 %v11439_v25, %v8108_v23 }
 0x11c   :  { %3558 = vmatpush.bf16.msra.mxu3 %v8429_v8  ;;  %v11503_v27 = vld [vmem:[#allocation2 + $0x624] sm:$0xf0]  ;;  %3531 = vmatpush.bf16.msra.mxu1 %v7885_v19  ;;  %v13044_v8 = vperm.slane %v12623_v63, 0 }
 0x11d   :  { %v8844_v28 = vld [vmem:[#allocation2 + $0x9c8] sm:$0xf]  ;;  %v8365_v40 = vor.u32 %v11503_v27, %v8364_v26 }
 0x11e   :  { %v11623_v29 = vld [vmem:[#allocation2 + $0x9e4] sm:$0xf0]  ;;  %3545 = vmatpush.bf16.msra.mxu2 %v8141_v20  ;;  %3518 = vmatpush.bf16.msra.mxu0 %v7597_v31 }
 0x11f   :  { %v9100_v30 = vld [vmem:[#allocation2 + $0xbc8] sm:$0xf]  ;;  %v8845_v41 = vor.u32 %v11623_v29, %v8844_v28 }
 0x120   :  { %v11687_v32 = vld [vmem:[#allocation2 + $0xbe4] sm:$0xf0]  ;;  %3559 = vmatpush.bf16.msra.mxu3 %v8397_v24  ;;  %3532 = vmatpush.bf16.msra.mxu1 %v7853_v35  ;;  %v3297_v24 = vadd.f32 %v3296_v22, %v13044_v8  ;;  %v9334_v8 = vld [vmem:[#allocation2 + $0xdb0] sm:$0xf0] }
 0x121   :  { %v9356_v33 = vld [vmem:[#allocation2 + $0xdc8] sm:$0xf]  ;;  %v9101_v42 = vor.u32 %v11687_v32, %v9100_v30  ;;  %3519 = vmatmul.bf16.vlgmr.msra.gmra.mxu0 %v12552_v58 }
 0x122   :  { %v11751_v34 = vld [vmem:[#allocation2 + $0xde4] sm:$0xf0]  ;;  %3546 = vmatpush.bf16.msra.mxu2 %v8109_v36  ;;  %3567 = vmatpush.bf16.msrb.mxu0 %v8845_v41  ;;  %v3310_v36 = vpop.f32.mrf.mxu1 }
 0x123   :  { %v9612_v37 = vld [vmem:[#allocation2 + $0xfc8] sm:$0xf]  ;;  %v9357_v45 = vor.u32 %v11751_v34, %v9356_v33  ;;  %3533 = vmatmul.bf16.vlgmr.msra.gmra.mxu1 %v12570_v10 }
 0x124   :  { %v11815_v38 = vld [vmem:[#allocation2 + $0xfe4] sm:$0xf0]  ;;  %3560 = vmatpush.bf16.msra.mxu3 %v8365_v40  ;;  %3581 = vmatpush.bf16.msrb.mxu1 %v9101_v42 }
 0x125   :  { %v8812_v46 = vld [vmem:[#allocation2 + $0x988] sm:$0xf]  ;;  %v9613_v50 = vor.u32 %v11815_v38, %v9612_v37  ;;  %3547 = vmatmul.bf16.vlgmr.msra.gmra.mxu2 %v12557_v1  ;;  %v3311_v38 = vadd.f32 %v3310_v36, %v3297_v24  ;;  %v11363_v24 = vld [vmem:[#allocation2 + $0x1cc] sm:$0xf] }
 0x126   :  { %v11615_v48 = vld [vmem:[#allocation2 + $0x9a4] sm:$0xf0]  ;;  %3595 = vmatpush.bf16.msrb.mxu2 %v9357_v45 }
 0x127   :  { %v9068_v49 = vld [vmem:[#allocation2 + $0xb88] sm:$0xf]  ;;  %v8813_v56 = vor.u32 %v11615_v48, %v8812_v46  ;;  %3561 = vmatmul.bf16.vlgmr.msra.gmra.mxu3 %v12575_v17 }
 0x128   :  { %v11679_v51 = vld [vmem:[#allocation2 + $0xba4] sm:$0xf0]  ;;  %3609 = vmatpush.bf16.msrb.mxu3 %v9613_v50 }
 0x129   :  { %v9324_v52 = vld [vmem:[#allocation2 + $0xd88] sm:$0xf]  ;;  %v9069_v59 = vor.u32 %v11679_v51, %v9068_v49  ;;  %3568 = vmatpush.bf16.msrb.mxu0 %v8813_v56 }
 0x12a   :  { %v11743_v53 = vld [vmem:[#allocation2 + $0xda4] sm:$0xf0] }
 0x12b   :  { %v9580_v54 = vld [vmem:[#allocation2 + $0xf88] sm:$0xf]  ;;  %v9325_v60 = vor.u32 %v11743_v53, %v9324_v52  ;;  %3582 = vmatpush.bf16.msrb.mxu1 %v9069_v59  ;;  %v3324_v52 = vpop.f32.mrf.mxu2 }
 0x12c   :  { %v11807_v55 = vld [vmem:[#allocation2 + $0xfa4] sm:$0xf0] }
 0x12d   :  { %v8780_v57 = vld [vmem:[#allocation2 + $0x948] sm:$0xf]  ;;  %v9581_v0 = vor.u32 %v11807_v55, %v9580_v54  ;;  %3596 = vmatpush.bf16.msrb.mxu2 %v9325_v60  ;;  %v3325_v55 = vadd.f32 %v3324_v52, %v3311_v38  ;;  %v8558_v52 = vld [vmem:[#allocation2 + $0x7a8] sm:$0xf0] }
 0x12e   :  { %v11607_v61 = vld [vmem:[#allocation2 + $0x964] sm:$0xf0] }
 0x12f   :  { %v9036_v62 = vld [vmem:[#allocation2 + $0xb48] sm:$0xf]  ;;  %v8781_v7 = vor.u32 %v11607_v61, %v8780_v57  ;;  %3610 = vmatpush.bf16.msrb.mxu3 %v9581_v0 }
 0x130   :  { %v11671_v2 = vld [vmem:[#allocation2 + $0xb64] sm:$0xf0] }
 0x131   :  { %v9292_v3 = vld [vmem:[#allocation2 + $0xd48] sm:$0xf]  ;;  %v9037_v9 = vor.u32 %v11671_v2, %v9036_v62  ;;  %3569 = vmatpush.bf16.msrb.mxu0 %v8781_v7 }
 0x132   :  { %v11735_v4 = vld [vmem:[#allocation2 + $0xd64] sm:$0xf0] }
 0x133   :  { %v9548_v5 = vld [vmem:[#allocation2 + $0xf48] sm:$0xf]  ;;  %v9293_v11 = vor.u32 %v11735_v4, %v9292_v3  ;;  %3583 = vmatpush.bf16.msrb.mxu1 %v9037_v9 }
 0x134   :  { %v11799_v6 = vld [vmem:[#allocation2 + $0xf64] sm:$0xf0] }
 0x135   :  { %v8748_v12 = vld [vmem:[#allocation2 + $0x908] sm:$0xf]  ;;  %v9549_v15 = vor.u32 %v11799_v6, %v9548_v5  ;;  %3597 = vmatpush.bf16.msrb.mxu2 %v9293_v11  ;;  %v3338_v5 = vpop.f32.mrf.mxu3 }
 0x136   :  { %v11599_v13 = vld [vmem:[#allocation2 + $0x924] sm:$0xf0]  ;;  %v12632_v9 = vadd.f32 %v3338_v5, %v3325_v55 }
 0x137   :  { %v9004_v14 = vld [vmem:[#allocation2 + $0xb08] sm:$0xf]  ;;  %v8749_v23 = vor.u32 %v11599_v13, %v8748_v12  ;;  %3611 = vmatpush.bf16.msrb.mxu3 %v9549_v15 }
 0x138   :  { %v11663_v16 = vld [vmem:[#allocation2 + $0xb24] sm:$0xf0] }
 0x139   :  { %v9260_v18 = vld [vmem:[#allocation2 + $0xd08] sm:$0xf]  ;;  %v9005_v25 = vor.u32 %v11663_v16, %v9004_v14  ;;  %3570 = vmatpush.bf16.msrb.mxu0 %v8749_v23 }
 0x13a   :  { %v11727_v19 = vld [vmem:[#allocation2 + $0xd24] sm:$0xf0] }
 0x13b   :  { %v9516_v20 = vld [vmem:[#allocation2 + $0xf08] sm:$0xf]  ;;  %v9261_v26 = vor.u32 %v11727_v19, %v9260_v18  ;;  %3584 = vmatpush.bf16.msrb.mxu1 %v9005_v25  ;;  %v7822_v25 = vld [vmem:[#allocation2 + $0x1e8] sm:$0xf0] }
 0x13c   :  { %v11791_v21 = vld [vmem:[#allocation2 + $0xf24] sm:$0xf0]  ;;  %v7825_v36 = vor.u32 %v11363_v24, %v7822_v25 }
 0x13d   :  { %v8716_v27 = vld [vmem:[#allocation2 + $0x8c8] sm:$0xf]  ;;  %v9517_v30 = vor.u32 %v11791_v21, %v9516_v20  ;;  %3598 = vmatpush.bf16.msrb.mxu2 %v9261_v26  ;;  %v11427_v26 = vld [vmem:[#allocation2 + $0x3cc] sm:$0xf] }
 0x13e   :  { %v11591_v28 = vld [vmem:[#allocation2 + $0x8e4] sm:$0xf0] }
 0x13f   :  { %v8972_v29 = vld [vmem:[#allocation2 + $0xac8] sm:$0xf]  ;;  %v8717_v37 = vor.u32 %v11591_v28, %v8716_v27  ;;  %3612 = vmatpush.bf16.msrb.mxu3 %v9517_v30  ;;  %v8078_v28 = vld [vmem:[#allocation2 + $0x3e8] sm:$0xf0] }
 0x140   :  { %v11655_v31 = vld [vmem:[#allocation2 + $0xae4] sm:$0xf0]  ;;  %v8334_v30 = vld [vmem:[#allocation2 + $0x5e8] sm:$0xf0] }
 0x141   :  { %v9228_v32 = vld [vmem:[#allocation2 + $0xcc8] sm:$0xf]  ;;  %v8973_v40 = vor.u32 %v11655_v31, %v8972_v29  ;;  %3571 = vmatpush.bf16.msrb.mxu0 %v8717_v37  ;;  %v11491_v29 = vld [vmem:[#allocation2 + $0x5cc] sm:$0xf]  ;;  %v8081_v37 = vor.u32 %v11427_v26, %v8078_v28 }
 0x142   :  { %v11719_v33 = vld [vmem:[#allocation2 + $0xce4] sm:$0xf0]  ;;  %v8337_v38 = vor.u32 %v11491_v29, %v8334_v30  ;;  %v11331_v29 = vld [vmem:[#allocation2 + $0xcc] sm:$0xf] }
 0x143   :  { %v9484_v34 = vld [vmem:[#allocation2 + $0xec8] sm:$0xf]  ;;  %v9229_v41 = vor.u32 %v11719_v33, %v9228_v32  ;;  %3585 = vmatpush.bf16.msrb.mxu1 %v8973_v40  ;;  %v11555_v33 = vld [vmem:[#allocation2 + $0x7cc] sm:$0xf]  ;;  %v12634_v40 = vpop.f32.mrf.mxu0 }
 0x144   :  { %v11783_v35 = vld [vmem:[#allocation2 + $0xee4] sm:$0xf0]  ;;  %v7694_v30 = vld [vmem:[#allocation2 + $0xe8] sm:$0xf0] }
 0x145   :  { %v8684_v42 = vld [vmem:[#allocation2 + $0x888] sm:$0xf]  ;;  %v9485_v48 = vor.u32 %v11783_v35, %v9484_v34  ;;  %3599 = vmatpush.bf16.msrb.mxu2 %v9229_v41  ;;  %v8590_v34 = vld [vmem:[#allocation2 + $0x7e8] sm:$0xf0] }
 0x146   :  { %v11583_v45 = vld [vmem:[#allocation2 + $0x8a4] sm:$0xf0]  ;;  %v11355_v41 = vld [vmem:[#allocation2 + $0x18c] sm:$0xf] }
 0x147   :  { %v8940_v46 = vld [vmem:[#allocation2 + $0xa88] sm:$0xf]  ;;  %v8685_v56 = vor.u32 %v11583_v45, %v8684_v42  ;;  %3613 = vmatpush.bf16.msrb.mxu3 %v9485_v48  ;;  %v7790_v42 = vld [vmem:[#allocation2 + $0x1a8] sm:$0xf0] }
 0x148   :  { %v11647_v49 = vld [vmem:[#allocation2 + $0xaa4] sm:$0xf0]  ;;  %v11419_v45 = vld [vmem:[#allocation2 + $0x38c] sm:$0xf] }
 0x149   :  { %v9196_v50 = vld [vmem:[#allocation2 + $0xc88] sm:$0xf]  ;;  %v8941_v57 = vor.u32 %v11647_v49, %v8940_v46  ;;  %3572 = vmatpush.bf16.msrb.mxu0 %v8685_v56  ;;  %v8593_v46 = vor.u32 %v11555_v33, %v8590_v34  ;;  %v8046_v48 = vld [vmem:[#allocation2 + $0x3a8] sm:$0xf0] }
 0x14a   :  { %v11711_v51 = vld [vmem:[#allocation2 + $0xca4] sm:$0xf0]  ;;  %v11483_v49 = vld [vmem:[#allocation2 + $0x58c] sm:$0xf]  ;;  %v8049_v55 = vor.u32 %v11419_v45, %v8046_v48 }
 0x14b   :  { %v9452_v53 = vld [vmem:[#allocation2 + $0xe88] sm:$0xf]  ;;  %v9197_v59 = vor.u32 %v11711_v51, %v9196_v50  ;;  %3586 = vmatpush.bf16.msrb.mxu1 %v8941_v57  ;;  %v8302_v50 = vld [vmem:[#allocation2 + $0x5a8] sm:$0xf0] }
 0x14c   :  { %v11775_v54 = vld [vmem:[#allocation2 + $0xea4] sm:$0xf0]  ;;  %v11547_v51 = vld [vmem:[#allocation2 + $0x78c] sm:$0xf]  ;;  %v8305_v56 = vor.u32 %v11483_v49, %v8302_v50 }
 0x14d   :  { %v8652_v60 = vld [vmem:[#allocation2 + $0x848] sm:$0xf]  ;;  %v9453_v0 = vor.u32 %v11775_v54, %v9452_v53  ;;  %3600 = vmatpush.bf16.msrb.mxu2 %v9197_v59  ;;  %v12636_v53 = vpop.f32.mrf.mxu1  ;;  %v7793_v54 = vor.u32 %v11355_v41, %v7790_v42  ;;  %v11347_v57 = vld [vmem:[#allocation2 + $0x14c] sm:$0xf]  ;;  %v7697_v41 = vor.u32 %v11331_v29, %v7694_v30 }
 0x14e   :  { %v11575_v61 = vld [vmem:[#allocation2 + $0x864] sm:$0xf0]  ;;  %v7758_v59 = vld [vmem:[#allocation2 + $0x168] sm:$0xf0] }
 0x14f   :  { %v8908_v62 = vld [vmem:[#allocation2 + $0xa48] sm:$0xf]  ;;  %v8653_v11 = vor.u32 %v11575_v61, %v8652_v60  ;;  %3614 = vmatpush.bf16.msrb.mxu3 %v9453_v0  ;;  %v11411_v60 = vld [vmem:[#allocation2 + $0x34c] sm:$0xf]  ;;  %v8561_v61 = vor.u32 %v11547_v51, %v8558_v52  ;;  %v7761_v5 = vor.u32 %v11347_v57, %v7758_v59 }
 0x150   :  { %v11639_v2 = vld [vmem:[#allocation2 + $0xa64] sm:$0xf0]  ;;  %v11475_v0 = vld [vmem:[#allocation2 + $0x54c] sm:$0xf] }
 0x151   :  { %v9164_v3 = vld [vmem:[#allocation2 + $0xc48] sm:$0xf]  ;;  %v8909_v14 = vor.u32 %v11639_v2, %v8908_v62  ;;  %3573 = vmatpush.bf16.msrb.mxu0 %v8653_v11  ;;  %v8014_v62 = vld [vmem:[#allocation2 + $0x368] sm:$0xf0] }
 0x152   :  { %v11703_v4 = vld [vmem:[#allocation2 + $0xc64] sm:$0xf0]  ;;  %v8270_v2 = vld [vmem:[#allocation2 + $0x568] sm:$0xf0] }
 0x153   :  { %v9420_v6 = vld [vmem:[#allocation2 + $0xe48] sm:$0xf]  ;;  %v9165_v15 = vor.u32 %v11703_v4, %v9164_v3  ;;  %3587 = vmatpush.bf16.msrb.mxu1 %v8909_v14  ;;  %v11539_v3 = vld [vmem:[#allocation2 + $0x74c] sm:$0xf]  ;;  %v8273_v11 = vor.u32 %v11475_v0, %v8270_v2 }
 0x154   :  { %v11767_v7 = vld [vmem:[#allocation2 + $0xe64] sm:$0xf0]  ;;  %v8526_v4 = vld [vmem:[#allocation2 + $0x768] sm:$0xf0] }
 0x155   :  { %v8620_v12 = vld [vmem:[#allocation2 + $0x808] sm:$0xf]  ;;  %v9421_v20 = vor.u32 %v11767_v7, %v9420_v6  ;;  %3601 = vmatpush.bf16.msrb.mxu2 %v9165_v15  ;;  %v12642_v6 = vpop.f32.mrf.mxu2  ;;  %v8017_v7 = vor.u32 %v11411_v60, %v8014_v62  ;;  %v11403_v14 = vld [vmem:[#allocation2 + $0x30c] sm:$0xf]  ;;  %v8529_v15 = vor.u32 %v11539_v3, %v8526_v4  ;;  %v3366_v28 = vpop.f32.mrf.mxu1 }
 0x156   :  { %v11567_v13 = vld [vmem:[#allocation2 + $0x824] sm:$0xf0]  ;;  %v7950_v34 = vld [vmem:[#allocation2 + $0x2e8] sm:$0xf0] }
 0x157   :  { %v8876_v16 = vld [vmem:[#allocation2 + $0xa08] sm:$0xf]  ;;  %v8621_v27 = vor.u32 %v11567_v13, %v8620_v12  ;;  %3615 = vmatpush.bf16.msrb.mxu3 %v9421_v20  ;;  %v11339_v12 = vld [vmem:[#allocation2 + $0x10c] sm:$0xf] }
 0x158   :  { %v11631_v18 = vld [vmem:[#allocation2 + $0xa24] sm:$0xf0]  ;;  %v7726_v13 = vld [vmem:[#allocation2 + $0x128] sm:$0xf0] }
 0x159   :  { %v9132_v19 = vld [vmem:[#allocation2 + $0xc08] sm:$0xf]  ;;  %v8877_v31 = vor.u32 %v11631_v18, %v8876_v16  ;;  %3574 = vmatpush.bf16.msrb.mxu0 %v8621_v27  ;;  %v12644_v16 = vpop.f32.mrf.mxu3  ;;  %v7982_v18 = vld [vmem:[#allocation2 + $0x328] sm:$0xf0]  ;;  %v7729_v25 = vor.u32 %v11339_v12, %v7726_v13 }
 0x15a   :  { %v11695_v21 = vld [vmem:[#allocation2 + $0xc24] sm:$0xf0]  ;;  %v8238_v20 = vld [vmem:[#allocation2 + $0x528] sm:$0xf0]  ;;  %v7985_v26 = vor.u32 %v11403_v14, %v7982_v18 }
 0x15b   :  { %v9388_v22 = vld [vmem:[#allocation2 + $0xe08] sm:$0xf]  ;;  %v9133_v32 = vor.u32 %v11695_v21, %v9132_v19  ;;  %3588 = vmatpush.bf16.msrb.mxu1 %v8877_v31  ;;  %v11467_v19 = vld [vmem:[#allocation2 + $0x50c] sm:$0xf]  ;;  %v3352_v21 = vpop.f32.mrf.mxu0 }
 0x15c   :  { %v11759_v23 = vld [vmem:[#allocation2 + $0xe24] sm:$0xf0]  ;;  %3575 = vmatmul.bf16.vlgmr.msrb.gmra.mxu0 %v12603_v39  ;;  %v3353_v24 = vadd.f32 %v3352_v21, %v12632_v9  ;;  %v8241_v27 = vor.u32 %v11467_v19, %v8238_v20  ;;  %v11395_v31 = vld [vmem:[#allocation2 + $0x2cc] sm:$0xf] }
 0x15d   :  { %v9389_v35 = vor.u32 %v11759_v23, %v9388_v22  ;;  %3602 = vmatpush.bf16.msrb.mxu2 %v9133_v32  ;;  %3623 = vmatpush.bf16.msra.mxu0 %v7825_v36  ;;  %v11531_v22 = vld [vmem:[#allocation2 + $0x70c] sm:$0xf]  ;;  %v7953_v9 = vor.u32 %v11395_v31, %v7950_v34  ;;  %v3380_v50 = vpop.f32.mrf.mxu2 }
 0x15e   :  { %3589 = vmatmul.bf16.vlgmr.msrb.gmra.mxu1 %v12607_v44  ;;  %v8494_v23 = vld [vmem:[#allocation2 + $0x728] sm:$0xf0]  ;;  %v3367_v33 = vadd.f32 %v3366_v28, %v3353_v24 }
 0x15f   :  { %3616 = vmatpush.bf16.msrb.mxu3 %v9389_v35  ;;  %3637 = vmatpush.bf16.msra.mxu1 %v8081_v37  ;;  %v8497_v32 = vor.u32 %v11531_v22, %v8494_v23  ;;  %v11459_v35 = vld [vmem:[#allocation2 + $0x4cc] sm:$0xf] }
 0x160   :  { %3603 = vmatmul.bf16.vlgmr.msrb.gmra.mxu2 %v12605_v43  ;;  %v8206_v36 = vld [vmem:[#allocation2 + $0x4e8] sm:$0xf0] }
 0x161   :  { %3651 = vmatpush.bf16.msra.mxu2 %v8337_v38  ;;  %3624 = vmatpush.bf16.msra.mxu0 %v7793_v54  ;;  %v11523_v37 = vld [vmem:[#allocation2 + $0x6cc] sm:$0xf]  ;;  %v8209_v42 = vor.u32 %v11459_v35, %v8206_v36  ;;  %v3394_v59 = vpop.f32.mrf.mxu3 }
 0x162   :  { %3617 = vmatmul.bf16.vlgmr.msrb.gmra.mxu3 %v12609_v47  ;;  %v8462_v38 = vld [vmem:[#allocation2 + $0x6e8] sm:$0xf0] }
 0x163   :  { %3665 = vmatpush.bf16.msra.mxu3 %v8593_v46  ;;  %3638 = vmatpush.bf16.msra.mxu1 %v8049_v55  ;;  %v11323_v45 = vld [vmem:[#allocation2 + $0x8c] sm:$0xf]  ;;  %v8465_v49 = vor.u32 %v11523_v37, %v8462_v38  ;;  %v3381_v55 = vadd.f32 %v3380_v50, %v3367_v33 }
 0x164   :  { %v7662_v46 = vld [vmem:[#allocation2 + $0xa8] sm:$0xf0] }
 0x165   :  { %3652 = vmatpush.bf16.msra.mxu2 %v8305_v56  ;;  %3625 = vmatpush.bf16.msra.mxu0 %v7761_v5  ;;  %v11387_v48 = vld [vmem:[#allocation2 + $0x28c] sm:$0xf]  ;;  %v7665_v60 = vor.u32 %v11323_v45, %v7662_v46 }
 0x166   :  { %v7918_v51 = vld [vmem:[#allocation2 + $0x2a8] sm:$0xf0] }
 0x167   :  { %3666 = vmatpush.bf16.msra.mxu3 %v8561_v61  ;;  %3639 = vmatpush.bf16.msra.mxu1 %v8017_v7  ;;  %v11451_v52 = vld [vmem:[#allocation2 + $0x48c] sm:$0xf]  ;;  %v12647_v61 = vadd.f32 %v3394_v59, %v3381_v55  ;;  %v7921_v62 = vor.u32 %v11387_v48, %v7918_v51 }
 0x168   :  { %v8174_v54 = vld [vmem:[#allocation2 + $0x4a8] sm:$0xf0] }
 0x169   :  { %3653 = vmatpush.bf16.msra.mxu2 %v8273_v11  ;;  %3626 = vmatpush.bf16.msra.mxu0 %v7729_v25  ;;  %v11515_v56 = vld [vmem:[#allocation2 + $0x68c] sm:$0xf]  ;;  %13046 = vst [vmem:[#allocation20_spill] sm:$0xff] %v12647_v61  ;;  %v8177_v0 = vor.u32 %v11451_v52, %v8174_v54  ;;  %v7806_v61 = vld [vmem:[#allocation2 + $0x1b8] sm:$0xf0] }
 0x16a   :  { %v8430_v57 = vld [vmem:[#allocation2 + $0x6a8] sm:$0xf0] }
 0x16b   :  { %3667 = vmatpush.bf16.msra.mxu3 %v8529_v15  ;;  %3640 = vmatpush.bf16.msra.mxu1 %v7985_v26  ;;  %v11315_v2 = vld [vmem:[#allocation2 + $0x4c] sm:$0xf]  ;;  %v8433_v5 = vor.u32 %v11515_v56, %v8430_v57  ;;  %v12649_v56 = vpop.f32.mrf.mxu0 }
 0x16c   :  { %v7630_v3 = vld [vmem:[#allocation2 + $0x68] sm:$0xf0] }
 0x16d   :  { %3654 = vmatpush.bf16.msra.mxu2 %v8241_v27  ;;  %3627 = vmatpush.bf16.msra.mxu0 %v7697_v41  ;;  %v11379_v4 = vld [vmem:[#allocation2 + $0x24c] sm:$0xf]  ;;  %v7633_v15 = vor.u32 %v11315_v2, %v7630_v3 }
 0x16e   :  { %v7886_v7 = vld [vmem:[#allocation2 + $0x268] sm:$0xf0] }
 0x16f   :  { %3668 = vmatpush.bf16.msra.mxu3 %v8497_v32  ;;  %3641 = vmatpush.bf16.msra.mxu1 %v7953_v9  ;;  %v11443_v11 = vld [vmem:[#allocation2 + $0x44c] sm:$0xf]  ;;  %v7889_v20 = vor.u32 %v11379_v4, %v7886_v7 }
 0x170   :  { %v8142_v12 = vld [vmem:[#allocation2 + $0x468] sm:$0xf0] }
 0x171   :  { %3655 = vmatpush.bf16.msra.mxu2 %v8209_v42  ;;  %v11507_v13 = vld [vmem:[#allocation2 + $0x64c] sm:$0xf]  ;;  %3628 = vmatpush.bf16.msra.mxu0 %v7665_v60  ;;  %v8145_v21 = vor.u32 %v11443_v11, %v8142_v12 }
 0x172   :  { %v8398_v14 = vld [vmem:[#allocation2 + $0x668] sm:$0xf0] }
 0x173   :  { %3669 = vmatpush.bf16.msra.mxu3 %v8465_v49  ;;  %v11307_v18 = vld [vmem:[#allocation2 + $0xc] sm:$0xf]  ;;  %3642 = vmatpush.bf16.msra.mxu1 %v7921_v62  ;;  %v8401_v25 = vor.u32 %v11507_v13, %v8398_v14  ;;  %v12651_v62 = vpop.f32.mrf.mxu1 }
 0x174   :  { %v7598_v19 = vld [vmem:[#allocation2 + $0x28] sm:$0xf0] }
 0x175   :  { %3656 = vmatpush.bf16.msra.mxu2 %v8177_v0  ;;  %v11371_v22 = vld [vmem:[#allocation2 + $0x20c] sm:$0xf]  ;;  %3629 = vmatpush.bf16.msra.mxu0 %v7633_v15  ;;  %v7601_v32 = vor.u32 %v11307_v18, %v7598_v19  ;;  %v13043_v19 = vperm.slane %v12623_v63, 1 }
 0x176   :  { %v7854_v23 = vld [vmem:[#allocation2 + $0x228] sm:$0xf0] }
 0x177   :  { %v11435_v24 = vld [vmem:[#allocation2 + $0x40c] sm:$0xf]  ;;  %3670 = vmatpush.bf16.msra.mxu3 %v8433_v5  ;;  %3643 = vmatpush.bf16.msra.mxu1 %v7889_v20  ;;  %v7857_v36 = vor.u32 %v11371_v22, %v7854_v23 }
 0x178   :  { %v8110_v26 = vld [vmem:[#allocation2 + $0x428] sm:$0xf0] }
 0x179   :  { %v11499_v27 = vld [vmem:[#allocation2 + $0x60c] sm:$0xf]  ;;  %3657 = vmatpush.bf16.msra.mxu2 %v8145_v21  ;;  %v8113_v37 = vor.u32 %v11435_v24, %v8110_v26  ;;  %3630 = vmatpush.bf16.msra.mxu0 %v7601_v32  ;;  %v3408_v32 = vpop.f32.mrf.mxu0 }
 0x17a   :  { %v8366_v28 = vld [vmem:[#allocation2 + $0x628] sm:$0xf0] }
 0x17b   :  { %v11619_v29 = vld [vmem:[#allocation2 + $0x9cc] sm:$0xf]  ;;  %3671 = vmatpush.bf16.msra.mxu3 %v8401_v25  ;;  %v8369_v9 = vor.u32 %v11499_v27, %v8366_v28  ;;  %3644 = vmatpush.bf16.msra.mxu1 %v7857_v36  ;;  %v12658_v25 = vpop.f32.mrf.mxu2 }
 0x17c   :  { %v8846_v30 = vld [vmem:[#allocation2 + $0x9e8] sm:$0xf0]  ;;  %3631 = vmatmul.bf16.vlgmr.msra.gmra.mxu0 %v12552_v58 }
 0x17d   :  { %v11683_v31 = vld [vmem:[#allocation2 + $0xbcc] sm:$0xf]  ;;  %v8849_v42 = vor.u32 %v11619_v29, %v8846_v30  ;;  %3658 = vmatpush.bf16.msra.mxu2 %v8113_v37 }
 0x17e   :  { %v9102_v33 = vld [vmem:[#allocation2 + $0xbe8] sm:$0xf0]  ;;  %3645 = vmatmul.bf16.vlgmr.msra.gmra.mxu1 %v12570_v10 }
 0x17f   :  { %v11747_v34 = vld [vmem:[#allocation2 + $0xdcc] sm:$0xf]  ;;  %v9105_v45 = vor.u32 %v11683_v31, %v9102_v33  ;;  %3672 = vmatpush.bf16.msra.mxu3 %v8369_v9  ;;  %3679 = vmatpush.bf16.msrb.mxu0 %v8849_v42  ;;  %v12660_v33 = vpop.f32.mrf.mxu3  ;;  %v3422_v42 = vpop.f32.mrf.mxu1 }
 0x180   :  { %v9358_v35 = vld [vmem:[#allocation2 + $0xde8] sm:$0xf0]  ;;  %3659 = vmatmul.bf16.vlgmr.msra.gmra.mxu2 %v12557_v1  ;;  %13047 = vst [vmem:[#allocation21_spill] sm:$0xff] %v12660_v33 }
 0x181   :  { %v11811_v38 = vld [vmem:[#allocation2 + $0xfcc] sm:$0xf]  ;;  %v9361_v46 = vor.u32 %v11747_v34, %v9358_v35  ;;  %3693 = vmatpush.bf16.msrb.mxu1 %v9105_v45  ;;  %v3409_v35 = vadd.f32 %v3408_v32, %v13043_v19  ;;  %v11676_v19 = vld [vmem:[#allocation2 + $0xb94] sm:$0xf] }
 0x182   :  { %v9614_v41 = vld [vmem:[#allocation2 + $0xfe8] sm:$0xf0]  ;;  %3673 = vmatmul.bf16.vlgmr.msra.gmra.mxu3 %v12575_v17 }
 0x183   :  { %v11611_v48 = vld [vmem:[#allocation2 + $0x98c] sm:$0xf]  ;;  %v9617_v51 = vor.u32 %v11811_v38, %v9614_v41  ;;  %3707 = vmatpush.bf16.msrb.mxu2 %v9361_v46 }
 0x184   :  { %v8814_v49 = vld [vmem:[#allocation2 + $0x9a8] sm:$0xf0] }
 0x185   :  { %v11675_v50 = vld [vmem:[#allocation2 + $0xb8c] sm:$0xf]  ;;  %v8817_v60 = vor.u32 %v11611_v48, %v8814_v49  ;;  %3721 = vmatpush.bf16.msrb.mxu3 %v9617_v51 }
 0x186   :  { %v9070_v52 = vld [vmem:[#allocation2 + $0xba8] sm:$0xf0] }
 0x187   :  { %v11739_v54 = vld [vmem:[#allocation2 + $0xd8c] sm:$0xf]  ;;  %v9073_v0 = vor.u32 %v11675_v50, %v9070_v52  ;;  %3680 = vmatpush.bf16.msrb.mxu0 %v8817_v60  ;;  %v3423_v50 = vadd.f32 %v3422_v42, %v3409_v35 }
 0x188   :  { %v9326_v55 = vld [vmem:[#allocation2 + $0xda8] sm:$0xf0] }
 0x189   :  { %v11803_v57 = vld [vmem:[#allocation2 + $0xf8c] sm:$0xf]  ;;  %v9329_v2 = vor.u32 %v11739_v54, %v9326_v55  ;;  %3694 = vmatpush.bf16.msrb.mxu1 %v9073_v0 }
 0x18a   :  { %v9582_v59 = vld [vmem:[#allocation2 + $0xfa8] sm:$0xf0] }
 0x18b   :  { %v11603_v3 = vld [vmem:[#allocation2 + $0x94c] sm:$0xf]  ;;  %v9585_v7 = vor.u32 %v11803_v57, %v9582_v59  ;;  %3708 = vmatpush.bf16.msrb.mxu2 %v9329_v2 }
 0x18c   :  { %v8782_v4 = vld [vmem:[#allocation2 + $0x968] sm:$0xf0] }
 0x18d   :  { %v11667_v5 = vld [vmem:[#allocation2 + $0xb4c] sm:$0xf]  ;;  %v8785_v18 = vor.u32 %v11603_v3, %v8782_v4  ;;  %3722 = vmatpush.bf16.msrb.mxu3 %v9585_v7  ;;  %v3436_v7 = vpop.f32.mrf.mxu2 }
 0x18e   :  { %v9038_v11 = vld [vmem:[#allocation2 + $0xb68] sm:$0xf0] }
 0x18f   :  { %v11731_v12 = vld [vmem:[#allocation2 + $0xd4c] sm:$0xf]  ;;  %v9041_v20 = vor.u32 %v11667_v5, %v9038_v11  ;;  %3681 = vmatpush.bf16.msrb.mxu0 %v8785_v18 }
 0x190   :  { %v9294_v13 = vld [vmem:[#allocation2 + $0xd68] sm:$0xf0] }
 0x191   :  { %v11795_v14 = vld [vmem:[#allocation2 + $0xf4c] sm:$0xf]  ;;  %v9297_v21 = vor.u32 %v11731_v12, %v9294_v13  ;;  %3695 = vmatpush.bf16.msrb.mxu1 %v9041_v20  ;;  %v3437_v13 = vadd.f32 %v3436_v7, %v3423_v50  ;;  %v11368_v50 = vld [vmem:[#allocation2 + $0x1ec] sm:$0xf0] }
 0x192   :  { %v9550_v15 = vld [vmem:[#allocation2 + $0xf68] sm:$0xf0] }
 0x193   :  { %v11595_v22 = vld [vmem:[#allocation2 + $0x90c] sm:$0xf]  ;;  %v9553_v26 = vor.u32 %v11795_v14, %v9550_v15  ;;  %3709 = vmatpush.bf16.msrb.mxu2 %v9297_v21  ;;  %v3450_v15 = vpop.f32.mrf.mxu3 }
 0x194   :  { %v8750_v23 = vld [vmem:[#allocation2 + $0x928] sm:$0xf0] }
 0x195   :  { %v11659_v24 = vld [vmem:[#allocation2 + $0xb0c] sm:$0xf]  ;;  %v8753_v34 = vor.u32 %v11595_v22, %v8750_v23  ;;  %3723 = vmatpush.bf16.msrb.mxu3 %v9553_v26 }
 0x196   :  { %v9006_v27 = vld [vmem:[#allocation2 + $0xb28] sm:$0xf0] }
 0x197   :  { %v11723_v28 = vld [vmem:[#allocation2 + $0xd0c] sm:$0xf]  ;;  %v9009_v36 = vor.u32 %v11659_v24, %v9006_v27  ;;  %3682 = vmatpush.bf16.msrb.mxu0 %v8753_v34  ;;  %v12664_v24 = vadd.f32 %v3450_v15, %v3437_v13  ;;  %v11360_v13 = vld [vmem:[#allocation2 + $0x1ac] sm:$0xf0] }
 0x198   :  { %v9262_v29 = vld [vmem:[#allocation2 + $0xd28] sm:$0xf0] }
 0x199   :  { %v11787_v30 = vld [vmem:[#allocation2 + $0xf0c] sm:$0xf]  ;;  %v9265_v37 = vor.u32 %v11723_v28, %v9262_v29  ;;  %3696 = vmatpush.bf16.msrb.mxu1 %v9009_v36 }
 0x19a   :  { %v9518_v31 = vld [vmem:[#allocation2 + $0xf28] sm:$0xf0] }
 0x19b   :  { %v11587_v38 = vld [vmem:[#allocation2 + $0x8cc] sm:$0xf]  ;;  %v9521_v45 = vor.u32 %v11787_v30, %v9518_v31  ;;  %3710 = vmatpush.bf16.msrb.mxu2 %v9265_v37 }
 0x19c   :  { %v8718_v41 = vld [vmem:[#allocation2 + $0x8e8] sm:$0xf0] }
 0x19d   :  { %v11651_v9 = vld [vmem:[#allocation2 + $0xacc] sm:$0xf]  ;;  %v8721_v54 = vor.u32 %v11587_v38, %v8718_v41  ;;  %3724 = vmatpush.bf16.msrb.mxu3 %v9521_v45 }
 0x19e   :  { %v8974_v46 = vld [vmem:[#allocation2 + $0xae8] sm:$0xf0] }
 0x19f   :  { %v11715_v48 = vld [vmem:[#allocation2 + $0xccc] sm:$0xf]  ;;  %v8977_v55 = vor.u32 %v11651_v9, %v8974_v46  ;;  %3683 = vmatpush.bf16.msrb.mxu0 %v8721_v54  ;;  %v11432_v54 = vld [vmem:[#allocation2 + $0x3ec] sm:$0xf0] }
 0x1a0   :  { %v9230_v49 = vld [vmem:[#allocation2 + $0xce8] sm:$0xf0] }
 0x1a1   :  { %v11779_v51 = vld [vmem:[#allocation2 + $0xecc] sm:$0xf]  ;;  %v9233_v57 = vor.u32 %v11715_v48, %v9230_v49  ;;  %3697 = vmatpush.bf16.msrb.mxu1 %v8977_v55  ;;  %v7828_v49 = vld [vmem:[#allocation2 + $0x1d0] sm:$0xf] }
 0x1a2   :  { %v9486_v52 = vld [vmem:[#allocation2 + $0xee8] sm:$0xf0]  ;;  %v8340_v55 = vld [vmem:[#allocation2 + $0x5d0] sm:$0xf] }
 0x1a3   :  { %v11579_v59 = vld [vmem:[#allocation2 + $0x88c] sm:$0xf]  ;;  %v9489_v2 = vor.u32 %v11779_v51, %v9486_v52  ;;  %3711 = vmatpush.bf16.msrb.mxu2 %v9233_v57  ;;  %v8084_v51 = vld [vmem:[#allocation2 + $0x3d0] sm:$0xf] }
 0x1a4   :  { %v8686_v60 = vld [vmem:[#allocation2 + $0x8a8] sm:$0xf0]  ;;  %v11496_v57 = vld [vmem:[#allocation2 + $0x5ec] sm:$0xf0] }
 0x1a5   :  { %v11643_v0 = vld [vmem:[#allocation2 + $0xa8c] sm:$0xf]  ;;  %v8689_v14 = vor.u32 %v11579_v59, %v8686_v60  ;;  %3725 = vmatpush.bf16.msrb.mxu3 %v9489_v2  ;;  %v11560_v2 = vld [vmem:[#allocation2 + $0x7ec] sm:$0xf0]  ;;  %v8341_v7 = vor.u32 %v11496_v57, %v8340_v55 }
 0x1a6   :  { %v8942_v3 = vld [vmem:[#allocation2 + $0xaa8] sm:$0xf0]  ;;  %v8244_v55 = vld [vmem:[#allocation2 + $0x510] sm:$0xf] }
 0x1a7   :  { %v11707_v4 = vld [vmem:[#allocation2 + $0xc8c] sm:$0xf]  ;;  %v8945_v18 = vor.u32 %v11643_v0, %v8942_v3  ;;  %3684 = vmatpush.bf16.msrb.mxu0 %v8689_v14  ;;  %v8596_v0 = vld [vmem:[#allocation2 + $0x7d0] sm:$0xf] }
 0x1a8   :  { %v9198_v5 = vld [vmem:[#allocation2 + $0xca8] sm:$0xf0]  ;;  %v8052_v14 = vld [vmem:[#allocation2 + $0x390] sm:$0xf]  ;;  %v8597_v15 = vor.u32 %v11560_v2, %v8596_v0 }
 0x1a9   :  { %v11771_v11 = vld [vmem:[#allocation2 + $0xe8c] sm:$0xf]  ;;  %v9201_v20 = vor.u32 %v11707_v4, %v9198_v5  ;;  %3698 = vmatpush.bf16.msrb.mxu1 %v8945_v18  ;;  %v7829_v4 = vor.u32 %v11368_v50, %v7828_v49  ;;  %v8085_v5 = vor.u32 %v11432_v54, %v8084_v51  ;;  %v11424_v18 = vld [vmem:[#allocation2 + $0x3ac] sm:$0xf0] }
 0x1aa   :  { %v9454_v12 = vld [vmem:[#allocation2 + $0xea8] sm:$0xf0]  ;;  %v11344_v49 = vld [vmem:[#allocation2 + $0x12c] sm:$0xf0] }
 0x1ab   :  { %v11571_v21 = vld [vmem:[#allocation2 + $0x84c] sm:$0xf]  ;;  %v9457_v26 = vor.u32 %v11771_v11, %v9454_v12  ;;  %3712 = vmatpush.bf16.msrb.mxu2 %v9201_v20  ;;  %v12666_v11 = vpop.f32.mrf.mxu0  ;;  %v7796_v12 = vld [vmem:[#allocation2 + $0x190] sm:$0xf] }
 0x1ac   :  { %v8654_v22 = vld [vmem:[#allocation2 + $0x868] sm:$0xf0]  ;;  %v8308_v20 = vld [vmem:[#allocation2 + $0x590] sm:$0xf] }
 0x1ad   :  { %v11635_v23 = vld [vmem:[#allocation2 + $0xa4c] sm:$0xf]  ;;  %v8657_v32 = vor.u32 %v11571_v21, %v8654_v22  ;;  %3726 = vmatpush.bf16.msrb.mxu3 %v9457_v26  ;;  %v11488_v21 = vld [vmem:[#allocation2 + $0x5ac] sm:$0xf0]  ;;  %v12668_v26 = vpop.f32.mrf.mxu1 }
 0x1ae   :  { %v8910_v27 = vld [vmem:[#allocation2 + $0xa68] sm:$0xf0]  ;;  %v8564_v22 = vld [vmem:[#allocation2 + $0x790] sm:$0xf] }
 0x1af   :  { %v11699_v28 = vld [vmem:[#allocation2 + $0xc4c] sm:$0xf]  ;;  %v8913_v36 = vor.u32 %v11635_v23, %v8910_v27  ;;  %3685 = vmatpush.bf16.msrb.mxu0 %v8657_v32  ;;  %v11552_v23 = vld [vmem:[#allocation2 + $0x7ac] sm:$0xf0]  ;;  %v7797_v27 = vor.u32 %v11360_v13, %v7796_v12 }
 0x1b0   :  { %v9166_v29 = vld [vmem:[#allocation2 + $0xc68] sm:$0xf0]  ;;  %v8020_v32 = vld [vmem:[#allocation2 + $0x350] sm:$0xf] }
 0x1b1   :  { %v11763_v30 = vld [vmem:[#allocation2 + $0xe4c] sm:$0xf]  ;;  %v9169_v37 = vor.u32 %v11699_v28, %v9166_v29  ;;  %3699 = vmatpush.bf16.msrb.mxu1 %v8913_v36  ;;  %v8053_v28 = vor.u32 %v11424_v18, %v8052_v14  ;;  %v8309_v29 = vor.u32 %v11488_v21, %v8308_v20  ;;  %v8276_v36 = vld [vmem:[#allocation2 + $0x550] sm:$0xf] }
 0x1b2   :  { %v9422_v31 = vld [vmem:[#allocation2 + $0xe68] sm:$0xf0]  ;;  %v7988_v50 = vld [vmem:[#allocation2 + $0x310] sm:$0xf] }
 0x1b3   :  { %v11563_v34 = vld [vmem:[#allocation2 + $0x80c] sm:$0xf]  ;;  %v9425_v42 = vor.u32 %v11763_v30, %v9422_v31  ;;  %3713 = vmatpush.bf16.msrb.mxu2 %v9169_v37  ;;  %v7764_v30 = vld [vmem:[#allocation2 + $0x150] sm:$0xf] }
 0x1b4   :  { %v8622_v35 = vld [vmem:[#allocation2 + $0x828] sm:$0xf0]  ;;  %v11352_v31 = vld [vmem:[#allocation2 + $0x16c] sm:$0xf0] }
 0x1b5   :  { %v11627_v38 = vld [vmem:[#allocation2 + $0xa0c] sm:$0xf]  ;;  %v8625_v52 = vor.u32 %v11563_v34, %v8622_v35  ;;  %3727 = vmatpush.bf16.msrb.mxu3 %v9425_v42  ;;  %v8565_v34 = vor.u32 %v11552_v23, %v8564_v22  ;;  %v11416_v35 = vld [vmem:[#allocation2 + $0x36c] sm:$0xf0]  ;;  %v12674_v42 = vpop.f32.mrf.mxu2 }
 0x1b6   :  { %v8878_v41 = vld [vmem:[#allocation2 + $0xa28] sm:$0xf0]  ;;  %v11480_v37 = vld [vmem:[#allocation2 + $0x56c] sm:$0xf0] }
 0x1b7   :  { %v11691_v9 = vld [vmem:[#allocation2 + $0xc0c] sm:$0xf]  ;;  %v8881_v59 = vor.u32 %v11627_v38, %v8878_v41  ;;  %3686 = vmatpush.bf16.msrb.mxu0 %v8625_v52  ;;  %v8532_v38 = vld [vmem:[#allocation2 + $0x750] sm:$0xf]  ;;  %v12676_v52 = vpop.f32.mrf.mxu3 }
 0x1b8   :  { %v9134_v45 = vld [vmem:[#allocation2 + $0xc28] sm:$0xf0]  ;;  %v11544_v41 = vld [vmem:[#allocation2 + $0x76c] sm:$0xf0] }
 0x1b9   :  { %v11755_v46 = vld [vmem:[#allocation2 + $0xe0c] sm:$0xf]  ;;  %v9137_v60 = vor.u32 %v11691_v9, %v9134_v45  ;;  %3700 = vmatpush.bf16.msrb.mxu1 %v8881_v59  ;;  %v7765_v9 = vor.u32 %v11352_v31, %v7764_v30  ;;  %v8021_v45 = vor.u32 %v11416_v35, %v8020_v32  ;;  %v8533_v51 = vor.u32 %v11544_v41, %v8532_v38  ;;  %v11408_v54 = vld [vmem:[#allocation2 + $0x32c] sm:$0xf0]  ;;  %v3464_v59 = vpop.f32.mrf.mxu0 }
 0x1ba   :  { %v9390_v48 = vld [vmem:[#allocation2 + $0xe28] sm:$0xf0]  ;;  %3687 = vmatmul.bf16.vlgmr.msrb.gmra.mxu0 %v12603_v39  ;;  %v11472_v57 = vld [vmem:[#allocation2 + $0x52c] sm:$0xf0]  ;;  %v3465_v2 = vadd.f32 %v3464_v59, %v12664_v24 }
 0x1bb   :  { %v9393_v3 = vor.u32 %v11755_v46, %v9390_v48  ;;  %3714 = vmatpush.bf16.msrb.mxu2 %v9137_v60  ;;  %3735 = vmatpush.bf16.msra.mxu0 %v7829_v4  ;;  %v8277_v46 = vor.u32 %v11480_v37, %v8276_v36  ;;  %v7732_v48 = vld [vmem:[#allocation2 + $0x110] sm:$0xf]  ;;  %v7989_v4 = vor.u32 %v11408_v54, %v7988_v50 }
 0x1bc   :  { %3701 = vmatmul.bf16.vlgmr.msrb.gmra.mxu1 %v12607_v44  ;;  %v8500_v60 = vld [vmem:[#allocation2 + $0x710] sm:$0xf] }
 0x1bd   :  { %3728 = vmatpush.bf16.msrb.mxu3 %v9393_v3  ;;  %3749 = vmatpush.bf16.msra.mxu1 %v8085_v5  ;;  %v11536_v0 = vld [vmem:[#allocation2 + $0x72c] sm:$0xf0]  ;;  %v7733_v3 = vor.u32 %v11344_v49, %v7732_v48  ;;  %v8245_v5 = vor.u32 %v11472_v57, %v8244_v55  ;;  %v3492_v35 = vpop.f32.mrf.mxu2 }
 0x1be   :  { %3715 = vmatmul.bf16.vlgmr.msrb.gmra.mxu2 %v12605_v43  ;;  %v7700_v12 = vld [vmem:[#allocation2 + $0xd0] sm:$0xf] }
 0x1bf   :  { %3763 = vmatpush.bf16.msra.mxu2 %v8341_v7  ;;  %3736 = vmatpush.bf16.msra.mxu0 %v7797_v27  ;;  %v3478_v7 = vpop.f32.mrf.mxu1  ;;  %v11336_v13 = vld [vmem:[#allocation2 + $0xec] sm:$0xf0] }
 0x1c0   :  { %3729 = vmatmul.bf16.vlgmr.msrb.gmra.mxu3 %v12609_v47  ;;  %v7956_v14 = vld [vmem:[#allocation2 + $0x2d0] sm:$0xf]  ;;  %v3479_v18 = vadd.f32 %v3478_v7, %v3465_v2 }
 0x1c1   :  { %3777 = vmatpush.bf16.msra.mxu3 %v8597_v15  ;;  %3750 = vmatpush.bf16.msra.mxu1 %v8053_v28  ;;  %v8501_v15 = vor.u32 %v11536_v0, %v8500_v60  ;;  %v11400_v20 = vld [vmem:[#allocation2 + $0x2ec] sm:$0xf0]  ;;  %v7701_v28 = vor.u32 %v11336_v13, %v7700_v12 }
 0x1c2   :  { %v8212_v21 = vld [vmem:[#allocation2 + $0x4d0] sm:$0xf]  ;;  %v7957_v24 = vor.u32 %v11400_v20, %v7956_v14  ;;  %v3493_v41 = vadd.f32 %v3492_v35, %v3479_v18 }
 0x1c3   :  { %3764 = vmatpush.bf16.msra.mxu2 %v8309_v29  ;;  %3737 = vmatpush.bf16.msra.mxu0 %v7765_v9  ;;  %v11464_v22 = vld [vmem:[#allocation2 + $0x4ec] sm:$0xf0] }
 0x1c4   :  { %v8468_v23 = vld [vmem:[#allocation2 + $0x6d0] sm:$0xf]  ;;  %v8213_v29 = vor.u32 %v11464_v22, %v8212_v21 }
 0x1c5   :  { %3778 = vmatpush.bf16.msra.mxu3 %v8565_v34  ;;  %3751 = vmatpush.bf16.msra.mxu1 %v8021_v45  ;;  %v11528_v27 = vld [vmem:[#allocation2 + $0x6ec] sm:$0xf0] }
 0x1c6   :  { %v7668_v30 = vld [vmem:[#allocation2 + $0x90] sm:$0xf]  ;;  %v8469_v34 = vor.u32 %v11528_v27, %v8468_v23 }
 0x1c7   :  { %3765 = vmatpush.bf16.msra.mxu2 %v8277_v46  ;;  %3738 = vmatpush.bf16.msra.mxu0 %v7733_v3  ;;  %v11328_v31 = vld [vmem:[#allocation2 + $0xac] sm:$0xf0]  ;;  %v3506_v46 = vpop.f32.mrf.mxu3 }
 0x1c8   :  { %v7924_v32 = vld [vmem:[#allocation2 + $0x290] sm:$0xf]  ;;  %v7669_v48 = vor.u32 %v11328_v31, %v7668_v30  ;;  %v12679_v49 = vadd.f32 %v3506_v46, %v3493_v41 }
 0x1c9   :  { %3779 = vmatpush.bf16.msra.mxu3 %v8533_v51  ;;  %3752 = vmatpush.bf16.msra.mxu1 %v7989_v4  ;;  %v11392_v36 = vld [vmem:[#allocation2 + $0x2ac] sm:$0xf0] }
 0x1ca   :  { %v8180_v37 = vld [vmem:[#allocation2 + $0x490] sm:$0xf]  ;;  %13048 = vst [vmem:[#allocation22_spill] sm:$0xff] %v12679_v49  ;;  %v7925_v50 = vor.u32 %v11392_v36, %v7924_v32  ;;  %v11357_v49 = vld [vmem:[#allocation2 + $0x19c] sm:$0xf] }
 0x1cb   :  { %3766 = vmatpush.bf16.msra.mxu2 %v8245_v5  ;;  %v11456_v38 = vld [vmem:[#allocation2 + $0x4ac] sm:$0xf0]  ;;  %3739 = vmatpush.bf16.msra.mxu0 %v7701_v28 }
 0x1cc   :  { %v8436_v9 = vld [vmem:[#allocation2 + $0x690] sm:$0xf]  ;;  %v8181_v51 = vor.u32 %v11456_v38, %v8180_v37 }
 0x1cd   :  { %3780 = vmatpush.bf16.msra.mxu3 %v8501_v15  ;;  %v11520_v45 = vld [vmem:[#allocation2 + $0x6ac] sm:$0xf0]  ;;  %3753 = vmatpush.bf16.msra.mxu1 %v7957_v24 }
 0x1ce   :  { %v7636_v54 = vld [vmem:[#allocation2 + $0x50] sm:$0xf]  ;;  %v8437_v59 = vor.u32 %v11520_v45, %v8436_v9 }
 0x1cf   :  { %3767 = vmatpush.bf16.msra.mxu2 %v8213_v29  ;;  %v11320_v55 = vld [vmem:[#allocation2 + $0x6c] sm:$0xf0]  ;;  %3740 = vmatpush.bf16.msra.mxu0 %v7669_v48 }
 0x1d0   :  { %v7892_v57 = vld [vmem:[#allocation2 + $0x250] sm:$0xf]  ;;  %v7637_v5 = vor.u32 %v11320_v55, %v7636_v54 }
 0x1d1   :  { %3781 = vmatpush.bf16.msra.mxu3 %v8469_v34  ;;  %v11384_v60 = vld [vmem:[#allocation2 + $0x26c] sm:$0xf0]  ;;  %3754 = vmatpush.bf16.msra.mxu1 %v7925_v50 }
 0x1d2   :  { %v8148_v0 = vld [vmem:[#allocation2 + $0x450] sm:$0xf]  ;;  %v7893_v13 = vor.u32 %v11384_v60, %v7892_v57  ;;  %v12681_v60 = vpop.f32.mrf.mxu0 }
 0x1d3   :  { %v11448_v2 = vld [vmem:[#allocation2 + $0x46c] sm:$0xf0]  ;;  %3768 = vmatpush.bf16.msra.mxu2 %v8181_v51  ;;  %3741 = vmatpush.bf16.msra.mxu0 %v7637_v5 }
 0x1d4   :  { %v8404_v3 = vld [vmem:[#allocation2 + $0x650] sm:$0xf]  ;;  %v8149_v14 = vor.u32 %v11448_v2, %v8148_v0 }
 0x1d5   :  { %v11512_v4 = vld [vmem:[#allocation2 + $0x66c] sm:$0xf0]  ;;  %3782 = vmatpush.bf16.msra.mxu3 %v8437_v59  ;;  %3755 = vmatpush.bf16.msra.mxu1 %v7893_v13 }
 0x1d6   :  { %v7604_v7 = vld [vmem:[#allocation2 + $0x10] sm:$0xf]  ;;  %v8405_v21 = vor.u32 %v11512_v4, %v8404_v3  ;;  %v12683_v4 = vpop.f32.mrf.mxu1 }
 0x1d7   :  { %v11312_v12 = vld [vmem:[#allocation2 + $0x2c] sm:$0xf0]  ;;  %3769 = vmatpush.bf16.msra.mxu2 %v8149_v14  ;;  %13049 = vst [vmem:[#allocation23_spill] sm:$0xff] %v12683_v4 }
 0x1d8   :  { %v7860_v15 = vld [vmem:[#allocation2 + $0x210] sm:$0xf]  ;;  %v7605_v30 = vor.u32 %v11312_v12, %v7604_v7 }
 0x1d9   :  { %v11376_v18 = vld [vmem:[#allocation2 + $0x22c] sm:$0xf0]  ;;  %3783 = vmatpush.bf16.msra.mxu3 %v8405_v21 }
 0x1da   :  { %v8116_v20 = vld [vmem:[#allocation2 + $0x410] sm:$0xf]  ;;  %v7861_v35 = vor.u32 %v11376_v18, %v7860_v15  ;;  %3742 = vmatpush.bf16.msra.mxu0 %v7605_v30 }
 0x1db   :  { %v11440_v22 = vld [vmem:[#allocation2 + $0x42c] sm:$0xf0] }
 0x1dc   :  { %v8372_v23 = vld [vmem:[#allocation2 + $0x610] sm:$0xf]  ;;  %v8117_v36 = vor.u32 %v11440_v22, %v8116_v20  ;;  %3756 = vmatpush.bf16.msra.mxu1 %v7861_v35  ;;  %v12692_v35 = vpop.f32.mrf.mxu2 }
 0x1dd   :  { %v11504_v27 = vld [vmem:[#allocation2 + $0x62c] sm:$0xf0]  ;;  %3743 = vmatmul.bf16.vlgmr.msra.gmra.mxu0 %v12552_v58  ;;  %13050 = vst [vmem:[#allocation24_spill] sm:$0xff] %v12692_v35 }
 0x1de   :  { %v8852_v28 = vld [vmem:[#allocation2 + $0x9d0] sm:$0xf]  ;;  %v8373_v41 = vor.u32 %v11504_v27, %v8372_v23  ;;  %3770 = vmatpush.bf16.msra.mxu2 %v8117_v36 }
 0x1df   :  { %v11624_v24 = vld [vmem:[#allocation2 + $0x9ec] sm:$0xf0]  ;;  %3757 = vmatmul.bf16.vlgmr.msra.gmra.mxu1 %v12570_v10 }
 0x1e0   :  { %v9108_v29 = vld [vmem:[#allocation2 + $0xbd0] sm:$0xf]  ;;  %v8853_v9 = vor.u32 %v11624_v24, %v8852_v28  ;;  %3784 = vmatpush.bf16.msra.mxu3 %v8373_v41  ;;  %v12689_v28 = vld [vmem:[#allocation4] sm:$0xff] }
 0x1e1   :  { %v11688_v31 = vld [vmem:[#allocation2 + $0xbec] sm:$0xf0]  ;;  %3771 = vmatmul.bf16.vlgmr.msra.gmra.mxu2 %v12557_v1  ;;  %v13042_v24 = vperm.slane %v12689_v28, 2 }
 0x1e2   :  { %v9364_v32 = vld [vmem:[#allocation2 + $0xdd0] sm:$0xf]  ;;  %v9109_v45 = vor.u32 %v11688_v31, %v9108_v29  ;;  %3791 = vmatpush.bf16.msrb.mxu0 %v8853_v9 }
 0x1e3   :  { %v11752_v34 = vld [vmem:[#allocation2 + $0xdec] sm:$0xf0]  ;;  %3785 = vmatmul.bf16.vlgmr.msra.gmra.mxu3 %v12575_v17 }
 0x1e4   :  { %v9620_v37 = vld [vmem:[#allocation2 + $0xfd0] sm:$0xf]  ;;  %v9365_v46 = vor.u32 %v11752_v34, %v9364_v32  ;;  %3805 = vmatpush.bf16.msrb.mxu1 %v9109_v45 }
 0x1e5   :  { %v11816_v38 = vld [vmem:[#allocation2 + $0xfec] sm:$0xf0] }
 0x1e6   :  { %v8820_v48 = vld [vmem:[#allocation2 + $0x990] sm:$0xf]  ;;  %v9621_v54 = vor.u32 %v11816_v38, %v9620_v37  ;;  %3819 = vmatpush.bf16.msrb.mxu2 %v9365_v46  ;;  %v3520_v46 = vpop.f32.mrf.mxu0 }
 0x1e7   :  { %v11616_v50 = vld [vmem:[#allocation2 + $0x9ac] sm:$0xf0] }
 0x1e8   :  { %v9076_v51 = vld [vmem:[#allocation2 + $0xb90] sm:$0xf]  ;;  %v8821_v3 = vor.u32 %v11616_v50, %v8820_v48  ;;  %3833 = vmatpush.bf16.msrb.mxu3 %v9621_v54  ;;  %v12694_v48 = vpop.f32.mrf.mxu3 }
 0x1e9   :  { %v11680_v55 = vld [vmem:[#allocation2 + $0xbac] sm:$0xf0]  ;;  %13051 = vst [vmem:[#allocation25_spill] sm:$0xff] %v12694_v48  ;;  %v8318_v48 = vld [vmem:[#allocation2 + $0x5b8] sm:$0xf0] }
 0x1ea   :  { %v9332_v57 = vld [vmem:[#allocation2 + $0xd90] sm:$0xf]  ;;  %v9077_v5 = vor.u32 %v11680_v55, %v9076_v51  ;;  %3792 = vmatpush.bf16.msrb.mxu0 %v8821_v3  ;;  %v3521_v51 = vadd.f32 %v3520_v46, %v13042_v24  ;;  %v8822_v24 = vld [vmem:[#allocation2 + $0x9b0] sm:$0xf0] }
 0x1eb   :  { %v11744_v59 = vld [vmem:[#allocation2 + $0xdac] sm:$0xf0] }
 0x1ec   :  { %v9588_v0 = vld [vmem:[#allocation2 + $0xf90] sm:$0xf]  ;;  %v9333_v7 = vor.u32 %v11744_v59, %v9332_v57  ;;  %3806 = vmatpush.bf16.msrb.mxu1 %v9077_v5 }
 0x1ed   :  { %v11808_v2 = vld [vmem:[#allocation2 + $0xfac] sm:$0xf0] }
 0x1ee   :  { %v8788_v12 = vld [vmem:[#allocation2 + $0x950] sm:$0xf]  ;;  %v9589_v15 = vor.u32 %v11808_v2, %v9588_v0  ;;  %3820 = vmatpush.bf16.msrb.mxu2 %v9333_v7  ;;  %v3534_v2 = vpop.f32.mrf.mxu1 }
 0x1ef   :  { %v11608_v13 = vld [vmem:[#allocation2 + $0x96c] sm:$0xf0] }
 0x1f0   :  { %v9044_v14 = vld [vmem:[#allocation2 + $0xb50] sm:$0xf]  ;;  %v8789_v27 = vor.u32 %v11608_v13, %v8788_v12  ;;  %3834 = vmatpush.bf16.msrb.mxu3 %v9589_v15  ;;  %v3535_v13 = vadd.f32 %v3534_v2, %v3521_v51 }
 0x1f1   :  { %v11672_v18 = vld [vmem:[#allocation2 + $0xb6c] sm:$0xf0] }
 0x1f2   :  { %v9300_v20 = vld [vmem:[#allocation2 + $0xd50] sm:$0xf]  ;;  %v9045_v29 = vor.u32 %v11672_v18, %v9044_v14  ;;  %3793 = vmatpush.bf16.msrb.mxu0 %v8789_v27 }
 0x1f3   :  { %v11736_v21 = vld [vmem:[#allocation2 + $0xd6c] sm:$0xf0] }
 0x1f4   :  { %v9556_v22 = vld [vmem:[#allocation2 + $0xf50] sm:$0xf]  ;;  %v9301_v30 = vor.u32 %v11736_v21, %v9300_v20  ;;  %3807 = vmatpush.bf16.msrb.mxu1 %v9045_v29 }
 0x1f5   :  { %v11800_v23 = vld [vmem:[#allocation2 + $0xf6c] sm:$0xf0] }
 0x1f6   :  { %v8756_v31 = vld [vmem:[#allocation2 + $0x910] sm:$0xf]  ;;  %v9557_v36 = vor.u32 %v11800_v23, %v9556_v22  ;;  %3821 = vmatpush.bf16.msrb.mxu2 %v9301_v30 }
 0x1f7   :  { %v11600_v32 = vld [vmem:[#allocation2 + $0x92c] sm:$0xf0] }
 0x1f8   :  { %v9012_v34 = vld [vmem:[#allocation2 + $0xb10] sm:$0xf]  ;;  %v8757_v50 = vor.u32 %v11600_v32, %v8756_v31  ;;  %3835 = vmatpush.bf16.msrb.mxu3 %v9557_v36 }
 0x1f9   :  { %v11664_v37 = vld [vmem:[#allocation2 + $0xb2c] sm:$0xf0] }
 0x1fa   :  { %v9268_v38 = vld [vmem:[#allocation2 + $0xd10] sm:$0xf]  ;;  %v9013_v54 = vor.u32 %v11664_v37, %v9012_v34  ;;  %3794 = vmatpush.bf16.msrb.mxu0 %v8757_v50  ;;  %v3548_v34 = vpop.f32.mrf.mxu2 }
 0x1fb   :  { %v11728_v41 = vld [vmem:[#allocation2 + $0xd2c] sm:$0xf0] }
 0x1fc   :  { %v9524_v9 = vld [vmem:[#allocation2 + $0xf10] sm:$0xf]  ;;  %v9269_v55 = vor.u32 %v11728_v41, %v9268_v38  ;;  %3808 = vmatpush.bf16.msrb.mxu1 %v9013_v54  ;;  %v3549_v38 = vadd.f32 %v3548_v34, %v3535_v13 }
 0x1fd   :  { %v11792_v45 = vld [vmem:[#allocation2 + $0xf2c] sm:$0xf0] }
 0x1fe   :  { %v8724_v57 = vld [vmem:[#allocation2 + $0x8d0] sm:$0xf]  ;;  %v9525_v3 = vor.u32 %v11792_v45, %v9524_v9  ;;  %3822 = vmatpush.bf16.msrb.mxu2 %v9269_v55  ;;  %v3562_v9 = vpop.f32.mrf.mxu3 }
 0x1ff   :  { %v11592_v59 = vld [vmem:[#allocation2 + $0x8ec] sm:$0xf0]  ;;  %v12698_v55 = vadd.f32 %v3562_v9, %v3549_v38  ;;  %v8342_v38 = vld [vmem:[#allocation2 + $0x5f0] sm:$0xf0] }
 0x200   :  { %v8980_v0 = vld [vmem:[#allocation2 + $0xad0] sm:$0xf]  ;;  %v8725_v18 = vor.u32 %v11592_v59, %v8724_v57  ;;  %3836 = vmatpush.bf16.msrb.mxu3 %v9525_v3 }
 0x201   :  { %v11656_v5 = vld [vmem:[#allocation2 + $0xaec] sm:$0xf0] }
 0x202   :  { %v9236_v7 = vld [vmem:[#allocation2 + $0xcd0] sm:$0xf]  ;;  %v8981_v20 = vor.u32 %v11656_v5, %v8980_v0  ;;  %3795 = vmatpush.bf16.msrb.mxu0 %v8725_v18 }
 0x203   :  { %v11720_v12 = vld [vmem:[#allocation2 + $0xcec] sm:$0xf0] }
 0x204   :  { %v9492_v14 = vld [vmem:[#allocation2 + $0xed0] sm:$0xf]  ;;  %v9237_v21 = vor.u32 %v11720_v12, %v9236_v7  ;;  %3809 = vmatpush.bf16.msrb.mxu1 %v8981_v20 }
 0x205   :  { %v11784_v15 = vld [vmem:[#allocation2 + $0xeec] sm:$0xf0] }
 0x206   :  { %v8692_v22 = vld [vmem:[#allocation2 + $0x890] sm:$0xf]  ;;  %v9493_v29 = vor.u32 %v11784_v15, %v9492_v14  ;;  %3823 = vmatpush.bf16.msrb.mxu2 %v9237_v21 }
 0x207   :  { %v11584_v23 = vld [vmem:[#allocation2 + $0x8ac] sm:$0xf0] }
 0x208   :  { %v8948_v27 = vld [vmem:[#allocation2 + $0xa90] sm:$0xf]  ;;  %v8693_v41 = vor.u32 %v11584_v23, %v8692_v22  ;;  %3837 = vmatpush.bf16.msrb.mxu3 %v9493_v29 }
 0x209   :  { %v11648_v30 = vld [vmem:[#allocation2 + $0xaac] sm:$0xf0] }
 0x20a   :  { %v9204_v31 = vld [vmem:[#allocation2 + $0xc90] sm:$0xf]  ;;  %v8949_v45 = vor.u32 %v11648_v30, %v8948_v27  ;;  %3796 = vmatpush.bf16.msrb.mxu0 %v8693_v41  ;;  %v11364_v30 = vld [vmem:[#allocation2 + $0x1d4] sm:$0xf] }
 0x20b   :  { %v11712_v32 = vld [vmem:[#allocation2 + $0xcac] sm:$0xf0] }
 0x20c   :  { %v9460_v36 = vld [vmem:[#allocation2 + $0xe90] sm:$0xf]  ;;  %v9205_v46 = vor.u32 %v11712_v32, %v9204_v31  ;;  %3810 = vmatpush.bf16.msrb.mxu1 %v8949_v45  ;;  %v7830_v31 = vld [vmem:[#allocation2 + $0x1f0] sm:$0xf0] }
 0x20d   :  { %v11776_v37 = vld [vmem:[#allocation2 + $0xeac] sm:$0xf0]  ;;  %v11428_v32 = vld [vmem:[#allocation2 + $0x3d4] sm:$0xf] }
 0x20e   :  { %v8660_v50 = vld [vmem:[#allocation2 + $0x850] sm:$0xf]  ;;  %v9461_v57 = vor.u32 %v11776_v37, %v9460_v36  ;;  %3824 = vmatpush.bf16.msrb.mxu2 %v9205_v46  ;;  %v8086_v36 = vld [vmem:[#allocation2 + $0x3f0] sm:$0xf0] }
 0x20f   :  { %v11576_v51 = vld [vmem:[#allocation2 + $0x86c] sm:$0xf0]  ;;  %v11492_v37 = vld [vmem:[#allocation2 + $0x5d4] sm:$0xf] }
 0x210   :  { %v8916_v54 = vld [vmem:[#allocation2 + $0xa50] sm:$0xf]  ;;  %v8661_v7 = vor.u32 %v11576_v51, %v8660_v50  ;;  %3838 = vmatpush.bf16.msrb.mxu3 %v9461_v57  ;;  %v11556_v45 = vld [vmem:[#allocation2 + $0x7d4] sm:$0xf]  ;;  %v7833_v51 = vor.u32 %v11364_v30, %v7830_v31  ;;  %v8345_v57 = vor.u32 %v11492_v37, %v8342_v38 }
 0x211   :  { %v11640_v59 = vld [vmem:[#allocation2 + $0xa6c] sm:$0xf0]  ;;  %v8598_v46 = vld [vmem:[#allocation2 + $0x7f0] sm:$0xf0] }
 0x212   :  { %v9172_v0 = vld [vmem:[#allocation2 + $0xc50] sm:$0xf]  ;;  %v8917_v14 = vor.u32 %v11640_v59, %v8916_v54  ;;  %3797 = vmatpush.bf16.msrb.mxu0 %v8661_v7  ;;  %v8089_v54 = vor.u32 %v11428_v32, %v8086_v36  ;;  %v12700_v59 = vpop.f32.mrf.mxu0  ;;  %v8054_v7 = vld [vmem:[#allocation2 + $0x3b0] sm:$0xf0] }
 0x213   :  { %v11704_v2 = vld [vmem:[#allocation2 + $0xc6c] sm:$0xf0]  ;;  %v8022_v31 = vld [vmem:[#allocation2 + $0x370] sm:$0xf0] }
 0x214   :  { %v9428_v3 = vld [vmem:[#allocation2 + $0xe50] sm:$0xf]  ;;  %v9173_v15 = vor.u32 %v11704_v2, %v9172_v0  ;;  %3811 = vmatpush.bf16.msrb.mxu1 %v8917_v14  ;;  %v11356_v0 = vld [vmem:[#allocation2 + $0x194] sm:$0xf] }
 0x215   :  { %v11768_v5 = vld [vmem:[#allocation2 + $0xe6c] sm:$0xf0]  ;;  %v7798_v2 = vld [vmem:[#allocation2 + $0x1b0] sm:$0xf0] }
 0x216   :  { %v8628_v12 = vld [vmem:[#allocation2 + $0x810] sm:$0xf]  ;;  %v9429_v22 = vor.u32 %v11768_v5, %v9428_v3  ;;  %3825 = vmatpush.bf16.msrb.mxu2 %v9173_v15  ;;  %v11420_v3 = vld [vmem:[#allocation2 + $0x394] sm:$0xf]  ;;  %v8601_v5 = vor.u32 %v11556_v45, %v8598_v46 }
 0x217   :  { %v11568_v13 = vld [vmem:[#allocation2 + $0x82c] sm:$0xf0]  ;;  %v11548_v14 = vld [vmem:[#allocation2 + $0x794] sm:$0xf] }
 0x218   :  { %v8884_v18 = vld [vmem:[#allocation2 + $0xa10] sm:$0xf]  ;;  %v8629_v34 = vor.u32 %v11568_v13, %v8628_v12  ;;  %3839 = vmatpush.bf16.msrb.mxu3 %v9429_v22  ;;  %v11484_v12 = vld [vmem:[#allocation2 + $0x594] sm:$0xf] }
 0x219   :  { %v11632_v20 = vld [vmem:[#allocation2 + $0xa2c] sm:$0xf0]  ;;  %v8310_v13 = vld [vmem:[#allocation2 + $0x5b0] sm:$0xf0] }
 0x21a   :  { %v9140_v21 = vld [vmem:[#allocation2 + $0xc10] sm:$0xf]  ;;  %v8885_v41 = vor.u32 %v11632_v20, %v8884_v18  ;;  %3798 = vmatpush.bf16.msrb.mxu0 %v8629_v34  ;;  %v8566_v15 = vld [vmem:[#allocation2 + $0x7b0] sm:$0xf0]  ;;  %v12702_v18 = vpop.f32.mrf.mxu1  ;;  %v7801_v20 = vor.u32 %v11356_v0, %v7798_v2  ;;  %v8313_v22 = vor.u32 %v11484_v12, %v8310_v13 }
 0x21b   :  { %v11696_v23 = vld [vmem:[#allocation2 + $0xc2c] sm:$0xf0]  ;;  %v8569_v30 = vor.u32 %v11548_v14, %v8566_v15  ;;  %v11476_v32 = vld [vmem:[#allocation2 + $0x554] sm:$0xf] }
 0x21c   :  { %v9396_v27 = vld [vmem:[#allocation2 + $0xe10] sm:$0xf]  ;;  %v9141_v9 = vor.u32 %v11696_v23, %v9140_v21  ;;  %3812 = vmatpush.bf16.msrb.mxu1 %v8885_v41  ;;  %v8057_v21 = vor.u32 %v11420_v3, %v8054_v7  ;;  %v11348_v23 = vld [vmem:[#allocation2 + $0x154] sm:$0xf]  ;;  %v12708_v41 = vpop.f32.mrf.mxu2 }
 0x21d   :  { %v11760_v29 = vld [vmem:[#allocation2 + $0xe2c] sm:$0xf0]  ;;  %3799 = vmatmul.bf16.vlgmr.msrb.gmra.mxu0 %v12603_v39  ;;  %v8278_v34 = vld [vmem:[#allocation2 + $0x570] sm:$0xf0] }
 0x21e   :  { %v9397_v50 = vor.u32 %v11760_v29, %v9396_v27  ;;  %3826 = vmatpush.bf16.msrb.mxu2 %v9141_v9  ;;  %3847 = vmatpush.bf16.msra.mxu0 %v7833_v51  ;;  %v7766_v27 = vld [vmem:[#allocation2 + $0x170] sm:$0xf0]  ;;  %v8281_v45 = vor.u32 %v11476_v32, %v8278_v34 }
 0x21f   :  { %v11412_v29 = vld [vmem:[#allocation2 + $0x354] sm:$0xf]  ;;  %3813 = vmatmul.bf16.vlgmr.msrb.gmra.mxu1 %v12607_v44  ;;  %v7769_v38 = vor.u32 %v11348_v23, %v7766_v27 }
 0x220   :  { %3840 = vmatpush.bf16.msrb.mxu3 %v9397_v50  ;;  %3861 = vmatpush.bf16.msra.mxu1 %v8089_v54  ;;  %v11540_v36 = vld [vmem:[#allocation2 + $0x754] sm:$0xf]  ;;  %v8025_v9 = vor.u32 %v11412_v29, %v8022_v31 }
 0x221   :  { %3827 = vmatmul.bf16.vlgmr.msrb.gmra.mxu2 %v12605_v43  ;;  %v8534_v37 = vld [vmem:[#allocation2 + $0x770] sm:$0xf0] }
 0x222   :  { %3875 = vmatpush.bf16.msra.mxu2 %v8345_v57  ;;  %3848 = vmatpush.bf16.msra.mxu0 %v7801_v20  ;;  %v11340_v46 = vld [vmem:[#allocation2 + $0x114] sm:$0xf]  ;;  %v8537_v54 = vor.u32 %v11540_v36, %v8534_v37  ;;  %v12710_v57 = vpop.f32.mrf.mxu3 }
 0x223   :  { %3841 = vmatmul.bf16.vlgmr.msrb.gmra.mxu3 %v12609_v47  ;;  %v7734_v50 = vld [vmem:[#allocation2 + $0x130] sm:$0xf0] }
 0x224   :  { %3889 = vmatpush.bf16.msra.mxu3 %v8601_v5  ;;  %3862 = vmatpush.bf16.msra.mxu1 %v8057_v21  ;;  %v11404_v51 = vld [vmem:[#allocation2 + $0x314] sm:$0xf]  ;;  %v3576_v5 = vpop.f32.mrf.mxu0  ;;  %v7737_v14 = vor.u32 %v11340_v46, %v7734_v50  ;;  %v3590_v21 = vpop.f32.mrf.mxu1 }
 0x225   :  { %v7990_v0 = vld [vmem:[#allocation2 + $0x330] sm:$0xf0]  ;;  %v3577_v13 = vadd.f32 %v3576_v5, %v12698_v55 }
 0x226   :  { %3876 = vmatpush.bf16.msra.mxu2 %v8313_v22  ;;  %v11468_v2 = vld [vmem:[#allocation2 + $0x514] sm:$0xf]  ;;  %3849 = vmatpush.bf16.msra.mxu0 %v7769_v38  ;;  %v7993_v15 = vor.u32 %v11404_v51, %v7990_v0  ;;  %v3604_v0 = vpop.f32.mrf.mxu2 }
 0x227   :  { %v8246_v3 = vld [vmem:[#allocation2 + $0x530] sm:$0xf0] }
 0x228   :  { %3890 = vmatpush.bf16.msra.mxu3 %v8569_v30  ;;  %v11532_v7 = vld [vmem:[#allocation2 + $0x714] sm:$0xf]  ;;  %3863 = vmatpush.bf16.msra.mxu1 %v8025_v9  ;;  %v8249_v20 = vor.u32 %v11468_v2, %v8246_v3  ;;  %v3591_v30 = vadd.f32 %v3590_v21, %v3577_v13 }
 0x229   :  { %v8502_v12 = vld [vmem:[#allocation2 + $0x730] sm:$0xf0] }
 0x22a   :  { %3877 = vmatpush.bf16.msra.mxu2 %v8281_v45  ;;  %v11332_v22 = vld [vmem:[#allocation2 + $0xd4] sm:$0xf]  ;;  %v8505_v29 = vor.u32 %v11532_v7, %v8502_v12  ;;  %3850 = vmatpush.bf16.msra.mxu0 %v7737_v14  ;;  %v3605_v5 = vadd.f32 %v3604_v0, %v3591_v30  ;;  %v3618_v13 = vpop.f32.mrf.mxu3 }
 0x22b   :  { %v7702_v23 = vld [vmem:[#allocation2 + $0xf0] sm:$0xf0] }
 0x22c   :  { %v11396_v27 = vld [vmem:[#allocation2 + $0x2d4] sm:$0xf]  ;;  %3891 = vmatpush.bf16.msra.mxu3 %v8537_v54  ;;  %v7705_v38 = vor.u32 %v11332_v22, %v7702_v23  ;;  %3864 = vmatpush.bf16.msra.mxu1 %v7993_v15  ;;  %v12713_v15 = vadd.f32 %v3618_v13, %v3605_v5 }
 0x22d   :  { %v7958_v31 = vld [vmem:[#allocation2 + $0x2f0] sm:$0xf0] }
 0x22e   :  { %v11460_v32 = vld [vmem:[#allocation2 + $0x4d4] sm:$0xf]  ;;  %3878 = vmatpush.bf16.msra.mxu2 %v8249_v20  ;;  %v7961_v55 = vor.u32 %v11396_v27, %v7958_v31  ;;  %3851 = vmatpush.bf16.msra.mxu0 %v7705_v38  ;;  %13052 = vst [vmem:[#allocation26_spill] sm:$0xff] %v12713_v15 }
 0x22f   :  { %v8214_v34 = vld [vmem:[#allocation2 + $0x4f0] sm:$0xf0] }
 0x230   :  { %v11524_v36 = vld [vmem:[#allocation2 + $0x6d4] sm:$0xf]  ;;  %v8217_v9 = vor.u32 %v11460_v32, %v8214_v34  ;;  %3892 = vmatpush.bf16.msra.mxu3 %v8505_v29  ;;  %3865 = vmatpush.bf16.msra.mxu1 %v7961_v55 }
 0x231   :  { %v8470_v37 = vld [vmem:[#allocation2 + $0x6f0] sm:$0xf0] }
 0x232   :  { %v11324_v45 = vld [vmem:[#allocation2 + $0x94] sm:$0xf]  ;;  %v8473_v51 = vor.u32 %v11524_v36, %v8470_v37  ;;  %3879 = vmatpush.bf16.msra.mxu2 %v8217_v9 }
 0x233   :  { %v7670_v46 = vld [vmem:[#allocation2 + $0xb0] sm:$0xf0] }
 0x234   :  { %v11388_v50 = vld [vmem:[#allocation2 + $0x294] sm:$0xf]  ;;  %v7673_v14 = vor.u32 %v11324_v45, %v7670_v46  ;;  %3893 = vmatpush.bf16.msra.mxu3 %v8473_v51 }
 0x235   :  { %v7926_v54 = vld [vmem:[#allocation2 + $0x2b0] sm:$0xf0] }
 0x236   :  { %v11452_v2 = vld [vmem:[#allocation2 + $0x494] sm:$0xf]  ;;  %v7929_v20 = vor.u32 %v11388_v50, %v7926_v54  ;;  %3852 = vmatpush.bf16.msra.mxu0 %v7673_v14 }
 0x237   :  { %v8182_v3 = vld [vmem:[#allocation2 + $0x4b0] sm:$0xf0] }
 0x238   :  { %v11516_v7 = vld [vmem:[#allocation2 + $0x694] sm:$0xf]  ;;  %v8185_v21 = vor.u32 %v11452_v2, %v8182_v3  ;;  %3866 = vmatpush.bf16.msra.mxu1 %v7929_v20 }
 0x239   :  { %v8438_v12 = vld [vmem:[#allocation2 + $0x6b0] sm:$0xf0] }
 0x23a   :  { %v11316_v22 = vld [vmem:[#allocation2 + $0x54] sm:$0xf]  ;;  %v8441_v29 = vor.u32 %v11516_v7, %v8438_v12  ;;  %3880 = vmatpush.bf16.msra.mxu2 %v8185_v21 }
 0x23b   :  { %v7638_v23 = vld [vmem:[#allocation2 + $0x70] sm:$0xf0] }
 0x23c   :  { %v11380_v27 = vld [vmem:[#allocation2 + $0x254] sm:$0xf]  ;;  %v7641_v37 = vor.u32 %v11316_v22, %v7638_v23  ;;  %3894 = vmatpush.bf16.msra.mxu3 %v8441_v29 }
 0x23d   :  { %v7894_v31 = vld [vmem:[#allocation2 + $0x270] sm:$0xf0] }
 0x23e   :  { %v11444_v32 = vld [vmem:[#allocation2 + $0x454] sm:$0xf]  ;;  %v7897_v55 = vor.u32 %v11380_v27, %v7894_v31  ;;  %3853 = vmatpush.bf16.msra.mxu0 %v7641_v37 }
 0x23f   :  { %v8150_v34 = vld [vmem:[#allocation2 + $0x470] sm:$0xf0] }
 0x240   :  { %v11508_v30 = vld [vmem:[#allocation2 + $0x654] sm:$0xf]  ;;  %v8153_v9 = vor.u32 %v11444_v32, %v8150_v34  ;;  %3867 = vmatpush.bf16.msra.mxu1 %v7897_v55 }
 0x241   :  { %v8406_v36 = vld [vmem:[#allocation2 + $0x670] sm:$0xf0] }
 0x242   :  { %v11308_v38 = vld [vmem:[#allocation2 + $0x14] sm:$0xf]  ;;  %v8409_v54 = vor.u32 %v11508_v30, %v8406_v36  ;;  %3881 = vmatpush.bf16.msra.mxu2 %v8153_v9 }
 0x243   :  { %v7606_v45 = vld [vmem:[#allocation2 + $0x30] sm:$0xf0] }
 0x244   :  { %v11372_v46 = vld [vmem:[#allocation2 + $0x214] sm:$0xf]  ;;  %v7609_v13 = vor.u32 %v11308_v38, %v7606_v45  ;;  %3895 = vmatpush.bf16.msra.mxu3 %v8409_v54 }
 0x245   :  { %v7862_v50 = vld [vmem:[#allocation2 + $0x230] sm:$0xf0] }
 0x246   :  { %v11436_v0 = vld [vmem:[#allocation2 + $0x414] sm:$0xf]  ;;  %v7865_v20 = vor.u32 %v11372_v46, %v7862_v50  ;;  %3854 = vmatpush.bf16.msra.mxu0 %v7609_v13 }
 0x247   :  { %v8118_v51 = vld [vmem:[#allocation2 + $0x430] sm:$0xf0] }
 0x248   :  { %v11500_v2 = vld [vmem:[#allocation2 + $0x614] sm:$0xf]  ;;  %v8121_v21 = vor.u32 %v11436_v0, %v8118_v51  ;;  %3868 = vmatpush.bf16.msra.mxu1 %v7865_v20 }
 0x249   :  { %v8374_v3 = vld [vmem:[#allocation2 + $0x630] sm:$0xf0]  ;;  %3855 = vmatmul.bf16.vlgmr.msra.gmra.mxu0 %v12552_v58 }
 0x24a   :  { %v11620_v5 = vld [vmem:[#allocation2 + $0x9d4] sm:$0xf]  ;;  %v8377_v29 = vor.u32 %v11500_v2, %v8374_v3  ;;  %3882 = vmatpush.bf16.msra.mxu2 %v8121_v21 }
 0x24b   :  { %v8854_v7 = vld [vmem:[#allocation2 + $0x9f0] sm:$0xf0]  ;;  %3869 = vmatmul.bf16.vlgmr.msra.gmra.mxu1 %v12570_v10 }
 0x24c   :  { %v11684_v12 = vld [vmem:[#allocation2 + $0xbd4] sm:$0xf]  ;;  %v8857_v32 = vor.u32 %v11620_v5, %v8854_v7  ;;  %3896 = vmatpush.bf16.msra.mxu3 %v8377_v29 }
 0x24d   :  { %v9110_v14 = vld [vmem:[#allocation2 + $0xbf0] sm:$0xf0]  ;;  %3883 = vmatmul.bf16.vlgmr.msra.gmra.mxu2 %v12557_v1 }
 0x24e   :  { %v11748_v22 = vld [vmem:[#allocation2 + $0xdd4] sm:$0xf]  ;;  %v9113_v34 = vor.u32 %v11684_v12, %v9110_v14  ;;  %3903 = vmatpush.bf16.msrb.mxu0 %v8857_v32 }
 0x24f   :  { %v9366_v23 = vld [vmem:[#allocation2 + $0xdf0] sm:$0xf0]  ;;  %3897 = vmatmul.bf16.vlgmr.msra.gmra.mxu3 %v12575_v17 }
 0x250   :  { %v11812_v27 = vld [vmem:[#allocation2 + $0xfd4] sm:$0xf]  ;;  %v9369_v30 = vor.u32 %v11748_v22, %v9366_v23  ;;  %3917 = vmatpush.bf16.msrb.mxu1 %v9113_v34 }
 0x251   :  { %v9622_v31 = vld [vmem:[#allocation2 + $0xff0] sm:$0xf0] }
 0x252   :  { %v11612_v36 = vld [vmem:[#allocation2 + $0x994] sm:$0xf]  ;;  %v9625_v37 = vor.u32 %v11812_v27, %v9622_v31  ;;  %3931 = vmatpush.bf16.msrb.mxu2 %v9369_v30 }
 0x253   :  { %v9078_v38 = vld [vmem:[#allocation2 + $0xbb0] sm:$0xf0]  ;;  %v8825_v46 = vor.u32 %v11612_v36, %v8822_v24 }
 0x254   :  { %v11740_v45 = vld [vmem:[#allocation2 + $0xd94] sm:$0xf]  ;;  %v9081_v50 = vor.u32 %v11676_v19, %v9078_v38  ;;  %3945 = vmatpush.bf16.msrb.mxu3 %v9625_v37 }
 0x255   :  { %v11804_v55 = vld [vmem:[#allocation2 + $0xf94] sm:$0xf]  ;;  %v9337_v0 = vor.u32 %v11740_v45, %v9334_v8  ;;  %3904 = vmatpush.bf16.msrb.mxu0 %v8825_v46 }
 0x256   :  { %v9590_v9 = vld [vmem:[#allocation2 + $0xfb0] sm:$0xf0]  ;;  %3918 = vmatpush.bf16.msrb.mxu1 %v9081_v50 }
 0x257   :  { %v11604_v54 = vld [vmem:[#allocation2 + $0x954] sm:$0xf]  ;;  %v9593_v3 = vor.u32 %v11804_v55, %v9590_v9  ;;  %3932 = vmatpush.bf16.msrb.mxu2 %v9337_v0 }
 0x258   :  { %v8790_v51 = vld [vmem:[#allocation2 + $0x970] sm:$0xf0] }
 0x259   :  { %v11668_v2 = vld [vmem:[#allocation2 + $0xb54] sm:$0xf]  ;;  %v8793_v24 = vor.u32 %v11604_v54, %v8790_v51  ;;  %3946 = vmatpush.bf16.msrb.mxu3 %v9593_v3 }
 0x25a   :  { %v9046_v5 = vld [vmem:[#allocation2 + $0xb70] sm:$0xf0] }
 0x25b   :  { %v11732_v7 = vld [vmem:[#allocation2 + $0xd54] sm:$0xf]  ;;  %v9049_v8 = vor.u32 %v11668_v2, %v9046_v5  ;;  %3905 = vmatpush.bf16.msrb.mxu0 %v8793_v24 }
 0x25c   :  { %v9302_v12 = vld [vmem:[#allocation2 + $0xd70] sm:$0xf0] }
 0x25d   :  { %v11796_v13 = vld [vmem:[#allocation2 + $0xf54] sm:$0xf]  ;;  %v9305_v19 = vor.u32 %v11732_v7, %v9302_v12  ;;  %3919 = vmatpush.bf16.msrb.mxu1 %v9049_v8 }
 0x25e   :  { %v9558_v14 = vld [vmem:[#allocation2 + $0xf70] sm:$0xf0] }
 0x25f   :  { %v11596_v22 = vld [vmem:[#allocation2 + $0x914] sm:$0xf]  ;;  %v9561_v21 = vor.u32 %v11796_v13, %v9558_v14  ;;  %3933 = vmatpush.bf16.msrb.mxu2 %v9305_v19 }
 0x260   :  { %v8758_v23 = vld [vmem:[#allocation2 + $0x930] sm:$0xf0] }
 0x261   :  { %v11660_v20 = vld [vmem:[#allocation2 + $0xb14] sm:$0xf]  ;;  %v8761_v30 = vor.u32 %v11596_v22, %v8758_v23  ;;  %3947 = vmatpush.bf16.msrb.mxu3 %v9561_v21 }
 0x262   :  { %v9014_v27 = vld [vmem:[#allocation2 + $0xb30] sm:$0xf0] }
 0x263   :  { %v11724_v31 = vld [vmem:[#allocation2 + $0xd14] sm:$0xf]  ;;  %v9017_v36 = vor.u32 %v11660_v20, %v9014_v27  ;;  %3906 = vmatpush.bf16.msrb.mxu0 %v8761_v30 }
 0x264   :  { %v9270_v29 = vld [vmem:[#allocation2 + $0xd30] sm:$0xf0] }
 0x265   :  { %v11788_v32 = vld [vmem:[#allocation2 + $0xf14] sm:$0xf]  ;;  %v9273_v37 = vor.u32 %v11724_v31, %v9270_v29  ;;  %3920 = vmatpush.bf16.msrb.mxu1 %v9017_v36 }
 0x266   :  { %v9526_v34 = vld [vmem:[#allocation2 + $0xf30] sm:$0xf0] }
 0x267   :  { %v11588_v38 = vld [vmem:[#allocation2 + $0x8d4] sm:$0xf]  ;;  %v9529_v9 = vor.u32 %v11788_v32, %v9526_v34  ;;  %3934 = vmatpush.bf16.msrb.mxu2 %v9273_v37 }
 0x268   :  { %v8726_v45 = vld [vmem:[#allocation2 + $0x8f0] sm:$0xf0] }
 0x269   :  { %v11652_v55 = vld [vmem:[#allocation2 + $0xad4] sm:$0xf]  ;;  %v8729_v2 = vor.u32 %v11588_v38, %v8726_v45  ;;  %3948 = vmatpush.bf16.msrb.mxu3 %v9529_v9 }
 0x26a   :  { %v8982_v46 = vld [vmem:[#allocation2 + $0xaf0] sm:$0xf0] }
 0x26b   :  { %v11716_v50 = vld [vmem:[#allocation2 + $0xcd4] sm:$0xf]  ;;  %v8985_v3 = vor.u32 %v11652_v55, %v8982_v46  ;;  %3907 = vmatpush.bf16.msrb.mxu0 %v8729_v2 }
 0x26c   :  { %v9238_v0 = vld [vmem:[#allocation2 + $0xcf0] sm:$0xf0] }
 0x26d   :  { %v11780_v54 = vld [vmem:[#allocation2 + $0xed4] sm:$0xf]  ;;  %v9241_v5 = vor.u32 %v11716_v50, %v9238_v0  ;;  %3921 = vmatpush.bf16.msrb.mxu1 %v8985_v3 }
 0x26e   :  { %v9494_v51 = vld [vmem:[#allocation2 + $0xef0] sm:$0xf0] }
 0x26f   :  { %v11580_v7 = vld [vmem:[#allocation2 + $0x894] sm:$0xf]  ;;  %v9497_v14 = vor.u32 %v11780_v54, %v9494_v51  ;;  %3935 = vmatpush.bf16.msrb.mxu2 %v9241_v5 }
 0x270   :  { %v8694_v12 = vld [vmem:[#allocation2 + $0x8b0] sm:$0xf0] }
 0x271   :  { %v11644_v13 = vld [vmem:[#allocation2 + $0xa94] sm:$0xf]  ;;  %v8697_v20 = vor.u32 %v11580_v7, %v8694_v12  ;;  %3949 = vmatpush.bf16.msrb.mxu3 %v9497_v14  ;;  %v11369_v14 = vld [vmem:[#allocation2 + $0x1f4] sm:$0xf0] }
 0x272   :  { %v8950_v24 = vld [vmem:[#allocation2 + $0xab0] sm:$0xf0] }
 0x273   :  { %v11708_v8 = vld [vmem:[#allocation2 + $0xc94] sm:$0xf]  ;;  %v8953_v21 = vor.u32 %v11644_v13, %v8950_v24  ;;  %3908 = vmatpush.bf16.msrb.mxu0 %v8697_v20  ;;  %v7836_v13 = vld [vmem:[#allocation2 + $0x1d8] sm:$0xf] }
 0x274   :  { %v9206_v19 = vld [vmem:[#allocation2 + $0xcb0] sm:$0xf0]  ;;  %v8092_v24 = vld [vmem:[#allocation2 + $0x3d8] sm:$0xf] }
 0x275   :  { %v11772_v22 = vld [vmem:[#allocation2 + $0xe94] sm:$0xf]  ;;  %v9209_v27 = vor.u32 %v11708_v8, %v9206_v19  ;;  %3922 = vmatpush.bf16.msrb.mxu1 %v8953_v21  ;;  %v11433_v19 = vld [vmem:[#allocation2 + $0x3f4] sm:$0xf0] }
 0x276   :  { %v9462_v23 = vld [vmem:[#allocation2 + $0xeb0] sm:$0xf0] }
 0x277   :  { %v11572_v31 = vld [vmem:[#allocation2 + $0x854] sm:$0xf]  ;;  %v9465_v34 = vor.u32 %v11772_v22, %v9462_v23  ;;  %3936 = vmatpush.bf16.msrb.mxu2 %v9209_v27  ;;  %v8348_v22 = vld [vmem:[#allocation2 + $0x5d8] sm:$0xf] }
 0x278   :  { %v8662_v29 = vld [vmem:[#allocation2 + $0x870] sm:$0xf0]  ;;  %v11497_v23 = vld [vmem:[#allocation2 + $0x5f4] sm:$0xf0] }
 0x279   :  { %v11636_v32 = vld [vmem:[#allocation2 + $0xa54] sm:$0xf]  ;;  %v8665_v55 = vor.u32 %v11572_v31, %v8662_v29  ;;  %3950 = vmatpush.bf16.msrb.mxu3 %v9465_v34  ;;  %v8604_v27 = vld [vmem:[#allocation2 + $0x7d8] sm:$0xf]  ;;  %v8093_v34 = vor.u32 %v11433_v19, %v8092_v24 }
 0x27a   :  { %v8918_v30 = vld [vmem:[#allocation2 + $0xa70] sm:$0xf0]  ;;  %v11561_v31 = vld [vmem:[#allocation2 + $0x7f4] sm:$0xf0] }
 0x27b   :  { %v11700_v36 = vld [vmem:[#allocation2 + $0xc54] sm:$0xf]  ;;  %v8921_v50 = vor.u32 %v11636_v32, %v8918_v30  ;;  %3909 = vmatpush.bf16.msrb.mxu0 %v8665_v55  ;;  %v7837_v32 = vor.u32 %v11369_v14, %v7836_v13  ;;  %v8349_v30 = vor.u32 %v11497_v23, %v8348_v22  ;;  %v11425_v55 = vld [vmem:[#allocation2 + $0x3b4] sm:$0xf0] }
 0x27c   :  { %v9174_v37 = vld [vmem:[#allocation2 + $0xc70] sm:$0xf0]  ;;  %v11417_v13 = vld [vmem:[#allocation2 + $0x374] sm:$0xf0] }
 0x27d   :  { %v11764_v38 = vld [vmem:[#allocation2 + $0xe54] sm:$0xf]  ;;  %v9177_v0 = vor.u32 %v11700_v36, %v9174_v37  ;;  %3923 = vmatpush.bf16.msrb.mxu1 %v8921_v50  ;;  %v7804_v36 = vld [vmem:[#allocation2 + $0x198] sm:$0xf] }
 0x27e   :  { %v9430_v45 = vld [vmem:[#allocation2 + $0xe70] sm:$0xf0]  ;;  %v11361_v37 = vld [vmem:[#allocation2 + $0x1b4] sm:$0xf0] }
 0x27f   :  { %v11564_v9 = vld [vmem:[#allocation2 + $0x814] sm:$0xf]  ;;  %v9433_v3 = vor.u32 %v11764_v38, %v9430_v45  ;;  %3937 = vmatpush.bf16.msrb.mxu2 %v9177_v0  ;;  %v8060_v38 = vld [vmem:[#allocation2 + $0x398] sm:$0xf]  ;;  %v8605_v45 = vor.u32 %v11561_v31, %v8604_v27 }
 0x280   :  { %v8630_v46 = vld [vmem:[#allocation2 + $0x830] sm:$0xf0]  ;;  %v8572_v50 = vld [vmem:[#allocation2 + $0x798] sm:$0xf] }
 0x281   :  { %v11628_v54 = vld [vmem:[#allocation2 + $0xa14] sm:$0xf]  ;;  %v8633_v8 = vor.u32 %v11564_v9, %v8630_v46  ;;  %3951 = vmatpush.bf16.msrb.mxu3 %v9433_v3  ;;  %v8316_v9 = vld [vmem:[#allocation2 + $0x598] sm:$0xf] }
 0x282   :  { %v8886_v51 = vld [vmem:[#allocation2 + $0xa30] sm:$0xf0]  ;;  %v11489_v46 = vld [vmem:[#allocation2 + $0x5b4] sm:$0xf0] }
 0x283   :  { %v11692_v2 = vld [vmem:[#allocation2 + $0xc14] sm:$0xf]  ;;  %v8889_v20 = vor.u32 %v11628_v54, %v8886_v51  ;;  %3910 = vmatpush.bf16.msrb.mxu0 %v8633_v8  ;;  %v11553_v0 = vld [vmem:[#allocation2 + $0x7b4] sm:$0xf0]  ;;  %v7805_v54 = vor.u32 %v11361_v37, %v7804_v36  ;;  %v8061_v51 = vor.u32 %v11425_v55, %v8060_v38 }
 0x284   :  { %v9142_v5 = vld [vmem:[#allocation2 + $0xc30] sm:$0xf0]  ;;  %v7772_v3 = vld [vmem:[#allocation2 + $0x158] sm:$0xf] }
 0x285   :  { %v11756_v7 = vld [vmem:[#allocation2 + $0xe14] sm:$0xf]  ;;  %v9145_v21 = vor.u32 %v11692_v2, %v9142_v5  ;;  %3924 = vmatpush.bf16.msrb.mxu1 %v8889_v20  ;;  %v8317_v2 = vor.u32 %v11489_v46, %v8316_v9  ;;  %v11353_v5 = vld [vmem:[#allocation2 + $0x174] sm:$0xf0] }
 0x286   :  { %v9398_v12 = vld [vmem:[#allocation2 + $0xe30] sm:$0xf0]  ;;  %3911 = vmatmul.bf16.vlgmr.msrb.gmra.mxu0 %v12603_v39  ;;  %v8284_v14 = vld [vmem:[#allocation2 + $0x558] sm:$0xf]  ;;  %v7773_v22 = vor.u32 %v11353_v5, %v7772_v3 }
 0x287   :  { %v9401_v29 = vor.u32 %v11756_v7, %v9398_v12  ;;  %3938 = vmatpush.bf16.msrb.mxu2 %v9145_v21  ;;  %3959 = vmatpush.bf16.msra.mxu0 %v7837_v32  ;;  %v8028_v7 = vld [vmem:[#allocation2 + $0x358] sm:$0xf]  ;;  %v8573_v12 = vor.u32 %v11553_v0, %v8572_v50 }
 0x288   :  { %v11481_v24 = vld [vmem:[#allocation2 + $0x574] sm:$0xf0]  ;;  %3925 = vmatmul.bf16.vlgmr.msrb.gmra.mxu1 %v12607_v44  ;;  %v8029_v23 = vor.u32 %v11417_v13, %v8028_v7 }
 0x289   :  { %3952 = vmatpush.bf16.msrb.mxu3 %v9401_v29  ;;  %3973 = vmatpush.bf16.msra.mxu1 %v8093_v34  ;;  %v8540_v8 = vld [vmem:[#allocation2 + $0x758] sm:$0xf]  ;;  %v8285_v20 = vor.u32 %v11481_v24, %v8284_v14 }
 0x28a   :  { %3939 = vmatmul.bf16.vlgmr.msrb.gmra.mxu2 %v12605_v43  ;;  %v11545_v19 = vld [vmem:[#allocation2 + $0x774] sm:$0xf0] }
 0x28b   :  { %3987 = vmatpush.bf16.msra.mxu2 %v8349_v30  ;;  %3960 = vmatpush.bf16.msra.mxu0 %v7805_v54  ;;  %v7740_v21 = vld [vmem:[#allocation2 + $0x118] sm:$0xf]  ;;  %v8541_v29 = vor.u32 %v11545_v19, %v8540_v8 }
 0x28c   :  { %3953 = vmatmul.bf16.vlgmr.msrb.gmra.mxu3 %v12609_v47  ;;  %v11345_v27 = vld [vmem:[#allocation2 + $0x134] sm:$0xf0] }
 0x28d   :  { %4001 = vmatpush.bf16.msra.mxu3 %v8605_v45  ;;  %3974 = vmatpush.bf16.msra.mxu1 %v8061_v51  ;;  %v7996_v31 = vld [vmem:[#allocation2 + $0x318] sm:$0xf]  ;;  %v7741_v38 = vor.u32 %v11345_v27, %v7740_v21 }
 0x28e   :  { %v11409_v32 = vld [vmem:[#allocation2 + $0x334] sm:$0xf0] }
 0x28f   :  { %3988 = vmatpush.bf16.msra.mxu2 %v8317_v2  ;;  %v8252_v34 = vld [vmem:[#allocation2 + $0x518] sm:$0xf]  ;;  %3961 = vmatpush.bf16.msra.mxu0 %v7773_v22  ;;  %v7997_v45 = vor.u32 %v11409_v32, %v7996_v31 }
 0x290   :  { %v11473_v30 = vld [vmem:[#allocation2 + $0x534] sm:$0xf0] }
 0x291   :  { %4002 = vmatpush.bf16.msra.mxu3 %v8573_v12  ;;  %v8508_v36 = vld [vmem:[#allocation2 + $0x718] sm:$0xf]  ;;  %3975 = vmatpush.bf16.msra.mxu1 %v8029_v23  ;;  %v8253_v55 = vor.u32 %v11473_v30, %v8252_v34 }
 0x292   :  { %v11537_v37 = vld [vmem:[#allocation2 + $0x734] sm:$0xf0] }
 0x293   :  { %3989 = vmatpush.bf16.msra.mxu2 %v8285_v20  ;;  %v7708_v9 = vld [vmem:[#allocation2 + $0xd8] sm:$0xf]  ;;  %v8509_v0 = vor.u32 %v11537_v37, %v8508_v36  ;;  %3962 = vmatpush.bf16.msra.mxu0 %v7741_v38 }
 0x294   :  { %v11337_v46 = vld [vmem:[#allocation2 + $0xf4] sm:$0xf0] }
 0x295   :  { %v7964_v50 = vld [vmem:[#allocation2 + $0x2d8] sm:$0xf]  ;;  %4003 = vmatpush.bf16.msra.mxu3 %v8541_v29  ;;  %v7709_v7 = vor.u32 %v11337_v46, %v7708_v9  ;;  %3976 = vmatpush.bf16.msra.mxu1 %v7997_v45 }
 0x296   :  { %v11401_v54 = vld [vmem:[#allocation2 + $0x2f4] sm:$0xf0] }
 0x297   :  { %v8220_v51 = vld [vmem:[#allocation2 + $0x4d8] sm:$0xf]  ;;  %3990 = vmatpush.bf16.msra.mxu2 %v8253_v55  ;;  %v7965_v12 = vor.u32 %v11401_v54, %v7964_v50  ;;  %3963 = vmatpush.bf16.msra.mxu0 %v7709_v7 }
 0x298   :  { %v11465_v2 = vld [vmem:[#allocation2 + $0x4f4] sm:$0xf0] }
 0x299   :  { %v8476_v3 = vld [vmem:[#allocation2 + $0x6d8] sm:$0xf]  ;;  %v8221_v13 = vor.u32 %v11465_v2, %v8220_v51  ;;  %4004 = vmatpush.bf16.msra.mxu3 %v8509_v0  ;;  %3977 = vmatpush.bf16.msra.mxu1 %v7965_v12 }
 0x29a   :  { %v11529_v5 = vld [vmem:[#allocation2 + $0x6f4] sm:$0xf0] }
 0x29b   :  { %v7676_v14 = vld [vmem:[#allocation2 + $0x98] sm:$0xf]  ;;  %v8477_v19 = vor.u32 %v11529_v5, %v8476_v3  ;;  %3991 = vmatpush.bf16.msra.mxu2 %v8221_v13 }
 0x29c   :  { %v11329_v24 = vld [vmem:[#allocation2 + $0xb4] sm:$0xf0] }
 0x29d   :  { %v7932_v8 = vld [vmem:[#allocation2 + $0x298] sm:$0xf]  ;;  %v7677_v31 = vor.u32 %v11329_v24, %v7676_v14  ;;  %4005 = vmatpush.bf16.msra.mxu3 %v8477_v19 }
 0x29e   :  { %v11393_v22 = vld [vmem:[#allocation2 + $0x2b4] sm:$0xf0] }
 0x29f   :  { %v8188_v23 = vld [vmem:[#allocation2 + $0x498] sm:$0xf]  ;;  %v7933_v29 = vor.u32 %v11393_v22, %v7932_v8  ;;  %3964 = vmatpush.bf16.msra.mxu0 %v7677_v31 }
 0x2a0   :  { %v11457_v20 = vld [vmem:[#allocation2 + $0x4b4] sm:$0xf0] }
 0x2a1   :  { %v8444_v21 = vld [vmem:[#allocation2 + $0x698] sm:$0xf]  ;;  %v8189_v32 = vor.u32 %v11457_v20, %v8188_v23  ;;  %3978 = vmatpush.bf16.msra.mxu1 %v7933_v29 }
 0x2a2   :  { %v11521_v27 = vld [vmem:[#allocation2 + $0x6b4] sm:$0xf0] }
 0x2a3   :  { %v7644_v34 = vld [vmem:[#allocation2 + $0x58] sm:$0xf]  ;;  %v8445_v37 = vor.u32 %v11521_v27, %v8444_v21  ;;  %3992 = vmatpush.bf16.msra.mxu2 %v8189_v32 }
 0x2a4   :  { %v11321_v30 = vld [vmem:[#allocation2 + $0x74] sm:$0xf0] }
 0x2a5   :  { %v7900_v36 = vld [vmem:[#allocation2 + $0x258] sm:$0xf]  ;;  %v7645_v50 = vor.u32 %v11321_v30, %v7644_v34  ;;  %4006 = vmatpush.bf16.msra.mxu3 %v8445_v37 }
 0x2a6   :  { %v11385_v38 = vld [vmem:[#allocation2 + $0x274] sm:$0xf0] }
 0x2a7   :  { %v8156_v45 = vld [vmem:[#allocation2 + $0x458] sm:$0xf]  ;;  %v7901_v51 = vor.u32 %v11385_v38, %v7900_v36  ;;  %3965 = vmatpush.bf16.msra.mxu0 %v7645_v50 }
 0x2a8   :  { %v11449_v55 = vld [vmem:[#allocation2 + $0x474] sm:$0xf0] }
 0x2a9   :  { %v8412_v9 = vld [vmem:[#allocation2 + $0x658] sm:$0xf]  ;;  %v8157_v2 = vor.u32 %v11449_v55, %v8156_v45  ;;  %3979 = vmatpush.bf16.msra.mxu1 %v7901_v51 }
 0x2aa   :  { %v11513_v46 = vld [vmem:[#allocation2 + $0x674] sm:$0xf0] }
 0x2ab   :  { %v7612_v0 = vld [vmem:[#allocation2 + $0x18] sm:$0xf]  ;;  %v8413_v12 = vor.u32 %v11513_v46, %v8412_v9  ;;  %3993 = vmatpush.bf16.msra.mxu2 %v8157_v2 }
 0x2ac   :  { %v11313_v54 = vld [vmem:[#allocation2 + $0x34] sm:$0xf0] }
 0x2ad   :  { %v7868_v3 = vld [vmem:[#allocation2 + $0x218] sm:$0xf]  ;;  %v7613_v23 = vor.u32 %v11313_v54, %v7612_v0  ;;  %4007 = vmatpush.bf16.msra.mxu3 %v8413_v12 }
 0x2ae   :  { %v11377_v5 = vld [vmem:[#allocation2 + $0x234] sm:$0xf0] }
 0x2af   :  { %v8124_v7 = vld [vmem:[#allocation2 + $0x418] sm:$0xf]  ;;  %v7869_v31 = vor.u32 %v11377_v5, %v7868_v3  ;;  %3966 = vmatpush.bf16.msra.mxu0 %v7613_v23 }
 0x2b0   :  { %v11441_v13 = vld [vmem:[#allocation2 + $0x434] sm:$0xf0] }
 0x2b1   :  { %v8380_v14 = vld [vmem:[#allocation2 + $0x618] sm:$0xf]  ;;  %v8125_v29 = vor.u32 %v11441_v13, %v8124_v7  ;;  %3980 = vmatpush.bf16.msra.mxu1 %v7869_v31 }
 0x2b2   :  { %v11505_v24 = vld [vmem:[#allocation2 + $0x634] sm:$0xf0]  ;;  %3967 = vmatmul.bf16.vlgmr.msra.gmra.mxu0 %v12552_v58 }
 0x2b3   :  { %v8860_v8 = vld [vmem:[#allocation2 + $0x9d8] sm:$0xf]  ;;  %v8381_v30 = vor.u32 %v11505_v24, %v8380_v14  ;;  %3994 = vmatpush.bf16.msra.mxu2 %v8125_v29 }
 0x2b4   :  { %v11625_v19 = vld [vmem:[#allocation2 + $0x9f4] sm:$0xf0]  ;;  %3981 = vmatmul.bf16.vlgmr.msra.gmra.mxu1 %v12570_v10 }
 0x2b5   :  { %v9116_v22 = vld [vmem:[#allocation2 + $0xbd8] sm:$0xf]  ;;  %v8861_v36 = vor.u32 %v11625_v19, %v8860_v8  ;;  %4008 = vmatpush.bf16.msra.mxu3 %v8381_v30 }
 0x2b6   :  { %v11689_v20 = vld [vmem:[#allocation2 + $0xbf4] sm:$0xf0]  ;;  %3995 = vmatmul.bf16.vlgmr.msra.gmra.mxu2 %v12557_v1 }
 0x2b7   :  { %v9372_v21 = vld [vmem:[#allocation2 + $0xdd8] sm:$0xf]  ;;  %v9117_v37 = vor.u32 %v11689_v20, %v9116_v22  ;;  %4015 = vmatpush.bf16.msrb.mxu0 %v8861_v36 }
 0x2b8   :  { %v11753_v27 = vld [vmem:[#allocation2 + $0xdf4] sm:$0xf0]  ;;  %4009 = vmatmul.bf16.vlgmr.msra.gmra.mxu3 %v12575_v17 }
 0x2b9   :  { %v9628_v32 = vld [vmem:[#allocation2 + $0xfd8] sm:$0xf]  ;;  %v9373_v38 = vor.u32 %v11753_v27, %v9372_v21  ;;  %4029 = vmatpush.bf16.msrb.mxu1 %v9117_v37 }
 0x2ba   :  { %v11817_v34 = vld [vmem:[#allocation2 + $0xff4] sm:$0xf0] }
 0x2bb   :  { %v8828_v45 = vld [vmem:[#allocation2 + $0x998] sm:$0xf]  ;;  %v9629_v46 = vor.u32 %v11817_v34, %v9628_v32  ;;  %4043 = vmatpush.bf16.msrb.mxu2 %v9373_v38 }
 0x2bc   :  { %v11617_v55 = vld [vmem:[#allocation2 + $0x9b4] sm:$0xf0] }
 0x2bd   :  { %v9084_v9 = vld [vmem:[#allocation2 + $0xb98] sm:$0xf]  ;;  %v8829_v3 = vor.u32 %v11617_v55, %v8828_v45  ;;  %4057 = vmatpush.bf16.msrb.mxu3 %v9629_v46 }
 0x2be   :  { %v11681_v50 = vld [vmem:[#allocation2 + $0xbb4] sm:$0xf0] }
 0x2bf   :  { %v9340_v0 = vld [vmem:[#allocation2 + $0xd98] sm:$0xf]  ;;  %v9085_v5 = vor.u32 %v11681_v50, %v9084_v9  ;;  %4016 = vmatpush.bf16.msrb.mxu0 %v8829_v3 }
 0x2c0   :  { %v11745_v54 = vld [vmem:[#allocation2 + $0xdb4] sm:$0xf0] }
 0x2c1   :  { %v9596_v51 = vld [vmem:[#allocation2 + $0xf98] sm:$0xf]  ;;  %v9341_v7 = vor.u32 %v11745_v54, %v9340_v0  ;;  %4030 = vmatpush.bf16.msrb.mxu1 %v9085_v5 }
 0x2c2   :  { %v11809_v2 = vld [vmem:[#allocation2 + $0xfb4] sm:$0xf0] }
 0x2c3   :  { %v8796_v12 = vld [vmem:[#allocation2 + $0x958] sm:$0xf]  ;;  %v9597_v24 = vor.u32 %v11809_v2, %v9596_v51  ;;  %4044 = vmatpush.bf16.msrb.mxu2 %v9341_v7 }
 0x2c4   :  { %v11609_v13 = vld [vmem:[#allocation2 + $0x974] sm:$0xf0] }
 0x2c5   :  { %v9052_v14 = vld [vmem:[#allocation2 + $0xb58] sm:$0xf]  ;;  %v8797_v21 = vor.u32 %v11609_v13, %v8796_v12  ;;  %4058 = vmatpush.bf16.msrb.mxu3 %v9597_v24 }
 0x2c6   :  { %v11673_v8 = vld [vmem:[#allocation2 + $0xb74] sm:$0xf0] }
 0x2c7   :  { %v9308_v19 = vld [vmem:[#allocation2 + $0xd58] sm:$0xf]  ;;  %v9053_v27 = vor.u32 %v11673_v8, %v9052_v14  ;;  %4017 = vmatpush.bf16.msrb.mxu0 %v8797_v21 }
 0x2c8   :  { %v11737_v22 = vld [vmem:[#allocation2 + $0xd74] sm:$0xf0] }
 0x2c9   :  { %v9564_v23 = vld [vmem:[#allocation2 + $0xf58] sm:$0xf]  ;;  %v9309_v31 = vor.u32 %v11737_v22, %v9308_v19  ;;  %4031 = vmatpush.bf16.msrb.mxu1 %v9053_v27 }
 0x2ca   :  { %v11801_v20 = vld [vmem:[#allocation2 + $0xf74] sm:$0xf0] }
 0x2cb   :  { %v8764_v29 = vld [vmem:[#allocation2 + $0x918] sm:$0xf]  ;;  %v9565_v30 = vor.u32 %v11801_v20, %v9564_v23  ;;  %4045 = vmatpush.bf16.msrb.mxu2 %v9309_v31 }
 0x2cc   :  { %v11601_v32 = vld [vmem:[#allocation2 + $0x934] sm:$0xf0] }
 0x2cd   :  { %v9020_v34 = vld [vmem:[#allocation2 + $0xb18] sm:$0xf]  ;;  %v8765_v9 = vor.u32 %v11601_v32, %v8764_v29  ;;  %4059 = vmatpush.bf16.msrb.mxu3 %v9565_v30  ;;  %v12727_v29 = vpop.f32.mrf.mxu0  ;;  %v12729_v30 = vpop.f32.mrf.mxu1 }
 0x2ce   :  { %v11665_v36 = vld [vmem:[#allocation2 + $0xb34] sm:$0xf0]  ;;  %13053 = vst [vmem:[#allocation27_spill] sm:$0xff] %v12727_v29  ;;  %v11677_v29 = vld [vmem:[#allocation2 + $0xb9c] sm:$0xf] }
 0x2cf   :  { %v9276_v37 = vld [vmem:[#allocation2 + $0xd18] sm:$0xf]  ;;  %v9021_v46 = vor.u32 %v11665_v36, %v9020_v34  ;;  %4018 = vmatpush.bf16.msrb.mxu0 %v8765_v9  ;;  %13054 = vst [vmem:[#allocation28_spill] sm:$0xff] %v12729_v30 }
 0x2d0   :  { %v11729_v38 = vld [vmem:[#allocation2 + $0xd34] sm:$0xf0] }
 0x2d1   :  { %v9532_v45 = vld [vmem:[#allocation2 + $0xf18] sm:$0xf]  ;;  %v9277_v50 = vor.u32 %v11729_v38, %v9276_v37  ;;  %4032 = vmatpush.bf16.msrb.mxu1 %v9021_v46 }
 0x2d2   :  { %v11793_v55 = vld [vmem:[#allocation2 + $0xf34] sm:$0xf0] }
 0x2d3   :  { %v8732_v0 = vld [vmem:[#allocation2 + $0x8d8] sm:$0xf]  ;;  %v9533_v2 = vor.u32 %v11793_v55, %v9532_v45  ;;  %4046 = vmatpush.bf16.msrb.mxu2 %v9277_v50 }
 0x2d4   :  { %v11593_v54 = vld [vmem:[#allocation2 + $0x8f4] sm:$0xf0] }
 0x2d5   :  { %v8988_v51 = vld [vmem:[#allocation2 + $0xad8] sm:$0xf]  ;;  %v8733_v14 = vor.u32 %v11593_v54, %v8732_v0  ;;  %4060 = vmatpush.bf16.msrb.mxu3 %v9533_v2 }
 0x2d6   :  { %v11657_v3 = vld [vmem:[#allocation2 + $0xaf4] sm:$0xf0] }
 0x2d7   :  { %v9244_v5 = vld [vmem:[#allocation2 + $0xcd8] sm:$0xf]  ;;  %v8989_v24 = vor.u32 %v11657_v3, %v8988_v51  ;;  %4019 = vmatpush.bf16.msrb.mxu0 %v8733_v14 }
 0x2d8   :  { %v11721_v7 = vld [vmem:[#allocation2 + $0xcf4] sm:$0xf0] }
 0x2d9   :  { %v9500_v12 = vld [vmem:[#allocation2 + $0xed8] sm:$0xf]  ;;  %v9245_v8 = vor.u32 %v11721_v7, %v9244_v5  ;;  %4033 = vmatpush.bf16.msrb.mxu1 %v8989_v24 }
 0x2da   :  { %v11785_v13 = vld [vmem:[#allocation2 + $0xef4] sm:$0xf0] }
 0x2db   :  { %v8700_v19 = vld [vmem:[#allocation2 + $0x898] sm:$0xf]  ;;  %v9501_v20 = vor.u32 %v11785_v13, %v9500_v12  ;;  %4047 = vmatpush.bf16.msrb.mxu2 %v9245_v8  ;;  %v12731_v12 = vpop.f32.mrf.mxu2 }
 0x2dc   :  { %v11585_v22 = vld [vmem:[#allocation2 + $0x8b4] sm:$0xf0]  ;;  %13055 = vst [vmem:[#allocation29_spill] sm:$0xff] %v12731_v12  ;;  %v11421_v12 = vld [vmem:[#allocation2 + $0x39c] sm:$0xf] }
 0x2dd   :  { %v8956_v23 = vld [vmem:[#allocation2 + $0xa98] sm:$0xf]  ;;  %v8701_v36 = vor.u32 %v11585_v22, %v8700_v19  ;;  %4061 = vmatpush.bf16.msrb.mxu3 %v9501_v20 }
 0x2de   :  { %v11649_v21 = vld [vmem:[#allocation2 + $0xab4] sm:$0xf0] }
 0x2df   :  { %v9212_v27 = vld [vmem:[#allocation2 + $0xc98] sm:$0xf]  ;;  %v8957_v37 = vor.u32 %v11649_v21, %v8956_v23  ;;  %4020 = vmatpush.bf16.msrb.mxu0 %v8701_v36  ;;  %v11429_v36 = vld [vmem:[#allocation2 + $0x3dc] sm:$0xf] }
 0x2e0   :  { %v11713_v31 = vld [vmem:[#allocation2 + $0xcb4] sm:$0xf0] }
 0x2e1   :  { %v9468_v32 = vld [vmem:[#allocation2 + $0xe98] sm:$0xf]  ;;  %v9213_v38 = vor.u32 %v11713_v31, %v9212_v27  ;;  %4034 = vmatpush.bf16.msrb.mxu1 %v8957_v37  ;;  %v12733_v27 = vpop.f32.mrf.mxu3  ;;  %v12735_v31 = vpop.f32.mrf.mxu0 }
 0x2e2   :  { %v11777_v34 = vld [vmem:[#allocation2 + $0xeb4] sm:$0xf0]  ;;  %13056 = vst [vmem:[#allocation30_spill] sm:$0xff] %v12733_v27 }
 0x2e3   :  { %v8668_v45 = vld [vmem:[#allocation2 + $0x858] sm:$0xf]  ;;  %v9469_v46 = vor.u32 %v11777_v34, %v9468_v32  ;;  %4048 = vmatpush.bf16.msrb.mxu2 %v9213_v38  ;;  %v11365_v32 = vld [vmem:[#allocation2 + $0x1dc] sm:$0xf]  ;;  %v12739_v30 = vpop.f32.mrf.mxu2 }
 0x2e4   :  { %v11577_v55 = vld [vmem:[#allocation2 + $0x874] sm:$0xf0]  ;;  %v7838_v34 = vld [vmem:[#allocation2 + $0x1f8] sm:$0xf0] }
 0x2e5   :  { %v8924_v9 = vld [vmem:[#allocation2 + $0xa58] sm:$0xf]  ;;  %v8669_v3 = vor.u32 %v11577_v55, %v8668_v45  ;;  %4062 = vmatpush.bf16.msrb.mxu3 %v9469_v46  ;;  %v12737_v45 = vpop.f32.mrf.mxu1  ;;  %v8094_v38 = vld [vmem:[#allocation2 + $0x3f8] sm:$0xf0] }
 0x2e6   :  { %v11641_v50 = vld [vmem:[#allocation2 + $0xa74] sm:$0xf0]  ;;  %v11493_v55 = vld [vmem:[#allocation2 + $0x5dc] sm:$0xf]  ;;  %v8097_v15 = vor.u32 %v11429_v36, %v8094_v38 }
 0x2e7   :  { %v9180_v0 = vld [vmem:[#allocation2 + $0xc58] sm:$0xf]  ;;  %v8925_v13 = vor.u32 %v11641_v50, %v8924_v9  ;;  %4021 = vmatpush.bf16.msrb.mxu0 %v8669_v3  ;;  %v8350_v9 = vld [vmem:[#allocation2 + $0x5f8] sm:$0xf0] }
 0x2e8   :  { %v11705_v54 = vld [vmem:[#allocation2 + $0xc74] sm:$0xf0]  ;;  %v8353_v27 = vor.u32 %v11493_v55, %v8350_v9  ;;  %v11477_v36 = vld [vmem:[#allocation2 + $0x55c] sm:$0xf] }
 0x2e9   :  { %v9436_v51 = vld [vmem:[#allocation2 + $0xe58] sm:$0xf]  ;;  %v9181_v14 = vor.u32 %v11705_v54, %v9180_v0  ;;  %4035 = vmatpush.bf16.msrb.mxu1 %v8925_v13  ;;  %v11557_v0 = vld [vmem:[#allocation2 + $0x7dc] sm:$0xf]  ;;  %v12744_v38 = vpop.f32.mrf.mxu0 }
 0x2ea   :  { %v11769_v2 = vld [vmem:[#allocation2 + $0xe74] sm:$0xf0]  ;;  %v8606_v54 = vld [vmem:[#allocation2 + $0x7f8] sm:$0xf0] }
 0x2eb   :  { %v8636_v5 = vld [vmem:[#allocation2 + $0x818] sm:$0xf]  ;;  %v9437_v22 = vor.u32 %v11769_v2, %v9436_v51  ;;  %4049 = vmatpush.bf16.msrb.mxu2 %v9181_v14  ;;  %v7841_v2 = vor.u32 %v11365_v32, %v7838_v34  ;;  %v8609_v3 = vor.u32 %v11557_v0, %v8606_v54  ;;  %v11549_v13 = vld [vmem:[#allocation2 + $0x79c] sm:$0xf] }
 0x2ec   :  { %v11569_v7 = vld [vmem:[#allocation2 + $0x834] sm:$0xf0]  ;;  %v8574_v14 = vld [vmem:[#allocation2 + $0x7b8] sm:$0xf0] }
 0x2ed   :  { %v8892_v24 = vld [vmem:[#allocation2 + $0xa18] sm:$0xf]  ;;  %v8637_v37 = vor.u32 %v11569_v7, %v8636_v5  ;;  %4063 = vmatpush.bf16.msrb.mxu3 %v9437_v22  ;;  %v8062_v5 = vld [vmem:[#allocation2 + $0x3b8] sm:$0xf0]  ;;  %v8577_v32 = vor.u32 %v11549_v13, %v8574_v14 }
 0x2ee   :  { %v11633_v8 = vld [vmem:[#allocation2 + $0xa34] sm:$0xf0]  ;;  %v11485_v7 = vld [vmem:[#allocation2 + $0x59c] sm:$0xf] }
 0x2ef   :  { %v9148_v19 = vld [vmem:[#allocation2 + $0xc18] sm:$0xf]  ;;  %v8893_v46 = vor.u32 %v11633_v8, %v8892_v24  ;;  %4022 = vmatpush.bf16.msrb.mxu0 %v8637_v37  ;;  %v7809_v24 = vor.u32 %v11357_v49, %v7806_v61  ;;  %v12741_v8 = vpop.f32.mrf.mxu3  ;;  %v8321_v22 = vor.u32 %v11485_v7, %v8318_v48  ;;  %v8030_v34 = vld [vmem:[#allocation2 + $0x378] sm:$0xf0]  ;;  %v12751_v7 = vpop.f32.mrf.mxu2 }
 0x2f0   :  { %v11697_v23 = vld [vmem:[#allocation2 + $0xc34] sm:$0xf0]  ;;  %13057 = vst [vmem:[#allocation31_spill] sm:$0xff] %v12741_v8  ;;  %v8286_v37 = vld [vmem:[#allocation2 + $0x578] sm:$0xf0] }
 0x2f1   :  { %v9404_v20 = vld [vmem:[#allocation2 + $0xe18] sm:$0xf]  ;;  %v9149_v50 = vor.u32 %v11697_v23, %v9148_v19  ;;  %4036 = vmatpush.bf16.msrb.mxu1 %v8893_v46  ;;  %v8065_v19 = vor.u32 %v11421_v12, %v8062_v5  ;;  %v11349_v23 = vld [vmem:[#allocation2 + $0x15c] sm:$0xf] }
 0x2f2   :  { %v11761_v21 = vld [vmem:[#allocation2 + $0xe34] sm:$0xf0]  ;;  %4023 = vmatmul.bf16.vlgmr.msrb.gmra.mxu0 %v12603_v39  ;;  %v11541_v61 = vld [vmem:[#allocation2 + $0x75c] sm:$0xf] }
 0x2f3   :  { %v9405_v51 = vor.u32 %v11761_v21, %v9404_v20  ;;  %4050 = vmatpush.bf16.msrb.mxu2 %v9149_v50  ;;  %4071 = vmatpush.bf16.msra.mxu0 %v7841_v2  ;;  %v7774_v20 = vld [vmem:[#allocation2 + $0x178] sm:$0xf0] }
 0x2f4   :  { %v11413_v21 = vld [vmem:[#allocation2 + $0x35c] sm:$0xf]  ;;  %4037 = vmatmul.bf16.vlgmr.msrb.gmra.mxu1 %v12607_v44  ;;  %v7777_v48 = vor.u32 %v11349_v23, %v7774_v20 }
 0x2f5   :  { %4064 = vmatpush.bf16.msrb.mxu3 %v9405_v51  ;;  %4085 = vmatpush.bf16.msra.mxu1 %v8097_v15  ;;  %v8542_v49 = vld [vmem:[#allocation2 + $0x778] sm:$0xf0]  ;;  %v12748_v15 = vpop.f32.mrf.mxu1  ;;  %v8033_v12 = vor.u32 %v11413_v21, %v8030_v34 }
 0x2f6   :  { %4051 = vmatmul.bf16.vlgmr.msrb.gmra.mxu2 %v12605_v43  ;;  %v11341_v55 = vld [vmem:[#allocation2 + $0x11c] sm:$0xf]  ;;  %v8545_v50 = vor.u32 %v11541_v61, %v8542_v49  ;;  %v12755_v49 = vpop.f32.mrf.mxu0 }
 0x2f7   :  { %4099 = vmatpush.bf16.msra.mxu2 %v8353_v27  ;;  %4072 = vmatpush.bf16.msra.mxu0 %v7809_v24  ;;  %v8289_v27 = vor.u32 %v11477_v36, %v8286_v37  ;;  %v7742_v9 = vld [vmem:[#allocation2 + $0x138] sm:$0xf0]  ;;  %v12753_v34 = vpop.f32.mrf.mxu3  ;;  %13059 = vst [vmem:[#allocation33_spill] sm:$0xff] %v12755_v49 }
 0x2f8   :  { %4065 = vmatmul.bf16.vlgmr.msrb.gmra.mxu3 %v12609_v47  ;;  %v11405_v46 = vld [vmem:[#allocation2 + $0x31c] sm:$0xf]  ;;  %v7745_v5 = vor.u32 %v11341_v55, %v7742_v9  ;;  %13058 = vst [vmem:[#allocation32_spill] sm:$0xff] %v12753_v34 }
 0x2f9   :  { %4113 = vmatpush.bf16.msra.mxu3 %v8609_v3  ;;  %4086 = vmatpush.bf16.msra.mxu1 %v8065_v19  ;;  %v7998_v0 = vld [vmem:[#allocation2 + $0x338] sm:$0xf0] }
 0x2fa   :  { %v11469_v54 = vld [vmem:[#allocation2 + $0x51c] sm:$0xf]  ;;  %v8001_v13 = vor.u32 %v11405_v46, %v7998_v0 }
 0x2fb   :  { %4100 = vmatpush.bf16.msra.mxu2 %v8321_v22  ;;  %v8254_v51 = vld [vmem:[#allocation2 + $0x538] sm:$0xf0]  ;;  %4073 = vmatpush.bf16.msra.mxu0 %v7777_v48 }
 0x2fc   :  { %v11533_v2 = vld [vmem:[#allocation2 + $0x71c] sm:$0xf]  ;;  %v8257_v14 = vor.u32 %v11469_v54, %v8254_v51 }
 0x2fd   :  { %4114 = vmatpush.bf16.msra.mxu3 %v8577_v32  ;;  %v8510_v3 = vld [vmem:[#allocation2 + $0x738] sm:$0xf0]  ;;  %4087 = vmatpush.bf16.msra.mxu1 %v8033_v12  ;;  %v12757_v46 = vpop.f32.mrf.mxu1 }
 0x2fe   :  { %v11333_v24 = vld [vmem:[#allocation2 + $0xdc] sm:$0xf]  ;;  %v8513_v23 = vor.u32 %v11533_v2, %v8510_v3  ;;  %13060 = vst [vmem:[#allocation34_spill] sm:$0xff] %v12757_v46 }
 0x2ff   :  { %4101 = vmatpush.bf16.msra.mxu2 %v8289_v27  ;;  %v7710_v19 = vld [vmem:[#allocation2 + $0xf8] sm:$0xf0]  ;;  %4074 = vmatpush.bf16.msra.mxu0 %v7745_v5 }
 0x300   :  { %v11397_v22 = vld [vmem:[#allocation2 + $0x2dc] sm:$0xf]  ;;  %v7713_v61 = vor.u32 %v11333_v24, %v7710_v19 }
 0x301   :  { %4115 = vmatpush.bf16.msra.mxu3 %v8545_v50  ;;  %v7966_v20 = vld [vmem:[#allocation2 + $0x2f8] sm:$0xf0]  ;;  %4088 = vmatpush.bf16.msra.mxu1 %v8001_v13 }
 0x302   :  { %v11461_v21 = vld [vmem:[#allocation2 + $0x4dc] sm:$0xf]  ;;  %v7969_v48 = vor.u32 %v11397_v22, %v7966_v20 }
 0x303   :  { %v8222_v32 = vld [vmem:[#allocation2 + $0x4f8] sm:$0xf0]  ;;  %4102 = vmatpush.bf16.msra.mxu2 %v8257_v14  ;;  %4075 = vmatpush.bf16.msra.mxu0 %v7713_v61 }
 0x304   :  { %v11525_v36 = vld [vmem:[#allocation2 + $0x6dc] sm:$0xf]  ;;  %v8225_v12 = vor.u32 %v11461_v21, %v8222_v32 }
 0x305   :  { %v8478_v37 = vld [vmem:[#allocation2 + $0x6f8] sm:$0xf0]  ;;  %4116 = vmatpush.bf16.msra.mxu3 %v8513_v23  ;;  %4089 = vmatpush.bf16.msra.mxu1 %v7969_v48  ;;  %v12761_v48 = vpop.f32.mrf.mxu3  ;;  %v12765_v33 = vpop.f32.mrf.mxu1 }
 0x306   :  { %v11325_v27 = vld [vmem:[#allocation2 + $0x9c] sm:$0xf]  ;;  %v8481_v50 = vor.u32 %v11525_v36, %v8478_v37  ;;  %v12759_v36 = vpop.f32.mrf.mxu2  ;;  %13062 = vst [vmem:[#allocation36_spill] sm:$0xff] %v12761_v48 }
 0x307   :  { %v7678_v55 = vld [vmem:[#allocation2 + $0xb8] sm:$0xf0]  ;;  %4103 = vmatpush.bf16.msra.mxu2 %v8225_v12  ;;  %13061 = vst [vmem:[#allocation35_spill] sm:$0xff] %v12759_v36  ;;  %v12763_v36 = vpop.f32.mrf.mxu0 }
 0x308   :  { %v11389_v9 = vld [vmem:[#allocation2 + $0x29c] sm:$0xf]  ;;  %v7681_v5 = vor.u32 %v11325_v27, %v7678_v55  ;;  %13063 = vst [vmem:[#allocation37_spill] sm:$0xff] %v12763_v36 }
 0x309   :  { %v7934_v0 = vld [vmem:[#allocation2 + $0x2b8] sm:$0xf0]  ;;  %4117 = vmatpush.bf16.msra.mxu3 %v8481_v50  ;;  %13064 = vst [vmem:[#allocation38_spill] sm:$0xff] %v12765_v33 }
 0x30a   :  { %v11453_v54 = vld [vmem:[#allocation2 + $0x49c] sm:$0xf]  ;;  %v7937_v13 = vor.u32 %v11389_v9, %v7934_v0  ;;  %4076 = vmatpush.bf16.msra.mxu0 %v7681_v5 }
 0x30b   :  { %v8190_v51 = vld [vmem:[#allocation2 + $0x4b8] sm:$0xf0] }
 0x30c   :  { %v11517_v2 = vld [vmem:[#allocation2 + $0x69c] sm:$0xf]  ;;  %v8193_v14 = vor.u32 %v11453_v54, %v8190_v51  ;;  %4090 = vmatpush.bf16.msra.mxu1 %v7937_v13 }
 0x30d   :  { %v8446_v3 = vld [vmem:[#allocation2 + $0x6b8] sm:$0xf0] }
 0x30e   :  { %v11317_v24 = vld [vmem:[#allocation2 + $0x5c] sm:$0xf]  ;;  %v8449_v20 = vor.u32 %v11517_v2, %v8446_v3  ;;  %4104 = vmatpush.bf16.msra.mxu2 %v8193_v14  ;;  %v12767_v4 = vpop.f32.mrf.mxu2 }
 0x30f   :  { %v7646_v19 = vld [vmem:[#allocation2 + $0x78] sm:$0xf0] }
 0x310   :  { %v11381_v22 = vld [vmem:[#allocation2 + $0x25c] sm:$0xf]  ;;  %v7649_v49 = vor.u32 %v11317_v24, %v7646_v19  ;;  %4118 = vmatpush.bf16.msra.mxu3 %v8449_v20 }
 0x311   :  { %v7902_v21 = vld [vmem:[#allocation2 + $0x278] sm:$0xf0] }
 0x312   :  { %v11445_v32 = vld [vmem:[#allocation2 + $0x45c] sm:$0xf]  ;;  %v7905_v12 = vor.u32 %v11381_v22, %v7902_v21  ;;  %4077 = vmatpush.bf16.msra.mxu0 %v7649_v49 }
 0x313   :  { %v8158_v23 = vld [vmem:[#allocation2 + $0x478] sm:$0xf0] }
 0x314   :  { %v11509_v37 = vld [vmem:[#allocation2 + $0x65c] sm:$0xf]  ;;  %v8161_v55 = vor.u32 %v11445_v32, %v8158_v23  ;;  %4091 = vmatpush.bf16.msra.mxu1 %v7905_v12 }
 0x315   :  { %v8414_v46 = vld [vmem:[#allocation2 + $0x678] sm:$0xf0] }
 0x316   :  { %v11309_v61 = vld [vmem:[#allocation2 + $0x1c] sm:$0xf]  ;;  %v8417_v54 = vor.u32 %v11509_v37, %v8414_v46  ;;  %4105 = vmatpush.bf16.msra.mxu2 %v8161_v55 }
 0x317   :  { %v7614_v27 = vld [vmem:[#allocation2 + $0x38] sm:$0xf0] }
 0x318   :  { %v11373_v9 = vld [vmem:[#allocation2 + $0x21c] sm:$0xf]  ;;  %v7617_v13 = vor.u32 %v11309_v61, %v7614_v27  ;;  %4119 = vmatpush.bf16.msra.mxu3 %v8417_v54 }
 0x319   :  { %v7870_v50 = vld [vmem:[#allocation2 + $0x238] sm:$0xf0] }
 0x31a   :  { %v11437_v0 = vld [vmem:[#allocation2 + $0x41c] sm:$0xf]  ;;  %v7873_v32 = vor.u32 %v11373_v9, %v7870_v50  ;;  %4078 = vmatpush.bf16.msra.mxu0 %v7617_v13  ;;  %v12769_v50 = vpop.f32.mrf.mxu3 }
 0x31b   :  { %v8126_v51 = vld [vmem:[#allocation2 + $0x438] sm:$0xf0] }
 0x31c   :  { %v11501_v2 = vld [vmem:[#allocation2 + $0x61c] sm:$0xf]  ;;  %v8129_v20 = vor.u32 %v11437_v0, %v8126_v51  ;;  %4092 = vmatpush.bf16.msra.mxu1 %v7873_v32  ;;  %v12771_v0 = vpop.f32.mrf.mxu0 }
 0x31d   :  { %v8382_v3 = vld [vmem:[#allocation2 + $0x638] sm:$0xf0]  ;;  %4079 = vmatmul.bf16.vlgmr.msra.gmra.mxu0 %v12552_v58 }
 0x31e   :  { %v11621_v5 = vld [vmem:[#allocation2 + $0x9dc] sm:$0xf]  ;;  %v8385_v37 = vor.u32 %v11501_v2, %v8382_v3  ;;  %4106 = vmatpush.bf16.msra.mxu2 %v8129_v20 }
 0x31f   :  { %v8862_v24 = vld [vmem:[#allocation2 + $0x9f8] sm:$0xf0]  ;;  %4093 = vmatmul.bf16.vlgmr.msra.gmra.mxu1 %v12570_v10 }
 0x320   :  { %v11685_v19 = vld [vmem:[#allocation2 + $0xbdc] sm:$0xf]  ;;  %v8865_v48 = vor.u32 %v11621_v5, %v8862_v24  ;;  %4120 = vmatpush.bf16.msra.mxu3 %v8385_v37  ;;  %v12773_v24 = vpop.f32.mrf.mxu1 }
 0x321   :  { %v9118_v14 = vld [vmem:[#allocation2 + $0xbf8] sm:$0xf0]  ;;  %4107 = vmatmul.bf16.vlgmr.msra.gmra.mxu2 %v12557_v1 }
 0x322   :  { %v11749_v22 = vld [vmem:[#allocation2 + $0xddc] sm:$0xf]  ;;  %v9121_v36 = vor.u32 %v11685_v19, %v9118_v14  ;;  %4127 = vmatpush.bf16.msrb.mxu0 %v8865_v48 }
 0x323   :  { %v9374_v21 = vld [vmem:[#allocation2 + $0xdf8] sm:$0xf0]  ;;  %4121 = vmatmul.bf16.vlgmr.msra.gmra.mxu3 %v12575_v17 }
 0x324   :  { %v11813_v46 = vld [vmem:[#allocation2 + $0xfdc] sm:$0xf]  ;;  %v9377_v35 = vor.u32 %v11749_v22, %v9374_v21  ;;  %4141 = vmatpush.bf16.msrb.mxu1 %v9121_v36 }
 0x325   :  { %v9630_v23 = vld [vmem:[#allocation2 + $0xff8] sm:$0xf0] }
 0x326   :  { %v11613_v34 = vld [vmem:[#allocation2 + $0x99c] sm:$0xf]  ;;  %v9633_v49 = vor.u32 %v11813_v46, %v9630_v23  ;;  %4155 = vmatpush.bf16.msrb.mxu2 %v9377_v35  ;;  %v12779_v23 = vpop.f32.mrf.mxu2 }
 0x327   :  { %v8830_v8 = vld [vmem:[#allocation2 + $0x9b8] sm:$0xf0] }
 0x328   :  { %v9086_v61 = vld [vmem:[#allocation2 + $0xbb8] sm:$0xf0]  ;;  %v8833_v9 = vor.u32 %v11613_v34, %v8830_v8  ;;  %4169 = vmatpush.bf16.msrb.mxu3 %v9633_v49  ;;  %v12781_v49 = vpop.f32.mrf.mxu3 }
 0x329   :  { %v11741_v27 = vld [vmem:[#allocation2 + $0xd9c] sm:$0xf]  ;;  %v9089_v54 = vor.u32 %v11677_v29, %v9086_v61 }
 0x32a   :  { %v9342_v33 = vld [vmem:[#allocation2 + $0xdb8] sm:$0xf0]  ;;  %4128 = vmatpush.bf16.msrb.mxu0 %v8833_v9 }
 0x32b   :  { %v11805_v12 = vld [vmem:[#allocation2 + $0xf9c] sm:$0xf]  ;;  %v9345_v51 = vor.u32 %v11741_v27, %v9342_v33  ;;  %4142 = vmatpush.bf16.msrb.mxu1 %v9089_v54 }
 0x32c   :  { %v9598_v55 = vld [vmem:[#allocation2 + $0xfb8] sm:$0xf0] }
 0x32d   :  { %v11605_v2 = vld [vmem:[#allocation2 + $0x95c] sm:$0xf]  ;;  %v9601_v19 = vor.u32 %v11805_v12, %v9598_v55  ;;  %4156 = vmatpush.bf16.msrb.mxu2 %v9345_v51 }
 0x32e   :  { %v8798_v3 = vld [vmem:[#allocation2 + $0x978] sm:$0xf0] }
 0x32f   :  { %v11669_v5 = vld [vmem:[#allocation2 + $0xb5c] sm:$0xf]  ;;  %v8801_v33 = vor.u32 %v11605_v2, %v8798_v3  ;;  %4170 = vmatpush.bf16.msrb.mxu3 %v9601_v19  ;;  %v12783_v3 = vpop.f32.mrf.mxu0 }
 0x330   :  { %v9054_v13 = vld [vmem:[#allocation2 + $0xb78] sm:$0xf0] }
 0x331   :  { %v11733_v48 = vld [vmem:[#allocation2 + $0xd5c] sm:$0xf]  ;;  %v9057_v35 = vor.u32 %v11669_v5, %v9054_v13  ;;  %4129 = vmatpush.bf16.msrb.mxu0 %v8801_v33  ;;  %v13065_v13 = vperm.slane %v12623_v63, 0 }
 0x332   :  { %v9310_v8 = vld [vmem:[#allocation2 + $0xd78] sm:$0xf0] }
 0x333   :  { %v11797_v34 = vld [vmem:[#allocation2 + $0xf5c] sm:$0xf]  ;;  %v9313_v29 = vor.u32 %v11733_v48, %v9310_v8  ;;  %4143 = vmatpush.bf16.msrb.mxu1 %v9057_v35  ;;  %v3299_v48 = vadd.f32 %v12634_v40, %v13065_v13  ;;  %v12788_v8 = vpop.f32.mrf.mxu1  ;;  %v12799_v13 = vld [vmem:[#allocation4] sm:$0xff] }
 0x334   :  { %v9566_v14 = vld [vmem:[#allocation2 + $0xf78] sm:$0xf0] }
 0x335   :  { %v11597_v36 = vld [vmem:[#allocation2 + $0x91c] sm:$0xf]  ;;  %v9569_v21 = vor.u32 %v11797_v34, %v9566_v14  ;;  %4157 = vmatpush.bf16.msrb.mxu2 %v9313_v29  ;;  %v3313_v40 = vadd.f32 %v12636_v53, %v3299_v48  ;;  %v674_v48 = vperm.slane %v12799_v13, 3 }
 0x336   :  { %v8766_v22 = vld [vmem:[#allocation2 + $0x938] sm:$0xf0] }
 0x337   :  { %v11661_v1 = vld [vmem:[#allocation2 + $0xb1c] sm:$0xf]  ;;  %v8769_v37 = vor.u32 %v11597_v36, %v8766_v22  ;;  %4171 = vmatpush.bf16.msrb.mxu3 %v9569_v21 }
 0x338   :  { %v9022_v32 = vld [vmem:[#allocation2 + $0xb38] sm:$0xf0] }
 0x339   :  { %v11725_v20 = vld [vmem:[#allocation2 + $0xd1c] sm:$0xf]  ;;  %v9025_v10 = vor.u32 %v11661_v1, %v9022_v32  ;;  %4130 = vmatpush.bf16.msrb.mxu0 %v8769_v37 }
 0x33a   :  { %v9278_v46 = vld [vmem:[#allocation2 + $0xd38] sm:$0xf0] }
 0x33b   :  { %v11789_v58 = vld [vmem:[#allocation2 + $0xf1c] sm:$0xf]  ;;  %v9281_v61 = vor.u32 %v11725_v20, %v9278_v46  ;;  %4144 = vmatpush.bf16.msrb.mxu1 %v9025_v10  ;;  %v12794_v10 = vpop.f32.mrf.mxu2 }
 0x33c   :  { %v9534_v17 = vld [vmem:[#allocation2 + $0xf38] sm:$0xf0] }
 0x33d   :  { %v11589_v27 = vld [vmem:[#allocation2 + $0x8dc] sm:$0xf]  ;;  %v9537_v9 = vor.u32 %v11789_v58, %v9534_v17  ;;  %4158 = vmatpush.bf16.msrb.mxu2 %v9281_v61  ;;  %v13066_v17 = vperm.slane %v12623_v63, 1 }
 0x33e   :  { %v8734_v12 = vld [vmem:[#allocation2 + $0x8f8] sm:$0xf0] }
 0x33f   :  { %v11653_v55 = vld [vmem:[#allocation2 + $0xadc] sm:$0xf]  ;;  %v8737_v34 = vor.u32 %v11589_v27, %v8734_v12  ;;  %4172 = vmatpush.bf16.msrb.mxu3 %v9537_v9  ;;  %v3411_v37 = vadd.f32 %v12666_v11, %v13066_v17  ;;  %v3327_v11 = vadd.f32 %v12642_v6, %v3313_v40  ;;  %v13067_v6 = vperm.slane %v12689_v28, 2 }
 0x340   :  { %v8990_v54 = vld [vmem:[#allocation2 + $0xaf8] sm:$0xf0] }
 0x341   :  { %v11717_v51 = vld [vmem:[#allocation2 + $0xcdc] sm:$0xf]  ;;  %v8993_v14 = vor.u32 %v11653_v55, %v8990_v54  ;;  %4131 = vmatpush.bf16.msrb.mxu0 %v8737_v34 }
 0x342   :  { %v9246_v2 = vld [vmem:[#allocation2 + $0xcf8] sm:$0xf0] }
 0x343   :  { %v11781_v5 = vld [vmem:[#allocation2 + $0xedc] sm:$0xf]  ;;  %v9249_v33 = vor.u32 %v11717_v51, %v9246_v2  ;;  %4145 = vmatpush.bf16.msrb.mxu1 %v8993_v14 }
 0x344   :  { %v9502_v19 = vld [vmem:[#allocation2 + $0xef8] sm:$0xf0] }
 0x345   :  { %v11581_v35 = vld [vmem:[#allocation2 + $0x89c] sm:$0xf]  ;;  %v9505_v22 = vor.u32 %v11781_v5, %v9502_v19  ;;  %4159 = vmatpush.bf16.msrb.mxu2 %v9249_v33  ;;  %v12796_v5 = vpop.f32.mrf.mxu3 }
 0x346   :  { %v8702_v29 = vld [vmem:[#allocation2 + $0x8b8] sm:$0xf0] }
 0x347   :  { %v11645_v36 = vld [vmem:[#allocation2 + $0xa9c] sm:$0xf]  ;;  %v8705_v58 = vor.u32 %v11581_v35, %v8702_v29  ;;  %4173 = vmatpush.bf16.msrb.mxu3 %v9505_v22  ;;  %v3425_v35 = vadd.f32 %v12668_v26, %v3411_v37  ;;  %v12803_v29 = vpop.f32.mrf.mxu0  ;;  %v9748_v37 = vld [vmem:[#allocation6 + $0xe0] sm:$0xf] }
 0x348   :  { %v8958_v1 = vld [vmem:[#allocation2 + $0xab8] sm:$0xf0] }
 0x349   :  { %v11709_v21 = vld [vmem:[#allocation2 + $0xc9c] sm:$0xf]  ;;  %v8961_v61 = vor.u32 %v11645_v36, %v8958_v1  ;;  %4132 = vmatpush.bf16.msrb.mxu0 %v8705_v58  ;;  %v3439_v28 = vadd.f32 %v12674_v42, %v3425_v35  ;;  %v9732_v42 = vld [vmem:[#allocation6 + $0xc0] sm:$0xf]  ;;  %v11844_v35 = vld [vmem:[#allocation6 + $0xcc] sm:$0xf0] }
 0x34a   :  { %v9214_v32 = vld [vmem:[#allocation2 + $0xcb8] sm:$0xf0] }
 0x34b   :  { %v11773_v20 = vld [vmem:[#allocation2 + $0xe9c] sm:$0xf]  ;;  %v9217_v27 = vor.u32 %v11709_v21, %v9214_v32  ;;  %4146 = vmatpush.bf16.msrb.mxu1 %v8961_v61  ;;  %v9876_v61 = vld [vmem:[#allocation6 + $0x1e0] sm:$0xf] }
 0x34c   :  { %v9470_v46 = vld [vmem:[#allocation2 + $0xeb8] sm:$0xf0] }
 0x34d   :  { %v11573_v12 = vld [vmem:[#allocation2 + $0x85c] sm:$0xf]  ;;  %v9473_v54 = vor.u32 %v11773_v20, %v9470_v46  ;;  %4160 = vmatpush.bf16.msrb.mxu2 %v9217_v27  ;;  %v3523_v20 = vadd.f32 %v12700_v59, %v13067_v6  ;;  %v12808_v46 = vpop.f32.mrf.mxu1  ;;  %v3341_v27 = vadd.f32 %v12644_v16, %v3327_v11  ;;  %v3633_v6 = vadd.f32 %v12735_v31, %v674_v48 }
 0x34e   :  { %v8670_v55 = vld [vmem:[#allocation2 + $0x878] sm:$0xf0]  ;;  %13068 = vst [vmem:[#allocation39_spill] sm:$0xff] %v12808_v46  ;;  %v3635_v11 = vadd.f32 %v12744_v38, %v674_v48  ;;  %v3453_v31 = vadd.f32 %v12676_v52, %v3439_v28  ;;  %v10116_v38 = vld [vmem:[#allocation6 + $0x3c0] sm:$0xf] }
 0x34f   :  { %v11637_v9 = vld [vmem:[#allocation2 + $0xa5c] sm:$0xf]  ;;  %v8673_v34 = vor.u32 %v11573_v12, %v8670_v55  ;;  %4174 = vmatpush.bf16.msrb.mxu3 %v9473_v54  ;;  %v11848_v12 = vld [vmem:[#allocation6 + $0xec] sm:$0xf0] }
 0x350   :  { %v8926_v51 = vld [vmem:[#allocation2 + $0xa78] sm:$0xf0]  ;;  %v9749_v16 = vor.u32 %v11848_v12, %v9748_v37  ;;  %v11940_v48 = vld [vmem:[#allocation6 + $0x3cc] sm:$0xf0]  ;;  %v12824_v37 = vpop.f32.mrf.mxu0  ;;  %v9716_v12 = vld [vmem:[#allocation6 + $0xa0] sm:$0xf] }
 0x351   :  { %v11701_v2 = vld [vmem:[#allocation2 + $0xc5c] sm:$0xf]  ;;  %v8929_v36 = vor.u32 %v11637_v9, %v8926_v51  ;;  %4133 = vmatpush.bf16.msrb.mxu0 %v8673_v34  ;;  %v11880_v9 = vld [vmem:[#allocation6 + $0x1ec] sm:$0xf0]  ;;  %v10004_v51 = vld [vmem:[#allocation6 + $0x2e0] sm:$0xf]  ;;  %v12815_v34 = vpop.f32.mrf.mxu2 }
 0x352   :  { %v9182_v53 = vld [vmem:[#allocation2 + $0xc78] sm:$0xf0]  ;;  %v11936_v28 = vld [vmem:[#allocation6 + $0x3ac] sm:$0xf0] }
 0x353   :  { %v11765_v19 = vld [vmem:[#allocation2 + $0xe5c] sm:$0xf]  ;;  %v9185_v22 = vor.u32 %v11701_v2, %v9182_v53  ;;  %v11912_v2 = vld [vmem:[#allocation6 + $0x2ec] sm:$0xf0]  ;;  %4147 = vmatpush.bf16.msrb.mxu1 %v8929_v36  ;;  %v10132_v53 = vld [vmem:[#allocation6 + $0x3e0] sm:$0xf] }
 0x354   :  { %v9438_v63 = vld [vmem:[#allocation2 + $0xe78] sm:$0xf0]  ;;  %v9860_v36 = vld [vmem:[#allocation6 + $0x1c0] sm:$0xf] }
 0x355   :  { %v11565_v14 = vld [vmem:[#allocation2 + $0x81c] sm:$0xf]  ;;  %v9441_v40 = vor.u32 %v11765_v19, %v9438_v63  ;;  %4161 = vmatpush.bf16.msrb.mxu2 %v9185_v22  ;;  %v11944_v19 = vld [vmem:[#allocation6 + $0x3ec] sm:$0xf0]  ;;  %v3537_v63 = vadd.f32 %v12702_v18, %v3523_v20  ;;  %v3355_v18 = vadd.f32 %v12649_v56, %v3341_v27  ;;  %v12819_v20 = vpop.f32.mrf.mxu3  ;;  %v9844_v27 = vld [vmem:[#allocation6 + $0x1a0] sm:$0xf] }
 0x356   :  { %v8638_v33 = vld [vmem:[#allocation2 + $0x838] sm:$0xf0]  ;;  %v10133_v22 = vor.u32 %v11944_v19, %v10132_v53  ;;  %v9700_v19 = vld [vmem:[#allocation6 + $0x80] sm:$0xf] }
 0x357   :  { %v11629_v1 = vld [vmem:[#allocation2 + $0xa1c] sm:$0xf]  ;;  %v8641_v55 = vor.u32 %v11565_v14, %v8638_v33  ;;  %4175 = vmatpush.bf16.msrb.mxu3 %v9441_v40  ;;  %v9877_v14 = vor.u32 %v11880_v9, %v9876_v61  ;;  %v10005_v33 = vor.u32 %v11912_v2, %v10004_v51  ;;  %v3551_v40 = vadd.f32 %v12708_v41, %v3537_v63  ;;  %v11840_v61 = vld [vmem:[#allocation6 + $0xac] sm:$0xf0]  ;;  %v10100_v2 = vld [vmem:[#allocation6 + $0x3a0] sm:$0xf] }
 0x358   :  { %v8894_v21 = vld [vmem:[#allocation2 + $0xa38] sm:$0xf0]  ;;  %v10117_v41 = vor.u32 %v11940_v48, %v10116_v38  ;;  %v11904_v9 = vld [vmem:[#allocation6 + $0x2ac] sm:$0xf0]  ;;  %v3467_v51 = vadd.f32 %v12681_v60, %v3453_v31  ;;  %v9828_v63 = vld [vmem:[#allocation6 + $0x180] sm:$0xf]  ;;  %v12846_v31 = vpop.f32.mrf.mxu0 }
 0x359   :  { %v11693_v32 = vld [vmem:[#allocation2 + $0xc1c] sm:$0xf]  ;;  %v8897_v59 = vor.u32 %v11629_v1, %v8894_v21  ;;  %4134 = vmatpush.bf16.msrb.mxu0 %v8641_v55  ;;  %v11876_v1 = vld [vmem:[#allocation6 + $0x1cc] sm:$0xf0]  ;;  %v9988_v21 = vld [vmem:[#allocation6 + $0x2c0] sm:$0xf]  ;;  %v12826_v55 = vpop.f32.mrf.mxu1 }
 0x35a   :  { %v9150_v58 = vld [vmem:[#allocation2 + $0xc38] sm:$0xf0]  ;;  %v9861_v56 = vor.u32 %v11876_v1, %v9860_v36  ;;  %v13071_v36 = vld [vmem:[#allocation31_spill] sm:$0xff] }
 0x35b   :  { %v11757_v17 = vld [vmem:[#allocation2 + $0xe1c] sm:$0xf]  ;;  %v9153_v54 = vor.u32 %v11693_v32, %v9150_v58  ;;  %v11908_v32 = vld [vmem:[#allocation6 + $0x2cc] sm:$0xf0]  ;;  %4148 = vmatpush.bf16.msrb.mxu1 %v8897_v59  ;;  %v3647_v58 = vadd.f32 %v12737_v45, %v3633_v6  ;;  %v3565_v59 = vadd.f32 %v12710_v57, %v3551_v40  ;;  %v9684_v48 = vld [vmem:[#allocation6 + $0x60] sm:$0xf] }
 0x35c   :  { %v9406_v26 = vld [vmem:[#allocation2 + $0xe38] sm:$0xf0]  ;;  %v9989_v52 = vor.u32 %v11908_v32, %v9988_v21  ;;  %4135 = vmatmul.bf16.vlgmr.msrb.gmra.mxu0 %v12603_v39  ;;  %v11872_v45 = vld [vmem:[#allocation6 + $0x1ac] sm:$0xf0]  ;;  %v9717_v39 = vor.u32 %v11840_v61, %v9716_v12 }
 0x35d   :  { %v9409_v46 = vor.u32 %v11757_v17, %v9406_v26  ;;  %4162 = vmatpush.bf16.msrb.mxu2 %v9153_v54  ;;  %5753 = vmatpush.bf16.msra.mxu0 %v9749_v16  ;;  %v9733_v17 = vor.u32 %v11844_v35, %v9732_v42  ;;  %v3649_v26 = vadd.f32 %v12748_v15, %v3635_v11  ;;  %v11868_v6 = vld [vmem:[#allocation6 + $0x18c] sm:$0xf0]  ;;  %v9956_v16 = vld [vmem:[#allocation6 + $0x280] sm:$0xf]  ;;  %v12838_v11 = vpop.f32.mrf.mxu2 }
 0x35e   :  { %v3369_v15 = vadd.f32 %v12651_v62, %v3355_v18  ;;  %4149 = vmatmul.bf16.vlgmr.msrb.gmra.mxu1 %v12607_v44  ;;  %v3661_v54 = vadd.f32 %v12739_v30, %v3647_v58  ;;  %v9845_v62 = vor.u32 %v11872_v45, %v9844_v27  ;;  %v11836_v44 = vld [vmem:[#allocation6 + $0x8c] sm:$0xf0]  ;;  %v13070_v42 = vld [vmem:[#allocation27_spill] sm:$0xff]  ;;  %v12844_v18 = vpop.f32.mrf.mxu3 }
 0x35f   :  { %4176 = vmatpush.bf16.msrb.mxu3 %v9409_v46  ;;  %5767 = vmatpush.bf16.msra.mxu1 %v9877_v14  ;;  %v9972_v46 = vld [vmem:[#allocation6 + $0x2a0] sm:$0xf]  ;;  %v3663_v53 = vadd.f32 %v12751_v7, %v3649_v26  ;;  %v11900_v57 = vld [vmem:[#allocation6 + $0x28c] sm:$0xf0]  ;;  %v3579_v35 = vadd.f32 %v13070_v42, %v3565_v59  ;;  %v9701_v1 = vor.u32 %v11836_v44, %v9700_v19 }
 0x360   :  { %4163 = vmatmul.bf16.vlgmr.msrb.gmra.mxu2 %v12605_v43  ;;  %v9973_v60 = vor.u32 %v11904_v9, %v9972_v46  ;;  %v10101_v43 = vor.u32 %v11936_v28, %v10100_v2  ;;  %v3383_v30 = vadd.f32 %v12658_v25, %v3369_v15  ;;  %v11932_v14 = vld [vmem:[#allocation6 + $0x38c] sm:$0xf0]  ;;  %v9829_v25 = vor.u32 %v11868_v6, %v9828_v63  ;;  %v9812_v58 = vld [vmem:[#allocation6 + $0x160] sm:$0xf] }
 0x361   :  { %5781 = vmatpush.bf16.msra.mxu2 %v10005_v33  ;;  %5754 = vmatpush.bf16.msra.mxu0 %v9733_v17  ;;  %v13069_v33 = vld [vmem:[#allocation23_spill] sm:$0xff]  ;;  %v13072_v21 = vld [vmem:[#allocation32_spill] sm:$0xff]  ;;  %v9957_v38 = vor.u32 %v11900_v57, %v9956_v16  ;;  %v12848_v17 = vpop.f32.mrf.mxu1  ;;  %v13074_v46 = vld [vmem:[#allocation21_spill] sm:$0xff] }
 0x362   :  { %4177 = vmatmul.bf16.vlgmr.msrb.gmra.mxu3 %v12609_v47  ;;  %v10084_v47 = vld [vmem:[#allocation6 + $0x380] sm:$0xf]  ;;  %v3481_v7 = vadd.f32 %v13069_v33, %v3467_v51  ;;  %v3677_v32 = vadd.f32 %v13072_v21, %v3663_v53  ;;  %v11832_v40 = vld [vmem:[#allocation6 + $0x6c] sm:$0xf0]  ;;  %v12852_v9 = vadd.f32 %v13074_v46, %v3383_v30 }
 0x363   :  { %5795 = vmatpush.bf16.msra.mxu3 %v10133_v22  ;;  %5768 = vmatpush.bf16.msra.mxu1 %v9861_v56  ;;  %v3675_v22 = vadd.f32 %v13071_v36, %v3661_v54  ;;  %v10085_v26 = vor.u32 %v11932_v14, %v10084_v47  ;;  %v11864_v56 = vld [vmem:[#allocation6 + $0x16c] sm:$0xf0]  ;;  %v9685_v59 = vor.u32 %v11832_v40, %v9684_v48  ;;  %v9796_v44 = vld [vmem:[#allocation6 + $0x140] sm:$0xf] }
 0x364   :  { %v11896_v12 = vld [vmem:[#allocation6 + $0x26c] sm:$0xf0]  ;;  %v9813_v53 = vor.u32 %v11864_v56, %v9812_v58  ;;  %v9924_v6 = vld [vmem:[#allocation6 + $0x240] sm:$0xf] }
 0x365   :  { %5782 = vmatpush.bf16.msra.mxu2 %v9989_v52  ;;  %5755 = vmatpush.bf16.msra.mxu0 %v9717_v39  ;;  %v9940_v52 = vld [vmem:[#allocation6 + $0x260] sm:$0xf]  ;;  %v13073_v61 = vld [vmem:[#allocation24_spill] sm:$0xff]  ;;  %v13076_v2 = vld [vmem:[#allocation33_spill] sm:$0xff]  ;;  %v12861_v33 = vpop.f32.mrf.mxu2 }
 0x366   :  { %v3495_v27 = vadd.f32 %v13073_v61, %v3481_v7  ;;  %v11928_v45 = vld [vmem:[#allocation6 + $0x36c] sm:$0xf0]  ;;  %v3689_v28 = vadd.f32 %v13076_v2, %v3675_v22  ;;  %v10052_v7 = vld [vmem:[#allocation6 + $0x340] sm:$0xf]  ;;  %v4191_v22 = vmax.f32 %v12852_v9, 0.0  ;;  %v12867_v48 = vpop.f32.mrf.mxu3 }
 0x367   :  { %5796 = vmatpush.bf16.msra.mxu3 %v10117_v41  ;;  %5769 = vmatpush.bf16.msra.mxu1 %v9845_v62  ;;  %v10068_v41 = vld [vmem:[#allocation6 + $0x360] sm:$0xf]  ;;  %v13075_v15 = vld [vmem:[#allocation28_spill] sm:$0xff]  ;;  %v13077_v54 = vld [vmem:[#allocation37_spill] sm:$0xff]  ;;  %v9941_v62 = vor.u32 %v11896_v12, %v9940_v52 }
 0x368   :  { %v3593_v51 = vadd.f32 %v13075_v15, %v3579_v35  ;;  %v3691_v39 = vadd.f32 %v13077_v54, %v3677_v32  ;;  %v11828_v19 = vld [vmem:[#allocation6 + $0x4c] sm:$0xf0]  ;;  %v10069_v63 = vor.u32 %v11928_v45, %v10068_v41  ;;  %v9780_v52 = vld [vmem:[#allocation6 + $0x120] sm:$0xf] }
 0x369   :  { %5783 = vmatpush.bf16.msra.mxu2 %v9973_v60  ;;  %5756 = vmatpush.bf16.msra.mxu0 %v9701_v1  ;;  %v9668_v60 = vld [vmem:[#allocation6 + $0x40] sm:$0xf]  ;;  %v11892_v16 = vld [vmem:[#allocation6 + $0x24c] sm:$0xf0] }
 0x36a   :  { %v13078_v57 = vld [vmem:[#allocation25_spill] sm:$0xff]  ;;  %v13080_v35 = vld [vmem:[#allocation20_spill] sm:$0xff]  ;;  %v13081_v1 = vld [vmem:[#allocation34_spill] sm:$0xff]  ;;  %v9669_v32 = vor.u32 %v11828_v19, %v9668_v60  ;;  %v9925_v58 = vor.u32 %v11892_v16, %v9924_v6  ;;  %v675_v60 = vperm.slane %v12799_v13, 4  ;;  %v676_v19 = vperm.slane %v12799_v13, 5 }
 0x36b   :  { %5797 = vmatpush.bf16.msra.mxu3 %v10101_v43  ;;  %5770 = vmatpush.bf16.msra.mxu1 %v9829_v25  ;;  %v11860_v43 = vld [vmem:[#allocation6 + $0x14c] sm:$0xf0]  ;;  %v12858_v30 = vadd.f32 %v13078_v57, %v3495_v27  ;;  %v4183_v36 = vmax.f32 %v13080_v35, 0.0  ;;  %v3703_v21 = vadd.f32 %v13081_v1, %v3689_v28  ;;  %v13082_v25 = vld [vmem:[#allocation38_spill] sm:$0xff] }
 0x36c   :  { %v13079_v47 = vld [vmem:[#allocation29_spill] sm:$0xff]  ;;  %v9797_v40 = vor.u32 %v11860_v43, %v9796_v44  ;;  %v9908_v27 = vld [vmem:[#allocation6 + $0x220] sm:$0xf]  ;;  %v3872_v44 = vpop.f32.mrf.mxu1 }
 0x36d   :  { %5784 = vmatpush.bf16.msra.mxu2 %v9957_v38  ;;  %v3607_v14 = vadd.f32 %v13079_v47, %v3593_v51  ;;  %v11924_v42 = vld [vmem:[#allocation6 + $0x34c] sm:$0xf0]  ;;  %5757 = vmatpush.bf16.msra.mxu0 %v9685_v59  ;;  %v3705_v38 = vadd.f32 %v13082_v25, %v3691_v39  ;;  %v13083_v45 = vld [vmem:[#allocation22_spill] sm:$0xff]  ;;  %v4192_v15 = vmax.f32 %v12858_v30, 0.0  ;;  %v3858_v59 = vpop.f32.mrf.mxu0 }
 0x36e   :  { %v11824_v56 = vld [vmem:[#allocation6 + $0x2c] sm:$0xf0]  ;;  %v10053_v12 = vor.u32 %v11924_v42, %v10052_v7  ;;  %v4184_v46 = vmax.f32 %v13083_v45, 0.0  ;;  %v13084_v51 = vld [vmem:[#allocation30_spill] sm:$0xff]  ;;  %v3886_v45 = vpop.f32.mrf.mxu2 }
 0x36f   :  { %5798 = vmatpush.bf16.msra.mxu3 %v10085_v26  ;;  %5771 = vmatpush.bf16.msra.mxu1 %v9813_v53  ;;  %v9652_v26 = vld [vmem:[#allocation6 + $0x20] sm:$0xf]  ;;  %v11856_v61 = vld [vmem:[#allocation6 + $0x12c] sm:$0xf0]  ;;  %v3621_v2 = vadd.f32 %v13084_v51, %v3607_v14  ;;  %v3719_v28 = vadd.f32 %v12767_v4, %v3705_v38 }
 0x370   :  { %v11888_v41 = vld [vmem:[#allocation6 + $0x22c] sm:$0xf0]  ;;  %v10036_v54 = vld [vmem:[#allocation6 + $0x320] sm:$0xf]  ;;  %v9781_v6 = vor.u32 %v11856_v61, %v9780_v52 }
 0x371   :  { %5785 = vmatpush.bf16.msra.mxu2 %v9941_v62  ;;  %v11920_v39 = vld [vmem:[#allocation6 + $0x32c] sm:$0xf0]  ;;  %v13085_v53 = vld [vmem:[#allocation35_spill] sm:$0xff]  ;;  %5758 = vmatpush.bf16.msra.mxu0 %v9669_v32  ;;  %v9909_v16 = vor.u32 %v11888_v41, %v9908_v27  ;;  %v3733_v1 = vadd.f32 %v12769_v50, %v3719_v28  ;;  %v4193_v32 = vmax.f32 %v3621_v2, 0.0  ;;  %v13087_v27 = vld [vmem:[#allocation26_spill] sm:$0xff]  ;;  %v3747_v41 = vadd.f32 %v12783_v3, %v675_v60 }
 0x372   :  { %v3717_v62 = vadd.f32 %v13085_v53, %v3703_v21  ;;  %v9636_v43 = vld [vmem:[#allocation6] sm:$0xf]  ;;  %v11820_v57 = vld [vmem:[#allocation6 + $0xc] sm:$0xf0]  ;;  %v10037_v47 = vor.u32 %v11920_v39, %v10036_v54  ;;  %v3857_v28 = vadd.f32 %v12846_v31, %v676_v19  ;;  %v3859_v2 = vadd.f32 %v3858_v59, %v676_v19 }
 0x373   :  { %5799 = vmatpush.bf16.msra.mxu3 %v10069_v63  ;;  %v9653_v63 = vor.u32 %v11824_v56, %v9652_v26  ;;  %5772 = vmatpush.bf16.msra.mxu1 %v9797_v40  ;;  %v9764_v30 = vld [vmem:[#allocation6 + $0x100] sm:$0xf]  ;;  %v11852_v4 = vld [vmem:[#allocation6 + $0x10c] sm:$0xf0]  ;;  %v3745_v40 = vadd.f32 %v12771_v0, %v675_v60  ;;  %v12886_v3 = vpack.c.bf16 %v4191_v22, %v4183_v36 }
 0x374   :  { %v9892_v14 = vld [vmem:[#allocation6 + $0x200] sm:$0xf]  ;;  %v11884_v7 = vld [vmem:[#allocation6 + $0x20c] sm:$0xf0]  ;;  %v9765_v50 = vor.u32 %v11852_v4, %v9764_v30  ;;  %v12888_v60 = vpack.c.bf16 %v4192_v15, %v4184_v46  ;;  %v3761_v30 = vadd.f32 %v12788_v8, %v3747_v41  ;;  %v3871_v9 = vadd.f32 %v12848_v17, %v3857_v28  ;;  %v12897_v22 = vpop.f32.mrf.mxu1 }
 0x375   :  { %5786 = vmatpush.bf16.msra.mxu2 %v9925_v58  ;;  %v10020_v42 = vld [vmem:[#allocation6 + $0x300] sm:$0xf]  ;;  %v11916_v21 = vld [vmem:[#allocation6 + $0x30c] sm:$0xf0]  ;;  %5759 = vmatpush.bf16.msra.mxu0 %v9653_v63  ;;  %v9637_v58 = vor.u32 %v11820_v57, %v9636_v43  ;;  %v9893_v51 = vor.u32 %v11884_v7, %v9892_v14  ;;  %v3900_v63 = vpop.f32.mrf.mxu3  ;;  %v12894_v4 = vpop.f32.mrf.mxu0  ;;  %v3873_v36 = vadd.f32 %v3872_v44, %v3859_v2 }
 0x376   :  { %v10260_v25 = vld [vmem:[#allocation6 + $0x4e0] sm:$0xf]  ;;  %v11976_v38 = vld [vmem:[#allocation6 + $0x4ec] sm:$0xf0]  ;;  %v10021_v54 = vor.u32 %v11916_v21, %v10020_v42 }
 0x377   :  { %5800 = vmatpush.bf16.msra.mxu3 %v10053_v12  ;;  %v13086_v26 = vld [vmem:[#allocation36_spill] sm:$0xff]  ;;  %v10388_v52 = vld [vmem:[#allocation6 + $0x5e0] sm:$0xf]  ;;  %v4185_v12 = vmax.f32 %v13087_v27, 0.0  ;;  %5773 = vmatpush.bf16.msra.mxu1 %v9781_v6  ;;  %v10261_v39 = vor.u32 %v11976_v38, %v10260_v25  ;;  %v3885_v25 = vadd.f32 %v12861_v33, %v3871_v9  ;;  %v3887_v38 = vadd.f32 %v3886_v45, %v3873_v36 }
 0x378   :  { %v3731_v56 = vadd.f32 %v13086_v26, %v3717_v62  ;;  %v12008_v61 = vld [vmem:[#allocation6 + $0x5ec] sm:$0xf0]  ;;  %v10516_v0 = vld [vmem:[#allocation6 + $0x6e0] sm:$0xf]  ;;  %v4194_v62 = vmax.f32 %v3733_v1, 0.0  ;;  %v3775_v1 = vadd.f32 %v12794_v10, %v3761_v30 }
 0x379   :  { %5787 = vmatpush.bf16.msra.mxu2 %v9909_v16  ;;  %v12040_v53 = vld [vmem:[#allocation6 + $0x6ec] sm:$0xf0]  ;;  %v10389_v43 = vor.u32 %v12008_v61, %v10388_v52  ;;  %v10244_v57 = vld [vmem:[#allocation6 + $0x4c0] sm:$0xf]  ;;  %v12890_v31 = vpack.c.bf16 %v4193_v32, %v4185_v12  ;;  %5760 = vmatpush.bf16.msra.mxu0 %v9637_v58  ;;  %v3759_v16 = vadd.f32 %v12773_v24, %v3745_v40  ;;  %v12908_v58 = vpop.f32.mrf.mxu2 }
 0x37a   :  { %v11972_v26 = vld [vmem:[#allocation6 + $0x4cc] sm:$0xf0]  ;;  %v10372_v59 = vld [vmem:[#allocation6 + $0x5c0] sm:$0xf]  ;;  %v4186_v6 = vmax.f32 %v3731_v56, 0.0  ;;  %v10517_v35 = vor.u32 %v12040_v53, %v10516_v0  ;;  %v3789_v41 = vadd.f32 %v12796_v5, %v3775_v1  ;;  %v3899_v45 = vadd.f32 %v12867_v48, %v3885_v25 }
 0x37b   :  { %5801 = vmatpush.bf16.msra.mxu3 %v10037_v47  ;;  %v12004_v19 = vld [vmem:[#allocation6 + $0x5cc] sm:$0xf0]  ;;  %5774 = vmatpush.bf16.msra.mxu1 %v9765_v50  ;;  %v10245_v46 = vor.u32 %v11972_v26, %v10244_v57  ;;  %v10500_v15 = vld [vmem:[#allocation6 + $0x6c0] sm:$0xf]  ;;  %v3773_v42 = vadd.f32 %v12779_v23, %v3759_v16 }
 0x37c   :  { %v12036_v47 = vld [vmem:[#allocation6 + $0x6cc] sm:$0xf0]  ;;  %v12899_v14 = vpack.c.bf16 %v4194_v62, %v4186_v6  ;;  %5761 = vmatmul.bf16.vlgmr.msra.gmra.mxu0 %v12886_v3  ;;  %v10373_v24 = vor.u32 %v12004_v19, %v10372_v59  ;;  %v10228_v8 = vld [vmem:[#allocation6 + $0x4a0] sm:$0xf]  ;;  %v3803_v26 = vadd.f32 %v12824_v37, %v3789_v41  ;;  %v3913_v48 = vadd.f32 %v12894_v4, %v3899_v45 }
 0x37d   :  { %5788 = vmatpush.bf16.msra.mxu2 %v9893_v51  ;;  %5809 = vmatpush.bf16.msrb.mxu0 %v10261_v39  ;;  %v11968_v7 = vld [vmem:[#allocation6 + $0x4ac] sm:$0xf0]  ;;  %v10356_v17 = vld [vmem:[#allocation6 + $0x5a0] sm:$0xf]  ;;  %v10501_v21 = vor.u32 %v12036_v47, %v10500_v15  ;;  %v3787_v10 = vadd.f32 %v12781_v49, %v3773_v42  ;;  %v12912_v50 = vpop.f32.mrf.mxu3  ;;  %v3901_v51 = vadd.f32 %v3900_v63, %v3887_v38  ;;  %v3914_v39 = vpop.f32.mrf.mxu0 }
 0x37e   :  { %5775 = vmatmul.bf16.vlgmr.msra.gmra.mxu1 %v12888_v60  ;;  %v12000_v44 = vld [vmem:[#allocation6 + $0x5ac] sm:$0xf0]  ;;  %v10229_v32 = vor.u32 %v11968_v7, %v10228_v8  ;;  %v10484_v56 = vld [vmem:[#allocation6 + $0x6a0] sm:$0xf]  ;;  %v3927_v4 = vadd.f32 %v12897_v22, %v3913_v48 }
 0x37f   :  { %5802 = vmatpush.bf16.msra.mxu3 %v10021_v54  ;;  %5823 = vmatpush.bf16.msrb.mxu1 %v10389_v43  ;;  %v12032_v40 = vld [vmem:[#allocation6 + $0x6ac] sm:$0xf0]  ;;  %v10357_v52 = vor.u32 %v12000_v44, %v10356_v17  ;;  %v10212_v61 = vld [vmem:[#allocation6 + $0x480] sm:$0xf]  ;;  %v3928_v43 = vpop.f32.mrf.mxu1  ;;  %v3801_v5 = vadd.f32 %v12803_v29, %v3787_v10  ;;  %v3915_v63 = vadd.f32 %v3914_v39, %v3901_v51  ;;  %v9750_v39 = vld [vmem:[#allocation6 + $0xf0] sm:$0xf0] }
 0x380   :  { %5789 = vmatmul.bf16.vlgmr.msra.gmra.mxu2 %v12890_v31  ;;  %v11964_v27 = vld [vmem:[#allocation6 + $0x48c] sm:$0xf0]  ;;  %v10340_v23 = vld [vmem:[#allocation6 + $0x580] sm:$0xf]  ;;  %v10485_v33 = vor.u32 %v12032_v40, %v10484_v56  ;;  %v3817_v29 = vadd.f32 %v12826_v55, %v3803_v26 }
 0x381   :  { %5837 = vmatpush.bf16.msrb.mxu2 %v10517_v35  ;;  %5810 = vmatpush.bf16.msrb.mxu0 %v10245_v46  ;;  %v11996_v12 = vld [vmem:[#allocation6 + $0x58c] sm:$0xf0]  ;;  %v10213_v28 = vor.u32 %v11964_v27, %v10212_v61  ;;  %v10468_v2 = vld [vmem:[#allocation6 + $0x680] sm:$0xf]  ;;  %v3942_v37 = vpop.f32.mrf.mxu2  ;;  %v3929_v8 = vadd.f32 %v3928_v43, %v3915_v63  ;;  %v3941_v27 = vadd.f32 %v12908_v58, %v3927_v4 }
 0x382   :  { %5803 = vmatmul.bf16.vlgmr.msra.gmra.mxu3 %v12899_v14  ;;  %v12028_v54 = vld [vmem:[#allocation6 + $0x68c] sm:$0xf0]  ;;  %v10341_v0 = vor.u32 %v11996_v12, %v10340_v23  ;;  %v10196_v53 = vld [vmem:[#allocation6 + $0x460] sm:$0xf]  ;;  %v3831_v42 = vadd.f32 %v12838_v11, %v3817_v29  ;;  %v677_v23 = vperm.slane %v12799_v13, 6 }
 0x383   :  { %5824 = vmatpush.bf16.msrb.mxu1 %v10373_v24  ;;  %v11960_v62 = vld [vmem:[#allocation6 + $0x46c] sm:$0xf0]  ;;  %v10324_v49 = vld [vmem:[#allocation6 + $0x560] sm:$0xf]  ;;  %v10469_v59 = vor.u32 %v12028_v54, %v10468_v2  ;;  %v3943_v56 = vadd.f32 %v3942_v37, %v3929_v8  ;;  %v9878_v13 = vld [vmem:[#allocation6 + $0x1f0] sm:$0xf0] }
 0x384   :  { %v11992_v57 = vld [vmem:[#allocation6 + $0x56c] sm:$0xf0]  ;;  %v10197_v19 = vor.u32 %v11960_v62, %v10196_v53  ;;  %v10452_v6 = vld [vmem:[#allocation6 + $0x660] sm:$0xf]  ;;  %v3845_v41 = vadd.f32 %v12844_v18, %v3831_v42  ;;  %v11878_v53 = vld [vmem:[#allocation6 + $0x1e4] sm:$0xf]  ;;  %v3955_v62 = vadd.f32 %v12912_v50, %v3941_v27 }
 0x385   :  { %5838 = vmatpush.bf16.msrb.mxu2 %v10501_v21  ;;  %5811 = vmatpush.bf16.msrb.mxu0 %v10229_v32  ;;  %v12024_v16 = vld [vmem:[#allocation6 + $0x66c] sm:$0xf0]  ;;  %v10325_v30 = vor.u32 %v11992_v57, %v10324_v49  ;;  %v10180_v35 = vld [vmem:[#allocation6 + $0x440] sm:$0xf]  ;;  %v3956_v1 = vpop.f32.mrf.mxu3  ;;  %v3968_v25 = vpop.f32.mrf.mxu0 }
 0x386   :  { %v11956_v9 = vld [vmem:[#allocation6 + $0x44c] sm:$0xf0]  ;;  %v10308_v36 = vld [vmem:[#allocation6 + $0x540] sm:$0xf]  ;;  %v10453_v24 = vor.u32 %v12024_v16, %v10452_v6  ;;  %v3957_v2 = vadd.f32 %v3956_v1, %v3943_v56  ;;  %v3969_v26 = vadd.f32 %v3968_v25, %v677_v23  ;;  %v10006_v6 = vld [vmem:[#allocation6 + $0x2f0] sm:$0xf0]  ;;  %v9881_v16 = vor.u32 %v11878_v53, %v9878_v13 }
 0x387   :  { %5825 = vmatpush.bf16.msrb.mxu1 %v10357_v52  ;;  %v11988_v46 = vld [vmem:[#allocation6 + $0x54c] sm:$0xf0]  ;;  %v13088_v15 = vld [vmem:[#allocation39_spill] sm:$0xff]  ;;  %v10181_v7 = vor.u32 %v11956_v9, %v10180_v35  ;;  %v3982_v52 = vpop.f32.mrf.mxu1  ;;  %v9734_v35 = vld [vmem:[#allocation6 + $0xd0] sm:$0xf0] }
 0x388   :  { %v3815_v47 = vadd.f32 %v13088_v15, %v3801_v5  ;;  %v10436_v17 = vld [vmem:[#allocation6 + $0x640] sm:$0xf]  ;;  %v12020_v44 = vld [vmem:[#allocation6 + $0x64c] sm:$0xf0]  ;;  %v10309_v21 = vor.u32 %v11988_v46, %v10308_v36  ;;  %v4195_v5 = vmax.f32 %v3845_v41, 0.0  ;;  %v3983_v4 = vadd.f32 %v3982_v52, %v3969_v26 }
 0x389   :  { %5839 = vmatpush.bf16.msrb.mxu2 %v10485_v33  ;;  %5812 = vmatpush.bf16.msrb.mxu0 %v10213_v28  ;;  %v10164_v38 = vld [vmem:[#allocation6 + $0x420] sm:$0xf]  ;;  %v11952_v32 = vld [vmem:[#allocation6 + $0x42c] sm:$0xf0]  ;;  %v10437_v22 = vor.u32 %v12020_v44, %v10436_v17  ;;  %v3996_v18 = vpop.f32.mrf.mxu2  ;;  %v11874_v46 = vld [vmem:[#allocation6 + $0x1c4] sm:$0xf] }
 0x38a   :  { %v10292_v55 = vld [vmem:[#allocation6 + $0x520] sm:$0xf]  ;;  %v11984_v40 = vld [vmem:[#allocation6 + $0x52c] sm:$0xf0]  ;;  %v3829_v61 = vadd.f32 %v12815_v34, %v3815_v47  ;;  %v10165_v11 = vor.u32 %v11952_v32, %v10164_v38  ;;  %v11846_v34 = vld [vmem:[#allocation6 + $0xe4] sm:$0xf] }
 0x38b   :  { %5826 = vmatpush.bf16.msrb.mxu1 %v10341_v0  ;;  %v10420_v12 = vld [vmem:[#allocation6 + $0x620] sm:$0xf]  ;;  %v12016_v10 = vld [vmem:[#allocation6 + $0x62c] sm:$0xf0]  ;;  %v10293_v33 = vor.u32 %v11984_v40, %v10292_v55  ;;  %v9753_v48 = vor.u32 %v11846_v34, %v9750_v39  ;;  %v9862_v15 = vld [vmem:[#allocation6 + $0x1d0] sm:$0xf0] }
 0x38c   :  { %v10148_v45 = vld [vmem:[#allocation6 + $0x400] sm:$0xf]  ;;  %v11948_v51 = vld [vmem:[#allocation6 + $0x40c] sm:$0xf0]  ;;  %v3843_v0 = vadd.f32 %v12819_v20, %v3829_v61  ;;  %v10421_v58 = vor.u32 %v12016_v10, %v10420_v12  ;;  %v4196_v20 = vmax.f32 %v3957_v2, 0.0  ;;  %v4188_v47 = vmax.f32 %v3955_v62, 0.0 }
 0x38d   :  { %5840 = vmatpush.bf16.msrb.mxu2 %v10469_v59  ;;  %5813 = vmatpush.bf16.msrb.mxu0 %v10197_v19  ;;  %v10276_v28 = vld [vmem:[#allocation6 + $0x500] sm:$0xf]  ;;  %v11980_v54 = vld [vmem:[#allocation6 + $0x50c] sm:$0xf0]  ;;  %v10149_v43 = vor.u32 %v11948_v51, %v10148_v45  ;;  %v4010_v63 = vpop.f32.mrf.mxu3  ;;  %v11910_v19 = vld [vmem:[#allocation6 + $0x2e4] sm:$0xf]  ;;  %v3970_v50 = vpop.f32.mrf.mxu0  ;;  %v9865_v1 = vor.u32 %v11874_v46, %v9862_v15 }
 0x38e   :  { %v10404_v49 = vld [vmem:[#allocation6 + $0x600] sm:$0xf]  ;;  %v12012_v57 = vld [vmem:[#allocation6 + $0x60c] sm:$0xf0]  ;;  %v10277_v59 = vor.u32 %v11980_v54, %v10276_v28  ;;  %v4187_v9 = vmax.f32 %v3843_v0, 0.0  ;;  %v10009_v37 = vor.u32 %v11910_v19, %v10006_v6  ;;  %v12930_v42 = vpack.c.bf16 %v4196_v20, %v4188_v47 }
 0x38f   :  { %5827 = vmatpush.bf16.msrb.mxu1 %v10325_v30  ;;  %v11842_v30 = vld [vmem:[#allocation6 + $0xc4] sm:$0xf]  ;;  %v10405_v36 = vor.u32 %v12012_v57, %v10404_v49  ;;  %v3984_v29 = vpop.f32.mrf.mxu1  ;;  %v9990_v44 = vld [vmem:[#allocation6 + $0x2d0] sm:$0xf0]  ;;  %v10644_v25 = vld [vmem:[#allocation6 + $0x7e0] sm:$0xf]  ;;  %v3971_v32 = vadd.f32 %v3970_v50, %v677_v23 }
 0x390   :  { %v9737_v8 = vor.u32 %v11842_v30, %v9734_v35  ;;  %v11906_v17 = vld [vmem:[#allocation6 + $0x2c4] sm:$0xf]  ;;  %v12072_v38 = vld [vmem:[#allocation6 + $0x7ec] sm:$0xf0]  ;;  %v9846_v55 = vld [vmem:[#allocation6 + $0x1b0] sm:$0xf0] }
 0x391   :  { %5841 = vmatpush.bf16.msrb.mxu2 %v10453_v24  ;;  %5814 = vmatpush.bf16.msrb.mxu0 %v10181_v7  ;;  %v12928_v24 = vpack.c.bf16 %v4195_v5, %v4187_v9  ;;  %v11838_v7 = vld [vmem:[#allocation6 + $0xa4] sm:$0xf]  ;;  %v10645_v40 = vor.u32 %v12072_v38, %v10644_v25  ;;  %v9993_v52 = vor.u32 %v11906_v17, %v9990_v44  ;;  %v10628_v12 = vld [vmem:[#allocation6 + $0x7c0] sm:$0xf]  ;;  %v12068_v10 = vld [vmem:[#allocation6 + $0x7cc] sm:$0xf0] }
 0x392   :  { %v11870_v56 = vld [vmem:[#allocation6 + $0x1a4] sm:$0xf]  ;;  %v9702_v45 = vld [vmem:[#allocation6 + $0x90] sm:$0xf0]  ;;  %v10629_v51 = vor.u32 %v12068_v10, %v10628_v12  ;;  %v3985_v28 = vadd.f32 %v3984_v29, %v3971_v32  ;;  %v10596_v9 = vld [vmem:[#allocation6 + $0x780] sm:$0xf] }
 0x393   :  { %5828 = vmatpush.bf16.msrb.mxu1 %v10309_v21  ;;  %v9718_v21 = vld [vmem:[#allocation6 + $0xb0] sm:$0xf0]  ;;  %v11902_v61 = vld [vmem:[#allocation6 + $0x2a4] sm:$0xf]  ;;  %5851 = vmatpush.bf16.msrb.mxu3 %v10645_v40  ;;  %v9849_v41 = vor.u32 %v11870_v56, %v9846_v55  ;;  %v12060_v50 = vld [vmem:[#allocation6 + $0x78c] sm:$0xf0] }
 0x394   :  { %v9721_v27 = vor.u32 %v11838_v7, %v9718_v21  ;;  %v11834_v23 = vld [vmem:[#allocation6 + $0x84] sm:$0xf]  ;;  %v9830_v34 = vld [vmem:[#allocation6 + $0x190] sm:$0xf0]  ;;  %v10597_v47 = vor.u32 %v12060_v50, %v10596_v9  ;;  %v10580_v32 = vld [vmem:[#allocation6 + $0x760] sm:$0xf] }
 0x395   :  { %5842 = vmatpush.bf16.msrb.mxu2 %v10437_v22  ;;  %5815 = vmatpush.bf16.msrb.mxu0 %v10165_v11  ;;  %v3997_v22 = vadd.f32 %v3996_v18, %v3983_v4  ;;  %v9974_v11 = vld [vmem:[#allocation6 + $0x2b0] sm:$0xf0]  ;;  %v4012_v2 = vpop.f32.mrf.mxu3  ;;  %v11866_v54 = vld [vmem:[#allocation6 + $0x184] sm:$0xf]  ;;  %v4024_v53 = vpop.f32.mrf.mxu0  ;;  %v9705_v13 = vor.u32 %v11834_v23, %v9702_v45  ;;  %v12064_v18 = vld [vmem:[#allocation6 + $0x7ac] sm:$0xf0] }
 0x396   :  { %v9977_v39 = vor.u32 %v11902_v61, %v9974_v11  ;;  %v11898_v0 = vld [vmem:[#allocation6 + $0x284] sm:$0xf]  ;;  %v9958_v62 = vld [vmem:[#allocation6 + $0x290] sm:$0xf0]  ;;  %v9833_v49 = vor.u32 %v11866_v54, %v9830_v34  ;;  %v12056_v56 = vld [vmem:[#allocation6 + $0x76c] sm:$0xf0] }
 0x397   :  { %5829 = vmatpush.bf16.msrb.mxu1 %v10293_v33  ;;  %v3998_v33 = vpop.f32.mrf.mxu2  ;;  %5852 = vmatpush.bf16.msrb.mxu3 %v10629_v51  ;;  %v4038_v57 = vpop.f32.mrf.mxu1  ;;  %v11830_v5 = vld [vmem:[#allocation6 + $0x64] sm:$0xf]  ;;  %v9686_v26 = vld [vmem:[#allocation6 + $0x70] sm:$0xf0]  ;;  %v9961_v20 = vor.u32 %v11898_v0, %v9958_v62  ;;  %v10581_v61 = vor.u32 %v12056_v56, %v10580_v32  ;;  %v10564_v51 = vld [vmem:[#allocation6 + $0x740] sm:$0xf] }
 0x398   :  { %v11862_v19 = vld [vmem:[#allocation6 + $0x164] sm:$0xf]  ;;  %v9814_v6 = vld [vmem:[#allocation6 + $0x170] sm:$0xf0]  ;;  %v9689_v30 = vor.u32 %v11830_v5, %v9686_v26 }
 0x399   :  { %5843 = vmatpush.bf16.msrb.mxu2 %v10421_v58  ;;  %5816 = vmatpush.bf16.msrb.mxu0 %v10149_v43  ;;  %v4011_v58 = vadd.f32 %v4010_v63, %v3997_v22  ;;  %v10612_v43 = vld [vmem:[#allocation6 + $0x7a0] sm:$0xf]  ;;  %v9942_v35 = vld [vmem:[#allocation6 + $0x270] sm:$0xf0]  ;;  %v11826_v46 = vld [vmem:[#allocation6 + $0x44] sm:$0xf] }
 0x39a   :  { %v9670_v15 = vld [vmem:[#allocation6 + $0x50] sm:$0xf0]  ;;  %v11890_v17 = vld [vmem:[#allocation6 + $0x244] sm:$0xf] }
 0x39b   :  { %5830 = vmatpush.bf16.msrb.mxu1 %v10277_v59  ;;  %v10613_v59 = vor.u32 %v12064_v18, %v10612_v43  ;;  %v4025_v63 = vadd.f32 %v4024_v53, %v4011_v58  ;;  %v9798_v4 = vld [vmem:[#allocation6 + $0x150] sm:$0xf0]  ;;  %v9673_v25 = vor.u32 %v11826_v46, %v9670_v15  ;;  %v11822_v40 = vld [vmem:[#allocation6 + $0x24] sm:$0xf] }
 0x39c   :  { %5817 = vmatmul.bf16.vlgmr.msrb.gmra.mxu0 %v12928_v24  ;;  %v9926_v38 = vld [vmem:[#allocation6 + $0x250] sm:$0xf0]  ;;  %v11818_v54 = vld [vmem:[#allocation6 + $0x4] sm:$0xf] }
 0x39d   :  { %5865 = vmatpush.bf16.msra.mxu0 %v9753_v48  ;;  %5844 = vmatpush.bf16.msrb.mxu2 %v10405_v36  ;;  %v3999_v48 = vadd.f32 %v3998_v33, %v3985_v28  ;;  %v9817_v36 = vor.u32 %v11862_v19, %v9814_v6  ;;  %v4039_v44 = vadd.f32 %v4038_v57, %v4025_v63  ;;  %v4066_v21 = vpop.f32.mrf.mxu3  ;;  %v9782_v11 = vld [vmem:[#allocation6 + $0x130] sm:$0xf0]  ;;  %v12052_v28 = vld [vmem:[#allocation6 + $0x74c] sm:$0xf0]  ;;  %v11882_v5 = vld [vmem:[#allocation6 + $0x204] sm:$0xf] }
 0x39e   :  { %5831 = vmatmul.bf16.vlgmr.msrb.gmra.mxu1 %v12930_v42  ;;  %5853 = vmatpush.bf16.msrb.mxu3 %v10613_v59  ;;  %v9929_v10 = vor.u32 %v11890_v17, %v9926_v38  ;;  %v9910_v45 = vld [vmem:[#allocation6 + $0x230] sm:$0xf0]  ;;  %v10565_v0 = vor.u32 %v12052_v28, %v10564_v51  ;;  %v12038_v15 = vld [vmem:[#allocation6 + $0x6e4] sm:$0xf]  ;;  %v10532_v17 = vld [vmem:[#allocation6 + $0x700] sm:$0xf] }
 0x39f   :  { %5879 = vmatpush.bf16.msra.mxu1 %v9881_v16  ;;  %v11894_v16 = vld [vmem:[#allocation6 + $0x264] sm:$0xf]  ;;  %v4013_v29 = vadd.f32 %v4012_v2, %v3999_v48  ;;  %v4040_v12 = vpop.f32.mrf.mxu1  ;;  %v9638_v34 = vld [vmem:[#allocation6 + $0x10] sm:$0xf0] }
 0x3a0   :  { %v9945_v7 = vor.u32 %v11894_v16, %v9942_v35  ;;  %v9766_v53 = vld [vmem:[#allocation6 + $0x110] sm:$0xf0]  ;;  %v9641_v19 = vor.u32 %v11818_v54, %v9638_v34  ;;  %v12048_v16 = vld [vmem:[#allocation6 + $0x72c] sm:$0xf0]  ;;  %v11970_v35 = vld [vmem:[#allocation6 + $0x4c4] sm:$0xf] }
 0x3a1   :  { %5893 = vmatpush.bf16.msra.mxu2 %v10009_v37  ;;  %5866 = vmatpush.bf16.msra.mxu0 %v9737_v8  ;;  %v11858_v37 = vld [vmem:[#allocation6 + $0x144] sm:$0xf]  ;;  %v4052_v8 = vpop.f32.mrf.mxu2  ;;  %v10262_v62 = vld [vmem:[#allocation6 + $0x4f0] sm:$0xf0] }
 0x3a2   :  { %5854 = vmatpush.bf16.msrb.mxu3 %v10597_v47  ;;  %v9801_v55 = vor.u32 %v11858_v37, %v9798_v4  ;;  %v4053_v33 = vadd.f32 %v4052_v8, %v4039_v44  ;;  %v10390_v57 = vld [vmem:[#allocation6 + $0x5f0] sm:$0xf0]  ;;  %v12002_v37 = vld [vmem:[#allocation6 + $0x5c4] sm:$0xf]  ;;  %v12044_v44 = vld [vmem:[#allocation6 + $0x70c] sm:$0xf0] }
 0x3a3   :  { %5880 = vmatpush.bf16.msra.mxu1 %v9865_v1  ;;  %v4026_v1 = vpop.f32.mrf.mxu0  ;;  %v9894_v6 = vld [vmem:[#allocation6 + $0x210] sm:$0xf0]  ;;  %v12030_v28 = vld [vmem:[#allocation6 + $0x6a4] sm:$0xf] }
 0x3a4   :  { %v4027_v22 = vadd.f32 %v4026_v1, %v4013_v29  ;;  %v4067_v26 = vadd.f32 %v4066_v21, %v4053_v33  ;;  %v10246_v46 = vld [vmem:[#allocation6 + $0x4d0] sm:$0xf0]  ;;  %v9897_v29 = vor.u32 %v11882_v5, %v9894_v6  ;;  %v11962_v33 = vld [vmem:[#allocation6 + $0x484] sm:$0xf] }
 0x3a5   :  { %5894 = vmatpush.bf16.msra.mxu2 %v9993_v52  ;;  %5867 = vmatpush.bf16.msra.mxu0 %v9721_v27  ;;  %v9654_v52 = vld [vmem:[#allocation6 + $0x30] sm:$0xf0]  ;;  %v11854_v27 = vld [vmem:[#allocation6 + $0x124] sm:$0xf]  ;;  %v4068_v48 = vpop.f32.mrf.mxu3  ;;  %v10249_v1 = vor.u32 %v11970_v35, %v10246_v46 }
 0x3a6   :  { %v9657_v23 = vor.u32 %v11822_v40, %v9654_v52  ;;  %5855 = vmatpush.bf16.msrb.mxu3 %v10581_v61  ;;  %v9785_v2 = vor.u32 %v11854_v27, %v9782_v11  ;;  %v4041_v58 = vadd.f32 %v4040_v12, %v4027_v22  ;;  %v10518_v47 = vld [vmem:[#allocation6 + $0x6f0] sm:$0xf0]  ;;  %v4189_v8 = vmax.f32 %v4067_v26, 0.0  ;;  %v12034_v40 = vld [vmem:[#allocation6 + $0x6c4] sm:$0xf] }
 0x3a7   :  { %5881 = vmatpush.bf16.msra.mxu1 %v9849_v41  ;;  %v11886_v41 = vld [vmem:[#allocation6 + $0x224] sm:$0xf]  ;;  %v10374_v4 = vld [vmem:[#allocation6 + $0x5d0] sm:$0xf0]  ;;  %v10521_v21 = vor.u32 %v12038_v15, %v10518_v47  ;;  %v10533_v61 = vor.u32 %v12044_v44, %v10532_v17 }
 0x3a8   :  { %v9913_v18 = vor.u32 %v11886_v41, %v9910_v45  ;;  %v10230_v38 = vld [vmem:[#allocation6 + $0x4b0] sm:$0xf0]  ;;  %v10377_v56 = vor.u32 %v12002_v37, %v10374_v4  ;;  %v11942_v27 = vld [vmem:[#allocation6 + $0x3e4] sm:$0xf] }
 0x3a9   :  { %5895 = vmatpush.bf16.msra.mxu2 %v9977_v39  ;;  %5868 = vmatpush.bf16.msra.mxu0 %v9705_v13  ;;  %v11850_v39 = vld [vmem:[#allocation6 + $0x104] sm:$0xf]  ;;  %v4054_v43 = vpop.f32.mrf.mxu2  ;;  %v10502_v52 = vld [vmem:[#allocation6 + $0x6d0] sm:$0xf0] }
 0x3aa   :  { %v11974_v13 = vld [vmem:[#allocation6 + $0x4e4] sm:$0xf]  ;;  %v4055_v59 = vadd.f32 %v4054_v43, %v4041_v58  ;;  %5856 = vmatpush.bf16.msrb.mxu3 %v10565_v0  ;;  %v9769_v63 = vor.u32 %v11850_v39, %v9766_v53  ;;  %v10358_v22 = vld [vmem:[#allocation6 + $0x5b0] sm:$0xf0]  ;;  %v10505_v41 = vor.u32 %v12034_v40, %v10502_v52 }
 0x3ab   :  { %5882 = vmatpush.bf16.msra.mxu1 %v9833_v49  ;;  %v12006_v49 = vld [vmem:[#allocation6 + $0x5e4] sm:$0xf]  ;;  %v10134_v11 = vld [vmem:[#allocation6 + $0x3f0] sm:$0xf0] }
 0x3ac   :  { %v4069_v50 = vadd.f32 %v4068_v48, %v4055_v59  ;;  %v10137_v12 = vor.u32 %v11942_v27, %v10134_v11  ;;  %v11938_v45 = vld [vmem:[#allocation6 + $0x3c4] sm:$0xf]  ;;  %v10118_v54 = vld [vmem:[#allocation6 + $0x3d0] sm:$0xf0]  ;;  %v4080_v27 = vpop.f32.mrf.mxu0 }
 0x3ad   :  { %5896 = vmatpush.bf16.msra.mxu2 %v9961_v20  ;;  %5869 = vmatpush.bf16.msra.mxu0 %v9689_v30  ;;  %v10548_v20 = vld [vmem:[#allocation6 + $0x720] sm:$0xf]  ;;  %v10265_v30 = vor.u32 %v11974_v13, %v10262_v62  ;;  %v11994_v34 = vld [vmem:[#allocation6 + $0x584] sm:$0xf]  ;;  %v10342_v39 = vld [vmem:[#allocation6 + $0x590] sm:$0xf0]  ;;  %v10121_v0 = vor.u32 %v11938_v45, %v10118_v54  ;;  %v4094_v54 = vpop.f32.mrf.mxu1 }
 0x3ae   :  { %v10549_v9 = vor.u32 %v12048_v16, %v10548_v20  ;;  %v11958_v13 = vld [vmem:[#allocation6 + $0x464] sm:$0xf]  ;;  %v10102_v43 = vld [vmem:[#allocation6 + $0x3b0] sm:$0xf0]  ;;  %v11849_v45 = vld [vmem:[#allocation6 + $0xf4] sm:$0xf0] }
 0x3af   :  { %5883 = vmatpush.bf16.msra.mxu1 %v9817_v36  ;;  %v10393_v36 = vor.u32 %v12006_v49, %v10390_v57  ;;  %v11934_v62 = vld [vmem:[#allocation6 + $0x3a4] sm:$0xf]  ;;  %v10198_v49 = vld [vmem:[#allocation6 + $0x470] sm:$0xf0] }
 0x3b0   :  { %5857 = vmatpush.bf16.msrb.mxu3 %v10549_v9  ;;  %v12026_v57 = vld [vmem:[#allocation6 + $0x684] sm:$0xf]  ;;  %v10470_v5 = vld [vmem:[#allocation6 + $0x690] sm:$0xf0]  ;;  %v10105_v48 = vor.u32 %v11934_v62, %v10102_v43 }
 0x3b1   :  { %5897 = vmatpush.bf16.msra.mxu2 %v9945_v7  ;;  %5870 = vmatpush.bf16.msra.mxu0 %v9673_v25  ;;  %v4197_v7 = vmax.f32 %v4069_v50, 0.0  ;;  %v11966_v25 = vld [vmem:[#allocation6 + $0x4a4] sm:$0xf]  ;;  %v10326_v59 = vld [vmem:[#allocation6 + $0x570] sm:$0xf0]  ;;  %v10473_v6 = vor.u32 %v12026_v57, %v10470_v5 }
 0x3b2   :  { %v11990_v26 = vld [vmem:[#allocation6 + $0x564] sm:$0xf]  ;;  %v10182_v35 = vld [vmem:[#allocation6 + $0x450] sm:$0xf0]  ;;  %v11845_v57 = vld [vmem:[#allocation6 + $0xd4] sm:$0xf0] }
 0x3b3   :  { %5884 = vmatpush.bf16.msra.mxu1 %v9801_v55  ;;  %v12934_v32 = vpack.c.bf16 %v4197_v7, %v4189_v8  ;;  %v11998_v55 = vld [vmem:[#allocation6 + $0x5a4] sm:$0xf]  ;;  %v10454_v50 = vld [vmem:[#allocation6 + $0x670] sm:$0xf0]  ;;  %v10012_v5 = vld [vmem:[#allocation6 + $0x2e8] sm:$0xf] }
 0x3b4   :  { %v10361_v51 = vor.u32 %v11998_v55, %v10358_v22  ;;  %5858 = vmatpush.bf16.msrb.mxu3 %v10533_v61  ;;  %v11954_v20 = vld [vmem:[#allocation6 + $0x444] sm:$0xf]  ;;  %v10310_v46 = vld [vmem:[#allocation6 + $0x550] sm:$0xf0] }
 0x3b5   :  { %5898 = vmatpush.bf16.msra.mxu2 %v9929_v10  ;;  %5871 = vmatpush.bf16.msra.mxu0 %v9657_v23  ;;  %v10233_v10 = vor.u32 %v11966_v25, %v10230_v38  ;;  %v10214_v23 = vld [vmem:[#allocation6 + $0x490] sm:$0xf0]  ;;  %v11930_v16 = vld [vmem:[#allocation6 + $0x384] sm:$0xf]  ;;  %v10185_v47 = vor.u32 %v11954_v20, %v10182_v35  ;;  %v11877_v20 = vld [vmem:[#allocation6 + $0x1d4] sm:$0xf0] }
 0x3b6   :  { %5845 = vmatmul.bf16.vlgmr.msrb.gmra.mxu2 %v12934_v32  ;;  %v10217_v58 = vor.u32 %v11962_v33, %v10214_v23  ;;  %v12022_v9 = vld [vmem:[#allocation6 + $0x664] sm:$0xf]  ;;  %v10070_v8 = vld [vmem:[#allocation6 + $0x370] sm:$0xf0]  ;;  %v9756_v23 = vld [vmem:[#allocation6 + $0xe8] sm:$0xf] }
 0x3b7   :  { %5885 = vmatpush.bf16.msra.mxu1 %v9785_v2  ;;  %v10486_v2 = vld [vmem:[#allocation6 + $0x6b0] sm:$0xf0]  ;;  %v11950_v37 = vld [vmem:[#allocation6 + $0x424] sm:$0xf] }
 0x3b8   :  { %5907 = vmatpush.bf16.msra.mxu3 %v10137_v12  ;;  %v10489_v53 = vor.u32 %v12030_v28, %v10486_v2  ;;  %v11926_v4 = vld [vmem:[#allocation6 + $0x364] sm:$0xf]  ;;  %v10166_v17 = vld [vmem:[#allocation6 + $0x430] sm:$0xf0]  ;;  %v9884_v28 = vld [vmem:[#allocation6 + $0x1e8] sm:$0xf] }
 0x3b9   :  { %5899 = vmatpush.bf16.msra.mxu2 %v9913_v18  ;;  %5872 = vmatpush.bf16.msra.mxu0 %v9641_v19  ;;  %v10345_v18 = vor.u32 %v11994_v34, %v10342_v39  ;;  %v10201_v19 = vor.u32 %v11958_v13, %v10198_v49  ;;  %v12018_v44 = vld [vmem:[#allocation6 + $0x644] sm:$0xf]  ;;  %v10294_v25 = vld [vmem:[#allocation6 + $0x530] sm:$0xf0]  ;;  %v10073_v38 = vor.u32 %v11926_v4, %v10070_v8  ;;  %v11881_v2 = vld [vmem:[#allocation6 + $0x1f4] sm:$0xf0] }
 0x3ba   :  { %v10169_v55 = vor.u32 %v11950_v37, %v10166_v17  ;;  %v10150_v52 = vld [vmem:[#allocation6 + $0x410] sm:$0xf0]  ;;  %v11922_v61 = vld [vmem:[#allocation6 + $0x344] sm:$0xf]  ;;  %v9757_v13 = vor.u32 %v11849_v45, %v9756_v23  ;;  %v9885_v49 = vor.u32 %v11881_v2, %v9884_v28  ;;  %v11909_v37 = vld [vmem:[#allocation6 + $0x2d4] sm:$0xf0] }
 0x3bb   :  { %5886 = vmatpush.bf16.msra.mxu1 %v9769_v63  ;;  %v10086_v63 = vld [vmem:[#allocation6 + $0x390] sm:$0xf0]  ;;  %v11978_v12 = vld [vmem:[#allocation6 + $0x504] sm:$0xf]  ;;  %v9852_v17 = vld [vmem:[#allocation6 + $0x1a8] sm:$0xf] }
 0x3bc   :  { %5873 = vmatmul.bf16.vlgmr.msra.gmra.mxu0 %v12886_v3  ;;  %5908 = vmatpush.bf16.msra.mxu3 %v10121_v0  ;;  %v10089_v15 = vor.u32 %v11930_v16, %v10086_v63  ;;  %v10054_v22 = vld [vmem:[#allocation6 + $0x350] sm:$0xf0]  ;;  %v11918_v0 = vld [vmem:[#allocation6 + $0x324] sm:$0xf]  ;;  %v4108_v16 = vpop.f32.mrf.mxu2  ;;  %v11833_v45 = vld [vmem:[#allocation6 + $0x74] sm:$0xf0] }
 0x3bd   :  { %5921 = vmatpush.bf16.msrb.mxu0 %v10265_v30  ;;  %5900 = vmatpush.bf16.msra.mxu2 %v9897_v29  ;;  %v10329_v30 = vor.u32 %v11990_v26, %v10326_v59  ;;  %v10457_v29 = vor.u32 %v12022_v9, %v10454_v50  ;;  %v10278_v33 = vld [vmem:[#allocation6 + $0x510] sm:$0xf0]  ;;  %v12010_v62 = vld [vmem:[#allocation6 + $0x604] sm:$0xf]  ;;  %v11913_v26 = vld [vmem:[#allocation6 + $0x2f4] sm:$0xf0]  ;;  %v12940_v9 = vpop.f32.mrf.mxu3 }
 0x3be   :  { %5887 = vmatmul.bf16.vlgmr.msra.gmra.mxu1 %v12888_v60  ;;  %v10406_v43 = vld [vmem:[#allocation6 + $0x610] sm:$0xf0]  ;;  %v11901_v28 = vld [vmem:[#allocation6 + $0x294] sm:$0xf0] }
 0x3bf   :  { %5935 = vmatpush.bf16.msrb.mxu1 %v10393_v36  ;;  %v11986_v36 = vld [vmem:[#allocation6 + $0x544] sm:$0xf]  ;;  %v10409_v63 = vor.u32 %v12010_v62, %v10406_v43  ;;  %v10022_v35 = vld [vmem:[#allocation6 + $0x310] sm:$0xf0]  ;;  %v9676_v62 = vld [vmem:[#allocation6 + $0x48] sm:$0xf] }
 0x3c0   :  { %5909 = vmatpush.bf16.msra.mxu3 %v10105_v48  ;;  %v10313_v7 = vor.u32 %v11986_v36, %v10310_v46  ;;  %v12251_v48 = vld [vmem:[#allocation4] sm:$0xff]  ;;  %v10013_v36 = vor.u32 %v11913_v26, %v10012_v5  ;;  %v9724_v46 = vld [vmem:[#allocation6 + $0xa8] sm:$0xf] }
 0x3c1   :  { %5922 = vmatpush.bf16.msrb.mxu0 %v10249_v1  ;;  %5949 = vmatpush.bf16.msrb.mxu2 %v10521_v21  ;;  %v10438_v1 = vld [vmem:[#allocation6 + $0x650] sm:$0xf0]  ;;  %v11982_v21 = vld [vmem:[#allocation6 + $0x524] sm:$0xf]  ;;  %v11897_v5 = vld [vmem:[#allocation6 + $0x274] sm:$0xf0] }
 0x3c2   :  { %v10441_v40 = vor.u32 %v12018_v44, %v10438_v1  ;;  %v10297_v11 = vor.u32 %v11982_v21, %v10294_v25  ;;  %v11873_v44 = vld [vmem:[#allocation6 + $0x1b4] sm:$0xf0]  ;;  %v9708_v25 = vld [vmem:[#allocation6 + $0x88] sm:$0xf] }
 0x3c3   :  { %5936 = vmatpush.bf16.msrb.mxu1 %v10377_v56  ;;  %v11946_v56 = vld [vmem:[#allocation6 + $0x404] sm:$0xf] }
 0x3c4   :  { %5910 = vmatpush.bf16.msra.mxu3 %v10089_v15  ;;  %v10153_v34 = vor.u32 %v11946_v56, %v10150_v52  ;;  %v9853_v56 = vor.u32 %v11873_v44, %v9852_v17  ;;  %v11905_v52 = vld [vmem:[#allocation6 + $0x2b4] sm:$0xf0]  ;;  %v9644_v44 = vld [vmem:[#allocation6 + $0x8] sm:$0xf] }
 0x3c5   :  { %5923 = vmatpush.bf16.msrb.mxu0 %v10233_v10  ;;  %5950 = vmatpush.bf16.msrb.mxu2 %v10505_v41  ;;  %v12014_v10 = vld [vmem:[#allocation6 + $0x624] sm:$0xf]  ;;  %v10422_v41 = vld [vmem:[#allocation6 + $0x630] sm:$0xf0] }
 0x3c6   :  { %5901 = vmatmul.bf16.vlgmr.msra.gmra.mxu2 %v12890_v31  ;;  %v10425_v39 = vor.u32 %v12014_v10, %v10422_v41  ;;  %v9692_v41 = vld [vmem:[#allocation6 + $0x68] sm:$0xf] }
 0x3c7   :  { %5937 = vmatpush.bf16.msrb.mxu1 %v10361_v51  ;;  %v10057_v51 = vor.u32 %v11922_v61, %v10054_v22 }
 0x3c8   :  { %5911 = vmatpush.bf16.msra.mxu3 %v10073_v38  ;;  %v4096_v38 = vpop.f32.mrf.mxu1 }
 0x3c9   :  { %5924 = vmatpush.bf16.msrb.mxu0 %v10217_v58  ;;  %5951 = vmatpush.bf16.msrb.mxu2 %v10489_v53  ;;  %v10038_v58 = vld [vmem:[#allocation6 + $0x330] sm:$0xf0]  ;;  %v10281_v53 = vor.u32 %v11978_v12, %v10278_v33  ;;  %v4110_v33 = vpop.f32.mrf.mxu2 }
 0x3ca   :  { %v10041_v59 = vor.u32 %v11918_v0, %v10038_v58  ;;  %v9820_v0 = vld [vmem:[#allocation6 + $0x168] sm:$0xf]  ;;  %v11865_v58 = vld [vmem:[#allocation6 + $0x174] sm:$0xf0] }
 0x3cb   :  { %5938 = vmatpush.bf16.msrb.mxu1 %v10345_v18  ;;  %v9740_v18 = vld [vmem:[#allocation6 + $0xc8] sm:$0xf] }
 0x3cc   :  { %5912 = vmatpush.bf16.msra.mxu3 %v10057_v51  ;;  %v9741_v50 = vor.u32 %v11845_v57, %v9740_v18  ;;  %v9964_v51 = vld [vmem:[#allocation6 + $0x288] sm:$0xf]  ;;  %v9821_v18 = vor.u32 %v11865_v58, %v9820_v0  ;;  %v11973_v0 = vld [vmem:[#allocation6 + $0x4d4] sm:$0xf0] }
 0x3cd   :  { %5925 = vmatpush.bf16.msrb.mxu0 %v10201_v19  ;;  %5952 = vmatpush.bf16.msrb.mxu2 %v10473_v6  ;;  %v678_v19 = vperm.slane %v12251_v48, 7  ;;  %v9868_v6 = vld [vmem:[#allocation6 + $0x1c8] sm:$0xf] }
 0x3ce   :  { %v9869_v15 = vor.u32 %v11877_v20, %v9868_v6  ;;  %v9948_v57 = vld [vmem:[#allocation6 + $0x268] sm:$0xf] }
 0x3cf   :  { %5939 = vmatpush.bf16.msrb.mxu1 %v10329_v30  ;;  %v11914_v30 = vld [vmem:[#allocation6 + $0x304] sm:$0xf]  ;;  %v4081_v8 = vadd.f32 %v4080_v27, %v678_v19  ;;  %v9836_v27 = vld [vmem:[#allocation6 + $0x188] sm:$0xf] }
 0x3d0   :  { %5913 = vmatpush.bf16.msra.mxu3 %v10041_v59  ;;  %v10025_v4 = vor.u32 %v11914_v30, %v10022_v35  ;;  %v9804_v48 = vld [vmem:[#allocation6 + $0x148] sm:$0xf]  ;;  %v11825_v30 = vld [vmem:[#allocation6 + $0x34] sm:$0xf0] }
 0x3d1   :  { %5926 = vmatpush.bf16.msrb.mxu0 %v10185_v47  ;;  %5953 = vmatpush.bf16.msrb.mxu2 %v10457_v29  ;;  %v11841_v47 = vld [vmem:[#allocation6 + $0xb4] sm:$0xf0]  ;;  %v9996_v29 = vld [vmem:[#allocation6 + $0x2c8] sm:$0xf]  ;;  %v4095_v61 = vadd.f32 %v4094_v54, %v4081_v8 }
 0x3d2   :  { %v9725_v1 = vor.u32 %v11841_v47, %v9724_v46  ;;  %v9997_v21 = vor.u32 %v11909_v37, %v9996_v29  ;;  %v11893_v46 = vld [vmem:[#allocation6 + $0x254] sm:$0xf0]  ;;  %v9788_v37 = vld [vmem:[#allocation6 + $0x128] sm:$0xf] }
 0x3d3   :  { %5940 = vmatpush.bf16.msrb.mxu1 %v10313_v7  ;;  %v4082_v7 = vpop.f32.mrf.mxu0  ;;  %v4109_v2 = vadd.f32 %v4108_v16, %v4095_v61  ;;  %v9949_v16 = vor.u32 %v11897_v5, %v9948_v57  ;;  %v11977_v61 = vld [vmem:[#allocation6 + $0x4f4] sm:$0xf0]  ;;  %v10524_v58 = vld [vmem:[#allocation6 + $0x6e8] sm:$0xf]  ;;  %v12070_v57 = vld [vmem:[#allocation6 + $0x7e4] sm:$0xf] }
 0x3d4   :  { %5914 = vmatpush.bf16.msra.mxu3 %v10025_v4  ;;  %v4083_v22 = vadd.f32 %v4082_v7, %v678_v19  ;;  %v11861_v19 = vld [vmem:[#allocation6 + $0x154] sm:$0xf0]  ;;  %v10646_v5 = vld [vmem:[#allocation6 + $0x7f0] sm:$0xf0] }
 0x3d5   :  { %5927 = vmatpush.bf16.msrb.mxu0 %v10169_v55  ;;  %5954 = vmatpush.bf16.msrb.mxu2 %v10441_v40  ;;  %v11837_v55 = vld [vmem:[#allocation6 + $0x94] sm:$0xf0]  ;;  %v9980_v40 = vld [vmem:[#allocation6 + $0x2a8] sm:$0xf]  ;;  %v4123_v26 = vadd.f32 %v12940_v9, %v4109_v2 }
 0x3d6   :  { %v9709_v12 = vor.u32 %v11837_v55, %v9708_v25  ;;  %v9981_v10 = vor.u32 %v11905_v52, %v9980_v40  ;;  %v11857_v9 = vld [vmem:[#allocation6 + $0x134] sm:$0xf0]  ;;  %v9772_v25 = vld [vmem:[#allocation6 + $0x108] sm:$0xf] }
 0x3d7   :  { %5941 = vmatpush.bf16.msrb.mxu1 %v10297_v11  ;;  %v11869_v11 = vld [vmem:[#allocation6 + $0x194] sm:$0xf0]  ;;  %v10268_v52 = vld [vmem:[#allocation6 + $0x4e8] sm:$0xf] }
 0x3d8   :  { %v9837_v23 = vor.u32 %v11869_v11, %v9836_v27  ;;  %v11853_v40 = vld [vmem:[#allocation6 + $0x114] sm:$0xf0]  ;;  %v10396_v27 = vld [vmem:[#allocation6 + $0x5e8] sm:$0xf] }
 0x3d9   :  { %5928 = vmatpush.bf16.msrb.mxu0 %v10153_v34  ;;  %5955 = vmatpush.bf16.msrb.mxu2 %v10425_v39  ;;  %v4097_v34 = vadd.f32 %v4096_v38, %v4083_v22  ;;  %v4124_v39 = vpop.f32.mrf.mxu3  ;;  %v9916_v38 = vld [vmem:[#allocation6 + $0x228] sm:$0xf]  ;;  %v12009_v11 = vld [vmem:[#allocation6 + $0x5f4] sm:$0xf0] }
 0x3da   :  { %v10252_v2 = vld [vmem:[#allocation6 + $0x4c8] sm:$0xf] }
 0x3db   :  { %5942 = vmatpush.bf16.msrb.mxu1 %v10281_v53  ;;  %v4136_v54 = vpop.f32.mrf.mxu0  ;;  %v9693_v53 = vor.u32 %v11833_v45, %v9692_v41  ;;  %v4150_v43 = vpop.f32.mrf.mxu1  ;;  %v4111_v59 = vadd.f32 %v4110_v33, %v4097_v34  ;;  %v10269_v45 = vor.u32 %v11977_v61, %v10268_v52  ;;  %v11961_v61 = vld [vmem:[#allocation6 + $0x474] sm:$0xf0] }
 0x3dc   :  { %5929 = vmatmul.bf16.vlgmr.msrb.gmra.mxu0 %v12928_v24  ;;  %v4137_v6 = vadd.f32 %v4136_v54, %v4123_v26  ;;  %v10397_v54 = vor.u32 %v12009_v11, %v10396_v27  ;;  %v10253_v26 = vor.u32 %v11973_v0, %v10252_v2  ;;  %v12029_v27 = vld [vmem:[#allocation6 + $0x694] sm:$0xf0]  ;;  %v10316_v0 = vld [vmem:[#allocation6 + $0x548] sm:$0xf] }
 0x3dd   :  { %5977 = vmatpush.bf16.msra.mxu0 %v9757_v13  ;;  %5956 = vmatpush.bf16.msrb.mxu2 %v10409_v63  ;;  %v9965_v13 = vor.u32 %v11901_v28, %v9964_v51  ;;  %v9660_v63 = vld [vmem:[#allocation6 + $0x28] sm:$0xf]  ;;  %v11885_v28 = vld [vmem:[#allocation6 + $0x214] sm:$0xf0] }
 0x3de   :  { %5943 = vmatmul.bf16.vlgmr.msrb.gmra.mxu1 %v12930_v42  ;;  %v9661_v4 = vor.u32 %v11825_v30, %v9660_v63  ;;  %v4151_v8 = vadd.f32 %v4150_v43, %v4137_v6  ;;  %v9900_v51 = vld [vmem:[#allocation6 + $0x208] sm:$0xf]  ;;  %v12005_v43 = vld [vmem:[#allocation6 + $0x5d4] sm:$0xf0] }
 0x3df   :  { %5991 = vmatpush.bf16.msra.mxu1 %v9885_v49  ;;  %v11829_v49 = vld [vmem:[#allocation6 + $0x54] sm:$0xf0]  ;;  %v10508_v63 = vld [vmem:[#allocation6 + $0x6c8] sm:$0xf] }
 0x3e0   :  { %5957 = vmatmul.bf16.vlgmr.msrb.gmra.mxu2 %v12934_v32  ;;  %v9677_v20 = vor.u32 %v11829_v49, %v9676_v62  ;;  %v10380_v62 = vld [vmem:[#allocation6 + $0x5c8] sm:$0xf]  ;;  %v9901_v49 = vor.u32 %v11885_v28, %v9900_v51  ;;  %v12037_v30 = vld [vmem:[#allocation6 + $0x6d4] sm:$0xf0] }
 0x3e1   :  { %5978 = vmatpush.bf16.msra.mxu0 %v9741_v50  ;;  %6005 = vmatpush.bf16.msra.mxu2 %v10013_v36  ;;  %v9805_v50 = vor.u32 %v11861_v19, %v9804_v48  ;;  %v9932_v36 = vld [vmem:[#allocation6 + $0x248] sm:$0xf]  ;;  %v11969_v19 = vld [vmem:[#allocation6 + $0x4b4] sm:$0xf0] }
 0x3e2   :  { %v9933_v17 = vor.u32 %v11893_v46, %v9932_v36  ;;  %v10236_v48 = vld [vmem:[#allocation6 + $0x4a8] sm:$0xf]  ;;  %v12001_v36 = vld [vmem:[#allocation6 + $0x5b4] sm:$0xf0] }
 0x3e3   :  { %5992 = vmatpush.bf16.msra.mxu1 %v9869_v15  ;;  %v4164_v35 = vpop.f32.mrf.mxu2  ;;  %v4125_v15 = vadd.f32 %v4124_v39, %v4111_v59  ;;  %v4138_v29 = vpop.f32.mrf.mxu0  ;;  %v10188_v51 = vld [vmem:[#allocation6 + $0x448] sm:$0xf]  ;;  %v11957_v2 = vld [vmem:[#allocation6 + $0x454] sm:$0xf0] }
 0x3e4   :  { %v4165_v55 = vadd.f32 %v4164_v35, %v4151_v8  ;;  %v4152_v22 = vpop.f32.mrf.mxu1  ;;  %v10649_v35 = vor.u32 %v12070_v57, %v10646_v5  ;;  %v11965_v8 = vld [vmem:[#allocation6 + $0x494] sm:$0xf0]  ;;  %v10444_v5 = vld [vmem:[#allocation6 + $0x648] sm:$0xf] }
 0x3e5   :  { %5979 = vmatpush.bf16.msra.mxu0 %v9725_v1  ;;  %6006 = vmatpush.bf16.msra.mxu2 %v9997_v21  ;;  %v4178_v47 = vpop.f32.mrf.mxu3  ;;  %v4139_v7 = vadd.f32 %v4138_v29, %v4125_v15  ;;  %v11821_v1 = vld [vmem:[#allocation6 + $0x14] sm:$0xf0]  ;;  %v9789_v21 = vor.u32 %v11857_v9, %v9788_v37  ;;  %v12066_v15 = vld [vmem:[#allocation6 + $0x7c4] sm:$0xf]  ;;  %v10237_v29 = vor.u32 %v11969_v19, %v10236_v48  ;;  %v10220_v9 = vld [vmem:[#allocation6 + $0x488] sm:$0xf] }
 0x3e6   :  { %v4179_v34 = vadd.f32 %v4178_v47, %v4165_v55  ;;  %v10630_v47 = vld [vmem:[#allocation6 + $0x7d0] sm:$0xf0]  ;;  %v10509_v37 = vor.u32 %v12037_v30, %v10508_v63  ;;  %v11953_v57 = vld [vmem:[#allocation6 + $0x434] sm:$0xf0]  ;;  %v10300_v48 = vld [vmem:[#allocation6 + $0x528] sm:$0xf] }
 0x3e7   :  { %5993 = vmatpush.bf16.msra.mxu1 %v9853_v56  ;;  %v11889_v56 = vld [vmem:[#allocation6 + $0x234] sm:$0xf0]  ;;  %v10156_v30 = vld [vmem:[#allocation6 + $0x408] sm:$0xf] }
 0x3e8   :  { %v9917_v41 = vor.u32 %v11889_v56, %v9916_v38  ;;  %v4190_v6 = vmax.f32 %v4179_v34, 0.0  ;;  %v10614_v38 = vld [vmem:[#allocation6 + $0x7b0] sm:$0xf0]  ;;  %v10221_v56 = vor.u32 %v11965_v8, %v10220_v9  ;;  %v10460_v34 = vld [vmem:[#allocation6 + $0x668] sm:$0xf] }
 0x3e9   :  { %5980 = vmatpush.bf16.msra.mxu0 %v9709_v12  ;;  %6007 = vmatpush.bf16.msra.mxu2 %v9981_v10  ;;  %v4153_v12 = vadd.f32 %v4152_v22, %v4139_v7  ;;  %v9645_v10 = vor.u32 %v11821_v1, %v9644_v44  ;;  %v10492_v7 = vld [vmem:[#allocation6 + $0x6a8] sm:$0xf]  ;;  %v10633_v44 = vor.u32 %v12066_v15, %v10630_v47  ;;  %v11985_v19 = vld [vmem:[#allocation6 + $0x534] sm:$0xf0]  ;;  %v12046_v9 = vld [vmem:[#allocation6 + $0x724] sm:$0xf] }
 0x3ea   :  { %v10348_v1 = vld [vmem:[#allocation6 + $0x588] sm:$0xf]  ;;  %v11981_v15 = vld [vmem:[#allocation6 + $0x514] sm:$0xf0]  ;;  %v9758_v8 = vld [vmem:[#allocation6 + $0xf8] sm:$0xf0] }
 0x3eb   :  { %5994 = vmatpush.bf16.msra.mxu1 %v9837_v23  ;;  %v4166_v33 = vpop.f32.mrf.mxu2  ;;  %v9773_v23 = vor.u32 %v11853_v40, %v9772_v25  ;;  %v12062_v25 = vld [vmem:[#allocation6 + $0x7a4] sm:$0xf]  ;;  %v10204_v40 = vld [vmem:[#allocation6 + $0x468] sm:$0xf] }
 0x3ec   :  { %v4167_v39 = vadd.f32 %v4166_v33, %v4153_v12  ;;  %v10476_v22 = vld [vmem:[#allocation6 + $0x688] sm:$0xf]  ;;  %v10617_v11 = vor.u32 %v12062_v25, %v10614_v38  ;;  %v10598_v33 = vld [vmem:[#allocation6 + $0x790] sm:$0xf0] }
 0x3ed   :  { %5981 = vmatpush.bf16.msra.mxu0 %v9693_v53  ;;  %6008 = vmatpush.bf16.msra.mxu2 %v9965_v13  ;;  %v12041_v53 = vld [vmem:[#allocation6 + $0x6f4] sm:$0xf0]  ;;  %v4180_v13 = vpop.f32.mrf.mxu3  ;;  %v10332_v12 = vld [vmem:[#allocation6 + $0x568] sm:$0xf] }
 0x3ee   :  { %v10525_v59 = vor.u32 %v12041_v53, %v10524_v58  ;;  %v11989_v58 = vld [vmem:[#allocation6 + $0x554] sm:$0xf0]  ;;  %v12054_v53 = vld [vmem:[#allocation6 + $0x764] sm:$0xf]  ;;  %v10428_v47 = vld [vmem:[#allocation6 + $0x628] sm:$0xf] }
 0x3ef   :  { %5995 = vmatpush.bf16.msra.mxu1 %v9821_v18  ;;  %v4181_v18 = vadd.f32 %v4180_v13, %v4167_v39  ;;  %v12025_v39 = vld [vmem:[#allocation6 + $0x674] sm:$0xf0]  ;;  %v10582_v13 = vld [vmem:[#allocation6 + $0x770] sm:$0xf0] }
 0x3f1   :  { %5982 = vmatpush.bf16.msra.mxu0 %v9677_v20  ;;  %6009 = vmatpush.bf16.msra.mxu2 %v9949_v16  ;;  %v4198_v20 = vmax.f32 %v4181_v18, 0.0  ;;  %v10381_v16 = vor.u32 %v12005_v43, %v10380_v62  ;;  %v10189_v62 = vor.u32 %v11957_v2, %v10188_v51  ;;  %v10461_v43 = vor.u32 %v12025_v39, %v10460_v34  ;;  %v10172_v18 = vld [vmem:[#allocation6 + $0x428] sm:$0xf]  ;;  %v11945_v51 = vld [vmem:[#allocation6 + $0x3f4] sm:$0xf0] }
 0x3f3   :  { %5996 = vmatpush.bf16.msra.mxu1 %v9805_v50  ;;  %v10364_v50 = vld [vmem:[#allocation6 + $0x5a8] sm:$0xf]  ;;  %v12947_v46 = vpack.c.bf16 %v4198_v20, %v4190_v6  ;;  %v12050_v6 = vld [vmem:[#allocation6 + $0x744] sm:$0xf]  ;;  %v10566_v20 = vld [vmem:[#allocation6 + $0x750] sm:$0xf0] }
 0x3f5   :  { %5983 = vmatpush.bf16.msra.mxu0 %v9661_v4  ;;  %6010 = vmatpush.bf16.msra.mxu2 %v9933_v17  ;;  %v10365_v4 = vor.u32 %v12001_v36, %v10364_v50  ;;  %v12033_v17 = vld [vmem:[#allocation6 + $0x6b4] sm:$0xf0]  ;;  %v10284_v50 = vld [vmem:[#allocation6 + $0x508] sm:$0xf]  ;;  %v10301_v36 = vor.u32 %v11985_v19, %v10300_v48  ;;  %v9710_v48 = vld [vmem:[#allocation6 + $0x98] sm:$0xf0] }
 0x3f6   :  { %5859 = vmatmul.bf16.vlgmr.msrb.gmra.mxu3 %v12947_v46  ;;  %v10493_v55 = vor.u32 %v12033_v17, %v10492_v7  ;;  %v10550_v7 = vld [vmem:[#allocation6 + $0x730] sm:$0xf0]  ;;  %v11879_v17 = vld [vmem:[#allocation6 + $0x1ec] sm:$0xf]  ;;  %v10285_v25 = vor.u32 %v11981_v15, %v10284_v50 }
 0x3f7   :  { %5997 = vmatpush.bf16.msra.mxu1 %v9789_v21  ;;  %5963 = vmatpush.bf16.msrb.mxu3 %v10649_v35  ;;  %v11997_v21 = vld [vmem:[#allocation6 + $0x594] sm:$0xf0]  ;;  %v11867_v19 = vld [vmem:[#allocation6 + $0x18c] sm:$0xf] }
 0x3f8   :  { %v10349_v52 = vor.u32 %v11997_v21, %v10348_v1  ;;  %v11949_v35 = vld [vmem:[#allocation6 + $0x414] sm:$0xf0] }
 0x3f9   :  { %5984 = vmatpush.bf16.msra.mxu0 %v9645_v10  ;;  %6011 = vmatpush.bf16.msra.mxu2 %v9917_v41  ;;  %v11993_v10 = vld [vmem:[#allocation6 + $0x574] sm:$0xf0]  ;;  %v12058_v41 = vld [vmem:[#allocation6 + $0x784] sm:$0xf]  ;;  %v10157_v1 = vor.u32 %v11949_v35, %v10156_v30  ;;  %v10108_v30 = vld [vmem:[#allocation6 + $0x3a8] sm:$0xf] }
 0x3fa   :  { %v10333_v28 = vor.u32 %v11993_v10, %v10332_v12  ;;  %v10014_v12 = vld [vmem:[#allocation6 + $0x2f8] sm:$0xf0]  ;;  %v10534_v10 = vld [vmem:[#allocation6 + $0x710] sm:$0xf0]  ;;  %v11937_v35 = vld [vmem:[#allocation6 + $0x3b4] sm:$0xf0] }
 0x3fb   :  { %5998 = vmatpush.bf16.msra.mxu1 %v9773_v23  ;;  %5964 = vmatpush.bf16.msrb.mxu3 %v10633_v44  ;;  %v10205_v23 = vor.u32 %v11961_v61, %v10204_v40  ;;  %v9886_v44 = vld [vmem:[#allocation6 + $0x1f8] sm:$0xf0]  ;;  %v12013_v40 = vld [vmem:[#allocation6 + $0x614] sm:$0xf0]  ;;  %v10553_v61 = vor.u32 %v12046_v9, %v10550_v7  ;;  %v10109_v9 = vor.u32 %v11937_v35, %v10108_v30  ;;  %v10028_v35 = vld [vmem:[#allocation6 + $0x308] sm:$0xf] }
 0x3fc   :  { %5985 = vmatmul.bf16.vlgmr.msra.gmra.mxu0 %v12886_v3  ;;  %v9966_v7 = vld [vmem:[#allocation6 + $0x298] sm:$0xf0] }
 0x3fd   :  { %6033 = vmatpush.bf16.msrb.mxu0 %v10269_v45  ;;  %6012 = vmatpush.bf16.msra.mxu2 %v9901_v49  ;;  %v10477_v45 = vor.u32 %v12029_v27, %v10476_v22  ;;  %v10317_v49 = vor.u32 %v11989_v58, %v10316_v0  ;;  %v9889_v22 = vor.u32 %v11879_v17, %v9886_v44  ;;  %v9742_v27 = vld [vmem:[#allocation6 + $0xd8] sm:$0xf0]  ;;  %v11871_v58 = vld [vmem:[#allocation6 + $0x1ac] sm:$0xf]  ;;  %v10092_v17 = vld [vmem:[#allocation6 + $0x388] sm:$0xf] }
 0x3fe   :  { %5999 = vmatmul.bf16.vlgmr.msra.gmra.mxu1 %v12888_v60  ;;  %v9726_v0 = vld [vmem:[#allocation6 + $0xb8] sm:$0xf0]  ;;  %v11933_v44 = vld [vmem:[#allocation6 + $0x394] sm:$0xf0] }
 0x3ff   :  { %6047 = vmatpush.bf16.msrb.mxu1 %v10397_v54  ;;  %5965 = vmatpush.bf16.msrb.mxu3 %v10617_v11  ;;  %v10601_v54 = vor.u32 %v12058_v41, %v10598_v33  ;;  %v11911_v11 = vld [vmem:[#allocation6 + $0x2ec] sm:$0xf]  ;;  %v9870_v33 = vld [vmem:[#allocation6 + $0x1d8] sm:$0xf0] }
 0x400   :  { %6013 = vmatmul.bf16.vlgmr.msra.gmra.mxu2 %v12890_v31  ;;  %v11875_v41 = vld [vmem:[#allocation6 + $0x1cc] sm:$0xf]  ;;  %v10017_v2 = vor.u32 %v11911_v11, %v10014_v12  ;;  %v11929_v11 = vld [vmem:[#allocation6 + $0x374] sm:$0xf0] }
 0x401   :  { %6034 = vmatpush.bf16.msrb.mxu0 %v10253_v26  ;;  %6061 = vmatpush.bf16.msrb.mxu2 %v10525_v59  ;;  %v12021_v26 = vld [vmem:[#allocation6 + $0x654] sm:$0xf0]  ;;  %v10585_v59 = vor.u32 %v12054_v53, %v10582_v13  ;;  %v9873_v39 = vor.u32 %v11875_v41, %v9870_v33  ;;  %v9854_v13 = vld [vmem:[#allocation6 + $0x1b8] sm:$0xf0]  ;;  %v11823_v33 = vld [vmem:[#allocation6 + $0x2c] sm:$0xf] }
 0x402   :  { %v10445_v63 = vor.u32 %v12021_v26, %v10444_v5  ;;  %v9857_v5 = vor.u32 %v11871_v58, %v9854_v13  ;;  %v11819_v58 = vld [vmem:[#allocation6 + $0xc] sm:$0xf] }
 0x403   :  { %6048 = vmatpush.bf16.msrb.mxu1 %v10381_v16  ;;  %5966 = vmatpush.bf16.msrb.mxu3 %v10601_v54  ;;  %v10173_v16 = vor.u32 %v11953_v57, %v10172_v18  ;;  %v11839_v54 = vld [vmem:[#allocation6 + $0xac] sm:$0xf]  ;;  %v10124_v18 = vld [vmem:[#allocation6 + $0x3c8] sm:$0xf] }
 0x404   :  { %v9729_v57 = vor.u32 %v11839_v54, %v9726_v0  ;;  %v11925_v54 = vld [vmem:[#allocation6 + $0x354] sm:$0xf0] }
 0x405   :  { %6035 = vmatpush.bf16.msrb.mxu0 %v10237_v29  ;;  %6062 = vmatpush.bf16.msrb.mxu2 %v10509_v37  ;;  %v12017_v29 = vld [vmem:[#allocation6 + $0x634] sm:$0xf0]  ;;  %v10569_v37 = vor.u32 %v12050_v6, %v10566_v20  ;;  %v9838_v20 = vld [vmem:[#allocation6 + $0x198] sm:$0xf0] }
 0x406   :  { %5915 = vmatmul.bf16.vlgmr.msra.gmra.mxu3 %v12899_v14  ;;  %v10429_v21 = vor.u32 %v12017_v29, %v10428_v47  ;;  %v11831_v47 = vld [vmem:[#allocation6 + $0x6c] sm:$0xf]  ;;  %v9694_v29 = vld [vmem:[#allocation6 + $0x78] sm:$0xf0] }
 0x407   :  { %6049 = vmatpush.bf16.msrb.mxu1 %v10365_v4  ;;  %5967 = vmatpush.bf16.msrb.mxu3 %v10585_v59  ;;  %v11847_v4 = vld [vmem:[#allocation6 + $0xec] sm:$0xf] }
 0x408   :  { %v9761_v38 = vor.u32 %v11847_v4, %v9758_v8  ;;  %v11835_v59 = vld [vmem:[#allocation6 + $0x8c] sm:$0xf]  ;;  %v9822_v4 = vld [vmem:[#allocation6 + $0x178] sm:$0xf0] }
 0x409   :  { %6036 = vmatpush.bf16.msrb.mxu0 %v10221_v56  ;;  %6063 = vmatpush.bf16.msrb.mxu2 %v10493_v55  ;;  %v12042_v56 = vld [vmem:[#allocation6 + $0x704] sm:$0xf]  ;;  %v10412_v55 = vld [vmem:[#allocation6 + $0x608] sm:$0xf]  ;;  %v9713_v50 = vor.u32 %v11835_v59, %v9710_v48  ;;  %v11899_v8 = vld [vmem:[#allocation6 + $0x28c] sm:$0xf] }
 0x40a   :  { %v10537_v34 = vor.u32 %v12042_v56, %v10534_v10  ;;  %v9678_v56 = vld [vmem:[#allocation6 + $0x58] sm:$0xf0]  ;;  %v11921_v59 = vld [vmem:[#allocation6 + $0x334] sm:$0xf0]  ;;  %v11975_v48 = vld [vmem:[#allocation6 + $0x4ec] sm:$0xf] }
 0x40b   :  { %6050 = vmatpush.bf16.msrb.mxu1 %v10349_v52  ;;  %v11843_v52 = vld [vmem:[#allocation6 + $0xcc] sm:$0xf]  ;;  %5968 = vmatpush.bf16.msrb.mxu3 %v10569_v37 }
 0x40c   :  { %v11863_v37 = vld [vmem:[#allocation6 + $0x16c] sm:$0xf] }
 0x40d   :  { %6037 = vmatpush.bf16.msrb.mxu0 %v10205_v23  ;;  %6064 = vmatpush.bf16.msrb.mxu2 %v10477_v45  ;;  %v10413_v23 = vor.u32 %v12013_v40, %v10412_v55  ;;  %v10140_v45 = vld [vmem:[#allocation6 + $0x3e8] sm:$0xf]  ;;  %v11859_v55 = vld [vmem:[#allocation6 + $0x14c] sm:$0xf]  ;;  %v10093_v40 = vor.u32 %v11933_v44, %v10092_v17  ;;  %v12073_v44 = vld [vmem:[#allocation6 + $0x7f4] sm:$0xf0] }
 0x40e   :  { %v10141_v53 = vor.u32 %v11945_v51, %v10140_v45  ;;  %v11855_v45 = vld [vmem:[#allocation6 + $0x12c] sm:$0xf]  ;;  %v10652_v17 = vld [vmem:[#allocation6 + $0x7e8] sm:$0xf] }
 0x40f   :  { %6051 = vmatpush.bf16.msrb.mxu1 %v10333_v28  ;;  %v9745_v28 = vor.u32 %v11843_v52, %v9742_v27  ;;  %5969 = vmatpush.bf16.msrb.mxu3 %v10553_v61  ;;  %v9806_v52 = vld [vmem:[#allocation6 + $0x158] sm:$0xf0]  ;;  %v11895_v61 = vld [vmem:[#allocation6 + $0x26c] sm:$0xf]  ;;  %v10076_v27 = vld [vmem:[#allocation6 + $0x368] sm:$0xf] }
 0x410   :  { %v9809_v10 = vor.u32 %v11859_v55, %v9806_v52  ;;  %v10077_v51 = vor.u32 %v11929_v11, %v10076_v27  ;;  %v11967_v52 = vld [vmem:[#allocation6 + $0x4ac] sm:$0xf]  ;;  %v10366_v11 = vld [vmem:[#allocation6 + $0x5b8] sm:$0xf0] }
 0x411   :  { %6038 = vmatpush.bf16.msrb.mxu0 %v10189_v62  ;;  %6065 = vmatpush.bf16.msrb.mxu2 %v10461_v43  ;;  %v11907_v62 = vld [vmem:[#allocation6 + $0x2cc] sm:$0xf]  ;;  %v9998_v43 = vld [vmem:[#allocation6 + $0x2d8] sm:$0xf0] }
 0x412   :  { %v10001_v26 = vor.u32 %v11907_v62, %v9998_v43  ;;  %v9646_v62 = vld [vmem:[#allocation6 + $0x18] sm:$0xf0]  ;;  %v11851_v43 = vld [vmem:[#allocation6 + $0x10c] sm:$0xf] }
 0x413   :  { %6052 = vmatpush.bf16.msrb.mxu1 %v10317_v49  ;;  %v11941_v49 = vld [vmem:[#allocation6 + $0x3d4] sm:$0xf0]  ;;  %5970 = vmatpush.bf16.msrb.mxu3 %v10537_v34  ;;  %v9934_v34 = vld [vmem:[#allocation6 + $0x258] sm:$0xf0] }
 0x414   :  { %v10125_v6 = vor.u32 %v11941_v49, %v10124_v18  ;;  %v9774_v18 = vld [vmem:[#allocation6 + $0x118] sm:$0xf0] }
 0x415   :  { %6039 = vmatpush.bf16.msrb.mxu0 %v10173_v16  ;;  %6066 = vmatpush.bf16.msrb.mxu2 %v10445_v63  ;;  %v11903_v16 = vld [vmem:[#allocation6 + $0x2ac] sm:$0xf]  ;;  %v9982_v63 = vld [vmem:[#allocation6 + $0x2b8] sm:$0xf0] }
 0x416   :  { %5971 = vmatmul.bf16.vlgmr.msrb.gmra.mxu3 %v12947_v46  ;;  %v9985_v15 = vor.u32 %v11903_v16, %v9982_v63  ;;  %v10398_v16 = vld [vmem:[#allocation6 + $0x5f8] sm:$0xf0]  ;;  %v9777_v63 = vor.u32 %v11851_v43, %v9774_v18  ;;  %v11959_v43 = vld [vmem:[#allocation6 + $0x46c] sm:$0xf] }
 0x417   :  { %6053 = vmatpush.bf16.msrb.mxu1 %v10301_v36  ;;  %6019 = vmatpush.bf16.msra.mxu3 %v10141_v53  ;;  %v9841_v36 = vor.u32 %v11867_v19, %v9838_v20  ;;  %v10270_v19 = vld [vmem:[#allocation6 + $0x4f8] sm:$0xf0]  ;;  %v12007_v20 = vld [vmem:[#allocation6 + $0x5ec] sm:$0xf] }
 0x418   :  { %v10206_v18 = vld [vmem:[#allocation6 + $0x478] sm:$0xf0] }
 0x419   :  { %6040 = vmatpush.bf16.msrb.mxu0 %v10157_v1  ;;  %6067 = vmatpush.bf16.msrb.mxu2 %v10429_v21  ;;  %v9697_v1 = vor.u32 %v11831_v47, %v9694_v29  ;;  %v9825_v21 = vor.u32 %v11863_v37, %v9822_v4  ;;  %v11883_v47 = vld [vmem:[#allocation6 + $0x20c] sm:$0xf]  ;;  %v9902_v29 = vld [vmem:[#allocation6 + $0x218] sm:$0xf0]  ;;  %v10401_v37 = vor.u32 %v12007_v20, %v10398_v16 }
 0x41a   :  { %v10254_v4 = vld [vmem:[#allocation6 + $0x4d8] sm:$0xf0]  ;;  %v11955_v16 = vld [vmem:[#allocation6 + $0x44c] sm:$0xf] }
 0x41b   :  { %6054 = vmatpush.bf16.msrb.mxu1 %v10285_v25  ;;  %6020 = vmatpush.bf16.msra.mxu3 %v10125_v6  ;;  %v9969_v25 = vor.u32 %v11899_v8, %v9966_v7  ;;  %v9649_v6 = vor.u32 %v11819_v58, %v9646_v62  ;;  %v12003_v8 = vld [vmem:[#allocation6 + $0x5cc] sm:$0xf]  ;;  %v10382_v7 = vld [vmem:[#allocation6 + $0x5d8] sm:$0xf0] }
 0x41c   :  { %6041 = vmatmul.bf16.vlgmr.msrb.gmra.mxu0 %v12928_v24  ;;  %v10385_v55 = vor.u32 %v12003_v8, %v10382_v7  ;;  %v10494_v58 = vld [vmem:[#allocation6 + $0x6b8] sm:$0xf0]  ;;  %v11951_v8 = vld [vmem:[#allocation6 + $0x42c] sm:$0xf] }
 0x41d   :  { %6089 = vmatpush.bf16.msra.mxu0 %v9761_v38  ;;  %6068 = vmatpush.bf16.msrb.mxu2 %v10413_v23  ;;  %v11827_v38 = vld [vmem:[#allocation6 + $0x4c] sm:$0xf]  ;;  %v9662_v23 = vld [vmem:[#allocation6 + $0x38] sm:$0xf0] }
 0x41e   :  { %6055 = vmatmul.bf16.vlgmr.msrb.gmra.mxu1 %v12930_v42  ;;  %v9681_v12 = vor.u32 %v11827_v38, %v9678_v56  ;;  %v9665_v0 = vor.u32 %v11823_v33, %v9662_v23  ;;  %v10510_v33 = vld [vmem:[#allocation6 + $0x6d8] sm:$0xf0] }
 0x41f   :  { %6103 = vmatpush.bf16.msra.mxu1 %v9889_v22  ;;  %6021 = vmatpush.bf16.msra.mxu3 %v10109_v9  ;;  %v9950_v22 = vld [vmem:[#allocation6 + $0x278] sm:$0xf0]  ;;  %v11971_v9 = vld [vmem:[#allocation6 + $0x4cc] sm:$0xf] }
 0x420   :  { %6069 = vmatmul.bf16.vlgmr.msrb.gmra.mxu2 %v12934_v32  ;;  %v9953_v41 = vor.u32 %v11895_v61, %v9950_v22  ;;  %v10257_v56 = vor.u32 %v11971_v9, %v10254_v4  ;;  %v10238_v61 = vld [vmem:[#allocation6 + $0x4b8] sm:$0xf0]  ;;  %v11999_v22 = vld [vmem:[#allocation6 + $0x5ac] sm:$0xf] }
 0x421   :  { %6090 = vmatpush.bf16.msra.mxu0 %v9745_v28  ;;  %6117 = vmatpush.bf16.msra.mxu2 %v10017_v2  ;;  %v9790_v28 = vld [vmem:[#allocation6 + $0x138] sm:$0xf0]  ;;  %v11891_v2 = vld [vmem:[#allocation6 + $0x24c] sm:$0xf]  ;;  %v10241_v23 = vor.u32 %v11967_v52, %v10238_v61 }
 0x422   :  { %v9793_v53 = vor.u32 %v11855_v45, %v9790_v28  ;;  %v9937_v13 = vor.u32 %v11891_v2, %v9934_v34  ;;  %v10222_v28 = vld [vmem:[#allocation6 + $0x498] sm:$0xf0]  ;;  %v11995_v2 = vld [vmem:[#allocation6 + $0x58c] sm:$0xf] }
 0x423   :  { %6104 = vmatpush.bf16.msra.mxu1 %v9873_v39  ;;  %6022 = vmatpush.bf16.msra.mxu3 %v10093_v40  ;;  %v10060_v39 = vld [vmem:[#allocation6 + $0x348] sm:$0xf]  ;;  %v10653_v40 = vor.u32 %v12073_v44, %v10652_v17  ;;  %v10174_v7 = vld [vmem:[#allocation6 + $0x438] sm:$0xf0]  ;;  %v11983_v17 = vld [vmem:[#allocation6 + $0x52c] sm:$0xf] }
 0x424   :  { %v10061_v49 = vor.u32 %v11925_v54, %v10060_v39  ;;  %v10620_v39 = vld [vmem:[#allocation6 + $0x7a8] sm:$0xf]  ;;  %v12065_v54 = vld [vmem:[#allocation6 + $0x7b4] sm:$0xf0] }
 0x425   :  { %6091 = vmatpush.bf16.msra.mxu0 %v9729_v57  ;;  %6118 = vmatpush.bf16.msra.mxu2 %v10001_v26  ;;  %v10044_v57 = vld [vmem:[#allocation6 + $0x328] sm:$0xf]  ;;  %v9918_v26 = vld [vmem:[#allocation6 + $0x238] sm:$0xf0]  ;;  %v10621_v62 = vor.u32 %v12065_v54, %v10620_v39  ;;  %v12045_v39 = vld [vmem:[#allocation6 + $0x714] sm:$0xf0] }
 0x426   :  { %v12011_v54 = vld [vmem:[#allocation6 + $0x60c] sm:$0xf] }
 0x427   :  { %6105 = vmatpush.bf16.msra.mxu1 %v9857_v5  ;;  %6023 = vmatpush.bf16.msra.mxu3 %v10077_v51  ;;  %v11887_v5 = vld [vmem:[#allocation6 + $0x22c] sm:$0xf] }
 0x428   :  { %v9921_v30 = vor.u32 %v11887_v5, %v9918_v26  ;;  %v11963_v51 = vld [vmem:[#allocation6 + $0x48c] sm:$0xf]  ;;  %v10334_v5 = vld [vmem:[#allocation6 + $0x578] sm:$0xf0]  ;;  %v10604_v26 = vld [vmem:[#allocation6 + $0x788] sm:$0xf] }
 0x429   :  { %6092 = vmatpush.bf16.msra.mxu0 %v9713_v50  ;;  %6119 = vmatpush.bf16.msra.mxu2 %v9985_v15  ;;  %v10045_v50 = vor.u32 %v11921_v59, %v10044_v57  ;;  %v11917_v15 = vld [vmem:[#allocation6 + $0x314] sm:$0xf0] }
 0x42a   :  { %v10029_v38 = vor.u32 %v11917_v15, %v10028_v35  ;;  %v12061_v59 = vld [vmem:[#allocation6 + $0x794] sm:$0xf0] }
 0x42b   :  { %6106 = vmatpush.bf16.msra.mxu1 %v9841_v36  ;;  %6024 = vmatpush.bf16.msra.mxu3 %v10061_v49  ;;  %v10273_v36 = vor.u32 %v11975_v48, %v10270_v19  ;;  %v11991_v49 = vld [vmem:[#allocation6 + $0x56c] sm:$0xf]  ;;  %v10478_v19 = vld [vmem:[#allocation6 + $0x698] sm:$0xf0]  ;;  %v10605_v20 = vor.u32 %v12061_v59, %v10604_v26  ;;  %v12057_v15 = vld [vmem:[#allocation6 + $0x774] sm:$0xf0] }
 0x42c   :  { %v12027_v48 = vld [vmem:[#allocation6 + $0x68c] sm:$0xf]  ;;  %v10126_v26 = vld [vmem:[#allocation6 + $0x3d8] sm:$0xf0] }
 0x42d   :  { %6093 = vmatpush.bf16.msra.mxu0 %v9697_v1  ;;  %6120 = vmatpush.bf16.msra.mxu2 %v9969_v25  ;;  %v9905_v1 = vor.u32 %v11883_v47, %v9902_v29  ;;  %v10526_v25 = vld [vmem:[#allocation6 + $0x6f8] sm:$0xf0]  ;;  %v10481_v35 = vor.u32 %v12027_v48, %v10478_v19  ;;  %v12023_v47 = vld [vmem:[#allocation6 + $0x66c] sm:$0xf]  ;;  %v10740_v48 = vld [vmem:[#allocation9 + $0xa0] sm:$0xf] }
 0x42e   :  { %v10462_v29 = vld [vmem:[#allocation6 + $0x678] sm:$0xf0]  ;;  %v12096_v19 = vld [vmem:[#allocation9 + $0xac] sm:$0xf0] }
 0x42f   :  { %6107 = vmatpush.bf16.msra.mxu1 %v9825_v21  ;;  %v12039_v21 = vld [vmem:[#allocation6 + $0x6ec] sm:$0xf]  ;;  %6025 = vmatpush.bf16.msra.mxu3 %v10045_v50  ;;  %v10318_v50 = vld [vmem:[#allocation6 + $0x558] sm:$0xf0]  ;;  %v10465_v44 = vor.u32 %v12023_v47, %v10462_v29 }
 0x430   :  { %v10529_v27 = vor.u32 %v12039_v21, %v10526_v25  ;;  %v10572_v21 = vld [vmem:[#allocation6 + $0x748] sm:$0xf]  ;;  %v12053_v25 = vld [vmem:[#allocation6 + $0x754] sm:$0xf0]  ;;  %v11931_v47 = vld [vmem:[#allocation6 + $0x38c] sm:$0xf] }
 0x431   :  { %6094 = vmatpush.bf16.msra.mxu0 %v9681_v12  ;;  %6121 = vmatpush.bf16.msra.mxu2 %v9953_v41  ;;  %v10636_v12 = vld [vmem:[#allocation6 + $0x7c8] sm:$0xf]  ;;  %v12035_v41 = vld [vmem:[#allocation6 + $0x6cc] sm:$0xf]  ;;  %v10573_v61 = vor.u32 %v12053_v25, %v10572_v21  ;;  %v10094_v29 = vld [vmem:[#allocation6 + $0x398] sm:$0xf0]  ;;  %v12965_v21 = vpop.f32.mrf.mxu0 }
 0x432   :  { %v10513_v34 = vor.u32 %v12035_v41, %v10510_v33  ;;  %v12049_v41 = vld [vmem:[#allocation6 + $0x734] sm:$0xf0]  ;;  %v12015_v33 = vld [vmem:[#allocation6 + $0x62c] sm:$0xf]  ;;  %v10078_v25 = vld [vmem:[#allocation6 + $0x378] sm:$0xf0] }
 0x433   :  { %6108 = vmatpush.bf16.msra.mxu1 %v9809_v10  ;;  %v12069_v10 = vld [vmem:[#allocation6 + $0x7d4] sm:$0xf0]  ;;  %6026 = vmatpush.bf16.msra.mxu3 %v10029_v38  ;;  %v12019_v38 = vld [vmem:[#allocation6 + $0x64c] sm:$0xf] }
 0x434   :  { %v10637_v45 = vor.u32 %v12069_v10, %v10636_v12  ;;  %v10556_v10 = vld [vmem:[#allocation6 + $0x728] sm:$0xf] }
 0x435   :  { %6095 = vmatpush.bf16.msra.mxu0 %v9665_v0  ;;  %6122 = vmatpush.bf16.msra.mxu2 %v9937_v13  ;;  %v12031_v0 = vld [vmem:[#allocation6 + $0x6ac] sm:$0xf] }
 0x436   :  { %6027 = vmatmul.bf16.vlgmr.msra.gmra.mxu3 %v12899_v14  ;;  %v10497_v57 = vor.u32 %v12031_v0, %v10494_v58  ;;  %v10414_v58 = vld [vmem:[#allocation6 + $0x618] sm:$0xf0] }
 0x437   :  { %6109 = vmatpush.bf16.msra.mxu1 %v9793_v53  ;;  %6075 = vmatpush.bf16.msrb.mxu3 %v10653_v40  ;;  %v10225_v53 = vor.u32 %v11963_v51, %v10222_v28  ;;  %v11947_v40 = vld [vmem:[#allocation6 + $0x40c] sm:$0xf] }
 0x439   :  { %6096 = vmatpush.bf16.msra.mxu0 %v9649_v6  ;;  %6123 = vmatpush.bf16.msra.mxu2 %v9921_v30  ;;  %v10337_v6 = vor.u32 %v11991_v49, %v10334_v5  ;;  %v11987_v30 = vld [vmem:[#allocation6 + $0x54c] sm:$0xf]  ;;  %v10417_v49 = vor.u32 %v12011_v54, %v10414_v58  ;;  %v12076_v54 = vld [vmem:[#allocation9 + $0xc] sm:$0xf0]  ;;  %v12102_v58 = vld [vmem:[#allocation9 + $0xe4] sm:$0xf] }
 0x43a   :  { %v10321_v9 = vor.u32 %v11987_v30, %v10318_v50  ;;  %v11939_v5 = vld [vmem:[#allocation6 + $0x3cc] sm:$0xf]  ;;  %v10741_v30 = vor.u32 %v12096_v19, %v10740_v48  ;;  %v12092_v50 = vld [vmem:[#allocation9 + $0x8c] sm:$0xf0]  ;;  %v10654_v48 = vld [vmem:[#allocation6 + $0x7f8] sm:$0xf0] }
 0x43b   :  { %6110 = vmatpush.bf16.msra.mxu1 %v9777_v63  ;;  %6076 = vmatpush.bf16.msrb.mxu3 %v10637_v45  ;;  %v10190_v63 = vld [vmem:[#allocation6 + $0x458] sm:$0xf0]  ;;  %v12104_v45 = vld [vmem:[#allocation9 + $0xec] sm:$0xf0] }
 0x43c   :  { %6097 = vmatmul.bf16.vlgmr.msra.gmra.mxu0 %v12886_v3  ;;  %v10369_v3 = vor.u32 %v11999_v22, %v10366_v11  ;;  %v10158_v22 = vld [vmem:[#allocation6 + $0x418] sm:$0xf0] }
 0x43d   :  { %6145 = vmatpush.bf16.msrb.mxu0 %v10273_v36  ;;  %6124 = vmatpush.bf16.msra.mxu2 %v9905_v1  ;;  %v10588_v36 = vld [vmem:[#allocation6 + $0x768] sm:$0xf]  ;;  %v10302_v1 = vld [vmem:[#allocation6 + $0x538] sm:$0xf0]  ;;  %v10161_v51 = vor.u32 %v11947_v40, %v10158_v22  ;;  %v10852_v40 = vld [vmem:[#allocation9 + $0x180] sm:$0xf]  ;;  %v12967_v22 = vpop.f32.mrf.mxu1 }
 0x43e   :  { %6111 = vmatmul.bf16.vlgmr.msra.gmra.mxu1 %v12888_v60  ;;  %v10350_v60 = vld [vmem:[#allocation6 + $0x598] sm:$0xf0]  ;;  %v10589_v4 = vor.u32 %v12057_v15, %v10588_v36  ;;  %v10305_v52 = vor.u32 %v11983_v17, %v10302_v1  ;;  %v12132_v15 = vld [vmem:[#allocation9 + $0x1cc] sm:$0xf0] }
 0x43f   :  { %6159 = vmatpush.bf16.msrb.mxu1 %v10401_v37  ;;  %v10353_v13 = vor.u32 %v11995_v2, %v10350_v60  ;;  %6077 = vmatpush.bf16.msrb.mxu3 %v10621_v62  ;;  %v10193_v37 = vor.u32 %v11955_v16, %v10190_v63  ;;  %v10286_v11 = vld [vmem:[#allocation6 + $0x518] sm:$0xf0]  ;;  %v10557_v2 = vor.u32 %v12049_v41, %v10556_v10  ;;  %v10540_v60 = vld [vmem:[#allocation6 + $0x708] sm:$0xf]  ;;  %v10756_v62 = vld [vmem:[#allocation9 + $0xc0] sm:$0xf] }
 0x440   :  { %6125 = vmatmul.bf16.vlgmr.msra.gmra.mxu2 %v12890_v31  ;;  %v10209_v31 = vor.u32 %v11959_v43, %v10206_v18  ;;  %v12100_v43 = vld [vmem:[#allocation9 + $0xcc] sm:$0xf0]  ;;  %v10541_v18 = vor.u32 %v12045_v39, %v10540_v60  ;;  %v11935_v16 = vld [vmem:[#allocation6 + $0x3ac] sm:$0xf]  ;;  %v10110_v63 = vld [vmem:[#allocation6 + $0x3b8] sm:$0xf0] }
 0x441   :  { %6146 = vmatpush.bf16.msrb.mxu0 %v10257_v56  ;;  %6173 = vmatpush.bf16.msrb.mxu2 %v10529_v27  ;;  %v10446_v56 = vld [vmem:[#allocation6 + $0x658] sm:$0xf0]  ;;  %v11979_v27 = vld [vmem:[#allocation6 + $0x50c] sm:$0xf]  ;;  %v10757_v59 = vor.u32 %v12100_v43, %v10756_v62  ;;  %v10113_v36 = vor.u32 %v11935_v16, %v10110_v63  ;;  %v12128_v17 = vld [vmem:[#allocation9 + $0x1ac] sm:$0xf0] }
 0x442   :  { %v10449_v12 = vor.u32 %v12019_v38, %v10446_v56  ;;  %v10289_v28 = vor.u32 %v11979_v27, %v10286_v11  ;;  %v10692_v56 = vld [vmem:[#allocation9 + $0x40] sm:$0xf]  ;;  %v12969_v27 = vpop.f32.mrf.mxu2  ;;  %v11923_v11 = vld [vmem:[#allocation6 + $0x34c] sm:$0xf]  ;;  %v12116_v43 = vld [vmem:[#allocation9 + $0x14c] sm:$0xf0] }
 0x443   :  { %6160 = vmatpush.bf16.msrb.mxu1 %v10385_v55  ;;  %6078 = vmatpush.bf16.msrb.mxu3 %v10605_v20  ;;  %v10177_v55 = vor.u32 %v11951_v8, %v10174_v7  ;;  %v12136_v20 = vld [vmem:[#allocation9 + $0x1ec] sm:$0xf0]  ;;  %v10868_v7 = vld [vmem:[#allocation9 + $0x1a0] sm:$0xf]  ;;  %v10758_v16 = vld [vmem:[#allocation9 + $0xd0] sm:$0xf0] }
 0x444   :  { %v12088_v8 = vld [vmem:[#allocation9 + $0x6c] sm:$0xf0]  ;;  %v10869_v1 = vor.u32 %v12128_v17, %v10868_v7  ;;  %v10660_v39 = vld [vmem:[#allocation9] sm:$0xf] }
 0x445   :  { %6147 = vmatpush.bf16.msrb.mxu0 %v10241_v23  ;;  %6174 = vmatpush.bf16.msrb.mxu2 %v10513_v34  ;;  %v10430_v23 = vld [vmem:[#allocation6 + $0x638] sm:$0xf0]  ;;  %v10804_v63 = vld [vmem:[#allocation9 + $0x120] sm:$0xf]  ;;  %v12108_v7 = vld [vmem:[#allocation9 + $0x10c] sm:$0xf0] }
 0x446   :  { %v10433_v34 = vor.u32 %v12015_v33, %v10430_v23  ;;  %v10676_v33 = vld [vmem:[#allocation9 + $0x20] sm:$0xf]  ;;  %v12080_v23 = vld [vmem:[#allocation9 + $0x2c] sm:$0xf0] }
 0x447   :  { %6161 = vmatpush.bf16.msrb.mxu1 %v10369_v3  ;;  %6079 = vmatpush.bf16.msrb.mxu3 %v10589_v4  ;;  %v10772_v3 = vld [vmem:[#allocation9 + $0xe0] sm:$0xf]  ;;  %v10677_v60 = vor.u32 %v12080_v23, %v10676_v33  ;;  %v10886_v33 = vld [vmem:[#allocation9 + $0x1d0] sm:$0xf0] }
 0x448   :  { %v10773_v0 = vor.u32 %v12104_v45, %v10772_v3  ;;  %v10708_v4 = vld [vmem:[#allocation9 + $0x60] sm:$0xf]  ;;  %v12120_v45 = vld [vmem:[#allocation9 + $0x16c] sm:$0xf0] }
 0x449   :  { %6148 = vmatpush.bf16.msrb.mxu0 %v10225_v53  ;;  %6175 = vmatpush.bf16.msrb.mxu2 %v10497_v57  ;;  %v11943_v53 = vld [vmem:[#allocation6 + $0x3ec] sm:$0xf]  ;;  %v10709_v38 = vor.u32 %v12088_v8, %v10708_v4  ;;  %v10836_v3 = vld [vmem:[#allocation9 + $0x160] sm:$0xf]  ;;  %v10742_v4 = vld [vmem:[#allocation9 + $0xb0] sm:$0xf0] }
 0x44a   :  { %v10788_v8 = vld [vmem:[#allocation9 + $0x100] sm:$0xf] }
 0x44b   :  { %6162 = vmatpush.bf16.msrb.mxu1 %v10353_v13  ;;  %6080 = vmatpush.bf16.msrb.mxu3 %v10573_v61  ;;  %v10142_v13 = vld [vmem:[#allocation6 + $0x3f8] sm:$0xf0]  ;;  %v12124_v61 = vld [vmem:[#allocation9 + $0x18c] sm:$0xf0]  ;;  %v10789_v17 = vor.u32 %v12108_v7, %v10788_v8  ;;  %v12047_v7 = vld [vmem:[#allocation6 + $0x72c] sm:$0xf] }
 0x44c   :  { %v10145_v57 = vor.u32 %v11943_v53, %v10142_v13  ;;  %v10853_v41 = vor.u32 %v12124_v61, %v10852_v40  ;;  %v10774_v53 = vld [vmem:[#allocation9 + $0xf0] sm:$0xf0]  ;;  %v10820_v13 = vld [vmem:[#allocation9 + $0x140] sm:$0xf] }
 0x44d   :  { %6149 = vmatpush.bf16.msrb.mxu0 %v10209_v31  ;;  %6176 = vmatpush.bf16.msrb.mxu2 %v10481_v35  ;;  %v10900_v31 = vld [vmem:[#allocation9 + $0x1e0] sm:$0xf]  ;;  %v10777_v19 = vor.u32 %v12102_v58, %v10774_v53 }
 0x44e   :  { %v10901_v35 = vor.u32 %v12136_v20, %v10900_v31  ;;  %v5778_v31 = vpop.f32.mrf.mxu1  ;;  %v12098_v20 = vld [vmem:[#allocation9 + $0xc4] sm:$0xf] }
 0x44f   :  { %6163 = vmatpush.bf16.msrb.mxu1 %v10337_v6  ;;  %6081 = vmatpush.bf16.msrb.mxu3 %v10557_v2  ;;  %v10129_v6 = vor.u32 %v11939_v5, %v10126_v26  ;;  %v11919_v2 = vld [vmem:[#allocation6 + $0x32c] sm:$0xf]  ;;  %v10821_v5 = vor.u32 %v12116_v43, %v10820_v13  ;;  %v12971_v26 = vld [vmem:[#allocation7] sm:$0xf]  ;;  %v10590_v43 = vld [vmem:[#allocation6 + $0x778] sm:$0xf0] }
 0x451   :  { %6150 = vmatpush.bf16.msrb.mxu0 %v10193_v37  ;;  %6177 = vmatpush.bf16.msrb.mxu2 %v10465_v44  ;;  %v10097_v44 = vor.u32 %v11931_v47, %v10094_v29  ;;  %v10638_v47 = vld [vmem:[#allocation6 + $0x7d8] sm:$0xf0]  ;;  %v10761_v29 = vor.u32 %v12098_v20, %v10758_v16 }
 0x453   :  { %6164 = vmatpush.bf16.msrb.mxu1 %v10321_v9  ;;  %6082 = vmatpush.bf16.msrb.mxu3 %v10541_v18  ;;  %v11915_v18 = vld [vmem:[#allocation6 + $0x30c] sm:$0xf] }
 0x455   :  { %6151 = vmatpush.bf16.msrb.mxu0 %v10177_v55  ;;  %6178 = vmatpush.bf16.msrb.mxu2 %v10449_v12  ;;  %v12084_v55 = vld [vmem:[#allocation9 + $0x4c] sm:$0xf0]  ;;  %v10062_v12 = vld [vmem:[#allocation6 + $0x358] sm:$0xf0] }
 0x456   :  { %6083 = vmatmul.bf16.vlgmr.msrb.gmra.mxu3 %v12947_v46  ;;  %v10693_v10 = vor.u32 %v12084_v55, %v10692_v56  ;;  %v12063_v56 = vld [vmem:[#allocation6 + $0x7ac] sm:$0xf]  ;;  %v10622_v55 = vld [vmem:[#allocation6 + $0x7b8] sm:$0xf0] }
 0x457   :  { %6165 = vmatpush.bf16.msrb.mxu1 %v10305_v52  ;;  %6131 = vmatpush.bf16.msra.mxu3 %v10145_v57  ;;  %v10661_v57 = vor.u32 %v12076_v54, %v10660_v39  ;;  %v10625_v23 = vor.u32 %v12063_v56, %v10622_v55  ;;  %v12126_v54 = vld [vmem:[#allocation9 + $0x1a4] sm:$0xf] }
 0x459   :  { %6152 = vmatpush.bf16.msrb.mxu0 %v10161_v51  ;;  %6179 = vmatpush.bf16.msrb.mxu2 %v10433_v34  ;;  %v10065_v51 = vor.u32 %v11923_v11, %v10062_v12  ;;  %v10046_v34 = vld [vmem:[#allocation6 + $0x338] sm:$0xf0]  ;;  %v12090_v11 = vld [vmem:[#allocation9 + $0x84] sm:$0xf]  ;;  %v10726_v12 = vld [vmem:[#allocation9 + $0x90] sm:$0xf0] }
 0x45a   :  { %v10049_v62 = vor.u32 %v11919_v2, %v10046_v34  ;;  %v12086_v34 = vld [vmem:[#allocation9 + $0x64] sm:$0xf] }
 0x45b   :  { %6166 = vmatpush.bf16.msrb.mxu1 %v10289_v28  ;;  %6132 = vmatpush.bf16.msra.mxu3 %v10129_v6  ;;  %v10837_v28 = vor.u32 %v12120_v45, %v10836_v3  ;;  %v12973_v6 = vpop.f32.mrf.mxu2  ;;  %v12059_v45 = vld [vmem:[#allocation6 + $0x78c] sm:$0xf] }
 0x45c   :  { %6153 = vmatmul.bf16.vlgmr.msrb.gmra.mxu0 %v12928_v24  ;;  %v10724_v24 = vld [vmem:[#allocation9 + $0x80] sm:$0xf] }
 0x45d   :  { %6991 = vmatpush.bf16.msra.mxu0 %v10773_v0  ;;  %6180 = vmatpush.bf16.msrb.mxu2 %v10417_v49  ;;  %v10725_v37 = vor.u32 %v12092_v50, %v10724_v24  ;;  %v5764_v0 = vpop.f32.mrf.mxu0  ;;  %v10030_v49 = vld [vmem:[#allocation6 + $0x318] sm:$0xf0]  ;;  %v4465_v24 = vperm.slane %v12971_v26, 0  ;;  %v12976_v50 = vpop.f32.mrf.mxu3 }
 0x45e   :  { %6167 = vmatmul.bf16.vlgmr.msrb.gmra.mxu1 %v12930_v42  ;;  %v10884_v42 = vld [vmem:[#allocation9 + $0x1c0] sm:$0xf] }
 0x45f   :  { %7005 = vmatpush.bf16.msra.mxu1 %v10901_v35  ;;  %v10885_v9 = vor.u32 %v12132_v15, %v10884_v42  ;;  %6133 = vmatpush.bf16.msra.mxu3 %v10113_v36  ;;  %v12112_v35 = vld [vmem:[#allocation9 + $0x12c] sm:$0xf0]  ;;  %v12067_v15 = vld [vmem:[#allocation6 + $0x7cc] sm:$0xf] }
 0x460   :  { %6181 = vmatmul.bf16.vlgmr.msrb.gmra.mxu2 %v12934_v32  ;;  %v11927_v32 = vld [vmem:[#allocation6 + $0x36c] sm:$0xf]  ;;  %v10805_v36 = vor.u32 %v12112_v35, %v10804_v63 }
 0x461   :  { %6992 = vmatpush.bf16.msra.mxu0 %v10757_v59  ;;  %v10081_v52 = vor.u32 %v11927_v32, %v10078_v25  ;;  %v12071_v59 = vld [vmem:[#allocation6 + $0x7ec] sm:$0xf]  ;;  %v10641_v32 = vor.u32 %v12067_v15, %v10638_v47  ;;  %v10838_v47 = vld [vmem:[#allocation9 + $0x170] sm:$0xf0] }
 0x462   :  { %v10657_v42 = vor.u32 %v12071_v59, %v10654_v48  ;;  %v10854_v59 = vld [vmem:[#allocation9 + $0x190] sm:$0xf0] }
 0x463   :  { %7006 = vmatpush.bf16.msra.mxu1 %v10885_v9  ;;  %6134 = vmatpush.bf16.msra.mxu3 %v10097_v44  ;;  %v12134_v44 = vld [vmem:[#allocation9 + $0x1e4] sm:$0xf]  ;;  %v12983_v61 = vpop.f32.mrf.mxu2 }
 0x465   :  { %6993 = vmatpush.bf16.msra.mxu0 %v10741_v30  ;;  %v10033_v30 = vor.u32 %v11915_v18, %v10030_v49  ;;  %v12978_v9 = vpop.f32.mrf.mxu0  ;;  %v5806_v2 = vpop.f32.mrf.mxu3  ;;  %v12082_v49 = vld [vmem:[#allocation9 + $0x44] sm:$0xf] }
 0x467   :  { %7007 = vmatpush.bf16.msra.mxu1 %v10869_v1  ;;  %6135 = vmatpush.bf16.msra.mxu3 %v10081_v52  ;;  %v10902_v1 = vld [vmem:[#allocation9 + $0x1f0] sm:$0xf0]  ;;  %v12981_v52 = vpop.f32.mrf.mxu1 }
 0x468   :  { %v10905_v25 = vor.u32 %v12134_v44, %v10902_v1  ;;  %v12074_v44 = vld [vmem:[#allocation9 + $0x4] sm:$0xf]  ;;  %v10662_v1 = vld [vmem:[#allocation9 + $0x10] sm:$0xf0] }
 0x469   :  { %6994 = vmatpush.bf16.msra.mxu0 %v10725_v37  ;;  %v12094_v37 = vld [vmem:[#allocation9 + $0xa4] sm:$0xf] }
 0x46a   :  { %v10745_v40 = vor.u32 %v12094_v37, %v10742_v4 }
 0x46b   :  { %7008 = vmatpush.bf16.msra.mxu1 %v10853_v41  ;;  %6136 = vmatpush.bf16.msra.mxu3 %v10065_v51  ;;  %v12130_v41 = vld [vmem:[#allocation9 + $0x1c4] sm:$0xf]  ;;  %v10606_v51 = vld [vmem:[#allocation6 + $0x798] sm:$0xf0] }
 0x46c   :  { %v10609_v53 = vor.u32 %v12059_v45, %v10606_v51  ;;  %v12105_v51 = vld [vmem:[#allocation9 + $0xf4] sm:$0xf0] }
 0x46d   :  { %6995 = vmatpush.bf16.msra.mxu0 %v10709_v38  ;;  %v5763_v38 = vadd.f32 %v12965_v21, %v4465_v24  ;;  %v10889_v21 = vor.u32 %v12130_v41, %v10886_v33  ;;  %v5820_v58 = vpop.f32.mrf.mxu0  ;;  %v10542_v41 = vld [vmem:[#allocation6 + $0x718] sm:$0xf0]  ;;  %v10665_v33 = vor.u32 %v12074_v44, %v10662_v1 }
 0x46e   :  { %v12089_v1 = vld [vmem:[#allocation9 + $0x74] sm:$0xf0] }
 0x46f   :  { %7009 = vmatpush.bf16.msra.mxu1 %v10837_v28  ;;  %6137 = vmatpush.bf16.msra.mxu3 %v10049_v62  ;;  %v5777_v3 = vadd.f32 %v12967_v22, %v5763_v38  ;;  %v10729_v28 = vor.u32 %v12090_v11, %v10726_v12  ;;  %v12055_v22 = vld [vmem:[#allocation6 + $0x76c] sm:$0xf]  ;;  %v5834_v48 = vpop.f32.mrf.mxu1 }
 0x471   :  { %6996 = vmatpush.bf16.msra.mxu0 %v10693_v10  ;;  %v5765_v10 = vadd.f32 %v5764_v0, %v4465_v24  ;;  %v10870_v0 = vld [vmem:[#allocation9 + $0x1b0] sm:$0xf0] }
 0x472   :  { %v10873_v13 = vor.u32 %v12126_v54, %v10870_v0 }
 0x473   :  { %7010 = vmatpush.bf16.msra.mxu1 %v10821_v5  ;;  %6138 = vmatpush.bf16.msra.mxu3 %v10033_v30  ;;  %v5779_v39 = vadd.f32 %v5778_v31, %v5765_v10  ;;  %v10593_v31 = vor.u32 %v12055_v22, %v10590_v43  ;;  %v10574_v30 = vld [vmem:[#allocation6 + $0x758] sm:$0xf0]  ;;  %v12168_v22 = vld [vmem:[#allocation9 + $0x2ec] sm:$0xf0]  ;;  %v12106_v43 = vld [vmem:[#allocation9 + $0x104] sm:$0xf] }
 0x475   :  { %6997 = vmatpush.bf16.msra.mxu0 %v10677_v60  ;;  %v10710_v60 = vld [vmem:[#allocation9 + $0x70] sm:$0xf0]  ;;  %v5793_v62 = vadd.f32 %v12973_v6, %v5779_v39  ;;  %v12051_v6 = vld [vmem:[#allocation6 + $0x74c] sm:$0xf]  ;;  %v4466_v39 = vperm.slane %v12971_v26, 1 }
 0x476   :  { %6139 = vmatmul.bf16.vlgmr.msra.gmra.mxu3 %v12899_v14  ;;  %v5791_v14 = vadd.f32 %v12969_v27, %v5777_v3  ;;  %v10713_v18 = vor.u32 %v12086_v34, %v10710_v60  ;;  %v12122_v27 = vld [vmem:[#allocation9 + $0x184] sm:$0xf]  ;;  %v10577_v37 = vor.u32 %v12051_v6, %v10574_v30  ;;  %v10780_v3 = vld [vmem:[#allocation9 + $0xe8] sm:$0xf] }
 0x477   :  { %7011 = vmatpush.bf16.msra.mxu1 %v10805_v36  ;;  %6187 = vmatpush.bf16.msrb.mxu3 %v10657_v42  ;;  %v10857_v20 = vor.u32 %v12122_v27, %v10854_v59  ;;  %v5807_v16 = vadd.f32 %v5806_v2, %v5793_v62  ;;  %v12078_v42 = vld [vmem:[#allocation9 + $0x24] sm:$0xf]  ;;  %v10678_v36 = vld [vmem:[#allocation9 + $0x30] sm:$0xf0]  ;;  %v10781_v0 = vor.u32 %v12105_v51, %v10780_v3  ;;  %v11028_v62 = vld [vmem:[#allocation9 + $0x2e0] sm:$0xf] }
 0x478   :  { %v5805_v5 = vadd.f32 %v12976_v50, %v5791_v14  ;;  %v12118_v50 = vld [vmem:[#allocation9 + $0x164] sm:$0xf]  ;;  %v10806_v2 = vld [vmem:[#allocation9 + $0x130] sm:$0xf0]  ;;  %v10684_v51 = vld [vmem:[#allocation9 + $0x28] sm:$0xf] }
 0x479   :  { %6998 = vmatpush.bf16.msra.mxu0 %v10661_v57  ;;  %v10694_v57 = vld [vmem:[#allocation9 + $0x50] sm:$0xf0]  ;;  %v5860_v24 = vpop.f32.mrf.mxu3  ;;  %v5821_v15 = vadd.f32 %v5820_v58, %v5807_v16  ;;  %v10841_v4 = vor.u32 %v12118_v50, %v10838_v47  ;;  %v10764_v58 = vld [vmem:[#allocation9 + $0xc8] sm:$0xf]  ;;  %v12164_v16 = vld [vmem:[#allocation9 + $0x2cc] sm:$0xf0] }
 0x47a   :  { %v5819_v63 = vadd.f32 %v12978_v9, %v5805_v5  ;;  %v10697_v35 = vor.u32 %v12082_v49, %v10694_v57  ;;  %v10558_v9 = vld [vmem:[#allocation6 + $0x738] sm:$0xf0]  ;;  %v10790_v49 = vld [vmem:[#allocation9 + $0x110] sm:$0xf0]  ;;  %v10996_v50 = vld [vmem:[#allocation9 + $0x2a0] sm:$0xf] }
 0x47b   :  { %7012 = vmatpush.bf16.msra.mxu1 %v10789_v17  ;;  %6188 = vmatpush.bf16.msrb.mxu3 %v10641_v32  ;;  %v10681_v17 = vor.u32 %v12078_v42, %v10678_v36  ;;  %v12114_v32 = vld [vmem:[#allocation9 + $0x144] sm:$0xf]  ;;  %v5835_v38 = vadd.f32 %v5834_v48, %v5821_v15  ;;  %v10561_v11 = vor.u32 %v12047_v7, %v10558_v9  ;;  %v10748_v48 = vld [vmem:[#allocation9 + $0xa8] sm:$0xf]  ;;  %v12093_v15 = vld [vmem:[#allocation9 + $0x94] sm:$0xf0] }
 0x47c   :  { %v5833_v8 = vadd.f32 %v12981_v52, %v5819_v63  ;;  %v12043_v52 = vld [vmem:[#allocation6 + $0x70c] sm:$0xf]  ;;  %v10793_v57 = vor.u32 %v12106_v43, %v10790_v49  ;;  %v12160_v47 = vld [vmem:[#allocation9 + $0x2ac] sm:$0xf0]  ;;  %v10782_v49 = vld [vmem:[#allocation9 + $0xf8] sm:$0xf0] }
 0x47d   :  { %7047 = vmatpush.bf16.msrb.mxu0 %v10777_v19  ;;  %v5848_v19 = vpop.f32.mrf.mxu2  ;;  %v10732_v42 = vld [vmem:[#allocation9 + $0x88] sm:$0xf] }
 0x47e   :  { %v5847_v56 = vadd.f32 %v12983_v61, %v5833_v8  ;;  %v5849_v12 = vadd.f32 %v5848_v19, %v5835_v38  ;;  %v10545_v61 = vor.u32 %v12043_v52, %v10542_v41  ;;  %v10733_v7 = vor.u32 %v12093_v15, %v10732_v42  ;;  %v10716_v9 = vld [vmem:[#allocation9 + $0x68] sm:$0xf]  ;;  %v10964_v52 = vld [vmem:[#allocation9 + $0x260] sm:$0xf]  ;;  %v12152_v41 = vld [vmem:[#allocation9 + $0x26c] sm:$0xf0] }
 0x47f   :  { %7061 = vmatpush.bf16.msrb.mxu1 %v10905_v25  ;;  %6189 = vmatpush.bf16.msrb.mxu3 %v10625_v23  ;;  %v10822_v25 = vld [vmem:[#allocation9 + $0x150] sm:$0xf0] }
 0x480   :  { %v10825_v55 = vor.u32 %v12114_v32, %v10822_v25  ;;  %v5861_v10 = vadd.f32 %v5860_v24, %v5847_v56  ;;  %v10980_v32 = vld [vmem:[#allocation9 + $0x280] sm:$0xf]  ;;  %v12156_v25 = vld [vmem:[#allocation9 + $0x28c] sm:$0xf0] }
 0x481   :  { %7048 = vmatpush.bf16.msrb.mxu0 %v10761_v29  ;;  %v5874_v29 = vpop.f32.mrf.mxu0  ;;  %v10981_v38 = vor.u32 %v12156_v25, %v10980_v32  ;;  %v10876_v25 = vld [vmem:[#allocation9 + $0x1a8] sm:$0xf] }
 0x482   :  { %v6201_v60 = vmax.f32 %v5861_v10, 0.0  ;;  %v5875_v19 = vadd.f32 %v5874_v29, %v4466_v39  ;;  %v12085_v10 = vld [vmem:[#allocation9 + $0x54] sm:$0xf0] }
 0x483   :  { %7062 = vmatpush.bf16.msrb.mxu1 %v10889_v21  ;;  %6190 = vmatpush.bf16.msrb.mxu3 %v10609_v53  ;;  %v5862_v21 = vpop.f32.mrf.mxu3  ;;  %v12101_v53 = vld [vmem:[#allocation9 + $0xd4] sm:$0xf0] }
 0x484   :  { %v5863_v45 = vadd.f32 %v5862_v21, %v5849_v12  ;;  %v10765_v59 = vor.u32 %v12101_v53, %v10764_v58  ;;  %v12077_v53 = vld [vmem:[#allocation9 + $0x14] sm:$0xf0] }
 0x485   :  { %7049 = vmatpush.bf16.msrb.mxu0 %v10745_v40  ;;  %v5888_v40 = vpop.f32.mrf.mxu1  ;;  %v5902_v23 = vpop.f32.mrf.mxu2 }
 0x486   :  { %v6205_v14 = vmax.f32 %v5863_v45, 0.0  ;;  %v5889_v36 = vadd.f32 %v5888_v40, %v5875_v19  ;;  %v10717_v40 = vor.u32 %v12089_v1, %v10716_v9  ;;  %v10908_v19 = vld [vmem:[#allocation9 + $0x1e8] sm:$0xf]  ;;  %v10750_v9 = vld [vmem:[#allocation9 + $0xb8] sm:$0xf0] }
 0x487   :  { %7063 = vmatpush.bf16.msrb.mxu1 %v10873_v13  ;;  %6191 = vmatpush.bf16.msrb.mxu3 %v10593_v31  ;;  %v12097_v31 = vld [vmem:[#allocation9 + $0xb4] sm:$0xf0] }
 0x488   :  { %v12994_v13 = vpack.c.bf16 %v6205_v14, %v6201_v60  ;;  %v10749_v24 = vor.u32 %v12097_v31, %v10748_v48  ;;  %v12137_v31 = vld [vmem:[#allocation9 + $0x1f4] sm:$0xf0] }
 0x489   :  { %7050 = vmatpush.bf16.msrb.mxu0 %v10729_v28  ;;  %v12110_v28 = vld [vmem:[#allocation9 + $0x124] sm:$0xf]  ;;  %v5876_v54 = vpop.f32.mrf.mxu0 }
 0x48a   :  { %v10809_v34 = vor.u32 %v12110_v28, %v10806_v2  ;;  %6999 = vmatmul.bf16.vlgmr.msra.gmra.mxu0 %v12994_v13  ;;  %v5877_v30 = vadd.f32 %v5876_v54, %v4466_v39  ;;  %v12081_v2 = vld [vmem:[#allocation9 + $0x34] sm:$0xf0] }
 0x48b   :  { %7064 = vmatpush.bf16.msrb.mxu1 %v10857_v20  ;;  %6192 = vmatpush.bf16.msrb.mxu3 %v10577_v37  ;;  %v5916_v27 = vpop.f32.mrf.mxu3  ;;  %v11012_v20 = vld [vmem:[#allocation9 + $0x2c0] sm:$0xf]  ;;  %v10997_v37 = vor.u32 %v12160_v47, %v10996_v50  ;;  %v10685_v54 = vor.u32 %v12081_v2, %v10684_v51  ;;  %v10982_v51 = vld [vmem:[#allocation9 + $0x290] sm:$0xf0] }
 0x48c   :  { %v11013_v6 = vor.u32 %v12164_v16, %v11012_v20 }
 0x48d   :  { %7051 = vmatpush.bf16.msrb.mxu0 %v10713_v18  ;;  %v11029_v18 = vor.u32 %v12168_v22, %v11028_v62  ;;  %v5890_v5 = vpop.f32.mrf.mxu1  ;;  %v5904_v63 = vpop.f32.mrf.mxu2  ;;  %v10932_v62 = vld [vmem:[#allocation9 + $0x220] sm:$0xf]  ;;  %v12144_v22 = vld [vmem:[#allocation9 + $0x22c] sm:$0xf0] }
 0x48e   :  { %v5891_v29 = vadd.f32 %v5890_v5, %v5877_v30  ;;  %v12166_v30 = vld [vmem:[#allocation9 + $0x2e4] sm:$0xf] }
 0x48f   :  { %7065 = vmatpush.bf16.msrb.mxu1 %v10841_v4  ;;  %6193 = vmatpush.bf16.msrb.mxu3 %v10561_v11  ;;  %v5903_v4 = vadd.f32 %v5902_v23, %v5889_v36  ;;  %v10700_v11 = vld [vmem:[#allocation9 + $0x48] sm:$0xf]  ;;  %v10965_v23 = vor.u32 %v12152_v41, %v10964_v52  ;;  %v11030_v36 = vld [vmem:[#allocation9 + $0x2f0] sm:$0xf0] }
 0x490   :  { %7019 = vmatpush.bf16.msra.mxu2 %v11029_v18  ;;  %v10701_v45 = vor.u32 %v12085_v10, %v10700_v11  ;;  %v12103_v18 = vld [vmem:[#allocation9 + $0xec] sm:$0xf]  ;;  %v11033_v47 = vor.u32 %v12166_v30, %v11030_v36  ;;  %v12142_v30 = vld [vmem:[#allocation9 + $0x224] sm:$0xf] }
 0x491   :  { %7052 = vmatpush.bf16.msrb.mxu0 %v10697_v35  ;;  %v5930_v35 = vpop.f32.mrf.mxu0  ;;  %v5917_v44 = vadd.f32 %v5916_v27, %v5903_v4  ;;  %v10785_v16 = vor.u32 %v12103_v18, %v10782_v49  ;;  %v12091_v11 = vld [vmem:[#allocation9 + $0x8c] sm:$0xf]  ;;  %v12117_v18 = vld [vmem:[#allocation9 + $0x154] sm:$0xf0]  ;;  %v12146_v49 = vld [vmem:[#allocation9 + $0x244] sm:$0xf] }
 0x493   :  { %7066 = vmatpush.bf16.msrb.mxu1 %v10825_v55  ;;  %6194 = vmatpush.bf16.msrb.mxu3 %v10545_v61  ;;  %v5918_v8 = vpop.f32.mrf.mxu3  ;;  %v5931_v12 = vadd.f32 %v5930_v35, %v5917_v44  ;;  %v10948_v61 = vld [vmem:[#allocation9 + $0x240] sm:$0xf]  ;;  %v12099_v35 = vld [vmem:[#allocation9 + $0xcc] sm:$0xf]  ;;  %v11014_v44 = vld [vmem:[#allocation9 + $0x2d0] sm:$0xf0] }
 0x494   :  { %7020 = vmatpush.bf16.msra.mxu2 %v11013_v6  ;;  %v12140_v6 = vld [vmem:[#allocation9 + $0x20c] sm:$0xf0] }
 0x495   :  { %7053 = vmatpush.bf16.msrb.mxu0 %v10681_v17  ;;  %v5905_v17 = vadd.f32 %v5904_v63, %v5891_v29  ;;  %v5958_v55 = vpop.f32.mrf.mxu2  ;;  %v10916_v63 = vld [vmem:[#allocation9 + $0x200] sm:$0xf] }
 0x496   :  { %6195 = vmatmul.bf16.vlgmr.msrb.gmra.mxu3 %v12947_v46  ;;  %v5944_v46 = vpop.f32.mrf.mxu1  ;;  %v10917_v42 = vor.u32 %v12140_v6, %v10916_v63  ;;  %v12075_v63 = vld [vmem:[#allocation9 + $0xc] sm:$0xf]  ;;  %v10670_v6 = vld [vmem:[#allocation9 + $0x18] sm:$0xf0] }
 0x497   :  { %7067 = vmatpush.bf16.msrb.mxu1 %v10809_v34  ;;  %v5919_v56 = vadd.f32 %v5918_v8, %v5905_v17  ;;  %v5945_v28 = vadd.f32 %v5944_v46, %v5931_v12  ;;  %v12148_v34 = vld [vmem:[#allocation9 + $0x24c] sm:$0xf0]  ;;  %v10892_v46 = vld [vmem:[#allocation9 + $0x1c8] sm:$0xf]  ;;  %v12133_v8 = vld [vmem:[#allocation9 + $0x1d4] sm:$0xf0] }
 0x498   :  { %7021 = vmatpush.bf16.msra.mxu2 %v10997_v37  ;;  %v10949_v14 = vor.u32 %v12148_v34, %v10948_v61  ;;  %v10909_v37 = vor.u32 %v12137_v31, %v10908_v19  ;;  %v12162_v17 = vld [vmem:[#allocation9 + $0x2c4] sm:$0xf]  ;;  %v10893_v32 = vor.u32 %v12133_v8, %v10892_v46  ;;  %v10734_v12 = vld [vmem:[#allocation9 + $0x98] sm:$0xf0]  ;;  %v10844_v34 = vld [vmem:[#allocation9 + $0x168] sm:$0xf] }
 0x499   :  { %7054 = vmatpush.bf16.msrb.mxu0 %v10665_v33  ;;  %v5932_v33 = vpop.f32.mrf.mxu0  ;;  %v5959_v58 = vadd.f32 %v5958_v55, %v5945_v28  ;;  %v11017_v1 = vor.u32 %v12162_v17, %v11014_v44  ;;  %v12158_v55 = vld [vmem:[#allocation9 + $0x2a4] sm:$0xf]  ;;  %v10737_v41 = vor.u32 %v12091_v11, %v10734_v12  ;;  %v10910_v46 = vld [vmem:[#allocation9 + $0x1f8] sm:$0xf0]  ;;  %v11156_v44 = vld [vmem:[#allocation9 + $0x3e0] sm:$0xf] }
 0x49a   :  { %v5933_v21 = vadd.f32 %v5932_v33, %v5919_v56  ;;  %v12129_v56 = vld [vmem:[#allocation9 + $0x1b4] sm:$0xf0]  ;;  %v10860_v33 = vld [vmem:[#allocation9 + $0x188] sm:$0xf]  ;;  %v12138_v8 = vld [vmem:[#allocation9 + $0x204] sm:$0xf] }
 0x49b   :  { %7068 = vmatpush.bf16.msrb.mxu1 %v10793_v57  ;;  %v5972_v3 = vpop.f32.mrf.mxu3  ;;  %v10933_v57 = vor.u32 %v12144_v22, %v10932_v62  ;;  %v10877_v52 = vor.u32 %v12129_v56, %v10876_v25  ;;  %v10828_v22 = vld [vmem:[#allocation9 + $0x148] sm:$0xf]  ;;  %v10894_v11 = vld [vmem:[#allocation9 + $0x1d8] sm:$0xf0] }
 0x49c   :  { %7022 = vmatpush.bf16.msra.mxu2 %v10981_v38  ;;  %7055 = vmatmul.bf16.vlgmr.msrb.gmra.mxu0 %v12994_v13  ;;  %v5973_v5 = vadd.f32 %v5972_v3, %v5959_v58  ;;  %v10718_v3 = vld [vmem:[#allocation9 + $0x78] sm:$0xf0]  ;;  %v10829_v19 = vor.u32 %v12117_v18, %v10828_v22 }
 0x49d   :  { %7103 = vmatpush.bf16.msra.mxu0 %v10781_v0  ;;  %v10668_v0 = vld [vmem:[#allocation9 + $0x8] sm:$0xf]  ;;  %v5960_v43 = vpop.f32.mrf.mxu2 }
 0x49e   :  { %v5946_v60 = vpop.f32.mrf.mxu1  ;;  %v10669_v48 = vor.u32 %v12077_v53, %v10668_v0  ;;  %v6202_v15 = vmax.f32 %v5973_v5, 0.0  ;;  %v10966_v0 = vld [vmem:[#allocation9 + $0x270] sm:$0xf0]  ;;  %v12079_v5 = vld [vmem:[#allocation9 + $0x2c] sm:$0xf] }
 0x49f   :  { %v5947_v39 = vadd.f32 %v5946_v60, %v5933_v21  ;;  %v12087_v21 = vld [vmem:[#allocation9 + $0x6c] sm:$0xf]  ;;  %v12121_v60 = vld [vmem:[#allocation9 + $0x174] sm:$0xf0] }
 0x4a0   :  { %7023 = vmatpush.bf16.msra.mxu2 %v10965_v23  ;;  %v12125_v23 = vld [vmem:[#allocation9 + $0x194] sm:$0xf0]  ;;  %v10721_v61 = vor.u32 %v12087_v21, %v10718_v3  ;;  %v10845_v62 = vor.u32 %v12121_v60, %v10844_v34 }
 0x4a1   :  { %7104 = vmatpush.bf16.msra.mxu0 %v10765_v59  ;;  %v5961_v27 = vadd.f32 %v5960_v43, %v5947_v39  ;;  %v10861_v2 = vor.u32 %v12125_v23, %v10860_v33  ;;  %v10702_v39 = vld [vmem:[#allocation9 + $0x58] sm:$0xf0]  ;;  %v5986_v53 = vpop.f32.mrf.mxu0  ;;  %v12127_v23 = vld [vmem:[#allocation9 + $0x1ac] sm:$0xf] }
 0x4a3   :  { %v5974_v59 = vpop.f32.mrf.mxu3 }
 0x4a4   :  { %7024 = vmatpush.bf16.msra.mxu2 %v10949_v14  ;;  %v5975_v20 = vadd.f32 %v5974_v59, %v5961_v27  ;;  %v12083_v14 = vld [vmem:[#allocation9 + $0x4c] sm:$0xf]  ;;  %v10686_v27 = vld [vmem:[#allocation9 + $0x38] sm:$0xf0] }
 0x4a5   :  { %7105 = vmatpush.bf16.msra.mxu0 %v10749_v24  ;;  %v10766_v24 = vld [vmem:[#allocation9 + $0xd8] sm:$0xf0]  ;;  %v10705_v43 = vor.u32 %v12083_v14, %v10702_v39  ;;  %v10689_v31 = vor.u32 %v12079_v5, %v10686_v27  ;;  %v12119_v5 = vld [vmem:[#allocation9 + $0x16c] sm:$0xf] }
 0x4a6   :  { %v6206_v50 = vmax.f32 %v5975_v20, 0.0  ;;  %v10769_v4 = vor.u32 %v12099_v35, %v10766_v24  ;;  %v10812_v20 = vld [vmem:[#allocation9 + $0x128] sm:$0xf]  ;;  %v10934_v35 = vld [vmem:[#allocation9 + $0x230] sm:$0xf0] }
 0x4a7   :  { %v10937_v24 = vor.u32 %v12142_v30, %v10934_v35  ;;  %v10846_v27 = vld [vmem:[#allocation9 + $0x178] sm:$0xf0] }
 0x4a8   :  { %7025 = vmatpush.bf16.msra.mxu2 %v10933_v57  ;;  %v12999_v29 = vpack.c.bf16 %v6206_v50, %v6202_v15  ;;  %v10950_v57 = vld [vmem:[#allocation9 + $0x250] sm:$0xf0]  ;;  %v10673_v15 = vor.u32 %v12075_v63, %v10670_v6  ;;  %v10796_v50 = vld [vmem:[#allocation9 + $0x108] sm:$0xf]  ;;  %v10849_v63 = vor.u32 %v12119_v5, %v10846_v27  ;;  %v12115_v6 = vld [vmem:[#allocation9 + $0x14c] sm:$0xf] }
 0x4a9   :  { %7106 = vmatpush.bf16.msra.mxu0 %v10733_v7  ;;  %v12095_v7 = vld [vmem:[#allocation9 + $0xac] sm:$0xf]  ;;  %v10953_v59 = vor.u32 %v12146_v49, %v10950_v57  ;;  %v10830_v35 = vld [vmem:[#allocation9 + $0x158] sm:$0xf0]  ;;  %v10972_v27 = vld [vmem:[#allocation9 + $0x268] sm:$0xf] }
 0x4aa   :  { %7013 = vmatmul.bf16.vlgmr.msra.gmra.mxu1 %v12999_v29  ;;  %v10753_v38 = vor.u32 %v12095_v7, %v10750_v9  ;;  %v10918_v7 = vld [vmem:[#allocation9 + $0x210] sm:$0xf0]  ;;  %v4467_v9 = vperm.slane %v12971_v26, 2 }
 0x4ab   :  { %7117 = vmatpush.bf16.msra.mxu1 %v10909_v37  ;;  %v12135_v37 = vld [vmem:[#allocation9 + $0x1ec] sm:$0xf]  ;;  %v10921_v17 = vor.u32 %v12138_v8, %v10918_v7  ;;  %v11060_v7 = vld [vmem:[#allocation9 + $0x320] sm:$0xf] }
 0x4ac   :  { %7026 = vmatpush.bf16.msra.mxu2 %v10917_v42  ;;  %v6014_v42 = vpop.f32.mrf.mxu2  ;;  %v10913_v56 = vor.u32 %v12135_v37, %v10910_v46  ;;  %v5987_v12 = vadd.f32 %v5986_v53, %v4467_v9  ;;  %v12188_v53 = vld [vmem:[#allocation9 + $0x38c] sm:$0xf0]  ;;  %v10814_v46 = vld [vmem:[#allocation9 + $0x138] sm:$0xf0] }
 0x4ad   :  { %7107 = vmatpush.bf16.msra.mxu0 %v10717_v40  ;;  %v10998_v40 = vld [vmem:[#allocation9 + $0x2b0] sm:$0xf0] }
 0x4ae   :  { %v11001_v10 = vor.u32 %v12158_v55, %v10998_v40  ;;  %v12131_v40 = vld [vmem:[#allocation9 + $0x1cc] sm:$0xf] }
 0x4af   :  { %7118 = vmatpush.bf16.msra.mxu1 %v10893_v32  ;;  %v10897_v33 = vor.u32 %v12131_v40, %v10894_v11  ;;  %v11044_v40 = vld [vmem:[#allocation9 + $0x300] sm:$0xf]  ;;  %v12172_v11 = vld [vmem:[#allocation9 + $0x30c] sm:$0xf0] }
 0x4b0   :  { %7075 = vmatpush.bf16.msrb.mxu2 %v11033_v47  ;;  %v12109_v47 = vld [vmem:[#allocation9 + $0x114] sm:$0xf0] }
 0x4b1   :  { %7108 = vmatpush.bf16.msra.mxu0 %v10701_v45  ;;  %v12154_v45 = vld [vmem:[#allocation9 + $0x284] sm:$0xf]  ;;  %v10797_v25 = vor.u32 %v12109_v47, %v10796_v50  ;;  %v10833_v47 = vor.u32 %v12115_v6, %v10830_v35 }
 0x4b2   :  { %v10985_v28 = vor.u32 %v12154_v45, %v10982_v51  ;;  %v10878_v45 = vld [vmem:[#allocation9 + $0x1b8] sm:$0xf0]  ;;  %v11124_v51 = vld [vmem:[#allocation9 + $0x3a0] sm:$0xf]  ;;  %v12178_v6 = vld [vmem:[#allocation9 + $0x344] sm:$0xf] }
 0x4b3   :  { %7119 = vmatpush.bf16.msra.mxu1 %v10877_v52  ;;  %v12196_v52 = vld [vmem:[#allocation9 + $0x3cc] sm:$0xf0]  ;;  %v10881_v14 = vor.u32 %v12127_v23, %v10878_v45 }
 0x4b4   :  { %7076 = vmatpush.bf16.msrb.mxu2 %v11017_v1  ;;  %v12200_v1 = vld [vmem:[#allocation9 + $0x3ec] sm:$0xf0]  ;;  %v6016_v21 = vpop.f32.mrf.mxu2 }
 0x4b5   :  { %7109 = vmatpush.bf16.msra.mxu0 %v10685_v54  ;;  %v12150_v54 = vld [vmem:[#allocation9 + $0x264] sm:$0xf] }
 0x4b6   :  { %v10969_v58 = vor.u32 %v12150_v54, %v10966_v0  ;;  %v10862_v0 = vld [vmem:[#allocation9 + $0x198] sm:$0xf0] }
 0x4b7   :  { %7120 = vmatpush.bf16.msra.mxu1 %v10861_v2 }
 0x4b8   :  { %7077 = vmatpush.bf16.msrb.mxu2 %v11001_v10  ;;  %v11140_v10 = vld [vmem:[#allocation9 + $0x3c0] sm:$0xf] }
 0x4b9   :  { %7110 = vmatpush.bf16.msra.mxu0 %v10669_v48  ;;  %v6000_v48 = vpop.f32.mrf.mxu1  ;;  %v6028_v32 = vpop.f32.mrf.mxu3  ;;  %v11141_v26 = vor.u32 %v12196_v52, %v11140_v10  ;;  %v11036_v10 = vld [vmem:[#allocation9 + $0x2e8] sm:$0xf]  ;;  %v12169_v52 = vld [vmem:[#allocation9 + $0x2f4] sm:$0xf0] }
 0x4ba   :  { %7069 = vmatmul.bf16.vlgmr.msrb.gmra.mxu1 %v12999_v29  ;;  %v6001_v2 = vadd.f32 %v6000_v48, %v5987_v12  ;;  %v11092_v48 = vld [vmem:[#allocation9 + $0x360] sm:$0xf] }
 0x4bb   :  { %7121 = vmatpush.bf16.msra.mxu1 %v10845_v62 }
 0x4bc   :  { %7111 = vmatmul.bf16.vlgmr.msra.gmra.mxu0 %v12994_v13  ;;  %7078 = vmatpush.bf16.msrb.mxu2 %v10985_v28  ;;  %v12192_v28 = vld [vmem:[#allocation9 + $0x3ac] sm:$0xf0]  ;;  %v6015_v60 = vadd.f32 %v6014_v42, %v6001_v2  ;;  %v6070_v57 = vpop.f32.mrf.mxu2  ;;  %v11020_v2 = vld [vmem:[#allocation9 + $0x2c8] sm:$0xf] }
 0x4bd   :  { %7159 = vmatpush.bf16.msrb.mxu0 %v10785_v16  ;;  %v12113_v16 = vld [vmem:[#allocation9 + $0x134] sm:$0xf0]  ;;  %v12180_v42 = vld [vmem:[#allocation9 + $0x34c] sm:$0xf0] }
 0x4be   :  { %v10813_v36 = vor.u32 %v12113_v16, %v10812_v20  ;;  %v6029_v22 = vadd.f32 %v6028_v32, %v6015_v60  ;;  %v11142_v60 = vld [vmem:[#allocation9 + $0x3d0] sm:$0xf0] }
 0x4bf   :  { %7122 = vmatpush.bf16.msra.mxu1 %v10829_v19  ;;  %v12184_v19 = vld [vmem:[#allocation9 + $0x36c] sm:$0xf0] }
 0x4c0   :  { %7079 = vmatpush.bf16.msrb.mxu2 %v10969_v58  ;;  %v11108_v58 = vld [vmem:[#allocation9 + $0x380] sm:$0xf]  ;;  %v11093_v20 = vor.u32 %v12184_v19, %v11092_v48  ;;  %v12182_v48 = vld [vmem:[#allocation9 + $0x364] sm:$0xf]  ;;  %v11094_v19 = vld [vmem:[#allocation9 + $0x370] sm:$0xf0] }
 0x4c1   :  { %7160 = vmatpush.bf16.msrb.mxu0 %v10769_v4  ;;  %v5988_v4 = vpop.f32.mrf.mxu0  ;;  %v6002_v55 = vpop.f32.mrf.mxu1 }
 0x4c2   :  { %v6030_v54 = vpop.f32.mrf.mxu3 }
 0x4c3   :  { %7123 = vmatpush.bf16.msra.mxu1 %v10813_v36 }
 0x4c4   :  { %7080 = vmatpush.bf16.msrb.mxu2 %v10953_v59 }
 0x4c5   :  { %7161 = vmatpush.bf16.msrb.mxu0 %v10753_v38  ;;  %v11157_v38 = vor.u32 %v12200_v1, %v11156_v44 }
 0x4c7   :  { %7033 = vmatpush.bf16.msra.mxu3 %v11157_v38  ;;  %7124 = vmatpush.bf16.msra.mxu1 %v10797_v25  ;;  %v12107_v38 = vld [vmem:[#allocation9 + $0x10c] sm:$0xf] }
 0x4c8   :  { %7081 = vmatpush.bf16.msrb.mxu2 %v10937_v24  ;;  %v11076_v24 = vld [vmem:[#allocation9 + $0x340] sm:$0xf] }
 0x4c9   :  { %7162 = vmatpush.bf16.msrb.mxu0 %v10737_v41  ;;  %v5989_v41 = vadd.f32 %v5988_v4, %v4467_v9  ;;  %v6042_v3 = vpop.f32.mrf.mxu0  ;;  %v6056_v39 = vpop.f32.mrf.mxu1  ;;  %v12111_v4 = vld [vmem:[#allocation9 + $0x12c] sm:$0xf]  ;;  %v12176_v9 = vld [vmem:[#allocation9 + $0x32c] sm:$0xf0] }
 0x4ca   :  { %7125 = vmatmul.bf16.vlgmr.msra.gmra.mxu1 %v12999_v29  ;;  %v6043_v59 = vadd.f32 %v6042_v3, %v6029_v22  ;;  %v11061_v44 = vor.u32 %v12176_v9, %v11060_v7  ;;  %v10817_v25 = vor.u32 %v12111_v4, %v10814_v46  ;;  %v10988_v22 = vld [vmem:[#allocation9 + $0x288] sm:$0xf]  ;;  %v12141_v7 = vld [vmem:[#allocation9 + $0x214] sm:$0xf0]  ;;  %v12167_v9 = vld [vmem:[#allocation9 + $0x2ec] sm:$0xf] }
 0x4cb   :  { %7173 = vmatpush.bf16.msrb.mxu1 %v10913_v56  ;;  %7034 = vmatpush.bf16.msra.mxu3 %v11141_v26  ;;  %v6003_v34 = vadd.f32 %v6002_v55, %v5989_v41  ;;  %v10798_v55 = vld [vmem:[#allocation9 + $0x118] sm:$0xf0]  ;;  %v11045_v26 = vor.u32 %v12172_v11, %v11044_v40  ;;  %v12198_v41 = vld [vmem:[#allocation9 + $0x3e4] sm:$0xf] }
 0x4cc   :  { %7082 = vmatpush.bf16.msrb.mxu2 %v10921_v17  ;;  %v6057_v36 = vadd.f32 %v6056_v39, %v6043_v59  ;;  %v6072_v17 = vpop.f32.mrf.mxu2  ;;  %v10801_v3 = vor.u32 %v12107_v38, %v10798_v55  ;;  %v11004_v39 = vld [vmem:[#allocation9 + $0x2a8] sm:$0xf]  ;;  %v12153_v59 = vld [vmem:[#allocation9 + $0x274] sm:$0xf0] }
 0x4cd   :  { %7163 = vmatpush.bf16.msrb.mxu0 %v10721_v61  ;;  %v11125_v61 = vor.u32 %v12192_v28, %v11124_v51  ;;  %v6017_v62 = vadd.f32 %v6016_v21, %v6003_v34  ;;  %v11037_v51 = vor.u32 %v12169_v52, %v11036_v10  ;;  %v12194_v34 = vld [vmem:[#allocation9 + $0x3c4] sm:$0xf]  ;;  %v12163_v10 = vld [vmem:[#allocation9 + $0x2cc] sm:$0xf]  ;;  %v11022_v52 = vld [vmem:[#allocation9 + $0x2d8] sm:$0xf0] }
 0x4ce   :  { %v6071_v8 = vadd.f32 %v6070_v57, %v6057_v36  ;;  %v10940_v36 = vld [vmem:[#allocation9 + $0x228] sm:$0xf] }
 0x4cf   :  { %7174 = vmatpush.bf16.msrb.mxu1 %v10897_v33  ;;  %7035 = vmatpush.bf16.msra.mxu3 %v11125_v61  ;;  %v6031_v18 = vadd.f32 %v6030_v54, %v6017_v62  ;;  %v11158_v33 = vld [vmem:[#allocation9 + $0x3f0] sm:$0xf0]  ;;  %v12165_v61 = vld [vmem:[#allocation9 + $0x2d4] sm:$0xf0] }
 0x4d0   :  { %v11161_v45 = vor.u32 %v12198_v41, %v11158_v33  ;;  %v12161_v54 = vld [vmem:[#allocation9 + $0x2b4] sm:$0xf0]  ;;  %v11025_v33 = vor.u32 %v12163_v10, %v11022_v52 }
 0x4d1   :  { %7164 = vmatpush.bf16.msrb.mxu0 %v10705_v43  ;;  %v11109_v43 = vor.u32 %v12188_v53, %v11108_v58  ;;  %v6058_v50 = vpop.f32.mrf.mxu1  ;;  %v11126_v58 = vld [vmem:[#allocation9 + $0x3b0] sm:$0xf0]  ;;  %v11005_v62 = vor.u32 %v12161_v54, %v11004_v39  ;;  %v10990_v39 = vld [vmem:[#allocation9 + $0x298] sm:$0xf0]  ;;  %v12185_v10 = vld [vmem:[#allocation9 + $0x374] sm:$0xf0] }
 0x4d3   :  { %7175 = vmatpush.bf16.msrb.mxu1 %v10881_v14  ;;  %7036 = vmatpush.bf16.msra.mxu3 %v11109_v43  ;;  %v11145_v14 = vor.u32 %v12194_v34, %v11142_v60  ;;  %v12157_v43 = vld [vmem:[#allocation9 + $0x294] sm:$0xf0] }
 0x4d4   :  { %v10989_v5 = vor.u32 %v12157_v43, %v10988_v22  ;;  %v6126_v4 = vpop.f32.mrf.mxu2  ;;  %v12151_v22 = vld [vmem:[#allocation9 + $0x26c] sm:$0xf]  ;;  %v10974_v43 = vld [vmem:[#allocation9 + $0x278] sm:$0xf0] }
 0x4d5   :  { %7165 = vmatpush.bf16.msrb.mxu0 %v10689_v31  ;;  %v6044_v31 = vpop.f32.mrf.mxu0 }
 0x4d6   :  { %v6045_v16 = vadd.f32 %v6044_v31, %v6031_v18  ;;  %v12186_v18 = vld [vmem:[#allocation9 + $0x384] sm:$0xf]  ;;  %v11097_v31 = vor.u32 %v12182_v48, %v11094_v19  ;;  %v10958_v48 = vld [vmem:[#allocation9 + $0x258] sm:$0xf0] }
 0x4d7   :  { %7037 = vmatpush.bf16.msra.mxu3 %v11093_v20  ;;  %v10973_v20 = vor.u32 %v12153_v59, %v10972_v27  ;;  %v12147_v59 = vld [vmem:[#allocation9 + $0x24c] sm:$0xf] }
 0x4d8   :  { %v6059_v37 = vadd.f32 %v6058_v50, %v6045_v16  ;;  %v10956_v16 = vld [vmem:[#allocation9 + $0x248] sm:$0xf]  ;;  %v12174_v50 = vld [vmem:[#allocation9 + $0x324] sm:$0xf] }
 0x4d9   :  { %7166 = vmatpush.bf16.msrb.mxu0 %v10673_v15  ;;  %v6084_v30 = vpop.f32.mrf.mxu3  ;;  %v11077_v15 = vor.u32 %v12180_v42, %v11076_v24  ;;  %v6112_v24 = vpop.f32.mrf.mxu1 }
 0x4da   :  { %v6085_v1 = vadd.f32 %v6084_v30, %v6071_v8  ;;  %v6073_v32 = vadd.f32 %v6072_v17, %v6059_v37  ;;  %v11078_v30 = vld [vmem:[#allocation9 + $0x350] sm:$0xf0]  ;;  %v10924_v8 = vld [vmem:[#allocation9 + $0x208] sm:$0xf] }
 0x4db   :  { %7038 = vmatpush.bf16.msra.mxu3 %v11077_v15  ;;  %v11081_v35 = vor.u32 %v12178_v6, %v11078_v30  ;;  %v12145_v15 = vld [vmem:[#allocation9 + $0x234] sm:$0xf0]  ;;  %v10925_v40 = vor.u32 %v12141_v7, %v10924_v8 }
 0x4dc   :  { %7167 = vmatmul.bf16.vlgmr.msrb.gmra.mxu0 %v12994_v13  ;;  %v12123_v13 = vld [vmem:[#allocation9 + $0x18c] sm:$0xf]  ;;  %v6203_v23 = vmax.f32 %v6085_v1, 0.0  ;;  %v10941_v46 = vor.u32 %v12145_v15, %v10940_v36  ;;  %v12170_v1 = vld [vmem:[#allocation9 + $0x304] sm:$0xf] }
 0x4dd   :  { %v10865_v49 = vor.u32 %v12123_v13, %v10862_v0  ;;  %v11021_v13 = vor.u32 %v12165_v61, %v11020_v2  ;;  %v12190_v0 = vld [vmem:[#allocation9 + $0x3a4] sm:$0xf]  ;;  %v12139_v15 = vld [vmem:[#allocation9 + $0x20c] sm:$0xf] }
 0x4de   :  { %v11129_v53 = vor.u32 %v12190_v0, %v11126_v58 }
 0x4df   :  { %7176 = vmatpush.bf16.msrb.mxu1 %v10865_v49  ;;  %7039 = vmatpush.bf16.msra.mxu3 %v11061_v44  ;;  %v11110_v49 = vld [vmem:[#allocation9 + $0x390] sm:$0xf0]  ;;  %v11038_v44 = vld [vmem:[#allocation9 + $0x2f8] sm:$0xf0] }
 0x4e0   :  { %v11113_v57 = vor.u32 %v12186_v18, %v11110_v49  ;;  %v11041_v11 = vor.u32 %v12167_v9, %v11038_v44  ;;  %v11148_v44 = vld [vmem:[#allocation9 + $0x3c8] sm:$0xf] }
 0x4e1   :  { %v6086_v56 = vpop.f32.mrf.mxu3 }
 0x4e2   :  { %v6087_v12 = vadd.f32 %v6086_v56, %v6073_v32  ;;  %v11046_v32 = vld [vmem:[#allocation9 + $0x310] sm:$0xf0] }
 0x4e3   :  { %7177 = vmatpush.bf16.msrb.mxu1 %v10849_v63  ;;  %7040 = vmatpush.bf16.msra.mxu3 %v11045_v26  ;;  %v12149_v63 = vld [vmem:[#allocation9 + $0x254] sm:$0xf0]  ;;  %v11049_v56 = vor.u32 %v12170_v1, %v11046_v32 }
 0x4e4   :  { %v6207_v21 = vmax.f32 %v6087_v12, 0.0  ;;  %v10957_v42 = vor.u32 %v12149_v63, %v10956_v16  ;;  %v6114_v12 = vpop.f32.mrf.mxu1  ;;  %v12143_v16 = vld [vmem:[#allocation9 + $0x22c] sm:$0xf]  ;;  %v10942_v63 = vld [vmem:[#allocation9 + $0x238] sm:$0xf0] }
 0x4e5   :  { %v12197_v1 = vld [vmem:[#allocation9 + $0x3d4] sm:$0xf0] }
 0x4e6   :  { %v13007_v28 = vpack.c.bf16 %v6207_v21, %v6203_v23  ;;  %v6128_v23 = vpop.f32.mrf.mxu2  ;;  %v11149_v32 = vor.u32 %v12197_v1, %v11148_v44  ;;  %v12211_v44 = vld [vmem:[#allocation12 + $0x48] sm:$0xff] }
 0x4e7   :  { %7178 = vmatpush.bf16.msrb.mxu1 %v10833_v47  ;;  %7089 = vmatpush.bf16.msrb.mxu3 %v11161_v45  ;;  %v11062_v47 = vld [vmem:[#allocation9 + $0x330] sm:$0xf0]  ;;  %v11006_v45 = vld [vmem:[#allocation9 + $0x2b8] sm:$0xf0]  ;;  %v12223_v1 = vld [vmem:[#allocation12 + $0xa8] sm:$0xff] }
 0x4e8   :  { %7027 = vmatmul.bf16.vlgmr.msra.gmra.mxu2 %v13007_v28  ;;  %v11065_v37 = vor.u32 %v12174_v50, %v11062_v47  ;;  %v10926_v50 = vld [vmem:[#allocation9 + $0x218] sm:$0xf0] }
 0x4e9   :  { %7131 = vmatpush.bf16.msra.mxu2 %v11037_v51  ;;  %v10929_v7 = vor.u32 %v12139_v15, %v10926_v50  ;;  %v12215_v15 = vld [vmem:[#allocation12 + $0x68] sm:$0xff]  ;;  %v12202_v50 = vld [vmem:[#allocation12] sm:$0xff] }
 0x4eb   :  { %7179 = vmatpush.bf16.msrb.mxu1 %v10817_v25  ;;  %7090 = vmatpush.bf16.msrb.mxu3 %v11145_v14  ;;  %v12252_v25 = vld [vmem:[#allocation7] sm:$0xf] }
 0x4ec   :  { %v4468_v38 = vperm.slane %v12252_v25, 3  ;;  %v6168_v60 = vpop.f32.mrf.mxu1  ;;  %v11132_v25 = vld [vmem:[#allocation9 + $0x3a8] sm:$0xf] }
 0x4ed   :  { %7132 = vmatpush.bf16.msra.mxu2 %v11021_v13  ;;  %v12155_v13 = vld [vmem:[#allocation9 + $0x28c] sm:$0xf] }
 0x4ef   :  { %7180 = vmatpush.bf16.msrb.mxu1 %v10801_v3  ;;  %7091 = vmatpush.bf16.msrb.mxu3 %v11129_v53  ;;  %v12159_v3 = vld [vmem:[#allocation9 + $0x2ac] sm:$0xf]  ;;  %v10993_v53 = vor.u32 %v12155_v13, %v10990_v39 }
 0x4f0   :  { %v11009_v34 = vor.u32 %v12159_v3, %v11006_v45  ;;  %v11052_v3 = vld [vmem:[#allocation9 + $0x308] sm:$0xf]  ;;  %v12173_v45 = vld [vmem:[#allocation9 + $0x314] sm:$0xf0]  ;;  %v12191_v39 = vld [vmem:[#allocation9 + $0x3ac] sm:$0xf] }
 0x4f1   :  { %7133 = vmatpush.bf16.msra.mxu2 %v11005_v62  ;;  %v6182_v62 = vpop.f32.mrf.mxu2 }
 0x4f2   :  { %7181 = vmatmul.bf16.vlgmr.msrb.gmra.mxu1 %v12999_v29  ;;  %v6098_v29 = vpop.f32.mrf.mxu0 }
 0x4f3   :  { %7092 = vmatpush.bf16.msrb.mxu3 %v11113_v57  ;;  %v6099_v26 = vadd.f32 %v6098_v29, %v4468_v38  ;;  %v10961_v29 = vor.u32 %v12147_v59, %v10958_v48  ;;  %v11070_v59 = vld [vmem:[#allocation9 + $0x338] sm:$0xf0] }
 0x4f5   :  { %7134 = vmatpush.bf16.msra.mxu2 %v10989_v5  ;;  %v6113_v51 = vadd.f32 %v6112_v24, %v6099_v26  ;;  %v10977_v5 = vor.u32 %v12151_v22, %v10974_v43  ;;  %v11084_v26 = vld [vmem:[#allocation9 + $0x348] sm:$0xf]  ;;  %v12183_v22 = vld [vmem:[#allocation9 + $0x36c] sm:$0xf]  ;;  %v11102_v43 = vld [vmem:[#allocation9 + $0x378] sm:$0xf0] }
 0x4f7   :  { %7093 = vmatpush.bf16.msrb.mxu3 %v11097_v31  ;;  %v6127_v61 = vadd.f32 %v6126_v4, %v6113_v51  ;;  %v6170_v31 = vpop.f32.mrf.mxu1  ;;  %v12201_v4 = vld [vmem:[#allocation9 + $0x3f4] sm:$0xf0]  ;;  %v12199_v51 = vld [vmem:[#allocation9 + $0x3ec] sm:$0xf] }
 0x4f8   :  { %7083 = vmatmul.bf16.vlgmr.msrb.gmra.mxu2 %v13007_v28 }
 0x4f9   :  { %7135 = vmatpush.bf16.msra.mxu2 %v10973_v20  ;;  %v6140_v55 = vpop.f32.mrf.mxu3  ;;  %v6184_v30 = vpop.f32.mrf.mxu2 }
 0x4fa   :  { %v6100_v17 = vpop.f32.mrf.mxu0  ;;  %v6141_v0 = vadd.f32 %v6140_v55, %v6127_v61  ;;  %v11116_v55 = vld [vmem:[#allocation9 + $0x388] sm:$0xf]  ;;  %v11053_v61 = vor.u32 %v12173_v45, %v11052_v3 }
 0x4fb   :  { %7094 = vmatpush.bf16.msrb.mxu3 %v11081_v35  ;;  %v6101_v41 = vadd.f32 %v6100_v17, %v4468_v38  ;;  %v12193_v38 = vld [vmem:[#allocation9 + $0x3b4] sm:$0xf0] }
 0x4fd   :  { %7136 = vmatpush.bf16.msra.mxu2 %v10957_v42  ;;  %v6115_v2 = vadd.f32 %v6114_v12, %v6101_v41  ;;  %v10945_v42 = vor.u32 %v12143_v16, %v10942_v63  ;;  %v11100_v12 = vld [vmem:[#allocation9 + $0x368] sm:$0xf]  ;;  %v12181_v41 = vld [vmem:[#allocation9 + $0x354] sm:$0xf0]  ;;  %v12207_v63 = vld [vmem:[#allocation12 + $0x28] sm:$0xff] }
 0x4fe   :  { %v11101_v52 = vor.u32 %v12185_v10, %v11100_v12  ;;  %v12208_v16 = vld [vmem:[#allocation12 + $0x30] sm:$0xff]  ;;  %v12221_v12 = vld [vmem:[#allocation12 + $0x98] sm:$0xff] }
 0x4ff   :  { %7095 = vmatpush.bf16.msrb.mxu3 %v11065_v37  ;;  %v6129_v54 = vadd.f32 %v6128_v23, %v6115_v2  ;;  %v11164_v37 = vld [vmem:[#allocation9 + $0x3e8] sm:$0xf]  ;;  %v11166_v2 = vld [vmem:[#allocation9 + $0x3f8] sm:$0xf0] }
 0x500   :  { %v11165_v9 = vor.u32 %v12201_v4, %v11164_v37  ;;  %v11068_v23 = vld [vmem:[#allocation9 + $0x328] sm:$0xf]  ;;  %v12213_v4 = vld [vmem:[#allocation12 + $0x58] sm:$0xff] }
 0x501   :  { %7137 = vmatpush.bf16.msra.mxu2 %v10941_v46  ;;  %v6142_v14 = vpop.f32.mrf.mxu3 }
 0x502   :  { %v6154_v21 = vpop.f32.mrf.mxu0  ;;  %v6143_v58 = vadd.f32 %v6142_v14, %v6129_v54  ;;  %v11150_v14 = vld [vmem:[#allocation9 + $0x3d8] sm:$0xf0] }
 0x503   :  { %7096 = vmatpush.bf16.msrb.mxu3 %v11049_v56  ;;  %v6155_v18 = vadd.f32 %v6154_v21, %v6141_v0  ;;  %v11133_v56 = vor.u32 %v12193_v38, %v11132_v25  ;;  %v12177_v21 = vld [vmem:[#allocation9 + $0x334] sm:$0xf0]  ;;  %v11134_v54 = vld [vmem:[#allocation9 + $0x3b8] sm:$0xf0]  ;;  %v13020_v25 = vld [vmem:[#allocation10] sm:$0xf] }
 0x504   :  { %v11137_v0 = vor.u32 %v12191_v39, %v11134_v54  ;;  %v12218_v39 = vld [vmem:[#allocation12 + $0x80] sm:$0xff]  ;;  %v12233_v54 = vld [vmem:[#allocation12 + $0xf8] sm:$0xff] }
 0x505   :  { %7138 = vmatpush.bf16.msra.mxu2 %v10925_v40  ;;  %v6169_v19 = vadd.f32 %v6168_v60, %v6155_v18  ;;  %v12189_v40 = vld [vmem:[#allocation9 + $0x394] sm:$0xf0]  ;;  %v12195_v60 = vld [vmem:[#allocation9 + $0x3cc] sm:$0xf]  ;;  %v11105_v18 = vor.u32 %v12183_v22, %v11102_v43 }
 0x506   :  { %v11153_v13 = vor.u32 %v12195_v60, %v11150_v14  ;;  %v12232_v22 = vld [vmem:[#allocation12 + $0xf0] sm:$0xff] }
 0x507   :  { %v6183_v6 = vadd.f32 %v6182_v62, %v6169_v19  ;;  %v12171_v19 = vld [vmem:[#allocation9 + $0x30c] sm:$0xf] }
 0x508   :  { %7139 = vmatmul.bf16.vlgmr.msra.gmra.mxu2 %v13007_v28 }
 0x509   :  { %7187 = vmatpush.bf16.msrb.mxu2 %v11041_v11  ;;  %v11117_v11 = vor.u32 %v12189_v40, %v11116_v55  ;;  %v12222_v55 = vld [vmem:[#allocation12 + $0xa0] sm:$0xff] }
 0x50a   :  { %v6156_v49 = vpop.f32.mrf.mxu0 }
 0x50b   :  { %v6157_v57 = vadd.f32 %v6156_v49, %v6143_v58  ;;  %v12187_v58 = vld [vmem:[#allocation9 + $0x38c] sm:$0xf] }
 0x50c   :  { %v12179_v49 = vld [vmem:[#allocation9 + $0x34c] sm:$0xf] }
 0x50d   :  { %7188 = vmatpush.bf16.msrb.mxu2 %v11025_v33  ;;  %v6171_v20 = vadd.f32 %v6170_v31, %v6157_v57  ;;  %v11085_v33 = vor.u32 %v12181_v41, %v11084_v26  ;;  %v11086_v57 = vld [vmem:[#allocation9 + $0x358] sm:$0xf0] }
 0x50e   :  { %v11054_v31 = vld [vmem:[#allocation9 + $0x318] sm:$0xf0] }
 0x50f   :  { %v6185_v24 = vadd.f32 %v6184_v30, %v6171_v20  ;;  %v12209_v20 = vld [vmem:[#allocation12 + $0x38] sm:$0xff] }
 0x510   :  { %7487 = vmatpush.bf16.msra.mxu0 %v12209_v20  ;;  %v12205_v30 = vld [vmem:[#allocation12 + $0x18] sm:$0xff] }
 0x511   :  { %7189 = vmatpush.bf16.msrb.mxu2 %v11009_v34  ;;  %v11169_v34 = vor.u32 %v12199_v51, %v11166_v2 }
 0x512   :  { %v7000_v37 = vpop.f32.mrf.mxu0 }
 0x514   :  { %7488 = vmatpush.bf16.msra.mxu0 %v12208_v16 }
 0x515   :  { %7190 = vmatpush.bf16.msrb.mxu2 %v10993_v53  ;;  %v11118_v53 = vld [vmem:[#allocation9 + $0x398] sm:$0xf0] }
 0x516   :  { %v11121_v62 = vor.u32 %v12187_v58, %v11118_v53  ;;  %v6344_v58 = vperm.slane %v13020_v25, 1 }
 0x518   :  { %7489 = vmatpush.bf16.msra.mxu0 %v12207_v63 }
 0x519   :  { %v6196_v27 = vpop.f32.mrf.mxu3  ;;  %7191 = vmatpush.bf16.msrb.mxu2 %v10977_v5  ;;  %v11089_v5 = vor.u32 %v12179_v49, %v11086_v57  ;;  %v12231_v57 = vld [vmem:[#allocation12 + $0xe8] sm:$0xff] }
 0x51a   :  { %v6197_v35 = vadd.f32 %v6196_v27, %v6183_v6  ;;  %v12175_v27 = vld [vmem:[#allocation9 + $0x32c] sm:$0xf]  ;;  %v12206_v6 = vld [vmem:[#allocation12 + $0x20] sm:$0xff] }
 0x51b   :  { %v11073_v48 = vor.u32 %v12175_v27, %v11070_v59 }
 0x51c   :  { %v6204_v46 = vmax.f32 %v6197_v35, 0.0  ;;  %7490 = vmatpush.bf16.msra.mxu0 %v12206_v6  ;;  %v12217_v35 = vld [vmem:[#allocation12 + $0x78] sm:$0xff] }
 0x51d   :  { %7192 = vmatpush.bf16.msrb.mxu2 %v10961_v29  ;;  %v11057_v29 = vor.u32 %v12171_v19, %v11054_v31  ;;  %7501 = vmatpush.bf16.msra.mxu1 %v12217_v35  ;;  %v12230_v19 = vld [vmem:[#allocation12 + $0xe0] sm:$0xff] }
 0x520   :  { %7491 = vmatpush.bf16.msra.mxu0 %v12205_v30 }
 0x521   :  { %v6198_v36 = vpop.f32.mrf.mxu3  ;;  %7193 = vmatpush.bf16.msrb.mxu2 %v10945_v42  ;;  %v12216_v42 = vld [vmem:[#allocation12 + $0x70] sm:$0xff] }
 0x522   :  { %v6199_v47 = vadd.f32 %v6198_v36, %v6185_v24  ;;  %v12204_v24 = vld [vmem:[#allocation12 + $0x10] sm:$0xff]  ;;  %7502 = vmatpush.bf16.msra.mxu1 %v12216_v42  ;;  %v12203_v36 = vld [vmem:[#allocation12 + $0x8] sm:$0xff]  ;;  %v12229_v42 = vld [vmem:[#allocation12 + $0xd8] sm:$0xff] }
 0x524   :  { %v6208_v8 = vmax.f32 %v6199_v47, 0.0  ;;  %7492 = vmatpush.bf16.msra.mxu0 %v12204_v24  ;;  %v12214_v47 = vld [vmem:[#allocation12 + $0x60] sm:$0xff] }
 0x525   :  { %7194 = vmatpush.bf16.msrb.mxu2 %v10929_v7 }
 0x526   :  { %v13013_v17 = vpack.c.bf16 %v6208_v8, %v6204_v46  ;;  %7503 = vmatpush.bf16.msra.mxu1 %v12215_v15  ;;  %v12225_v46 = vld [vmem:[#allocation12 + $0xb8] sm:$0xff] }
 0x527   :  { %v7014_v8 = vpop.f32.mrf.mxu1 }
 0x528   :  { %7041 = vmatmul.bf16.vlgmr.msra.gmra.mxu3 %v13013_v17  ;;  %7195 = vmatmul.bf16.vlgmr.msrb.gmra.mxu2 %v13007_v28  ;;  %v11069_v28 = vor.u32 %v12177_v21, %v11068_v23  ;;  %v12220_v23 = vld [vmem:[#allocation12 + $0x90] sm:$0xff] }
 0x529   :  { %7145 = vmatpush.bf16.msra.mxu3 %v11165_v9  ;;  %7493 = vmatpush.bf16.msra.mxu0 %v12203_v36  ;;  %v12212_v9 = vld [vmem:[#allocation12 + $0x50] sm:$0xff]  ;;  %v6345_v36 = vperm.slane %v13020_v25, 2 }
 0x52a   :  { %7504 = vmatpush.bf16.msra.mxu1 %v12214_v47  ;;  %7515 = vmatpush.bf16.msra.mxu2 %v12225_v46 }
 0x52d   :  { %7146 = vmatpush.bf16.msra.mxu3 %v11149_v32  ;;  %7494 = vmatpush.bf16.msra.mxu0 %v12202_v50  ;;  %v7002_v32 = vpop.f32.mrf.mxu0  ;;  %v12228_v50 = vld [vmem:[#allocation12 + $0xd0] sm:$0xff] }
 0x52e   :  { %7505 = vmatpush.bf16.msra.mxu1 %v12213_v4 }
 0x52f   :  { %v7016_v38 = vpop.f32.mrf.mxu1 }
 0x531   :  { %7147 = vmatpush.bf16.msra.mxu3 %v11133_v56  ;;  %v12210_v56 = vld [vmem:[#allocation12 + $0x40] sm:$0xff] }
 0x532   :  { %7506 = vmatpush.bf16.msra.mxu1 %v12212_v9  ;;  %v12227_v9 = vld [vmem:[#allocation12 + $0xc8] sm:$0xff] }
 0x535   :  { %7148 = vmatpush.bf16.msra.mxu3 %v11117_v11  ;;  %v6343_v11 = vperm.slane %v13020_v25, 0  ;;  %v7056_v26 = vpop.f32.mrf.mxu0 }
 0x536   :  { %7507 = vmatpush.bf16.msra.mxu1 %v12211_v44  ;;  %v7057_v49 = vadd.f32 %v7056_v26, %v6344_v58 }
 0x537   :  { %v7003_v41 = vadd.f32 %v7002_v32, %v6343_v11  ;;  %v7070_v21 = vpop.f32.mrf.mxu1 }
 0x538   :  { %7097 = vmatmul.bf16.vlgmr.msrb.gmra.mxu3 %v13013_v17  ;;  %v7071_v27 = vadd.f32 %v7070_v21, %v7057_v49 }
 0x539   :  { %7149 = vmatpush.bf16.msra.mxu3 %v11101_v52  ;;  %v7001_v52 = vadd.f32 %v7000_v37, %v6343_v11 }
 0x53a   :  { %7508 = vmatpush.bf16.msra.mxu1 %v12210_v56  ;;  %v12226_v56 = vld [vmem:[#allocation12 + $0xc0] sm:$0xff] }
 0x53d   :  { %7150 = vmatpush.bf16.msra.mxu3 %v11085_v33  ;;  %v7015_v33 = vadd.f32 %v7014_v8, %v7001_v52 }
 0x541   :  { %7151 = vmatpush.bf16.msra.mxu3 %v11069_v28  ;;  %v7017_v28 = vadd.f32 %v7016_v38, %v7003_v41 }
 0x545   :  { %7152 = vmatpush.bf16.msra.mxu3 %v11053_v61  ;;  %v12219_v61 = vld [vmem:[#allocation12 + $0x88] sm:$0xff] }
 0x548   :  { %7153 = vmatmul.bf16.vlgmr.msra.gmra.mxu3 %v13013_v17 }
 0x549   :  { %7201 = vmatpush.bf16.msrb.mxu3 %v11169_v34 }
 0x54d   :  { %7202 = vmatpush.bf16.msrb.mxu3 %v11153_v13 }
 0x551   :  { %7203 = vmatpush.bf16.msrb.mxu3 %v11137_v0  ;;  %v7058_v0 = vpop.f32.mrf.mxu0 }
 0x555   :  { %7204 = vmatpush.bf16.msrb.mxu3 %v11121_v62  ;;  %v7072_v62 = vpop.f32.mrf.mxu1 }
 0x559   :  { %7205 = vmatpush.bf16.msrb.mxu3 %v11105_v18  ;;  %v7112_v31 = vpop.f32.mrf.mxu0 }
 0x55a   :  { %v7113_v4 = vadd.f32 %v7112_v31, %v6345_v36 }
 0x55d   :  { %7206 = vmatpush.bf16.msrb.mxu3 %v11089_v5  ;;  %v7059_v5 = vadd.f32 %v7058_v0, %v6344_v58  ;;  %v7126_v16 = vpop.f32.mrf.mxu1 }
 0x55f   :  { %v7073_v59 = vadd.f32 %v7072_v62, %v7059_v5  ;;  %v12248_v62 = vld [vmem:[#allocation13] ss:$0 sm:$0xff] }
 0x561   :  { %7207 = vmatpush.bf16.msrb.mxu3 %v11073_v48  ;;  %v7114_v47 = vpop.f32.mrf.mxu0 }
 0x562   :  { %v7115_v8 = vadd.f32 %v7114_v47, %v6345_v36 }
 0x565   :  { %7208 = vmatpush.bf16.msrb.mxu3 %v11057_v29  ;;  %v7128_v46 = vpop.f32.mrf.mxu1 }
 0x566   :  { %v7129_v44 = vadd.f32 %v7128_v46, %v7115_v8 }
 0x568   :  { %7209 = vmatmul.bf16.vlgmr.msrb.gmra.mxu3 %v13013_v17  ;;  %v12224_v17 = vld [vmem:[#allocation12 + $0xb0] sm:$0xff] }
 0x569   :  { %7516 = vmatpush.bf16.msra.mxu2 %v12224_v17  ;;  %7529 = vmatpush.bf16.msra.mxu3 %v12233_v54  ;;  %v7168_v52 = vpop.f32.mrf.mxu0 }
 0x56b   :  { %v7028_v7 = vpop.f32.mrf.mxu2 }
 0x56c   :  { %v7029_v3 = vadd.f32 %v7028_v7, %v7015_v33  ;;  %v7127_v7 = vadd.f32 %v7126_v16, %v7113_v4  ;;  %v6346_v33 = vperm.slane %v13020_v25, 3 }
 0x56d   :  { %7517 = vmatpush.bf16.msra.mxu2 %v12223_v1  ;;  %7530 = vmatpush.bf16.msra.mxu3 %v12232_v22 }
 0x56f   :  { %v7182_v26 = vpop.f32.mrf.mxu1 }
 0x571   :  { %7518 = vmatpush.bf16.msra.mxu2 %v12222_v55  ;;  %7531 = vmatpush.bf16.msra.mxu3 %v12231_v57 }
 0x573   :  { %v7030_v40 = vpop.f32.mrf.mxu2 }
 0x574   :  { %v7031_v51 = vadd.f32 %v7030_v40, %v7017_v28  ;;  %v7169_v28 = vadd.f32 %v7168_v52, %v6346_v33 }
 0x575   :  { %7519 = vmatpush.bf16.msra.mxu2 %v12221_v12  ;;  %7532 = vmatpush.bf16.msra.mxu3 %v12230_v19 }
 0x579   :  { %7520 = vmatpush.bf16.msra.mxu2 %v12220_v23  ;;  %7533 = vmatpush.bf16.msra.mxu3 %v12229_v42  ;;  %v7170_v23 = vpop.f32.mrf.mxu0 }
 0x57b   :  { %v7084_v45 = vpop.f32.mrf.mxu2 }
 0x57c   :  { %v7085_v48 = vadd.f32 %v7084_v45, %v7071_v27  ;;  %v7171_v45 = vadd.f32 %v7170_v23, %v6346_v33 }
 0x57d   :  { %7521 = vmatpush.bf16.msra.mxu2 %v12219_v61  ;;  %7534 = vmatpush.bf16.msra.mxu3 %v12228_v50 }
 0x581   :  { %7522 = vmatpush.bf16.msra.mxu2 %v12218_v39  ;;  %7535 = vmatpush.bf16.msra.mxu3 %v12227_v9 }
 0x583   :  { %v7086_v43 = vpop.f32.mrf.mxu2 }
 0x584   :  { %v7087_v29 = vadd.f32 %v7086_v43, %v7073_v59 }
 0x585   :  { %7536 = vmatpush.bf16.msra.mxu3 %v12226_v56 }
 0x58b   :  { %v7140_v30 = vpop.f32.mrf.mxu2 }
 0x58c   :  { %v7141_v1 = vadd.f32 %v7140_v30, %v7127_v7 }
 0x593   :  { %v7142_v17 = vpop.f32.mrf.mxu2 }
 0x594   :  { %v7143_v32 = vadd.f32 %v7142_v17, %v7129_v44 }
 0x5ab   :  { %v7042_v10 = vpop.f32.mrf.mxu3  ;;  %v7196_v41 = vpop.f32.mrf.mxu2 }
 0x5ac   :  { %v7043_v2 = vadd.f32 %v7042_v10, %v7029_v3  ;;  %v7184_v3 = vpop.f32.mrf.mxu1 }
 0x5ad   :  { %v7185_v61 = vadd.f32 %v7184_v3, %v7171_v45 }
 0x5ae   :  { %v7215_v14 = vmax.f32 %v7043_v2, 0.0 }
 0x5b3   :  { %v7044_v34 = vpop.f32.mrf.mxu3  ;;  %v7198_v2 = vpop.f32.mrf.mxu2 }
 0x5b4   :  { %v7045_v60 = vadd.f32 %v7044_v34, %v7031_v51  ;;  %v7183_v51 = vadd.f32 %v7182_v26, %v7169_v28 }
 0x5b6   :  { %v7219_v13 = vmax.f32 %v7045_v60, 0.0  ;;  %v7197_v34 = vadd.f32 %v7196_v41, %v7183_v51  ;;  %v7199_v60 = vadd.f32 %v7198_v2, %v7185_v61 }
 0x5b8   :  { %v7223_v53 = vpack.c.bf16 %v7219_v13, %v7215_v14 }
 0x5ba   :  { %7495 = vmatmul.bf16.vlgmr.msra.gmra.mxu0 %v7223_v53 }
 0x5bb   :  { %v7098_v18 = vpop.f32.mrf.mxu3 }
 0x5bc   :  { %v7099_v20 = vadd.f32 %v7098_v18, %v7085_v48 }
 0x5be   :  { %v7216_v35 = vmax.f32 %v7099_v20, 0.0 }
 0x5c3   :  { %v7100_v63 = vpop.f32.mrf.mxu3 }
 0x5c4   :  { %v7101_v6 = vadd.f32 %v7100_v63, %v7087_v29 }
 0x5c6   :  { %v7220_v24 = vmax.f32 %v7101_v6, 0.0 }
 0x5c8   :  { %v7224_v15 = vpack.c.bf16 %v7220_v24, %v7216_v35 }
 0x5ca   :  { %7509 = vmatmul.bf16.vlgmr.msra.gmra.mxu1 %v7224_v15 }
 0x5cb   :  { %v7154_v37 = vpop.f32.mrf.mxu3 }
 0x5cc   :  { %v7155_v38 = vadd.f32 %v7154_v37, %v7141_v1 }
 0x5ce   :  { %v7217_v11 = vmax.f32 %v7155_v38, 0.0 }
 0x5d3   :  { %v7156_v55 = vpop.f32.mrf.mxu3 }
 0x5d4   :  { %v7157_v40 = vadd.f32 %v7156_v55, %v7143_v32 }
 0x5d6   :  { %v7221_v12 = vmax.f32 %v7157_v40, 0.0 }
 0x5d8   :  { %v7225_v10 = vpack.c.bf16 %v7221_v12, %v7217_v11 }
 0x5da   :  { %7523 = vmatmul.bf16.vlgmr.msra.gmra.mxu2 %v7225_v10 }
 0x5eb   :  { %v7210_v21 = vpop.f32.mrf.mxu3 }
 0x5ec   :  { %v7211_v14 = vadd.f32 %v7210_v21, %v7197_v34 }
 0x5ee   :  { %v7218_v54 = vmax.f32 %v7211_v14, 0.0 }
 0x5f3   :  { %v7212_v13 = vpop.f32.mrf.mxu3 }
 0x5f4   :  { %v7213_v39 = vadd.f32 %v7212_v13, %v7199_v60 }
 0x5f6   :  { %v7222_v0 = vmax.f32 %v7213_v39, 0.0 }
 0x5f8   :  { %v7226_v58 = vpack.c.bf16 %v7222_v0, %v7218_v54 }
 0x5fa   :  { %7537 = vmatmul.bf16.vlgmr.msra.gmra.mxu3 %v7226_v58 }
 0x637   :  { %v7496_v53 = vpop.f32.mrf.mxu0 }
 0x638   :  { %v7497_v43 = vadd.f32 %v12248_v62, %v7496_v53 }
 0x63f   :  { %v7498_v57 = vpop.f32.mrf.mxu0 }
 0x640   :  { %v7499_v48 = vadd.f32 %v12248_v62, %v7498_v57 }
 0x647   :  { %v7510_v25 = vpop.f32.mrf.mxu1 }
 0x648   :  { %v7511_v18 = vadd.f32 %v7510_v25, %v7497_v43 }
 0x64f   :  { %v7512_v59 = vpop.f32.mrf.mxu1 }
 0x650   :  { %v7513_v31 = vadd.f32 %v7512_v59, %v7499_v48 }
 0x65d   :  { %v7524_v22 = vpop.f32.mrf.mxu2 }
 0x65e   :  { %v7525_v49 = vadd.f32 %v7524_v22, %v7511_v18 }
 0x665   :  { %v7526_v19 = vpop.f32.mrf.mxu2 }
 0x666   :  { %v7527_v29 = vadd.f32 %v7526_v19, %v7513_v31 }
 0x67d   :  { %v7538_v5 = vpop.f32.mrf.mxu3 }
 0x67e   :  { %v7539_v27 = vadd.f32 %v7538_v5, %v7525_v49 }
 0x680   :  { %7543 = vst [vmem:[%s13041_s9] sm:$0xff] %v7539_v27 }
 0x685   :  { %v7540_v20 = vpop.f32.mrf.mxu3 }
 0x686   :  { %v7541_v16 = vadd.f32 %v7540_v20, %v7527_v29 }
 0x688   :  { %7544 = vst [vmem:[%s13041_s9 + $0x8] sm:$0xff] %v7541_v16 }
 0x689   :  { %7549 = vsyncpa [#allocation3], 1 }
 0x68a   :  { %7550 = vsyncpa [#allocation5], 1 }
 0x68b   :  { %7551 = vsyncpa [#allocation8], 1 }
 0x68c   :  { %7552 = vsyncpa [#allocation11], 1 }
 0x68d   :  { %7553 = vsyncpa [#allocation14], 1 }

</bundles_post_ra>
